<compile_context>
chip_gen: v6e
topology: v6e:2x2x1
jax: 0.10.0
libtpu: 0.0.40
codegen_flags: <defaults>
</compile_context>

<pallas_src>
import functools

import jax
import jax.numpy as jnp
from jax.experimental import pallas as pl
from jax.experimental.pallas import tpu as pltpu


# ---------------------------------------------------------------------------
# Fused kernel: one batch element x one row-tile per grid step (NHWC)
# ---------------------------------------------------------------------------

def _aspp_fused_kernel(dilations, dmax, w, th,
                       xp_ref, wc_ref, w8_ref, pool_ref, scale_ref, bias_ref,
                       o_ref):
    # xp_ref    : (H+2*dmax, W+2*dmax, Cin)  padded input, one batch element
    # wc_ref    : (Cin, 4*Cout)              c0 1x1 weight + center taps of c1..c3
    # w8_ref    : (3, 8*Cin, Cout)           8 non-center taps per dilation (im2col K)
    # pool_ref  : (1, Cout)                  precomputed imagepool branch (BN+ReLU done)
    # scale/bias: (1, 4*Cout)                folded BN for c0..c3
    # o_ref     : (th*W, 5*Cout) bf16        output rows [i*th, i*th+th), flattened
    cin = xp_ref.shape[-1]
    cout = pool_ref.shape[-1]
    i = pl.program_id(1)
    row0 = pl.multiple_of(i * th, th)          # first output row of this tile

    scale = scale_ref[...]                     # load once, slice values per branch
    bias = bias_ref[...]

    # --- shared center window: c0 (1x1) + the (ky=kx=1) tap of c1..c3 --------
    xc = xp_ref[pl.ds(row0 + dmax, th), dmax:dmax + w, :].reshape(th * w, cin)
    yc = jnp.dot(xc, wc_ref[...], preferred_element_type=jnp.float32)  # (th*W, 4*Cout)

    # branch c0: folded BN + ReLU, direct column-slice store
    y0 = yc[:, :cout] * scale[:, :cout] + bias[:, :cout]
    o_ref[:, 0:cout] = jnp.maximum(y0, 0.0).astype(o_ref.dtype)

    # --- c1..c3: 3x3 atrous conv; the 8 non-center taps as ONE im2col matmul --
    for b, d in enumerate(dilations):
        cols = []
        for ky in range(3):
            for kx in range(3):
                if ky == 1 and kx == 1:
                    continue                    # center tap already in yc
                r0 = row0 + dmax + (ky - 1) * d
                c0 = dmax + (kx - 1) * d        # static column offset
                cols.append(
                    xp_ref[pl.ds(r0, th), c0:c0 + w, :].reshape(th * w, cin))
        x8 = jnp.concatenate(cols, axis=-1)     # (th*W, 8*Cin) bf16
        acc = yc[:, (b + 1) * cout:(b + 2) * cout] + jnp.dot(
            x8, w8_ref[b], preferred_element_type=jnp.float32)
        yb = (acc * scale[:, (b + 1) * cout:(b + 2) * cout]
              + bias[:, (b + 1) * cout:(b + 2) * cout])
        o_ref[:, (b + 1) * cout:(b + 2) * cout] = \
            jnp.maximum(yb, 0.0).astype(o_ref.dtype)

    # --- imagepool: precomputed per-batch vector, broadcast into last columns -
    o_ref[:, 4 * cout:] = jnp.broadcast_to(
        pool_ref[...], (th * w, cout)).astype(o_ref.dtype)


# ---------------------------------------------------------------------------
# Parameter construction (deterministic, synthetic; arrays only -> jit-safe)
# ---------------------------------------------------------------------------

def _fold_bn(gamma, beta, running_mean, running_var, eps=1e-5):
    scale = gamma / jnp.sqrt(running_var + eps)
    bias = beta - running_mean * scale
    return (scale.reshape(1, -1).astype(jnp.float32),
            bias.reshape(1, -1).astype(jnp.float32))


def make_aspp_params(key, in_channels, out_channels):
    params = {}
    names = ["c0", "c1", "c2", "c3", "imagepool"]
    ksizes = [1, 3, 3, 3, 1]
    for name, ks in zip(names, ksizes):
        key, kw, kg, kb, km, kv = jax.random.split(key, 6)
        if ks == 1:
            wgt = jax.random.normal(kw, (in_channels, out_channels), jnp.float32) * 0.1
        else:
            # taps x Cin x Cout, (ky, kx) row-major (center tap = index 4)
            wgt = jax.random.normal(kw, (9, in_channels, out_channels), jnp.float32) * 0.1
        gamma = 1.0 + 0.1 * jax.random.normal(kg, (out_channels,), jnp.float32)
        beta = 0.1 * jax.random.normal(kb, (out_channels,), jnp.float32)
        rmean = 0.1 * jax.random.normal(km, (out_channels,), jnp.float32)
        rvar = 1.0 + 0.1 * jax.random.uniform(kv, (out_channels,), jnp.float32)
        scale, bias = _fold_bn(gamma, beta, rmean, rvar)
        params[name] = dict(w=wgt, scale=scale, bias=bias)
    return params


# ---------------------------------------------------------------------------
# Tiling / VMEM helpers
# ---------------------------------------------------------------------------

def _pick_row_tile(h, w, n, ctot):
    """Largest row tile that divides H, keeps the matmul M-dim a multiple of 8
    (or covers the whole image), fits a soft per-step budget, and -- when
    possible -- keeps n*(H//th) even so v7x's two TensorCores stay balanced."""
    row_budget = max(512, (4 << 20) // max(4 * ctot, 1))   # ~4 MiB of f32 rows
    cands = [th for th in range(h, 0, -1)
             if h % th == 0 and th * w <= row_budget
             and ((th * w) % 8 == 0 or th == h)]
    if not cands:
        return h
    for th in cands:
        if (n * (h // th)) % 2 == 0:
            return th
    return cands[0]


def _vmem_limit_bytes():
    # Re-derive the scoped-VMEM budget per generation: v5e/v6e have 128 MiB
    # physical (raise well above the 32 MiB default), v7x only 64 MiB.
    try:
        cap = int(pltpu.get_tpu_info().vmem_capacity_bytes)
    except Exception:
        cap = 64 * 1024 * 1024
    return min(int(cap * 0.8), 110 * 1024 * 1024)


# ---------------------------------------------------------------------------
# ASPP forward (pyramids is a static argument; no Python ints in the pytree)
# ---------------------------------------------------------------------------

@functools.partial(jax.jit, static_argnames=("pyramids",))
def aspp_forward(params, x_nchw, *, pyramids):
    pyramids = tuple(int(p) for p in pyramids)
    n, cin, h, w = x_nchw.shape
    cout = params["c0"]["w"].shape[1]
    ctot = 5 * cout
    dmax = max(pyramids)
    th = _pick_row_tile(h, w, n, ctot)

    # NCHW -> NHWC, bf16 activations, one shared pad of width dmax.
    x = jnp.transpose(x_nchw, (0, 2, 3, 1)).astype(jnp.bfloat16)
    xp = jnp.pad(x, ((0, 0), (dmax, dmax), (dmax, dmax), (0, 0)))
    hp, wp = h + 2 * dmax, w + 2 * dmax

    # ---- imagepool branch hoisted out of the grid loop (once per batch) -----
    # AdaptiveAvgPool2d(1) -> 1x1 conv -> BN -> ReLU; the bilinear upsample of a
    # 1x1 map is a constant broadcast, done inside the kernel store.
    mean = jnp.mean(x_nchw.astype(jnp.float32), axis=(2, 3))          # (N, Cin)
    ypool = mean @ params["imagepool"]["w"]                           # (N, Cout)
    ypool = jnp.maximum(
        ypool * params["imagepool"]["scale"] + params["imagepool"]["bias"], 0.0)
    ypool = ypool.reshape(n, 1, cout)

    # ---- fused weights ------------------------------------------------------
    # c0 1x1 + center taps of c1..c3 -> one (Cin, 4*Cout) matmul on the shared
    # center window; remaining 8 taps per dilation stacked along K (im2col).
    wc = jnp.concatenate(
        [params["c0"]["w"]] + [params[f"c{b}"]["w"][4] for b in (1, 2, 3)],
        axis=-1).astype(jnp.bfloat16)                                 # (Cin, 4*Cout)
    tap_order = [t for t in range(9) if t != 4]                       # kernel im2col order
    w8 = jnp.stack([
        jnp.concatenate([params[f"c{b}"]["w"][t] for t in tap_order], axis=0)
        for b in (1, 2, 3)]).astype(jnp.bfloat16)                     # (3, 8*Cin, Cout)

    order = ("c0", "c1", "c2", "c3")
    scale = jnp.concatenate([params[k]["scale"] for k in order], axis=-1)
    bias = jnp.concatenate([params[k]["bias"] for k in order], axis=-1)

    kernel = functools.partial(_aspp_fused_kernel, pyramids, dmax, w, th)

    flops = 2 * n * h * w * cin * cout * (4 + 3 * 8) + 2 * n * cin * cout
    bytes_accessed = int(
        sum(int(a.size) * a.dtype.itemsize
            for a in (xp, wc, w8, ypool, scale, bias))
        + n * h * w * ctot * 2)                                       # bf16 output

    out = pl.pallas_call(
        kernel,
        out_shape=jax.ShapeDtypeStruct((n, h * w, ctot), jnp.bfloat16),
        grid=(n, h // th),
        in_specs=[
            pl.BlockSpec((None, hp, wp, cin), lambda b, i: (b, 0, 0, 0)),
            pl.BlockSpec((cin, 4 * cout), lambda b, i: (0, 0)),
            pl.BlockSpec((3, 8 * cin, cout), lambda b, i: (0, 0, 0)),
            pl.BlockSpec((None, 1, cout), lambda b, i: (b, 0, 0)),
            pl.BlockSpec((1, 4 * cout), lambda b, i: (0, 0)),
            pl.BlockSpec((1, 4 * cout), lambda b, i: (0, 0)),
        ],
        out_specs=pl.BlockSpec((None, th * w, ctot), lambda b, i: (b, i, 0)),
        compiler_params=pltpu.CompilerParams(
            dimension_semantics=("parallel", "parallel"),
            vmem_limit_bytes=_vmem_limit_bytes(),
        ),
        cost_estimate=pl.CostEstimate(flops=int(flops), transcendentals=0,
                                      bytes_accessed=bytes_accessed),
    )(xp, wc, w8, ypool, scale, bias)

    # Concatenated NHWC result -> NCHW/f32 to match the PyTorch module exactly.
    # TODO(synk): drop this extra HBM pass and return NHWC/bf16 if downstream
    # consumers accept it.
    out = out.reshape(n, h, w, ctot)
    return jnp.transpose(out, (0, 3, 1, 2)).astype(jnp.float32)


# ---------------------------------------------------------------------------
# Main
# ---------------------------------------------------------------------------

if __name__ == "__main__":
    N, Cin, H, W = 2, 4, 16, 16
    Cout = 8
    pyramids = (2, 4, 6)

    key = jax.random.PRNGKey(0)
    kx, kp = jax.random.split(key)
    x = jax.random.normal(kx, (N, Cin, H, W), jnp.float32)
    params = make_aspp_params(kp, Cin, Cout)

    out = aspp_forward(params, x, pyramids=pyramids)
    jax.block_until_ready(out)
    assert out.shape == (N, 5 * Cout, H, W), out.shape
    print("KERNEL_OK")
</pallas_src>

<mosaic_0001>
module attributes {stable_mosaic.version = 11 : i64} {
  func.func @_aspp_fused_kernel(%arg0: i32, %arg1: i32, %arg2: memref<1x28x28x4xbf16, #tpu.memory_space<vmem>>, %arg3: memref<4x32xbf16, #tpu.memory_space<vmem>>, %arg4: memref<3x32x8xbf16, #tpu.memory_space<vmem>>, %arg5: memref<1x1x8xf32, #tpu.memory_space<vmem>>, %arg6: memref<1x32xf32, #tpu.memory_space<vmem>>, %arg7: memref<1x32xf32, #tpu.memory_space<vmem>>, %arg8: memref<1x256x40xbf16, #tpu.memory_space<vmem>>) attributes {dimension_semantics = [#tpu.dimension_semantics<parallel>, #tpu.dimension_semantics<parallel>], iteration_bounds = array<i64: 2, 1>, scalar_prefetch = 0 : i64, scratch_operands = 0 : i64, tpu.core_type = #tpu.core_type<tc>, window_params = [{transform_indices = @transform_0, window_bounds = array<i64: 1, 28, 28, 4>}, {pipeline_mode = #tpu.pipeline_mode<synchronous>, transform_indices = @transform_1, window_bounds = array<i64: 4, 32>}, {pipeline_mode = #tpu.pipeline_mode<synchronous>, transform_indices = @transform_2, window_bounds = array<i64: 3, 32, 8>}, {transform_indices = @transform_3, window_bounds = array<i64: 1, 1, 8>}, {pipeline_mode = #tpu.pipeline_mode<synchronous>, transform_indices = @transform_4, window_bounds = array<i64: 1, 32>}, {pipeline_mode = #tpu.pipeline_mode<synchronous>, transform_indices = @transform_5, window_bounds = array<i64: 1, 32>}, {transform_indices = @transform_6, window_bounds = array<i64: 1, 256, 40>}]} {
    %c16_i32 = arith.constant 16 : i32
    %0 = arith.muli %arg1, %c16_i32 : i32
    %1 = tpu.assume_multiple %0, 16 : i32
    %c0 = arith.constant 0 : index
    %c0_0 = arith.constant 0 : index
    %2 = vector.load %arg6[%c0, %c0_0] : memref<1x32xf32, #tpu.memory_space<vmem>>, vector<1x32xf32>
    %c0_1 = arith.constant 0 : index
    %c0_2 = arith.constant 0 : index
    %3 = vector.load %arg7[%c0_1, %c0_2] : memref<1x32xf32, #tpu.memory_space<vmem>>, vector<1x32xf32>
    %c6_i32 = arith.constant 6 : i32
    %4 = arith.addi %1, %c6_i32 : i32
    %c0_3 = arith.constant 0 : index
    %5 = arith.index_cast %4 : i32 to index
    %c6 = arith.constant 6 : index
    %c0_4 = arith.constant 0 : index
    %6 = vector.load %arg2[%c0_3, %5, %c6, %c0_4] : memref<1x28x28x4xbf16, #tpu.memory_space<vmem>>, vector<1x16x16x4xbf16>
    %7 = vector.shape_cast %6 : vector<1x16x16x4xbf16> to vector<16x16x4xbf16>
    %8 = vector.shape_cast %7 : vector<16x16x4xbf16> to vector<256x4xbf16>
    %c0_5 = arith.constant 0 : index
    %c0_6 = arith.constant 0 : index
    %9 = vector.load %arg3[%c0_5, %c0_6] : memref<4x32xbf16, #tpu.memory_space<vmem>>, vector<4x32xbf16>
    %cst = arith.constant dense<0.000000e+00> : vector<256x32xf32>
    %10 = tpu.matmul %8, %9, %cst {dimension_numbers = #tpu.dot_dimension_numbers<[1], [0], [0], [1], [0, 0, 1, 1], [], []>} : vector<256x4xbf16>, vector<4x32xbf16>, vector<256x32xf32> -> vector<256x32xf32>
    %11 = vector.extract_strided_slice %10 {offsets = [0, 0], sizes = [256, 8], strides = [1, 1]} : vector<256x32xf32> to vector<256x8xf32>
    %12 = vector.extract_strided_slice %2 {offsets = [0, 0], sizes = [1, 8], strides = [1, 1]} : vector<1x32xf32> to vector<1x8xf32>
    %13 = vector.broadcast %12 : vector<1x8xf32> to vector<256x8xf32>
    %14 = arith.mulf %11, %13 : vector<256x8xf32>
    %15 = vector.extract_strided_slice %3 {offsets = [0, 0], sizes = [1, 8], strides = [1, 1]} : vector<1x32xf32> to vector<1x8xf32>
    %16 = vector.broadcast %15 : vector<1x8xf32> to vector<256x8xf32>
    %17 = arith.addf %14, %16 : vector<256x8xf32>
    %cst_7 = arith.constant 0.000000e+00 : f32
    %18 = vector.broadcast %cst_7 : f32 to vector<256x8xf32>
    %19 = arith.maximumf %17, %18 : vector<256x8xf32>
    %20 = arith.truncf %19 : vector<256x8xf32> to vector<256x8xbf16>
    %c0_8 = arith.constant 0 : index
    %c0_9 = arith.constant 0 : index
    %c0_10 = arith.constant 0 : index
    %21 = vector.load %arg8[%c0_8, %c0_9, %c0_10] : memref<1x256x40xbf16, #tpu.memory_space<vmem>>, vector<1x256x8xbf16>
    %22 = vector.shape_cast %21 : vector<1x256x8xbf16> to vector<256x8xbf16>
    %23 = vector.shape_cast %20 : vector<256x8xbf16> to vector<1x256x8xbf16>
    tpu.vector_store %arg8[%c0_8, %c0_9, %c0_10], %23 {strides = array<i32>} : memref<1x256x40xbf16, #tpu.memory_space<vmem>>, vector<1x256x8xbf16>,
    %c6_i32_11 = arith.constant 6 : i32
    %24 = arith.addi %1, %c6_i32_11 : i32
    %c-2_i32 = arith.constant -2 : i32
    %25 = arith.addi %24, %c-2_i32 : i32
    %c0_12 = arith.constant 0 : index
    %26 = arith.index_cast %25 : i32 to index
    %c4 = arith.constant 4 : index
    %c0_13 = arith.constant 0 : index
    %27 = vector.load %arg2[%c0_12, %26, %c4, %c0_13] : memref<1x28x28x4xbf16, #tpu.memory_space<vmem>>, vector<1x16x16x4xbf16>
    %28 = vector.shape_cast %27 : vector<1x16x16x4xbf16> to vector<16x16x4xbf16>
    %29 = vector.shape_cast %28 : vector<16x16x4xbf16> to vector<256x4xbf16>
    %c6_i32_14 = arith.constant 6 : i32
    %30 = arith.addi %1, %c6_i32_14 : i32
    %c-2_i32_15 = arith.constant -2 : i32
    %31 = arith.addi %30, %c-2_i32_15 : i32
    %c0_16 = arith.constant 0 : index
    %32 = arith.index_cast %31 : i32 to index
    %c6_17 = arith.constant 6 : index
    %c0_18 = arith.constant 0 : index
    %33 = vector.load %arg2[%c0_16, %32, %c6_17, %c0_18] : memref<1x28x28x4xbf16, #tpu.memory_space<vmem>>, vector<1x16x16x4xbf16>
    %34 = vector.shape_cast %33 : vector<1x16x16x4xbf16> to vector<16x16x4xbf16>
    %35 = vector.shape_cast %34 : vector<16x16x4xbf16> to vector<256x4xbf16>
    %c6_i32_19 = arith.constant 6 : i32
    %36 = arith.addi %1, %c6_i32_19 : i32
    %c-2_i32_20 = arith.constant -2 : i32
    %37 = arith.addi %36, %c-2_i32_20 : i32
    %c0_21 = arith.constant 0 : index
    %38 = arith.index_cast %37 : i32 to index
    %c8 = arith.constant 8 : index
    %c0_22 = arith.constant 0 : index
    %39 = vector.load %arg2[%c0_21, %38, %c8, %c0_22] : memref<1x28x28x4xbf16, #tpu.memory_space<vmem>>, vector<1x16x16x4xbf16>
    %40 = vector.shape_cast %39 : vector<1x16x16x4xbf16> to vector<16x16x4xbf16>
    %41 = vector.shape_cast %40 : vector<16x16x4xbf16> to vector<256x4xbf16>
    %c6_i32_23 = arith.constant 6 : i32
    %42 = arith.addi %1, %c6_i32_23 : i32
    %c0_i32 = arith.constant 0 : i32
    %43 = arith.addi %42, %c0_i32 : i32
    %c0_24 = arith.constant 0 : index
    %44 = arith.index_cast %43 : i32 to index
    %c4_25 = arith.constant 4 : index
    %c0_26 = arith.constant 0 : index
    %45 = vector.load %arg2[%c0_24, %44, %c4_25, %c0_26] : memref<1x28x28x4xbf16, #tpu.memory_space<vmem>>, vector<1x16x16x4xbf16>
    %46 = vector.shape_cast %45 : vector<1x16x16x4xbf16> to vector<16x16x4xbf16>
    %47 = vector.shape_cast %46 : vector<16x16x4xbf16> to vector<256x4xbf16>
    %c6_i32_27 = arith.constant 6 : i32
    %48 = arith.addi %1, %c6_i32_27 : i32
    %c0_i32_28 = arith.constant 0 : i32
    %49 = arith.addi %48, %c0_i32_28 : i32
    %c0_29 = arith.constant 0 : index
    %50 = arith.index_cast %49 : i32 to index
    %c8_30 = arith.constant 8 : index
    %c0_31 = arith.constant 0 : index
    %51 = vector.load %arg2[%c0_29, %50, %c8_30, %c0_31] : memref<1x28x28x4xbf16, #tpu.memory_space<vmem>>, vector<1x16x16x4xbf16>
    %52 = vector.shape_cast %51 : vector<1x16x16x4xbf16> to vector<16x16x4xbf16>
    %53 = vector.shape_cast %52 : vector<16x16x4xbf16> to vector<256x4xbf16>
    %c6_i32_32 = arith.constant 6 : i32
    %54 = arith.addi %1, %c6_i32_32 : i32
    %c2_i32 = arith.constant 2 : i32
    %55 = arith.addi %54, %c2_i32 : i32
    %c0_33 = arith.constant 0 : index
    %56 = arith.index_cast %55 : i32 to index
    %c4_34 = arith.constant 4 : index
    %c0_35 = arith.constant 0 : index
    %57 = vector.load %arg2[%c0_33, %56, %c4_34, %c0_35] : memref<1x28x28x4xbf16, #tpu.memory_space<vmem>>, vector<1x16x16x4xbf16>
    %58 = vector.shape_cast %57 : vector<1x16x16x4xbf16> to vector<16x16x4xbf16>
    %59 = vector.shape_cast %58 : vector<16x16x4xbf16> to vector<256x4xbf16>
    %c6_i32_36 = arith.constant 6 : i32
    %60 = arith.addi %1, %c6_i32_36 : i32
    %c2_i32_37 = arith.constant 2 : i32
    %61 = arith.addi %60, %c2_i32_37 : i32
    %c0_38 = arith.constant 0 : index
    %62 = arith.index_cast %61 : i32 to index
    %c6_39 = arith.constant 6 : index
    %c0_40 = arith.constant 0 : index
    %63 = vector.load %arg2[%c0_38, %62, %c6_39, %c0_40] : memref<1x28x28x4xbf16, #tpu.memory_space<vmem>>, vector<1x16x16x4xbf16>
    %64 = vector.shape_cast %63 : vector<1x16x16x4xbf16> to vector<16x16x4xbf16>
    %65 = vector.shape_cast %64 : vector<16x16x4xbf16> to vector<256x4xbf16>
    %c6_i32_41 = arith.constant 6 : i32
    %66 = arith.addi %1, %c6_i32_41 : i32
    %c2_i32_42 = arith.constant 2 : i32
    %67 = arith.addi %66, %c2_i32_42 : i32
    %c0_43 = arith.constant 0 : index
    %68 = arith.index_cast %67 : i32 to index
    %c8_44 = arith.constant 8 : index
    %c0_45 = arith.constant 0 : index
    %69 = vector.load %arg2[%c0_43, %68, %c8_44, %c0_45] : memref<1x28x28x4xbf16, #tpu.memory_space<vmem>>, vector<1x16x16x4xbf16>
    %70 = vector.shape_cast %69 : vector<1x16x16x4xbf16> to vector<16x16x4xbf16>
    %71 = vector.shape_cast %70 : vector<16x16x4xbf16> to vector<256x4xbf16>
    %72 = tpu.concatenate %29, %35, %41, %47, %53, %59, %65, %71 in 1 : vector<256x4xbf16>, vector<256x4xbf16>, vector<256x4xbf16>, vector<256x4xbf16>, vector<256x4xbf16>, vector<256x4xbf16>, vector<256x4xbf16>, vector<256x4xbf16> -> vector<256x32xbf16>
    %73 = vector.extract_strided_slice %10 {offsets = [0, 8], sizes = [256, 8], strides = [1, 1]} : vector<256x32xf32> to vector<256x8xf32>
    %c0_46 = arith.constant 0 : index
    %c0_47 = arith.constant 0 : index
    %c0_48 = arith.constant 0 : index
    %74 = vector.load %arg4[%c0_46, %c0_47, %c0_48] : memref<3x32x8xbf16, #tpu.memory_space<vmem>>, vector<1x32x8xbf16>
    %75 = vector.shape_cast %74 : vector<1x32x8xbf16> to vector<32x8xbf16>
    %cst_49 = arith.constant dense<0.000000e+00> : vector<256x8xf32>
    %76 = tpu.matmul %72, %75, %cst_49 {dimension_numbers = #tpu.dot_dimension_numbers<[1], [0], [0], [1], [0, 0, 1, 1], [], []>} : vector<256x32xbf16>, vector<32x8xbf16>, vector<256x8xf32> -> vector<256x8xf32>
    %77 = arith.addf %73, %76 : vector<256x8xf32>
    %78 = vector.extract_strided_slice %2 {offsets = [0, 8], sizes = [1, 8], strides = [1, 1]} : vector<1x32xf32> to vector<1x8xf32>
    %79 = vector.broadcast %78 : vector<1x8xf32> to vector<256x8xf32>
    %80 = arith.mulf %77, %79 : vector<256x8xf32>
    %81 = vector.extract_strided_slice %3 {offsets = [0, 8], sizes = [1, 8], strides = [1, 1]} : vector<1x32xf32> to vector<1x8xf32>
    %82 = vector.broadcast %81 : vector<1x8xf32> to vector<256x8xf32>
    %83 = arith.addf %80, %82 : vector<256x8xf32>
    %cst_50 = arith.constant 0.000000e+00 : f32
    %84 = vector.broadcast %cst_50 : f32 to vector<256x8xf32>
    %85 = arith.maximumf %83, %84 : vector<256x8xf32>
    %86 = arith.truncf %85 : vector<256x8xf32> to vector<256x8xbf16>
    %c0_51 = arith.constant 0 : index
    %c0_52 = arith.constant 0 : index
    %c8_53 = arith.constant 8 : index
    %87 = vector.load %arg8[%c0_51, %c0_52, %c8_53] : memref<1x256x40xbf16, #tpu.memory_space<vmem>>, vector<1x256x8xbf16>
    %88 = vector.shape_cast %87 : vector<1x256x8xbf16> to vector<256x8xbf16>
    %89 = vector.shape_cast %86 : vector<256x8xbf16> to vector<1x256x8xbf16>
    tpu.vector_store %arg8[%c0_51, %c0_52, %c8_53], %89 {strides = array<i32>} : memref<1x256x40xbf16, #tpu.memory_space<vmem>>, vector<1x256x8xbf16>,
    %c6_i32_54 = arith.constant 6 : i32
    %90 = arith.addi %1, %c6_i32_54 : i32
    %c-4_i32 = arith.constant -4 : i32
    %91 = arith.addi %90, %c-4_i32 : i32
    %c0_55 = arith.constant 0 : index
    %92 = arith.index_cast %91 : i32 to index
    %c2 = arith.constant 2 : index
    %c0_56 = arith.constant 0 : index
    %93 = vector.load %arg2[%c0_55, %92, %c2, %c0_56] : memref<1x28x28x4xbf16, #tpu.memory_space<vmem>>, vector<1x16x16x4xbf16>
    %94 = vector.shape_cast %93 : vector<1x16x16x4xbf16> to vector<16x16x4xbf16>
    %95 = vector.shape_cast %94 : vector<16x16x4xbf16> to vector<256x4xbf16>
    %c6_i32_57 = arith.constant 6 : i32
    %96 = arith.addi %1, %c6_i32_57 : i32
    %c-4_i32_58 = arith.constant -4 : i32
    %97 = arith.addi %96, %c-4_i32_58 : i32
    %c0_59 = arith.constant 0 : index
    %98 = arith.index_cast %97 : i32 to index
    %c6_60 = arith.constant 6 : index
    %c0_61 = arith.constant 0 : index
    %99 = vector.load %arg2[%c0_59, %98, %c6_60, %c0_61] : memref<1x28x28x4xbf16, #tpu.memory_space<vmem>>, vector<1x16x16x4xbf16>
    %100 = vector.shape_cast %99 : vector<1x16x16x4xbf16> to vector<16x16x4xbf16>
    %101 = vector.shape_cast %100 : vector<16x16x4xbf16> to vector<256x4xbf16>
    %c6_i32_62 = arith.constant 6 : i32
    %102 = arith.addi %1, %c6_i32_62 : i32
    %c-4_i32_63 = arith.constant -4 : i32
    %103 = arith.addi %102, %c-4_i32_63 : i32
    %c0_64 = arith.constant 0 : index
    %104 = arith.index_cast %103 : i32 to index
    %c10 = arith.constant 10 : index
    %c0_65 = arith.constant 0 : index
    %105 = vector.load %arg2[%c0_64, %104, %c10, %c0_65] : memref<1x28x28x4xbf16, #tpu.memory_space<vmem>>, vector<1x16x16x4xbf16>
    %106 = vector.shape_cast %105 : vector<1x16x16x4xbf16> to vector<16x16x4xbf16>
    %107 = vector.shape_cast %106 : vector<16x16x4xbf16> to vector<256x4xbf16>
    %c6_i32_66 = arith.constant 6 : i32
    %108 = arith.addi %1, %c6_i32_66 : i32
    %c0_i32_67 = arith.constant 0 : i32
    %109 = arith.addi %108, %c0_i32_67 : i32
    %c0_68 = arith.constant 0 : index
    %110 = arith.index_cast %109 : i32 to index
    %c2_69 = arith.constant 2 : index
    %c0_70 = arith.constant 0 : index
    %111 = vector.load %arg2[%c0_68, %110, %c2_69, %c0_70] : memref<1x28x28x4xbf16, #tpu.memory_space<vmem>>, vector<1x16x16x4xbf16>
    %112 = vector.shape_cast %111 : vector<1x16x16x4xbf16> to vector<16x16x4xbf16>
    %113 = vector.shape_cast %112 : vector<16x16x4xbf16> to vector<256x4xbf16>
    %c6_i32_71 = arith.constant 6 : i32
    %114 = arith.addi %1, %c6_i32_71 : i32
    %c0_i32_72 = arith.constant 0 : i32
    %115 = arith.addi %114, %c0_i32_72 : i32
    %c0_73 = arith.constant 0 : index
    %116 = arith.index_cast %115 : i32 to index
    %c10_74 = arith.constant 10 : index
    %c0_75 = arith.constant 0 : index
    %117 = vector.load %arg2[%c0_73, %116, %c10_74, %c0_75] : memref<1x28x28x4xbf16, #tpu.memory_space<vmem>>, vector<1x16x16x4xbf16>
    %118 = vector.shape_cast %117 : vector<1x16x16x4xbf16> to vector<16x16x4xbf16>
    %119 = vector.shape_cast %118 : vector<16x16x4xbf16> to vector<256x4xbf16>
    %c6_i32_76 = arith.constant 6 : i32
    %120 = arith.addi %1, %c6_i32_76 : i32
    %c4_i32 = arith.constant 4 : i32
    %121 = arith.addi %120, %c4_i32 : i32
    %c0_77 = arith.constant 0 : index
    %122 = arith.index_cast %121 : i32 to index
    %c2_78 = arith.constant 2 : index
    %c0_79 = arith.constant 0 : index
    %123 = vector.load %arg2[%c0_77, %122, %c2_78, %c0_79] : memref<1x28x28x4xbf16, #tpu.memory_space<vmem>>, vector<1x16x16x4xbf16>
    %124 = vector.shape_cast %123 : vector<1x16x16x4xbf16> to vector<16x16x4xbf16>
    %125 = vector.shape_cast %124 : vector<16x16x4xbf16> to vector<256x4xbf16>
    %c6_i32_80 = arith.constant 6 : i32
    %126 = arith.addi %1, %c6_i32_80 : i32
    %c4_i32_81 = arith.constant 4 : i32
    %127 = arith.addi %126, %c4_i32_81 : i32
    %c0_82 = arith.constant 0 : index
    %128 = arith.index_cast %127 : i32 to index
    %c6_83 = arith.constant 6 : index
    %c0_84 = arith.constant 0 : index
    %129 = vector.load %arg2[%c0_82, %128, %c6_83, %c0_84] : memref<1x28x28x4xbf16, #tpu.memory_space<vmem>>, vector<1x16x16x4xbf16>
    %130 = vector.shape_cast %129 : vector<1x16x16x4xbf16> to vector<16x16x4xbf16>
    %131 = vector.shape_cast %130 : vector<16x16x4xbf16> to vector<256x4xbf16>
    %c6_i32_85 = arith.constant 6 : i32
    %132 = arith.addi %1, %c6_i32_85 : i32
    %c4_i32_86 = arith.constant 4 : i32
    %133 = arith.addi %132, %c4_i32_86 : i32
    %c0_87 = arith.constant 0 : index
    %134 = arith.index_cast %133 : i32 to index
    %c10_88 = arith.constant 10 : index
    %c0_89 = arith.constant 0 : index
    %135 = vector.load %arg2[%c0_87, %134, %c10_88, %c0_89] : memref<1x28x28x4xbf16, #tpu.memory_space<vmem>>, vector<1x16x16x4xbf16>
    %136 = vector.shape_cast %135 : vector<1x16x16x4xbf16> to vector<16x16x4xbf16>
    %137 = vector.shape_cast %136 : vector<16x16x4xbf16> to vector<256x4xbf16>
    %138 = tpu.concatenate %95, %101, %107, %113, %119, %125, %131, %137 in 1 : vector<256x4xbf16>, vector<256x4xbf16>, vector<256x4xbf16>, vector<256x4xbf16>, vector<256x4xbf16>, vector<256x4xbf16>, vector<256x4xbf16>, vector<256x4xbf16> -> vector<256x32xbf16>
    %139 = vector.extract_strided_slice %10 {offsets = [0, 16], sizes = [256, 8], strides = [1, 1]} : vector<256x32xf32> to vector<256x8xf32>
    %c1 = arith.constant 1 : index
    %c0_90 = arith.constant 0 : index
    %c0_91 = arith.constant 0 : index
    %140 = vector.load %arg4[%c1, %c0_90, %c0_91] : memref<3x32x8xbf16, #tpu.memory_space<vmem>>, vector<1x32x8xbf16>
    %141 = vector.shape_cast %140 : vector<1x32x8xbf16> to vector<32x8xbf16>
    %cst_92 = arith.constant dense<0.000000e+00> : vector<256x8xf32>
    %142 = tpu.matmul %138, %141, %cst_92 {dimension_numbers = #tpu.dot_dimension_numbers<[1], [0], [0], [1], [0, 0, 1, 1], [], []>} : vector<256x32xbf16>, vector<32x8xbf16>, vector<256x8xf32> -> vector<256x8xf32>
    %143 = arith.addf %139, %142 : vector<256x8xf32>
    %144 = vector.extract_strided_slice %2 {offsets = [0, 16], sizes = [1, 8], strides = [1, 1]} : vector<1x32xf32> to vector<1x8xf32>
    %145 = vector.broadcast %144 : vector<1x8xf32> to vector<256x8xf32>
    %146 = arith.mulf %143, %145 : vector<256x8xf32>
    %147 = vector.extract_strided_slice %3 {offsets = [0, 16], sizes = [1, 8], strides = [1, 1]} : vector<1x32xf32> to vector<1x8xf32>
    %148 = vector.broadcast %147 : vector<1x8xf32> to vector<256x8xf32>
    %149 = arith.addf %146, %148 : vector<256x8xf32>
    %cst_93 = arith.constant 0.000000e+00 : f32
    %150 = vector.broadcast %cst_93 : f32 to vector<256x8xf32>
    %151 = arith.maximumf %149, %150 : vector<256x8xf32>
    %152 = arith.truncf %151 : vector<256x8xf32> to vector<256x8xbf16>
    %c0_94 = arith.constant 0 : index
    %c0_95 = arith.constant 0 : index
    %c16 = arith.constant 16 : index
    %153 = vector.load %arg8[%c0_94, %c0_95, %c16] : memref<1x256x40xbf16, #tpu.memory_space<vmem>>, vector<1x256x8xbf16>
    %154 = vector.shape_cast %153 : vector<1x256x8xbf16> to vector<256x8xbf16>
    %155 = vector.shape_cast %152 : vector<256x8xbf16> to vector<1x256x8xbf16>
    tpu.vector_store %arg8[%c0_94, %c0_95, %c16], %155 {strides = array<i32>} : memref<1x256x40xbf16, #tpu.memory_space<vmem>>, vector<1x256x8xbf16>,
    %c6_i32_96 = arith.constant 6 : i32
    %156 = arith.addi %1, %c6_i32_96 : i32
    %c-6_i32 = arith.constant -6 : i32
    %157 = arith.addi %156, %c-6_i32 : i32
    %c0_97 = arith.constant 0 : index
    %158 = arith.index_cast %157 : i32 to index
    %c0_98 = arith.constant 0 : index
    %c0_99 = arith.constant 0 : index
    %159 = vector.load %arg2[%c0_97, %158, %c0_98, %c0_99] : memref<1x28x28x4xbf16, #tpu.memory_space<vmem>>, vector<1x16x16x4xbf16>
    %160 = vector.shape_cast %159 : vector<1x16x16x4xbf16> to vector<16x16x4xbf16>
    %161 = vector.shape_cast %160 : vector<16x16x4xbf16> to vector<256x4xbf16>
    %c6_i32_100 = arith.constant 6 : i32
    %162 = arith.addi %1, %c6_i32_100 : i32
    %c-6_i32_101 = arith.constant -6 : i32
    %163 = arith.addi %162, %c-6_i32_101 : i32
    %c0_102 = arith.constant 0 : index
    %164 = arith.index_cast %163 : i32 to index
    %c6_103 = arith.constant 6 : index
    %c0_104 = arith.constant 0 : index
    %165 = vector.load %arg2[%c0_102, %164, %c6_103, %c0_104] : memref<1x28x28x4xbf16, #tpu.memory_space<vmem>>, vector<1x16x16x4xbf16>
    %166 = vector.shape_cast %165 : vector<1x16x16x4xbf16> to vector<16x16x4xbf16>
    %167 = vector.shape_cast %166 : vector<16x16x4xbf16> to vector<256x4xbf16>
    %c6_i32_105 = arith.constant 6 : i32
    %168 = arith.addi %1, %c6_i32_105 : i32
    %c-6_i32_106 = arith.constant -6 : i32
    %169 = arith.addi %168, %c-6_i32_106 : i32
    %c0_107 = arith.constant 0 : index
    %170 = arith.index_cast %169 : i32 to index
    %c12 = arith.constant 12 : index
    %c0_108 = arith.constant 0 : index
    %171 = vector.load %arg2[%c0_107, %170, %c12, %c0_108] : memref<1x28x28x4xbf16, #tpu.memory_space<vmem>>, vector<1x16x16x4xbf16>
    %172 = vector.shape_cast %171 : vector<1x16x16x4xbf16> to vector<16x16x4xbf16>
    %173 = vector.shape_cast %172 : vector<16x16x4xbf16> to vector<256x4xbf16>
    %c6_i32_109 = arith.constant 6 : i32
    %174 = arith.addi %1, %c6_i32_109 : i32
    %c0_i32_110 = arith.constant 0 : i32
    %175 = arith.addi %174, %c0_i32_110 : i32
    %c0_111 = arith.constant 0 : index
    %176 = arith.index_cast %175 : i32 to index
    %c0_112 = arith.constant 0 : index
    %c0_113 = arith.constant 0 : index
    %177 = vector.load %arg2[%c0_111, %176, %c0_112, %c0_113] : memref<1x28x28x4xbf16, #tpu.memory_space<vmem>>, vector<1x16x16x4xbf16>
    %178 = vector.shape_cast %177 : vector<1x16x16x4xbf16> to vector<16x16x4xbf16>
    %179 = vector.shape_cast %178 : vector<16x16x4xbf16> to vector<256x4xbf16>
    %c6_i32_114 = arith.constant 6 : i32
    %180 = arith.addi %1, %c6_i32_114 : i32
    %c0_i32_115 = arith.constant 0 : i32
    %181 = arith.addi %180, %c0_i32_115 : i32
    %c0_116 = arith.constant 0 : index
    %182 = arith.index_cast %181 : i32 to index
    %c12_117 = arith.constant 12 : index
    %c0_118 = arith.constant 0 : index
    %183 = vector.load %arg2[%c0_116, %182, %c12_117, %c0_118] : memref<1x28x28x4xbf16, #tpu.memory_space<vmem>>, vector<1x16x16x4xbf16>
    %184 = vector.shape_cast %183 : vector<1x16x16x4xbf16> to vector<16x16x4xbf16>
    %185 = vector.shape_cast %184 : vector<16x16x4xbf16> to vector<256x4xbf16>
    %c6_i32_119 = arith.constant 6 : i32
    %186 = arith.addi %1, %c6_i32_119 : i32
    %c6_i32_120 = arith.constant 6 : i32
    %187 = arith.addi %186, %c6_i32_120 : i32
    %c0_121 = arith.constant 0 : index
    %188 = arith.index_cast %187 : i32 to index
    %c0_122 = arith.constant 0 : index
    %c0_123 = arith.constant 0 : index
    %189 = vector.load %arg2[%c0_121, %188, %c0_122, %c0_123] : memref<1x28x28x4xbf16, #tpu.memory_space<vmem>>, vector<1x16x16x4xbf16>
    %190 = vector.shape_cast %189 : vector<1x16x16x4xbf16> to vector<16x16x4xbf16>
    %191 = vector.shape_cast %190 : vector<16x16x4xbf16> to vector<256x4xbf16>
    %c6_i32_124 = arith.constant 6 : i32
    %192 = arith.addi %1, %c6_i32_124 : i32
    %c6_i32_125 = arith.constant 6 : i32
    %193 = arith.addi %192, %c6_i32_125 : i32
    %c0_126 = arith.constant 0 : index
    %194 = arith.index_cast %193 : i32 to index
    %c6_127 = arith.constant 6 : index
    %c0_128 = arith.constant 0 : index
    %195 = vector.load %arg2[%c0_126, %194, %c6_127, %c0_128] : memref<1x28x28x4xbf16, #tpu.memory_space<vmem>>, vector<1x16x16x4xbf16>
    %196 = vector.shape_cast %195 : vector<1x16x16x4xbf16> to vector<16x16x4xbf16>
    %197 = vector.shape_cast %196 : vector<16x16x4xbf16> to vector<256x4xbf16>
    %c6_i32_129 = arith.constant 6 : i32
    %198 = arith.addi %1, %c6_i32_129 : i32
    %c6_i32_130 = arith.constant 6 : i32
    %199 = arith.addi %198, %c6_i32_130 : i32
    %c0_131 = arith.constant 0 : index
    %200 = arith.index_cast %199 : i32 to index
    %c12_132 = arith.constant 12 : index
    %c0_133 = arith.constant 0 : index
    %201 = vector.load %arg2[%c0_131, %200, %c12_132, %c0_133] : memref<1x28x28x4xbf16, #tpu.memory_space<vmem>>, vector<1x16x16x4xbf16>
    %202 = vector.shape_cast %201 : vector<1x16x16x4xbf16> to vector<16x16x4xbf16>
    %203 = vector.shape_cast %202 : vector<16x16x4xbf16> to vector<256x4xbf16>
    %204 = tpu.concatenate %161, %167, %173, %179, %185, %191, %197, %203 in 1 : vector<256x4xbf16>, vector<256x4xbf16>, vector<256x4xbf16>, vector<256x4xbf16>, vector<256x4xbf16>, vector<256x4xbf16>, vector<256x4xbf16>, vector<256x4xbf16> -> vector<256x32xbf16>
    %205 = vector.extract_strided_slice %10 {offsets = [0, 24], sizes = [256, 8], strides = [1, 1]} : vector<256x32xf32> to vector<256x8xf32>
    %c2_134 = arith.constant 2 : index
    %c0_135 = arith.constant 0 : index
    %c0_136 = arith.constant 0 : index
    %206 = vector.load %arg4[%c2_134, %c0_135, %c0_136] : memref<3x32x8xbf16, #tpu.memory_space<vmem>>, vector<1x32x8xbf16>
    %207 = vector.shape_cast %206 : vector<1x32x8xbf16> to vector<32x8xbf16>
    %cst_137 = arith.constant dense<0.000000e+00> : vector<256x8xf32>
    %208 = tpu.matmul %204, %207, %cst_137 {dimension_numbers = #tpu.dot_dimension_numbers<[1], [0], [0], [1], [0, 0, 1, 1], [], []>} : vector<256x32xbf16>, vector<32x8xbf16>, vector<256x8xf32> -> vector<256x8xf32>
    %209 = arith.addf %205, %208 : vector<256x8xf32>
    %210 = vector.extract_strided_slice %2 {offsets = [0, 24], sizes = [1, 8], strides = [1, 1]} : vector<1x32xf32> to vector<1x8xf32>
    %211 = vector.broadcast %210 : vector<1x8xf32> to vector<256x8xf32>
    %212 = arith.mulf %209, %211 : vector<256x8xf32>
    %213 = vector.extract_strided_slice %3 {offsets = [0, 24], sizes = [1, 8], strides = [1, 1]} : vector<1x32xf32> to vector<1x8xf32>
    %214 = vector.broadcast %213 : vector<1x8xf32> to vector<256x8xf32>
    %215 = arith.addf %212, %214 : vector<256x8xf32>
    %cst_138 = arith.constant 0.000000e+00 : f32
    %216 = vector.broadcast %cst_138 : f32 to vector<256x8xf32>
    %217 = arith.maximumf %215, %216 : vector<256x8xf32>
    %218 = arith.truncf %217 : vector<256x8xf32> to vector<256x8xbf16>
    %c0_139 = arith.constant 0 : index
    %c0_140 = arith.constant 0 : index
    %c24 = arith.constant 24 : index
    %219 = vector.load %arg8[%c0_139, %c0_140, %c24] : memref<1x256x40xbf16, #tpu.memory_space<vmem>>, vector<1x256x8xbf16>
    %220 = vector.shape_cast %219 : vector<1x256x8xbf16> to vector<256x8xbf16>
    %221 = vector.shape_cast %218 : vector<256x8xbf16> to vector<1x256x8xbf16>
    tpu.vector_store %arg8[%c0_139, %c0_140, %c24], %221 {strides = array<i32>} : memref<1x256x40xbf16, #tpu.memory_space<vmem>>, vector<1x256x8xbf16>,
    %c0_141 = arith.constant 0 : index
    %c0_142 = arith.constant 0 : index
    %c0_143 = arith.constant 0 : index
    %222 = vector.load %arg5[%c0_141, %c0_142, %c0_143] : memref<1x1x8xf32, #tpu.memory_space<vmem>>, vector<1x1x8xf32>
    %223 = vector.shape_cast %222 : vector<1x1x8xf32> to vector<1x8xf32>
    %224 = vector.shape_cast %223 : vector<1x8xf32> to vector<1x8xf32>
    %225 = vector.broadcast %224 : vector<1x8xf32> to vector<256x8xf32>
    %226 = arith.truncf %225 : vector<256x8xf32> to vector<256x8xbf16>
    %c0_144 = arith.constant 0 : index
    %c0_145 = arith.constant 0 : index
    %c32 = arith.constant 32 : index
    %227 = vector.load %arg8[%c0_144, %c0_145, %c32] : memref<1x256x40xbf16, #tpu.memory_space<vmem>>, vector<1x256x8xbf16>
    %228 = vector.shape_cast %227 : vector<1x256x8xbf16> to vector<256x8xbf16>
    %229 = vector.shape_cast %226 : vector<256x8xbf16> to vector<1x256x8xbf16>
    tpu.vector_store %arg8[%c0_144, %c0_145, %c32], %229 {strides = array<i32>} : memref<1x256x40xbf16, #tpu.memory_space<vmem>>, vector<1x256x8xbf16>,
    return
  }
  func.func @transform_0(%arg0: i32, %arg1: i32) -> (i32, i32, i32, i32) {
    %c0_i32 = arith.constant 0 : i32
    %c0_i32_0 = arith.constant 0 : i32
    %c0_i32_1 = arith.constant 0 : i32
    %c0_i32_2 = arith.constant 0 : i32
    return %arg0, %c0_i32, %c0_i32_0, %c0_i32_1 : i32, i32, i32, i32
  }
  func.func @transform_1(%arg0: i32, %arg1: i32) -> (i32, i32) {
    %c0_i32 = arith.constant 0 : i32
    %c0_i32_0 = arith.constant 0 : i32
    %c0_i32_1 = arith.constant 0 : i32
    return %c0_i32, %c0_i32_0 : i32, i32
  }
  func.func @transform_2(%arg0: i32, %arg1: i32) -> (i32, i32, i32) {
    %c0_i32 = arith.constant 0 : i32
    %c0_i32_0 = arith.constant 0 : i32
    %c0_i32_1 = arith.constant 0 : i32
    %c0_i32_2 = arith.constant 0 : i32
    return %c0_i32, %c0_i32_0, %c0_i32_1 : i32, i32, i32
  }
  func.func @transform_3(%arg0: i32, %arg1: i32) -> (i32, i32, i32) {
    %c0_i32 = arith.constant 0 : i32
    %c0_i32_0 = arith.constant 0 : i32
    %c0_i32_1 = arith.constant 0 : i32
    return %arg0, %c0_i32, %c0_i32_0 : i32, i32, i32
  }
  func.func @transform_4(%arg0: i32, %arg1: i32) -> (i32, i32) {
    %c0_i32 = arith.constant 0 : i32
    %c0_i32_0 = arith.constant 0 : i32
    %c0_i32_1 = arith.constant 0 : i32
    return %c0_i32, %c0_i32_0 : i32, i32
  }
  func.func @transform_5(%arg0: i32, %arg1: i32) -> (i32, i32) {
    %c0_i32 = arith.constant 0 : i32
    %c0_i32_0 = arith.constant 0 : i32
    %c0_i32_1 = arith.constant 0 : i32
    return %c0_i32, %c0_i32_0 : i32, i32
  }
  func.func @transform_6(%arg0: i32, %arg1: i32) -> (i32, i32, i32) {
    %c0_i32 = arith.constant 0 : i32
    %c0_i32_0 = arith.constant 0 : i32
    return %arg0, %arg1, %c0_i32 : i32, i32, i32
  }
}

</mosaic_0001>

<bundles_post_ra>
// kernel: aspp_forward.1
= control target key start
LH: loop header
LB: loop body
LE: loop exit
PB: predicated region body
PF: predicated region fallthrough
CT: control target
= control target key end

     0   :  { %s11883_s21 = smov 0   ;;  %s11885_s22 = smov 0   ;;  %s18818_s0 = inlined_call_operand.vmem [shape: bf16[2,28,28,4], index: 0, kind: input, shape index: {}]   ;;  %s18819_s1 = inlined_call_operand.vmem [shape: bf16[4,32], index: 1, kind: input, shape index: {}]   ;;  %s18820_s2 = inlined_call_operand.vmem [shape: bf16[3,32,8], index: 2, kind: input, shape index: {}]   ;;  %s18821_s3 = inlined_call_operand.vmem [shape: f32[2,1,8], index: 3, kind: input, shape index: {}]   ;;  %s18822_s4 = inlined_call_operand.vmem [shape: f32[1,32], index: 4, kind: input, shape index: {}]   ;;  %s18823_s5 = inlined_call_operand.vmem [shape: f32[1,32], index: 5, kind: input, shape index: {}]   ;;  %s18824_s6 = inlined_call_operand.vmem [shape: bf16[2,256,40], index: 6, kind: output, shape index: {}]  }
   0x1   :  { %s11887_s23 = smov 0  }
   0x2 LB: > { %s28_s24 = sadd.s32 1, %s11834_s22  ;;  %p9507_p0 = scmp.ge.s32.totalorder %s11838_s23, 1  ;;  %s11838_s23 = sphi %s11887_s23, %s16_s23   ;;  %s11834_s22 = sphi %s11885_s22, %s19510_s22   ;;  %s11830_s21 = sphi %s11883_s21, %s19509_s21  }
   0x3   : > { %p30_p1 = scmp.ge.s32.totalorder %s28_s24, 2  ;;  %p234_p2 = scmp.lt.s32.totalorder %s11838_s23, 3 }
   0x5   : > { %s19512_s24 = smov (%p30_p1, %s28_s24), 0  ;;  %p235_p3 = pnand %p9507_p0, %p234_p2 }
   0x7   : > { %238 = sbr.rel (%p235_p3) target bundleno = 1461 (0x5b5), region = 44 }
   0xc   : > { %p271_p4 = scmp.lt.s32.totalorder %s11830_s21, 1  ;;  %vm393_vm0 = vcmask 1040384   ;;  %vm394_vm1 = vcmask 1044484   ;;  %v18920_v0 = vmov 0  ;;  %s11840_s29 = smov 4   ;;  %vm606_vm3 = vcmask 1041408  }
   0xd   : > { %vm11909_vm2 = vmor %vm393_vm0, %vm394_vm1  ;;  %s11841_s30 = smov 8   ;;  %vm1141_vm4 = vcmask 1045508   ;;  %s11842_s7 = smov 12   ;;  %vm557_vm6 = vcmask 31744   ;;  %vm2779_vm7 = vcmask 64512   ;;  %vm2812_vm8 = vcmask 97280  }
   0xe   : > { %s19514_s21 = smov (!%p271_p4, %s11830_s21), 1  ;;  %v18921_v0 = vsel %vm11909_vm2, 4294967295, %v18920_v0  ;;  %vm12149_vm5 = vmor %vm606_vm3, %vm1141_vm4  ;;  %s11843_s8 = smov 16   ;;  %vm2845_vm9 = vcmask 130048   ;;  %vm3704_vm10 = vcmask 1042432   ;;  %vm3705_vm11 = vcmask 1046532  }
   0xf   : > { %s11619_s25 = smul.u32 448, %s19514_s21  ;;  %18922 = vst [vmem:[#allocation2_spill] sm:$0xff] %v18921_v0  ;;  %s11844_s9 = smov 20   ;;  %vm13496_vm12 = vmor %vm3704_vm10, %vm3705_vm11  ;;  %vm2878_vm13 = vcmask 162816   ;;  %vm2911_vm14 = vcmask 195584   ;;  %vm2944_vm15 = vcmask 228352  }
  0x10   : > { %s11845_s10 = smov 24   ;;  %s11846_s15 = smov 28   ;;  %vm2993_vm0 = vcmask 261120   ;;  %vm1007_vm1 = vcmask 60416   ;;  %vm9307_vm4 = vcmask 257216  }
  0x11   : > { %s11907_s28 = scalar_lea.vmem %s18818_s0, %s11619_s25  ;;  %s11275_s26 = sshll.u32 %s19514_s21, 7 }
  0x12   : > { %v11914_v1 = vld [vmem:[%s11907_s28 + $0x64] sm:$0xf]  ;;  %v9709_v2 = vld [vmem:[%s11907_s28 + $0x60] sm:$0x8]  ;;  %v9710_v3 = vld [vmem:[%s11907_s28 + $0x68] sm:$0x7]  ;;  %s14736_s12 = scalar_lea.vmem %s18824_s6, %s11275_s26 }
  0x13   : > { %v9739_v4 = vrot.slane %v9709_v2, 11  ;;  %v1335_v5 = vrot.slane %v11914_v1, 7  ;;  %v1338_v6 = vrot.slane %v9710_v3, 7  ;;  %v11920_v7 = vld [vmem:[%s11907_s28 + $0x44] sm:$0xf]  ;;  %s11847_s14 = smov 32  }
  0x14   : > { %v9705_v8 = vld [vmem:[%s11907_s28 + $0x40] sm:$0x8]  ;;  %v9706_v9 = vld [vmem:[%s11907_s28 + $0x48] sm:$0x7]  ;;  %v1321_v10 = vrot.slane %v11920_v7, 7 }
  0x15   : > { %v1336_v11 = vsel %vm11909_vm2, %v9739_v4, %v1335_v5  ;;  %v1337_v12 = vrot.slane %v1335_v5, 4  ;;  %v9737_v13 = vrot.slane %v9705_v8, 11  ;;  %v1324_v14 = vrot.slane %v9706_v9, 7  ;;  %v11928_v15 = vld [vmem:[%s11907_s28 + $0x74] sm:$0xf] }
  0x16   : > { %v1323_v16 = vrot.slane %v1321_v10, 4  ;;  %v9711_v17 = vld [vmem:[%s11907_s28 + $0x70] sm:$0x8]  ;;  %v9712_v18 = vld [vmem:[%s11907_s28 + $0x78] sm:$0x7]  ;;  %v1342_v19 = vrot.slane %v11928_v15, 7 }
  0x17   : > { %v1339_v20 = vsel %vm11909_vm2, %v1337_v12, %v1338_v6  ;;  %v1322_v21 = vsel %vm11909_vm2, %v9737_v13, %v1321_v10  ;;  %v9740_v22 = vrot.slane %v9711_v17, 11  ;;  %v1345_v23 = vrot.slane %v9712_v18, 7  ;;  %v11938_v24 = vld [vmem:[%s11907_s28 + $0x54] sm:$0xf]  ;;  %v9707_v25 = vld [vmem:[%s11907_s28 + $0x50] sm:$0x8] }
  0x18   : > { %v9995_v26 = vcombine.low %v1336_v11, %v1339_v20  ;;  %v1325_v27 = vsel %vm11909_vm2, %v1323_v16, %v1324_v14  ;;  %v1344_v28 = vrot.slane %v1342_v19, 4  ;;  %v9708_v29 = vld [vmem:[%s11907_s28 + $0x58] sm:$0x7]  ;;  %v9738_v30 = vrot.slane %v9707_v25, 11  ;;  %v11945_v31 = vld [vmem:[%s11907_s28 + $0x94] sm:$0xf] }
  0x19   : > { %v9993_v32 = vcombine.low %v1322_v21, %v1325_v27  ;;  %v1343_v33 = vsel %vm11909_vm2, %v9740_v22, %v1342_v19  ;;  %v1328_v34 = vrot.slane %v11938_v24, 7  ;;  %v1331_v35 = vrot.slane %v9708_v29, 7  ;;  %v9715_v36 = vld [vmem:[%s11907_s28 + $0x90] sm:$0x8]  ;;  %v9716_v37 = vld [vmem:[%s11907_s28 + $0x98] sm:$0x7] }
  0x1a   : > { %2175 = vrot.lane.b32.xlu1 %v9995_v26, %s11840_s29  ;;  %v1346_v38 = vsel %vm11909_vm2, %v1344_v28, %v1345_v23  ;;  %v9742_v39 = vrot.slane %v9715_v36, 11  ;;  %v1356_v40 = vrot.slane %v11945_v31, 7  ;;  %v1359_v41 = vrot.slane %v9716_v37, 7  ;;  %v11957_v42 = vld [vmem:[%s11907_s28 + $0x84] sm:$0xf] }
  0x1b   : > { %2171 = vrot.lane.b32.xlu0 %v9993_v32, %s11840_s29  ;;  %v9996_v43 = vcombine.low %v1343_v33, %v1346_v38  ;;  %v1329_v44 = vsel %vm11909_vm2, %v9738_v30, %v1328_v34  ;;  %v1330_v45 = vrot.slane %v1328_v34, 4  ;;  %v9713_v46 = vld [vmem:[%s11907_s28 + $0x80] sm:$0x8]  ;;  %v9714_v47 = vld [vmem:[%s11907_s28 + $0x88] sm:$0x7]  ;;  %v1349_v48 = vrot.slane %v11957_v42, 7 }
  0x1c   : > { %v1357_v49 = vsel %vm11909_vm2, %v9742_v39, %v1356_v40  ;;  %v1358_v50 = vrot.slane %v1356_v40, 4  ;;  %v9741_v51 = vrot.slane %v9713_v46, 11  ;;  %v1352_v52 = vrot.slane %v9714_v47, 7  ;;  %v11968_v53 = vld [vmem:[%s11907_s28 + $0xb4] sm:$0xf] }
  0x1d   : > { %v1332_v54 = vsel %vm11909_vm2, %v1330_v45, %v1331_v35  ;;  %v1351_v55 = vrot.slane %v1349_v48, 4  ;;  %v9719_v56 = vld [vmem:[%s11907_s28 + $0xb0] sm:$0x8]  ;;  %v9720_v57 = vld [vmem:[%s11907_s28 + $0xb8] sm:$0x7]  ;;  %v1370_v58 = vrot.slane %v11968_v53, 7 }
  0x1e   : > { %2177 = vrot.lane.b32.xlu1 %v9996_v43, %s11840_s29  ;;  %v9994_v59 = vcombine.low %v1329_v44, %v1332_v54  ;;  %v1360_v60 = vsel %vm11909_vm2, %v1358_v50, %v1359_v41  ;;  %v1350_v61 = vsel %vm11909_vm2, %v9741_v51, %v1349_v48  ;;  %v9744_v62 = vrot.slane %v9719_v56, 11  ;;  %v11981_v63 = vld [vmem:[%s11907_s28 + $0xa4] sm:$0xf]  ;;  %v9717_v2 = vld [vmem:[%s11907_s28 + $0xa0] sm:$0x8] }
  0x1f   : > { %v9998_v3 = vcombine.low %v1357_v49, %v1360_v60  ;;  %v1353_v4 = vsel %vm11909_vm2, %v1351_v55, %v1352_v52  ;;  %v1372_v5 = vrot.slane %v1370_v58, 4  ;;  %v1373_v6 = vrot.slane %v9720_v57, 7  ;;  %v9718_v8 = vld [vmem:[%s11907_s28 + $0xa8] sm:$0x7]  ;;  %v11988_v9 = vld [vmem:[%s11907_s28 + $0xd4] sm:$0xf] }
  0x20   : > { %2173 = vrot.lane.b32.xlu0 %v9994_v59, %s11840_s29  ;;  %v9997_v10 = vcombine.low %v1350_v61, %v1353_v4  ;;  %v1371_v11 = vsel %vm11909_vm2, %v9744_v62, %v1370_v58  ;;  %v9743_v12 = vrot.slane %v9717_v2, 11  ;;  %v1363_v13 = vrot.slane %v11981_v63, 7  ;;  %v9723_v14 = vld [vmem:[%s11907_s28 + $0xd0] sm:$0x8]  ;;  %v9724_v16 = vld [vmem:[%s11907_s28 + $0xd8] sm:$0x7] }
  0x21   : > { %v1374_v17 = vsel %vm11909_vm2, %v1372_v5, %v1373_v6  ;;  %v1366_v18 = vrot.slane %v9718_v8, 7  ;;  %v9746_v19 = vrot.slane %v9723_v14, 11  ;;  %v1384_v20 = vrot.slane %v11988_v9, 7  ;;  %v12000_v21 = vld [vmem:[%s11907_s28 + $0xc4] sm:$0xf] }
  0x22   : > { %2181 = vrot.lane.b32.xlu1 %v9998_v3, %s11840_s29  ;;  %v10000_v22 = vcombine.low %v1371_v11, %v1374_v17  ;;  %v1364_v23 = vsel %vm11909_vm2, %v9743_v12, %v1363_v13  ;;  %v1365_v25 = vrot.slane %v1363_v13, 4  ;;  %v1387_v26 = vrot.slane %v9724_v16, 7  ;;  %v9721_v27 = vld [vmem:[%s11907_s28 + $0xc0] sm:$0x8]  ;;  %v9722_v28 = vld [vmem:[%s11907_s28 + $0xc8] sm:$0x7] }
  0x23   : > { %v1385_v29 = vsel %vm11909_vm2, %v9746_v19, %v1384_v20  ;;  %v1386_v30 = vrot.slane %v1384_v20, 4  ;;  %v9745_v32 = vrot.slane %v9721_v27, 11  ;;  %v1377_v33 = vrot.slane %v12000_v21, 7  ;;  %v12011_v34 = vld [vmem:[%s11907_s28 + $0xf4] sm:$0xf] }
  0x24   : > { %2179 = vrot.lane.b32.xlu0 %v9997_v10, %s11840_s29  ;;  %v1367_v35 = vsel %vm11909_vm2, %v1365_v25, %v1366_v18  ;;  %v1380_v36 = vrot.slane %v9722_v28, 7  ;;  %v9727_v37 = vld [vmem:[%s11907_s28 + $0xf0] sm:$0x8]  ;;  %v9728_v38 = vld [vmem:[%s11907_s28 + $0xf8] sm:$0x7]  ;;  %v1398_v39 = vrot.slane %v12011_v34, 7 }
  0x25   : > { %v9999_v40 = vcombine.low %v1364_v23, %v1367_v35  ;;  %v1388_v41 = vsel %vm11909_vm2, %v1386_v30, %v1387_v26  ;;  %v1378_v43 = vsel %vm11909_vm2, %v9745_v32, %v1377_v33  ;;  %v1379_v44 = vrot.slane %v1377_v33, 4  ;;  %v12024_v45 = vld [vmem:[%s11907_s28 + $0xe4] sm:$0xf]  ;;  %v9725_v46 = vld [vmem:[%s11907_s28 + $0xe0] sm:$0x8] }
  0x26   : > { %2185 = vrot.lane.b32.xlu1 %v10000_v22, %s11840_s29  ;;  %v10002_v47 = vcombine.low %v1385_v29, %v1388_v41  ;;  %v9748_v48 = vrot.slane %v9727_v37, 11  ;;  %v1400_v49 = vrot.slane %v1398_v39, 4  ;;  %v1401_v50 = vrot.slane %v9728_v38, 7  ;;  %v9726_v51 = vld [vmem:[%s11907_s28 + $0xe8] sm:$0x7] }
  0x27   : > { %v1381_v52 = vsel %vm11909_vm2, %v1379_v44, %v1380_v36  ;;  %v9747_v54 = vrot.slane %v9725_v46, 11  ;;  %v1391_v55 = vrot.slane %v12024_v45, 7  ;;  %v1394_v56 = vrot.slane %v9726_v51, 7  ;;  %v12033_v57 = vld [vmem:[%s11907_s28 + $0x114] sm:$0xf] }
  0x28   : > { %2183 = vrot.lane.b32.xlu0 %v9999_v40, %s11840_s29  ;;  %v10001_v58 = vcombine.low %v1378_v43, %v1381_v52  ;;  %v1399_v59 = vsel %vm11909_vm2, %v9748_v48, %v1398_v39  ;;  %v1402_v60 = vsel %vm11909_vm2, %v1400_v49, %v1401_v50  ;;  %v9731_v61 = vld [vmem:[%s11907_s28 + $0x110] sm:$0x8]  ;;  %v9732_v62 = vld [vmem:[%s11907_s28 + $0x118] sm:$0x7]  ;;  %v1412_v2 = vrot.slane %v12033_v57, 7 }
  0x29   : > { %v10004_v3 = vcombine.low %v1399_v59, %v1402_v60  ;;  %v1392_v4 = vsel %vm11909_vm2, %v9747_v54, %v1391_v55  ;;  %v1393_v5 = vrot.slane %v1391_v55, 4  ;;  %v9750_v6 = vrot.slane %v9731_v61, 11  ;;  %v12046_v8 = vld [vmem:[%s11907_s28 + $0x104] sm:$0xf]  ;;  %v9729_v10 = vld [vmem:[%s11907_s28 + $0x100] sm:$0x8] }
  0x2a   : > { %2189 = vrot.lane.b32.xlu1 %v10002_v47, %s11840_s29  ;;  %v1414_v11 = vrot.slane %v1412_v2, 4  ;;  %v1415_v12 = vrot.slane %v9732_v62, 7  ;;  %v9730_v13 = vld [vmem:[%s11907_s28 + $0x108] sm:$0x7]  ;;  %v9749_v14 = vrot.slane %v9729_v10, 11  ;;  %v1405_v16 = vrot.slane %v12046_v8, 7 }
  0x2b   : > { %v1395_v17 = vsel %vm11909_vm2, %v1393_v5, %v1394_v56  ;;  %v1413_v18 = vsel %vm11909_vm2, %v9750_v6, %v1412_v2  ;;  %v1408_v19 = vrot.slane %v9730_v13, 7  ;;  %v12057_v20 = vld [vmem:[%s11907_s28 + $0x134] sm:$0xf]  ;;  %v9735_v22 = vld [vmem:[%s11907_s28 + $0x130] sm:$0x8] }
  0x2c   : > { %2187 = vrot.lane.b32.xlu0 %v10001_v58, %s11840_s29  ;;  %v10003_v23 = vcombine.low %v1392_v4, %v1395_v17  ;;  %v1416_v25 = vsel %vm11909_vm2, %v1414_v11, %v1415_v12  ;;  %v1407_v26 = vrot.slane %v1405_v16, 4  ;;  %v9736_v27 = vld [vmem:[%s11907_s28 + $0x138] sm:$0x7]  ;;  %v12065_v28 = vld [vmem:[%s11907_s28 + $0x124] sm:$0xf]  ;;  %v1406_v29 = vsel %vm11909_vm2, %v9749_v14, %v1405_v16 }
  0x2d   : > { %v9752_v30 = vrot.slane %v9735_v22, 11  ;;  %v1426_v32 = vrot.slane %v12057_v20, 7  ;;  %v1429_v33 = vrot.slane %v9736_v27, 7  ;;  %v9733_v35 = vld [vmem:[%s11907_s28 + $0x120] sm:$0x8]  ;;  %v10006_v36 = vcombine.low %v1413_v18, %v1416_v25 }
  0x2e   : > { %2193 = vrot.lane.b32.xlu1 %v10004_v3, %s11840_s29  ;;  %v1409_v37 = vsel %vm11909_vm2, %v1407_v26, %v1408_v19  ;;  %v9734_v38 = vld [vmem:[%s11907_s28 + $0x128] sm:$0x7]  ;;  %v9751_v39 = vrot.slane %v9733_v35, 11  ;;  %v1419_v40 = vrot.slane %v12065_v28, 7  ;;  %v9754_v52 = vld [vmem:[%s11907_s28 + $0x58] sm:$0xf] }
  0x2f   : > { %v1427_v41 = vsel %vm11909_vm2, %v9752_v30, %v1426_v32  ;;  %v1428_v43 = vrot.slane %v1426_v32, 4  ;;  %v1422_v44 = vrot.slane %v9734_v38, 7  ;;  %v10005_v46 = vcombine.low %v1406_v29, %v1409_v37  ;;  %v9753_v55 = vld [vmem:[%s11907_s28 + $0x48] sm:$0xf]  ;;  %v9756_v58 = vld [vmem:[%s11907_s28 + $0x78] sm:$0xf] }
  0x30   : > { %2191 = vrot.lane.b32.xlu0 %v10003_v23, %s11840_s29  ;;  %v1421_v47 = vrot.slane %v1419_v40, 4  ;;  %v1420_v49 = vsel %vm11909_vm2, %v9751_v39, %v1419_v40  ;;  %v10010_v56 = vcombine.low %v11938_v24, %v9754_v52  ;;  %v10009_v59 = vcombine.low %v11920_v7, %v9753_v55  ;;  %v9755_v60 = vld [vmem:[%s11907_s28 + $0x68] sm:$0xf]  ;;  %v9758_v62 = vld [vmem:[%s11907_s28 + $0x98] sm:$0xf] }
  0x31   : > { %v1430_v48 = vsel %vm11909_vm2, %v1428_v43, %v1429_v33  ;;  %v10012_v61 = vcombine.low %v11928_v15, %v9756_v58  ;;  %v10011_v2 = vcombine.low %v11914_v1, %v9755_v60  ;;  %v9757_v24 = vld [vmem:[%s11907_s28 + $0x88] sm:$0xf]  ;;  %v10014_v3 = vcombine.low %v11945_v31, %v9758_v62  ;;  %v9760_v7 = vld [vmem:[%s11907_s28 + $0xb8] sm:$0xf]  ;;  %v12119_v11 = vld [vmem:[%s11907_s28 + $0x74] sm:$0xf] }
  0x32   : > { %2197 = vrot.lane.b32.xlu1 %v10006_v36, %s11840_s29  ;;  %v10008_v50 = vcombine.low %v1427_v41, %v1430_v48  ;;  %v1423_v51 = vsel %vm11909_vm2, %v1421_v47, %v1422_v44  ;;  %v10013_v4 = vcombine.low %v11957_v42, %v9757_v24  ;;  %v9759_v15 = vld [vmem:[%s11907_s28 + $0xa8] sm:$0xf]  ;;  %v10016_v5 = vcombine.low %v11968_v53, %v9760_v7  ;;  %v9762_v1 = vld [vmem:[%s11907_s28 + $0xd8] sm:$0xf]  ;;  %v12125_v13 = vld [vmem:[%s11907_s28 + $0x64] sm:$0xf] }
  0x33   : > { %v10007_v54 = vcombine.low %v1420_v49, %v1423_v51  ;;  %v10015_v31 = vcombine.low %v11981_v63, %v9759_v15  ;;  %v9761_v6 = vld [vmem:[%s11907_s28 + $0xc8] sm:$0xf]  ;;  %v10018_v10 = vcombine.low %v11988_v9, %v9762_v1  ;;  %v9764_v42 = vld [vmem:[%s11907_s28 + $0xf8] sm:$0xf]  ;;  %v9772_v14 = vld [vmem:[%s11907_s28 + $0x70] sm:$0xc] }
  0x34   : > { %2195 = vrot.lane.b32.xlu0 %v10005_v46, %s11840_s29  ;;  %v10017_v53 = vcombine.low %v12000_v21, %v9761_v6  ;;  %v9763_v12 = vld [vmem:[%s11907_s28 + $0xe8] sm:$0xf]  ;;  %v10020_v63 = vcombine.low %v12011_v34, %v9764_v42  ;;  %v9766_v9 = vld [vmem:[%s11907_s28 + $0x118] sm:$0xf]  ;;  %v1552_v21 = vrot.slane %v12119_v11, 6  ;;  %v1545_v23 = vrot.slane %v12125_v13, 6 }
  0x35   : > { %v10019_v16 = vcombine.low %v12024_v45, %v9763_v12  ;;  %v9765_v17 = vld [vmem:[%s11907_s28 + $0x108] sm:$0xf]  ;;  %v9774_v18 = vld [vmem:[%s11907_s28 + $0x78] sm:$0x3]  ;;  %v12135_v19 = vld [vmem:[%s11907_s28 + $0x94] sm:$0xf]  ;;  %v10022_v25 = vcombine.low %v12033_v57, %v9766_v9 }
  0x36   : > { %2201 = vrot.lane.b32.xlu1 %v10008_v50, %s11840_s29  ;;  %v9768_v34 = vld [vmem:[%s11907_s28 + $0x138] sm:$0xf]  ;;  %v9769_v22 = vld [vmem:[%s11907_s28 + $0x60] sm:$0xc]  ;;  %v9818_v26 = vrot.slane %v9772_v14, 10  ;;  %v18923_v30 = vmov 0  ;;  %v10021_v57 = vcombine.low %v12046_v8, %v9765_v17 }
  0x37   : > { %v9771_v27 = vld [vmem:[%s11907_s28 + $0x68] sm:$0x3]  ;;  %v12144_v29 = vld [vmem:[%s11907_s28 + $0x84] sm:$0xf]  ;;  %v18924_v30 = vsel %vm12149_vm5, 4294967295, %v18923_v30  ;;  %v1554_v32 = vrot.slane %v1552_v21, 4  ;;  %v10024_v46 = vcombine.low %v12057_v20, %v9768_v34 }
  0x38   : > { %2199 = vrot.lane.b32.xlu0 %v10007_v54, %s11840_s29  ;;  %v9767_v45 = vld [vmem:[%s11907_s28 + $0x128] sm:$0xf]  ;;  %18925 = vst [vmem:[#allocation3_spill] sm:$0xff] %v18924_v30  ;;  %v1555_v33 = vrot.slane %v9774_v18, 6  ;;  %v9778_v35 = vld [vmem:[%s11907_s28 + $0x90] sm:$0xc]  ;;  %v1553_v47 = vsel %vm12149_vm5, %v9818_v26, %v1552_v21 }
  0x39   : > { %v1566_v36 = vrot.slane %v12135_v19, 6  ;;  %v9817_v37 = vrot.slane %v9769_v22, 10  ;;  %v9780_v38 = vld [vmem:[%s11907_s28 + $0x98] sm:$0x3]  ;;  %v12159_v39 = vld [vmem:[%s11907_s28 + $0xb4] sm:$0xf]  ;;  %v10023_v20 = vcombine.low %v12065_v28, %v9767_v45 }
  0x3a   : > { %2269 = vrot.lane.b32.xlu1 %v10010_v56, %s11841_s30  ;;  %v1547_v40 = vrot.slane %v1545_v23, 4  ;;  %v1548_v41 = vrot.slane %v9771_v27, 6  ;;  %v9775_v43 = vld [vmem:[%s11907_s28 + $0x80] sm:$0xc]  ;;  %v1559_v44 = vrot.slane %v12144_v29, 6  ;;  %v9820_v8 = vrot.slane %v9778_v35, 10 }
  0x3b   : > { %v9777_v48 = vld [vmem:[%s11907_s28 + $0x88] sm:$0x3]  ;;  %v12169_v49 = vld [vmem:[%s11907_s28 + $0xa4] sm:$0xf]  ;;  %v1556_v50 = vsel %vm12149_vm5, %v1554_v32, %v1555_v33  ;;  %v1568_v51 = vrot.slane %v1566_v36, 4  ;;  %v1569_v52 = vrot.slane %v9780_v38, 6  ;;  %v1546_v56 = vsel %vm12149_vm5, %v9817_v37, %v1545_v23 }
  0x3c   : > { %2267 = vrot.lane.b32.xlu0 %v10009_v59, %s11841_s30  ;;  %v9784_v54 = vld [vmem:[%s11907_s28 + $0xb0] sm:$0xc]  ;;  %v1580_v55 = vrot.slane %v12159_v39, 6  ;;  %v9819_v58 = vrot.slane %v9775_v43, 10  ;;  %v9786_v59 = vld [vmem:[%s11907_s28 + $0xb8] sm:$0x3]  ;;  %v10026_v28 = vcombine.low %v1553_v47, %v1556_v50  ;;  %v1567_v7 = vsel %vm12149_vm5, %v9820_v8, %v1566_v36 }
  0x3d   : > { %v12181_v60 = vld [vmem:[%s11907_s28 + $0xd4] sm:$0xf]  ;;  %v1561_v62 = vrot.slane %v1559_v44, 4  ;;  %v9781_v24 = vld [vmem:[%s11907_s28 + $0xa0] sm:$0xc]  ;;  %v1570_v1 = vsel %vm12149_vm5, %v1568_v51, %v1569_v52  ;;  %v1583_v6 = vrot.slane %v9786_v59, 6 }
  0x3e   : > { %2273 = vrot.lane.b32.xlu1 %v10012_v61, %s11841_s30  ;;  %v1549_v61 = vsel %vm12149_vm5, %v1547_v40, %v1548_v41  ;;  %v9783_v15 = vld [vmem:[%s11907_s28 + $0xa8] sm:$0x3]  ;;  %v1594_v42 = vrot.slane %v12181_v60, 6  ;;  %v1560_v12 = vsel %vm12149_vm5, %v9819_v58, %v1559_v44  ;;  %v9792_v9 = vld [vmem:[%s11907_s28 + $0xd8] sm:$0x3]  ;;  %v10028_v22 = vcombine.low %v1567_v7, %v1570_v1 }
  0x3f   : > { %v12203_v14 = vld [vmem:[%s11907_s28 + $0xf4] sm:$0xf]  ;;  %v1576_v17 = vrot.slane %v9783_v15, 6  ;;  %v9787_v18 = vld [vmem:[%s11907_s28 + $0xc0] sm:$0xc]  ;;  %v1597_v33 = vrot.slane %v9792_v9, 6 }
  0x40   : > { %2271 = vrot.lane.b32.xlu0 %v10011_v2, %s11841_s30  ;;  %v1562_v2 = vrot.slane %v9777_v48, 6  ;;  %v9789_v26 = vld [vmem:[%s11907_s28 + $0xc8] sm:$0x3]  ;;  %v12214_v27 = vld [vmem:[%s11907_s28 + $0xe4] sm:$0xf]  ;;  %v1596_v32 = vrot.slane %v1594_v42, 4 }
  0x41   : > { %v9796_v35 = vld [vmem:[%s11907_s28 + $0xf0] sm:$0xc]  ;;  %v1608_v36 = vrot.slane %v12203_v14, 6  ;;  %v9823_v38 = vrot.slane %v9787_v18, 10  ;;  %v9798_v40 = vld [vmem:[%s11907_s28 + $0xf8] sm:$0x3] }
  0x42   : > { %2277 = vrot.lane.b32.xlu1 %v10014_v3, %s11841_s30  ;;  %v1573_v3 = vrot.slane %v12169_v49, 6  ;;  %v1563_v21 = vsel %vm12149_vm5, %v1561_v62, %v1562_v2  ;;  %v12225_v41 = vld [vmem:[%s11907_s28 + $0x114] sm:$0xf]  ;;  %v9793_v47 = vld [vmem:[%s11907_s28 + $0xe0] sm:$0xc]  ;;  %v1601_v8 = vrot.slane %v12214_v27, 6 }
  0x43   : > { %v9826_v51 = vrot.slane %v9796_v35, 10  ;;  %v9795_v52 = vld [vmem:[%s11907_s28 + $0xe8] sm:$0x3]  ;;  %v9802_v58 = vld [vmem:[%s11907_s28 + $0x110] sm:$0xc]  ;;  %v1622_v59 = vrot.slane %v12225_v41, 6 }
  0x44   : > { %2275 = vrot.lane.b32.xlu0 %v10013_v4, %s11841_s30  ;;  %v9822_v4 = vrot.slane %v9784_v54, 10  ;;  %v12236_v54 = vld [vmem:[%s11907_s28 + $0x104] sm:$0xf]  ;;  %v9825_v2 = vrot.slane %v9793_v47, 10  ;;  %v1603_v7 = vrot.slane %v1601_v8, 4 }
  0x45   : > { %v9799_v15 = vld [vmem:[%s11907_s28 + $0x100] sm:$0xc]  ;;  %v1615_v1 = vrot.slane %v12236_v54, 6 }
  0x46   : > { %2281 = vrot.lane.b32.xlu1 %v10016_v5, %s11841_s30  ;;  %v12192_v5 = vld [vmem:[%s11907_s28 + $0xc4] sm:$0xf]  ;;  %v1581_v23 = vsel %vm12149_vm5, %v9822_v4, %v1580_v55  ;;  %v1604_v4 = vrot.slane %v9795_v52, 6  ;;  %v1602_v18 = vsel %vm12149_vm5, %v9825_v2, %v1601_v8 }
  0x47   : > { %v1587_v34 = vrot.slane %v12192_v5, 6 }
  0x48   : > { %2279 = vrot.lane.b32.xlu0 %v10015_v31, %s11841_s30  ;;  %v1582_v31 = vrot.slane %v1580_v55, 4  ;;  %v1598_v55 = vsel %vm12149_vm5, %v1596_v32, %v1597_v33  ;;  %v9805_v32 = vld [vmem:[%s11907_s28 + $0x120] sm:$0xc] }
  0x49   : > { %v1589_v44 = vrot.slane %v1587_v34, 4  ;;  %v1588_v62 = vsel %vm12149_vm5, %v9823_v38, %v1587_v34  ;;  %v9827_v34 = vrot.slane %v9799_v15, 10  ;;  %v12280_v38 = vld [vmem:[%s11907_s28 + $0x144] sm:$0xf] }
  0x4a   : > { %2285 = vrot.lane.b32.xlu1 %v10018_v10, %s11841_s30  ;;  %v9790_v10 = vld [vmem:[%s11907_s28 + $0xd0] sm:$0xc]  ;;  %v1584_v45 = vsel %vm12149_vm5, %v1582_v31, %v1583_v6  ;;  %v1609_v6 = vsel %vm12149_vm5, %v9826_v51, %v1608_v36  ;;  %v9816_v51 = vld [vmem:[%s11907_s28 + $0x158] sm:$0x3] }
  0x4b   : > { %v10030_v48 = vcombine.low %v1581_v23, %v1584_v45  ;;  %v12269_v23 = vld [vmem:[%s11907_s28 + $0x154] sm:$0xf]  ;;  %v1616_v8 = vsel %vm12149_vm5, %v9827_v34, %v1615_v1 }
  0x4c   : > { %2283 = vrot.lane.b32.xlu0 %v10017_v53, %s11841_s30  ;;  %v10025_v53 = vcombine.low %v1546_v56, %v1549_v61  ;;  %v1611_v56 = vrot.slane %v9798_v40, 6 }
  0x4e   : > { %2289 = vrot.lane.b32.xlu1 %v10020_v63, %s11841_s30  ;;  %v9821_v63 = vrot.slane %v9781_v24, 10  ;;  %v9804_v24 = vld [vmem:[%s11907_s28 + $0x118] sm:$0x3] }
  0x4f   : > { %v1625_v9 = vrot.slane %v9804_v24, 6 }
  0x50   : > { %2287 = vrot.lane.b32.xlu0 %v10019_v16, %s11841_s30  ;;  %v1575_v16 = vrot.slane %v1573_v3, 4  ;;  %v1574_v37 = vsel %vm12149_vm5, %v9821_v63, %v1573_v3  ;;  %v12247_v3 = vld [vmem:[%s11907_s28 + $0x134] sm:$0xf]  ;;  %v1624_v63 = vrot.slane %v1622_v59, 4 }
  0x52   : > { %2293 = vrot.lane.b32.xlu1 %v10022_v25, %s11841_s30  ;;  %v9824_v25 = vrot.slane %v9790_v10, 10  ;;  %v1577_v43 = vsel %vm12149_vm5, %v1575_v16, %v1576_v17  ;;  %v9828_v10 = vrot.slane %v9802_v58, 10  ;;  %v1636_v16 = vrot.slane %v12247_v3, 6 }
  0x53   : > { %v10029_v61 = vcombine.low %v1574_v37, %v1577_v43  ;;  %v9807_v37 = vld [vmem:[%s11907_s28 + $0x128] sm:$0x3]  ;;  %v1626_v40 = vsel %vm12149_vm5, %v1624_v63, %v1625_v9 }
  0x54   : > { %2291 = vrot.lane.b32.xlu0 %v10021_v57, %s11841_s30  ;;  %v10027_v57 = vcombine.low %v1560_v12, %v1563_v21  ;;  %v1595_v50 = vsel %vm12149_vm5, %v9824_v25, %v1594_v42  ;;  %v9801_v42 = vld [vmem:[%s11907_s28 + $0x108] sm:$0x3]  ;;  %v9808_v21 = vld [vmem:[%s11907_s28 + $0x130] sm:$0xc]  ;;  %v1605_v25 = vsel %vm12149_vm5, %v1603_v7, %v1604_v4  ;;  %v1638_v43 = vrot.slane %v1636_v16, 4 }
  0x55   : > { %v10032_v31 = vcombine.low %v1595_v50, %v1598_v55  ;;  %v1618_v45 = vrot.slane %v9801_v42, 6  ;;  %v10033_v47 = vcombine.low %v1602_v18, %v1605_v25  ;;  %v9814_v50 = vld [vmem:[%s11907_s28 + $0x150] sm:$0xc]  ;;  %v1653_v7 = vrot.slane %v9816_v51, 6  ;;  %v9834_v18 = vld [vmem:[%s11907_s28 + $0x78] sm:$0xf] }
  0x56   : > { %2297 = vrot.lane.b32.xlu1 %v10024_v46, %s11841_s30  ;;  %v1590_v46 = vrot.slane %v9789_v26, 6  ;;  %v1617_v26 = vrot.slane %v1615_v1, 4  ;;  %v9832_v24 = vrot.slane %v9814_v50, 10  ;;  %v10042_v25 = vcombine.low %v12119_v11, %v9834_v18  ;;  %v9837_v11 = vld [vmem:[%s11907_s28 + $0xa8] sm:$0xf] }
  0x57   : > { %v9854_v50 = vld [vmem:[%s11907_s28 + $0x98] sm:$0x3]  ;;  %v9849_v51 = vld [vmem:[%s11907_s28 + $0x80] sm:$0xc]  ;;  %v9847_v18 = vld [vmem:[%s11907_s28 + $0x148] sm:$0xf] }
  0x58   : > { %2295 = vrot.lane.b32.xlu0 %v10023_v20, %s11841_s30  ;;  %v1610_v20 = vrot.slane %v1608_v36, 4  ;;  %v1623_v36 = vsel %vm12149_vm5, %v9828_v10, %v1622_v59  ;;  %v1619_v52 = vsel %vm12149_vm5, %v1617_v26, %v1618_v45  ;;  %v9836_v26 = vld [vmem:[%s11907_s28 + $0x98] sm:$0xf] }
  0x59   : > { %v10036_v58 = vcombine.low %v1623_v36, %v1626_v40  ;;  %v10035_v4 = vcombine.low %v1616_v8, %v1619_v52  ;;  %v9842_v40 = vld [vmem:[%s11907_s28 + $0xf8] sm:$0xf]  ;;  %v9852_v8 = vld [vmem:[%s11907_s28 + $0x90] sm:$0xc] }
  0x5a   : > { %2349 = vrot.lane.b32.xlu1 %v10026_v28, %s11842_s7  ;;  %v1591_v28 = vsel %vm12149_vm5, %v1589_v44, %v1590_v46  ;;  %v1612_v12 = vsel %vm12149_vm5, %v1610_v20, %v1611_v56  ;;  %v1650_v46 = vrot.slane %v12269_v23, 6  ;;  %v1632_v20 = vrot.slane %v9807_v37, 6  ;;  %v9839_v37 = vld [vmem:[%s11907_s28 + $0xc8] sm:$0xf] }
  0x5b   : > { %v10031_v17 = vcombine.low %v1588_v62, %v1591_v28  ;;  %v10034_v35 = vcombine.low %v1609_v6, %v1612_v12  ;;  %v1643_v56 = vrot.slane %v12280_v38, 6  ;;  %v9813_v62 = vld [vmem:[%s11907_s28 + $0x148] sm:$0x3] }
  0x5c   : > { %2347 = vrot.lane.b32.xlu0 %v10025_v53, %s11842_s7  ;;  %v12258_v53 = vld [vmem:[%s11907_s28 + $0x124] sm:$0xf]  ;;  %v1652_v28 = vrot.slane %v1650_v46, 4  ;;  %v1646_v10 = vrot.slane %v9813_v62, 6  ;;  %v1651_v12 = vsel %vm12149_vm5, %v9832_v24, %v1650_v46  ;;  %v9844_v46 = vld [vmem:[%s11907_s28 + $0x118] sm:$0xf] }
  0x5d   : > { %v1629_v33 = vrot.slane %v12258_v53, 6  ;;  %v1645_v6 = vrot.slane %v1643_v56, 4 }
  0x5e   : > { %2353 = vrot.lane.b32.xlu1 %v10028_v22, %s11842_s7  ;;  %v9810_v22 = vld [vmem:[%s11907_s28 + $0x138] sm:$0x3]  ;;  %v1654_v63 = vsel %vm12149_vm5, %v1652_v28, %v1653_v7  ;;  %v1783_v28 = vrot.slane %v9854_v50, 6  ;;  %v9897_v7 = vrot.slane %v9849_v51, 10 }
  0x5f   : > { %v1639_v44 = vrot.slane %v9810_v22, 6  ;;  %v1631_v55 = vrot.slane %v1629_v33, 4  ;;  %v9833_v22 = vld [vmem:[%s11907_s28 + $0x68] sm:$0xf]  ;;  %v9872_v51 = vld [vmem:[%s11907_s28 + $0xf8] sm:$0x3] }
  0x60   : > { %2351 = vrot.lane.b32.xlu0 %v10027_v57, %s11842_s7  ;;  %v9830_v57 = vrot.slane %v9808_v21, 10  ;;  %v10041_v45 = vcombine.low %v12125_v13, %v9833_v22 }
  0x61   : > { %v1640_v2 = vsel %vm12149_vm5, %v1638_v43, %v1639_v44  ;;  %v1633_v1 = vsel %vm12149_vm5, %v1631_v55, %v1632_v20  ;;  %v10047_v43 = vcombine.low %v12192_v5, %v9839_v37  ;;  %v12346_v44 = vld [vmem:[%s11907_s28 + $0x94] sm:$0xf]  ;;  %v9843_v5 = vld [vmem:[%s11907_s28 + $0x108] sm:$0xf]  ;;  %v9846_v55 = vld [vmem:[%s11907_s28 + $0x138] sm:$0xf] }
  0x62   : > { %2357 = vrot.lane.b32.xlu1 %v10030_v48, %s11842_s7  ;;  %v9829_v48 = vrot.slane %v9805_v32, 10  ;;  %v1637_v59 = vsel %vm12149_vm5, %v9830_v57, %v1636_v16  ;;  %v1647_v16 = vsel %vm12149_vm5, %v1645_v6, %v1646_v10  ;;  %v9835_v32 = vld [vmem:[%s11907_s28 + $0x88] sm:$0xf]  ;;  %v9840_v57 = vld [vmem:[%s11907_s28 + $0xd8] sm:$0xf] }
  0x63   : > { %v10038_v42 = vcombine.low %v1637_v59, %v1640_v2  ;;  %v10043_v36 = vcombine.low %v12144_v29, %v9835_v32  ;;  %v10048_v29 = vcombine.low %v12181_v60, %v9840_v57  ;;  %v9851_v20 = vld [vmem:[%s11907_s28 + $0x88] sm:$0x3]  ;;  %v9898_v2 = vrot.slane %v9852_v8, 10  ;;  %v9860_v10 = vld [vmem:[%s11907_s28 + $0xb8] sm:$0x3] }
  0x64   : > { %2355 = vrot.lane.b32.xlu0 %v10029_v61, %s11842_s7  ;;  %v9811_v61 = vld [vmem:[%s11907_s28 + $0x140] sm:$0xc]  ;;  %v1630_v15 = vsel %vm12149_vm5, %v9829_v48, %v1629_v33  ;;  %v10044_v33 = vcombine.low %v12135_v19, %v9836_v26  ;;  %v10045_v19 = vcombine.low %v12169_v49, %v9837_v11  ;;  %v10050_v49 = vcombine.low %v12203_v14, %v9842_v40  ;;  %v9845_v59 = vld [vmem:[%s11907_s28 + $0x128] sm:$0xf]  ;;  %v9866_v26 = vld [vmem:[%s11907_s28 + $0xd8] sm:$0x3] }
  0x65   : > { %v10037_v9 = vcombine.low %v1630_v15, %v1633_v1  ;;  %v1780_v48 = vrot.slane %v12346_v44, 6  ;;  %v10052_v14 = vcombine.low %v12225_v41, %v9844_v46  ;;  %v9848_v41 = vld [vmem:[%s11907_s28 + $0x158] sm:$0xf]  ;;  %v1776_v1 = vrot.slane %v9851_v20, 6  ;;  %v12416_v37 = vld [vmem:[%s11907_s28 + $0xe4] sm:$0xf] }
  0x66   : > { %2361 = vrot.lane.b32.xlu1 %v10032_v31, %s11842_s7  ;;  %v9831_v31 = vrot.slane %v9811_v61, 10  ;;  %v12374_v61 = vld [vmem:[%s11907_s28 + $0xa4] sm:$0xf]  ;;  %v10055_v40 = vcombine.low %v12280_v38, %v9847_v18 }
  0x67   : > { %v1782_v24 = vrot.slane %v1780_v48, 4 }
  0x68   : > { %2359 = vrot.lane.b32.xlu0 %v10031_v17, %s11842_s7  ;;  %v1644_v21 = vsel %vm12149_vm5, %v9831_v31, %v1643_v56  ;;  %v10040_v17 = vcombine.low %v1651_v12, %v1654_v63  ;;  %v12365_v56 = vld [vmem:[%s11907_s28 + $0xb4] sm:$0xf]  ;;  %v9858_v31 = vld [vmem:[%s11907_s28 + $0xb0] sm:$0xc]  ;;  %v1787_v12 = vrot.slane %v12374_v61, 6 }
  0x69   : > { %v10039_v34 = vcombine.low %v1644_v21, %v1647_v16  ;;  %v1794_v6 = vrot.slane %v12365_v56, 6  ;;  %v9857_v21 = vld [vmem:[%s11907_s28 + $0xa8] sm:$0x3]  ;;  %v1784_v22 = vsel %vm12149_vm5, %v1782_v24, %v1783_v28  ;;  %v9900_v32 = vrot.slane %v9858_v31, 10  ;;  %v12447_v24 = vld [vmem:[%s11907_s28 + $0x114] sm:$0xf] }
  0x6a   : > { %2365 = vrot.lane.b32.xlu1 %v10034_v35, %s11842_s7  ;;  %v9838_v35 = vld [vmem:[%s11907_s28 + $0xb8] sm:$0xf]  ;;  %v1790_v57 = vrot.slane %v9857_v21, 6  ;;  %v12455_v31 = vld [vmem:[%s11907_s28 + $0x104] sm:$0xf]  ;;  %v1836_v18 = vrot.slane %v12447_v24, 6 }
  0x6b   : > { %v10046_v13 = vcombine.low %v12159_v39, %v9838_v35  ;;  %v9841_v39 = vld [vmem:[%s11907_s28 + $0xe8] sm:$0xf]  ;;  %v1797_v35 = vrot.slane %v9860_v10, 6  ;;  %v1795_v38 = vsel %vm12149_vm5, %v9900_v32, %v1794_v6 }
  0x6c   : > { %2363 = vrot.lane.b32.xlu0 %v10033_v47, %s11842_s7  ;;  %v12350_v47 = vld [vmem:[%s11907_s28 + $0x84] sm:$0xf]  ;;  %v10049_v60 = vcombine.low %v12214_v27, %v9841_v39  ;;  %v1811_v39 = vrot.slane %v9866_v26, 6 }
  0x6d   : > { %v1773_v52 = vrot.slane %v12350_v47, 6 }
  0x6e   : > { %2369 = vrot.lane.b32.xlu1 %v10036_v58, %s11842_s7  ;;  %v10051_v58 = vcombine.low %v12236_v54, %v9843_v5  ;;  %v10054_v54 = vcombine.low %v12247_v3, %v9846_v55  ;;  %v9864_v3 = vld [vmem:[%s11907_s28 + $0xd0] sm:$0xc]  ;;  %v1815_v55 = vrot.slane %v12416_v37, 6 }
  0x6f   : > { %v1775_v15 = vrot.slane %v1773_v52, 4  ;;  %v9870_v5 = vld [vmem:[%s11907_s28 + $0xf0] sm:$0xc] }
  0x70   : > { %2367 = vrot.lane.b32.xlu0 %v10035_v4, %s11842_s7  ;;  %v12379_v4 = vld [vmem:[%s11907_s28 + $0xd4] sm:$0xf] }
  0x71   : > { %v1808_v16 = vrot.slane %v12379_v4, 6 }
  0x72   : > { %2373 = vrot.lane.b32.xlu1 %v10038_v42, %s11842_s7  ;;  %v9855_v42 = vld [vmem:[%s11907_s28 + $0xa0] sm:$0xc] }
  0x73   : > { %v9899_v11 = vrot.slane %v9855_v42, 10  ;;  %v1825_v42 = vrot.slane %v9872_v51, 6  ;;  %v12497_v51 = vld [vmem:[%s11907_s28 + $0x154] sm:$0xf] }
  0x74   : > { %2371 = vrot.lane.b32.xlu0 %v10037_v9, %s11842_s7  ;;  %v10053_v9 = vcombine.low %v12258_v53, %v9845_v59  ;;  %v12405_v53 = vld [vmem:[%s11907_s28 + $0xc4] sm:$0xf] }
  0x75   : > { %v1801_v46 = vrot.slane %v12405_v53, 6 }
  0x76   : > { %2377 = vrot.lane.b32.xlu1 %v10040_v17, %s11842_s7  ;;  %v10056_v17 = vcombine.low %v12269_v23, %v9848_v41  ;;  %v1777_v23 = vsel %vm12149_vm5, %v1775_v15, %v1776_v1 }
  0x77   : > { %v1803_v15 = vrot.slane %v1801_v46, 4 }
  0x78   : > { %2375 = vrot.lane.b32.xlu0 %v10039_v34, %s11842_s7  ;;  %v1781_v34 = vsel %vm12149_vm5, %v9898_v2, %v1780_v48  ;;  %v9869_v2 = vld [vmem:[%s11907_s28 + $0xe8] sm:$0x3] }
  0x7a   : > { %2445 = vrot.lane.b32.xlu1 %v10042_v25, %s11843_s8  ;;  %v1774_v25 = vsel %vm12149_vm5, %v9897_v7, %v1773_v52  ;;  %v9867_v52 = vld [vmem:[%s11907_s28 + $0xe0] sm:$0xc] }
  0x7b   : > { %v10057_v50 = vcombine.low %v1774_v25, %v1777_v23  ;;  %v1829_v25 = vrot.slane %v12455_v31, 6 }
  0x7c   : > { %2443 = vrot.lane.b32.xlu0 %v10041_v45, %s11843_s8 }
  0x7e   : > { %2449 = vrot.lane.b32.xlu1 %v10044_v33, %s11843_s8  ;;  %v1796_v33 = vrot.slane %v1794_v6, 4  ;;  %v9904_v6 = vrot.slane %v9870_v5, 10 }
  0x80   : > { %2447 = vrot.lane.b32.xlu0 %v10043_v36, %s11843_s8  ;;  %v12413_v36 = vld [vmem:[%s11907_s28 + $0xf4] sm:$0xf]  ;;  %v1798_v20 = vsel %vm12149_vm5, %v1796_v33, %v1797_v35 }
  0x81   : > { %v1822_v8 = vrot.slane %v12413_v36, 6  ;;  %v10060_v21 = vcombine.low %v1795_v38, %v1798_v20  ;;  %v9879_v38 = vld [vmem:[%s11907_s28 + $0x120] sm:$0xc] }
  0x82   : > { %2453 = vrot.lane.b32.xlu1 %v10046_v13, %s11843_s8  ;;  %v1789_v13 = vrot.slane %v1787_v12, 4 }
  0x83   : > { %v1824_v10 = vrot.slane %v1822_v8, 4 }
  0x84   : > { %2451 = vrot.lane.b32.xlu0 %v10045_v19, %s11843_s8  ;;  %v9902_v19 = vrot.slane %v9864_v3, 10  ;;  %v1791_v59 = vsel %vm12149_vm5, %v1789_v13, %v1790_v57  ;;  %v1817_v3 = vrot.slane %v1815_v55, 4  ;;  %v12475_v13 = vld [vmem:[%s11907_s28 + $0x134] sm:$0xf]  ;;  %v1823_v57 = vsel %vm12149_vm5, %v9904_v6, %v1822_v8 }
  0x85   : > { %v1838_v8 = vrot.slane %v1836_v18, 4  ;;  %v1850_v20 = vrot.slane %v12475_v13, 6 }
  0x86   : > { %2457 = vrot.lane.b32.xlu1 %v10048_v29, %s11843_s8  ;;  %v12443_v41 = vsel %vm12149_vm5, %v9902_v19, %v1808_v16  ;;  %v1826_v19 = vsel %vm12149_vm5, %v1824_v10, %v1825_v42 }
  0x87   : > { %v10064_v6 = vcombine.low %v1823_v57, %v1826_v19  ;;  %v12537_v19 = vld [vmem:[%s11907_s28 + $0x174] sm:$0xf] }
  0x88   : > { %2455 = vrot.lane.b32.xlu0 %v10047_v43, %s11843_s8  ;;  %v1810_v43 = vrot.slane %v1808_v16, 4  ;;  %v1818_v16 = vrot.slane %v9869_v2, 6  ;;  %18932 = vst [vmem:[#allocation10_spill] sm:$0xff] %v12537_v19 }
  0x8a   : > { %2461 = vrot.lane.b32.xlu1 %v10050_v49, %s11843_s8  ;;  %v9861_v49 = vld [vmem:[%s11907_s28 + $0xc0] sm:$0xc]  ;;  %v1812_v7 = vsel %vm12149_vm5, %v1810_v43, %v1811_v39  ;;  %v9882_v39 = vld [vmem:[%s11907_s28 + $0x130] sm:$0xc]  ;;  %v1819_v5 = vsel %vm12149_vm5, %v1817_v3, %v1818_v16  ;;  %v12521_v3 = vld [vmem:[%s11907_s28 + $0x144] sm:$0xf] }
  0x8b   : > { %v10062_v32 = vcombine.low %v12443_v41, %v1812_v7  ;;  %18930 = vst [vmem:[#allocation8_spill] sm:$0xff] %v12521_v3 }
  0x8c   : > { %2459 = vrot.lane.b32.xlu0 %v10049_v60, %s11843_s8  ;;  %v12368_v27 = vpop.permute.xlu1 %2175  ;;  %v9863_v60 = vld [vmem:[%s11907_s28 + $0xc8] sm:$0x3] }
  0x8d   : > { %v12376_v62 = vpop.permute.xlu0 %2171  ;;  %v1804_v1 = vrot.slane %v9863_v60, 6 }
  0x8e   : > { %2465 = vrot.lane.b32.xlu1 %v10052_v14, %s11843_s8  ;;  %v10058_v14 = vcombine.low %v1781_v34, %v1784_v22  ;;  %v9878_v34 = vld [vmem:[%s11907_s28 + $0x118] sm:$0x3]  ;;  %v9873_v22 = vld [vmem:[%s11907_s28 + $0x100] sm:$0xc] }
  0x8f   : > { %v1805_v35 = vsel %vm12149_vm5, %v1803_v15, %v1804_v1  ;;  %v9888_v15 = vld [vmem:[%s11907_s28 + $0x150] sm:$0xc]  ;;  %v12511_v1 = vld [vmem:[%s11907_s28 + $0x158] sm:$0x3] }
  0x90   : > { %2463 = vrot.lane.b32.xlu0 %v10051_v58, %s11843_s8  ;;  %v12389_v63 = vpop.permute.xlu1 %2177  ;;  %v1788_v58 = vsel %vm12149_vm5, %v9899_v11, %v1787_v12  ;;  %v9903_v12 = vrot.slane %v9867_v52, 10  ;;  %v9875_v11 = vld [vmem:[%s11907_s28 + $0x108] sm:$0x3]  ;;  %v1831_v52 = vrot.slane %v1829_v25, 4 }
  0x91   : > { %v10059_v23 = vcombine.low %v1788_v58, %v1791_v59  ;;  %v9881_v58 = vld [vmem:[%s11907_s28 + $0x128] sm:$0x3]  ;;  %v12502_v59 = vld [vmem:[%s11907_s28 + $0x64] sm:$0xf] }
  0x92   : > { %v12407_v45 = vpop.permute.xlu0 %2173  ;;  %2469 = vrot.lane.b32.xlu1 %v10054_v54, %s11843_s8  ;;  %v9901_v54 = vrot.slane %v9861_v49, 10  ;;  %v9884_v49 = vld [vmem:[%s11907_s28 + $0x138] sm:$0x3]  ;;  %v1846_v57 = vrot.slane %v9881_v58, 6 }
  0x94   : > { %2467 = vrot.lane.b32.xlu0 %v10053_v9, %s11843_s8  ;;  %v12419_v29 = vpop.permute.xlu1 %2181  ;;  %v1802_v33 = vsel %vm12149_vm5, %v9901_v54, %v1801_v46  ;;  %v12488_v46 = vld [vmem:[%s11907_s28 + $0x124] sm:$0xf] }
  0x95   : > { %v10061_v7 = vcombine.low %v1802_v33, %v1805_v35  ;;  %v1843_v54 = vrot.slane %v12488_v46, 6  ;;  %v12532_v33 = vld [vmem:[%s11907_s28 + $0x170] sm:$0xc] }
  0x96   : > { %v12427_v48 = vpop.permute.xlu0 %2179  ;;  %2473 = vrot.lane.b32.xlu1 %v10056_v17, %s11843_s8  ;;  %v9876_v17 = vld [vmem:[%s11907_s28 + $0x110] sm:$0xc] }
  0x97   : > { %v9906_v43 = vrot.slane %v9876_v17, 10 }
  0x98   : > { %2471 = vrot.lane.b32.xlu0 %v10055_v40, %s11843_s8  ;;  %v12450_v28 = vpop.permute.xlu1 %2185  ;;  %v12483_v40 = vsel %vm12149_vm5, %v9903_v12, %v1815_v55  ;;  %v1832_v55 = vrot.slane %v9875_v11, 6  ;;  %v1864_v12 = vrot.slane %v12497_v51, 6  ;;  %v1852_v11 = vrot.slane %v1850_v20, 4 }
  0x99   : > { %v10063_v10 = vcombine.low %v12483_v40, %v1819_v5  ;;  %v1837_v42 = vsel %vm12149_vm5, %v9906_v43, %v1836_v18  ;;  %v1853_v18 = vrot.slane %v9884_v49, 6  ;;  %v1845_v40 = vrot.slane %v1843_v54, 4  ;;  %v9896_v5 = vld [vmem:[%s11907_s28 + $0x178] sm:$0x3] }
  0x9a   : > { %v12457_v9 = vpop.permute.xlu0 %2183  ;;  %2525 = vrot.lane.b32.xlu1 %v10058_v14, %s11844_s9  ;;  %v1839_v14 = vrot.slane %v9878_v34, 6  ;;  %v1833_v35 = vsel %vm12149_vm5, %v1831_v52, %v1832_v55  ;;  %v9910_v43 = vrot.slane %v9888_v15, 10  ;;  %v1857_v49 = vrot.slane %v12521_v3, 6  ;;  %v9893_v52 = vld [vmem:[%s11907_s28 + $0x168] sm:$0x3] }
  0x9b   : > { %18926 = vst [vmem:[#allocation4_spill] sm:$0xff] %v12457_v9 }
  0x9c   : > { %2523 = vrot.lane.b32.xlu0 %v10057_v50, %s11844_s9  ;;  %v12466_v26 = vpop.permute.xlu1 %2189  ;;  %v9905_v50 = vrot.slane %v9873_v22, 10  ;;  %v1840_v17 = vsel %vm12149_vm5, %v1838_v8, %v1839_v14  ;;  %v9908_v22 = vrot.slane %v9882_v39, 10  ;;  %v1867_v39 = vrot.slane %v12511_v1, 6  ;;  %v12546_v8 = vld [vmem:[%s11907_s28 + $0x164] sm:$0xf] }
  0x9d   : > { %18927 = vst [vmem:[#allocation5_spill] sm:$0xff] %v12466_v26  ;;  %v1866_v14 = vrot.slane %v1864_v12, 4  ;;  %v10066_v58 = vcombine.low %v1837_v42, %v1840_v17  ;;  %v9912_v1 = vrot.slane %v12532_v33, 10  ;;  %v1847_v17 = vsel %vm12149_vm5, %v1845_v40, %v1846_v57  ;;  %v9920_v57 = vld [vmem:[%s11907_s28 + $0xb8] sm:$0x7] }
  0x9e   : > { %v12490_v60 = vpop.permute.xlu0 %2187  ;;  %2529 = vrot.lane.b32.xlu1 %v10060_v21, %s11844_s9  ;;  %v12518_v21 = vld [vmem:[%s11907_s28 + $0x140] sm:$0xc]  ;;  %v1830_v34 = vsel %vm12149_vm5, %v9905_v50, %v1829_v25  ;;  %v1851_v41 = vsel %vm12149_vm5, %v9908_v22, %v1850_v20  ;;  %v1956_v22 = vrot.slane %v12346_v44, 7  ;;  %v1949_v33 = vrot.slane %v12350_v47, 7 }
  0x9f   : > { %18928 = vst [vmem:[#allocation6_spill] sm:$0xff] %v12490_v60  ;;  %v9909_v50 = vrot.slane %v12518_v21, 10  ;;  %v1878_v21 = vrot.slane %v12537_v19, 6  ;;  %v1868_v60 = vsel %vm12149_vm5, %v1866_v14, %v1867_v39 }
  0xa0   : > { %2527 = vrot.lane.b32.xlu0 %v10059_v23, %s11844_s9  ;;  %v12506_v2 = vpop.permute.xlu1 %2193  ;;  %v9887_v23 = vld [vmem:[%s11907_s28 + $0x148] sm:$0x3]  ;;  %v1951_v39 = vrot.slane %v1949_v33, 4 }
  0xa1   : > { %18929 = vst [vmem:[#allocation7_spill] sm:$0xff] %v12506_v2  ;;  %v1860_v15 = vrot.slane %v9887_v23, 6  ;;  %v1871_v2 = vrot.slane %v12546_v8, 6  ;;  %v1881_v23 = vrot.slane %v9896_v5, 6  ;;  %v1880_v5 = vrot.slane %v1878_v21, 4 }
  0xa2   : > { %v12523_v16 = vpop.permute.xlu0 %2191  ;;  %2533 = vrot.lane.b32.xlu1 %v10062_v32, %s11844_s9  ;;  %v9907_v32 = vrot.slane %v9879_v38, 10  ;;  %v9891_v38 = vld [vmem:[%s11907_s28 + $0x160] sm:$0xc] }
  0xa3   : > { %18931 = vst [vmem:[#allocation9_spill] sm:$0xff] %v12523_v16  ;;  %v9916_v16 = vld [vmem:[%s11907_s28 + $0x98] sm:$0x7]  ;;  %v1873_v26 = vrot.slane %v1871_v2, 4 }
  0xa4   : > { %2531 = vrot.lane.b32.xlu0 %v10061_v7, %s11844_s9  ;;  %v12540_v25 = vpop.permute.xlu1 %2197  ;;  %v10065_v7 = vcombine.low %v1830_v34, %v1833_v35  ;;  %v1844_v20 = vsel %vm12149_vm5, %v9907_v32, %v1843_v54  ;;  %v1859_v34 = vrot.slane %v1857_v49, 4  ;;  %v12577_v35 = vld [vmem:[%s11907_s28 + $0xb0] sm:$0x8]  ;;  %v1865_v54 = vsel %vm12149_vm5, %v9910_v43, %v1864_v12 }
  0xa5   : > { %18933 = vst [vmem:[#allocation11_spill] sm:$0xff] %v12540_v25  ;;  %v1854_v25 = vsel %vm12149_vm5, %v1852_v11, %v1853_v18  ;;  %v9914_v18 = vld [vmem:[%s11907_s28 + $0x88] sm:$0x7]  ;;  %v9911_v32 = vrot.slane %v9891_v38, 10  ;;  %v10067_v40 = vcombine.low %v1844_v20, %v1847_v17  ;;  %v1858_v12 = vsel %vm12149_vm5, %v9909_v50, %v1857_v49 }
  0xa6   : > { %v12551_v55 = vpop.permute.xlu0 %2195  ;;  %2537 = vrot.lane.b32.xlu1 %v10064_v6, %s11844_s9  ;;  %v12564_v6 = vld [vmem:[%s11907_s28 + $0x80] sm:$0x8]  ;;  %v1861_v43 = vsel %vm12149_vm5, %v1859_v34, %v1860_v15  ;;  %v1952_v14 = vrot.slane %v9914_v18, 7  ;;  %v1882_v49 = vsel %vm12149_vm5, %v1880_v5, %v1881_v23  ;;  %v1973_v50 = vrot.slane %v9920_v57, 7  ;;  %v9918_v17 = vld [vmem:[%s11907_s28 + $0xa8] sm:$0x7] }
  0xa7   : > { %18934 = vst [vmem:[#allocation12_spill] sm:$0xff] %v12551_v55  ;;  %v9915_v55 = vld [vmem:[%s11907_s28 + $0x90] sm:$0x8]  ;;  %v9917_v15 = vld [vmem:[%s11907_s28 + $0xa0] sm:$0x8]  ;;  %v1872_v34 = vsel %vm12149_vm5, %v9911_v32, %v1871_v2  ;;  %v1984_v2 = vrot.slane %v12379_v4, 7 }
  0xa8   : > { %2535 = vrot.lane.b32.xlu0 %v10063_v10, %s11844_s9  ;;  %v12567_v42 = vpop.permute.xlu1 %2201  ;;  %v10068_v10 = vcombine.low %v1851_v41, %v1854_v25  ;;  %v1959_v41 = vrot.slane %v9916_v16, 7  ;;  %v9945_v25 = vrot.slane %v12564_v6, 11  ;;  %v1970_v16 = vrot.slane %v12365_v56, 7  ;;  %v9924_v57 = vld [vmem:[%s11907_s28 + $0xd8] sm:$0x7] }
  0xa9   : > { %18935 = vst [vmem:[#allocation13_spill] sm:$0xff] %v12567_v42  ;;  %v1874_v42 = vrot.slane %v9893_v52, 6  ;;  %v10070_v52 = vcombine.low %v1865_v54, %v1868_v60  ;;  %v1963_v6 = vrot.slane %v12374_v61, 7  ;;  %v10069_v60 = vcombine.low %v1858_v12, %v1861_v43  ;;  %v12624_v54 = vld [vmem:[%s11907_s28 + $0x44] sm:$0xf] }
  0xaa   : > { %v12579_v11 = vpop.permute.xlu0 %2199  ;;  %2541 = vrot.lane.b32.xlu1 %v10066_v58, %s11844_s9  ;;  %v1958_v58 = vrot.slane %v1956_v22, 4  ;;  %v1966_v5 = vrot.slane %v9918_v17, 7  ;;  %v12638_v12 = vld [vmem:[%s11907_s28 + $0x68] sm:$0x3]  ;;  %v18941_v43 = vrot.slane %v12502_v59, 6  ;;  %v1998_v17 = vrot.slane %v12413_v36, 7 }
  0xab   : > { %18936 = vst [vmem:[#allocation14_spill] sm:$0xff] %v12579_v11  ;;  %v9946_v11 = vrot.slane %v9915_v55, 11  ;;  %v9948_v55 = vrot.slane %v12577_v35, 11  ;;  %v1965_v4 = vrot.slane %v1963_v6, 4 }
  0xac   : > { %2539 = vrot.lane.b32.xlu0 %v10065_v7, %s11844_s9  ;;  %v12588_v9 = vpop.permute.xlu1 %2269  ;;  %v1879_v7 = vsel %vm12149_vm5, %v9912_v1, %v1878_v21  ;;  %v1875_v1 = vsel %vm12149_vm5, %v1873_v26, %v1874_v42  ;;  %v9923_v21 = vld [vmem:[%s11907_s28 + $0xd0] sm:$0x8]  ;;  %v1960_v35 = vsel %vm11909_vm2, %v1958_v58, %v1959_v41  ;;  %v18825_v26 = vrot.slane %v12624_v54, 6  ;;  %v9921_v58 = vld [vmem:[%s11907_s28 + $0xc0] sm:$0x8] }
  0xad   : > { %v10072_v23 = vcombine.low %v1879_v7, %v1882_v49  ;;  %v1957_v61 = vsel %vm11909_vm2, %v9946_v11, %v1956_v22  ;;  %v10071_v32 = vcombine.low %v1872_v34, %v1875_v1  ;;  %v1950_v22 = vsel %vm11909_vm2, %v9945_v25, %v1949_v33  ;;  %v12655_v34 = vld [vmem:[%s11907_s28 + $0x60] sm:$0xc] }
  0xae   : > { %v12595_v38 = vpop.permute.xlu0 %2267  ;;  %2545 = vrot.lane.b32.xlu1 %v10068_v10, %s11844_s9  ;;  %v1972_v10 = vrot.slane %v1970_v16, 4  ;;  %v9947_v11 = vrot.slane %v9917_v15, 11  ;;  %v1977_v41 = vrot.slane %v12405_v53, 7  ;;  %v10074_v33 = vcombine.low %v1957_v61, %v1960_v35 }
  0xaf   : > { %18937 = vst [vmem:[#allocation15_spill] sm:$0xff] %v12595_v38  ;;  %v1971_v25 = vsel %vm11909_vm2, %v9948_v55, %v1970_v16  ;;  %v1986_v49 = vrot.slane %v1984_v2, 4  ;;  %v1987_v15 = vrot.slane %v9924_v57, 7  ;;  %v12659_v1 = vrot.slane %v18825_v26, 4 }
  0xb0   : > { %2543 = vrot.lane.b32.xlu0 %v10067_v40, %s11844_s9  ;;  %v12607_v20 = vpop.permute.xlu1 %2273  ;;  %v1953_v40 = vsel %vm11909_vm2, %v1951_v39, %v1952_v14  ;;  %v9950_v39 = vrot.slane %v9923_v21, 11  ;;  %v9922_v14 = vld [vmem:[%s11907_s28 + $0xc8] sm:$0x7]  ;;  %v1974_v53 = vsel %vm11909_vm2, %v1972_v10, %v1973_v50  ;;  %v1964_v50 = vsel %vm11909_vm2, %v9947_v11, %v1963_v6  ;;  %v9925_v10 = vld [vmem:[%s11907_s28 + $0xe0] sm:$0x8] }
  0xb1   : > { %18938 = vst [vmem:[#allocation16_spill] sm:$0xff] %v12607_v20  ;;  %v10073_v16 = vcombine.low %v1950_v22, %v1953_v40  ;;  %v9949_v21 = vrot.slane %v9921_v58, 11  ;;  %v1967_v36 = vsel %vm11909_vm2, %v1965_v4, %v1966_v5  ;;  %v1979_v61 = vrot.slane %v1977_v41, 4  ;;  %v9926_v4 = vld [vmem:[%s11907_s28 + $0xe8] sm:$0x7] }
  0xb2   : > { %v12615_v18 = vpop.permute.xlu0 %2271  ;;  %2549 = vrot.lane.b32.xlu1 %v10070_v52, %s11844_s9  ;;  %v12642_v52 = vrot.slane %v18941_v43, 4  ;;  %v1980_v35 = vrot.slane %v9922_v14, 7  ;;  %v1991_v57 = vrot.slane %v12416_v37, 7  ;;  %v12673_v43 = vld [vmem:[%s11907_s28 + $0x48] sm:$0x3]  ;;  %v10076_v6 = vcombine.low %v1971_v25, %v1974_v53 }
  0xb3   : > { %18939 = vst [vmem:[#allocation17_spill] sm:$0xff] %v12615_v18  ;;  %v1985_v11 = vsel %vm11909_vm2, %v9950_v39, %v1984_v2  ;;  %v1988_v37 = vsel %vm11909_vm2, %v1986_v49, %v1987_v15  ;;  %v2000_v5 = vrot.slane %v1998_v17, 4  ;;  %v9931_v14 = vld [vmem:[%s11907_s28 + $0x110] sm:$0x8]  ;;  %v2012_v26 = vrot.slane %v12447_v24, 7 }
  0xb4   : > { %2547 = vrot.lane.b32.xlu0 %v10069_v60, %s11844_s9  ;;  %v12628_v42 = vpop.permute.xlu1 %2277  ;;  %v9927_v60 = vld [vmem:[%s11907_s28 + $0xf0] sm:$0x8]  ;;  %v10075_v2 = vcombine.low %v1964_v50, %v1967_v36  ;;  %v1978_v25 = vsel %vm11909_vm2, %v9949_v21, %v1977_v41  ;;  %v9951_v39 = vrot.slane %v9925_v10, 11  ;;  %v9932_v53 = vld [vmem:[%s11907_s28 + $0x118] sm:$0x7]  ;;  %v1981_v49 = vsel %vm11909_vm2, %v1979_v61, %v1980_v35 }
  0xb5   : > { %18940 = vst [vmem:[#allocation18_spill] sm:$0xff] %v12628_v42  ;;  %v9952_v40 = vrot.slane %v9927_v60, 11  ;;  %v1993_v24 = vrot.slane %v1991_v57, 4  ;;  %v1994_v15 = vrot.slane %v9926_v4, 7  ;;  %v9929_v60 = vld [vmem:[%s11907_s28 + $0x100] sm:$0x8]  ;;  %v10078_v50 = vcombine.low %v1985_v11, %v1988_v37 }
  0xb6   : > { %v12644_v7 = vpop.permute.xlu0 %2275  ;;  %2553 = vrot.lane.b32.xlu1 %v10072_v23, %s11844_s9  ;;  %v9928_v23 = vld [vmem:[%s11907_s28 + $0xf8] sm:$0x7]  ;;  %v9954_v21 = vrot.slane %v9931_v14, 11  ;;  %v9930_v36 = vld [vmem:[%s11907_s28 + $0x108] sm:$0x7]  ;;  %v2014_v35 = vrot.slane %v2012_v26, 4  ;;  %v10077_v11 = vcombine.low %v1978_v25, %v1981_v49 }
  0xb7   : > { %18942 = vst [vmem:[#allocation19_spill] sm:$0xff] %v12644_v7  ;;  %v2001_v58 = vrot.slane %v9928_v23, 7  ;;  %v2005_v23 = vrot.slane %v12455_v31, 7  ;;  %v1999_v41 = vsel %vm11909_vm2, %v9952_v40, %v1998_v17  ;;  %v2015_v31 = vrot.slane %v9932_v53, 7  ;;  %v9935_v10 = vld [vmem:[%s11907_s28 + $0x130] sm:$0x8] }
  0xb8   : > { %2551 = vrot.lane.b32.xlu0 %v10071_v32, %s11844_s9  ;;  %v12662_v55 = vpop.permute.xlu1 %2281  ;;  %v2026_v4 = vrot.slane %v12475_v13, 7  ;;  %v1992_v17 = vsel %vm11909_vm2, %v9951_v39, %v1991_v57  ;;  %v9953_v40 = vrot.slane %v9929_v60, 11  ;;  %v9936_v37 = vld [vmem:[%s11907_s28 + $0x138] sm:$0x7]  ;;  %v2008_v14 = vrot.slane %v9930_v36, 7 }
  0xb9   : > { %18943 = vst [vmem:[#allocation20_spill] sm:$0xff] %v12662_v55  ;;  %v12687_v55 = vld [vmem:[%s11907_s28 + $0x40] sm:$0xc]  ;;  %v2002_v61 = vsel %vm11909_vm2, %v2000_v5, %v2001_v58  ;;  %v1995_v5 = vsel %vm11909_vm2, %v1993_v24, %v1994_v15  ;;  %v2007_v58 = vrot.slane %v2005_v23, 4  ;;  %v2013_v39 = vsel %vm11909_vm2, %v9954_v21, %v2012_v26  ;;  %v9934_v24 = vld [vmem:[%s11907_s28 + $0x128] sm:$0x7] }
  0xba   : > { %v12675_v22 = vpop.permute.xlu0 %2279  ;;  %2605 = vrot.lane.b32.xlu1 %v10074_v33, %s11845_s10  ;;  %v9933_v53 = vld [vmem:[%s11907_s28 + $0x120] sm:$0x8]  ;;  %v10080_v57 = vcombine.low %v1999_v41, %v2002_v61  ;;  %v9956_v49 = vrot.slane %v9935_v10, 11  ;;  %v2016_v15 = vsel %vm11909_vm2, %v2014_v35, %v2015_v31  ;;  %v2029_v60 = vrot.slane %v9936_v37, 7  ;;  %v9939_v36 = vld [vmem:[%s11907_s28 + $0x150] sm:$0x8] }
  0xbb   : > { %18944 = vst [vmem:[#allocation21_spill] sm:$0xff] %v12675_v22  ;;  %v10079_v41 = vcombine.low %v1992_v17, %v1995_v5  ;;  %v2006_v21 = vsel %vm11909_vm2, %v9953_v40, %v2005_v23  ;;  %v9955_v61 = vrot.slane %v9933_v53, 11  ;;  %v9940_v35 = vld [vmem:[%s11907_s28 + $0x158] sm:$0x7]  ;;  %v2022_v31 = vrot.slane %v9934_v24, 7 }
  0xbc   : > { %2603 = vrot.lane.b32.xlu0 %v10073_v16, %s11845_s10  ;;  %v12690_v33 = vpop.permute.xlu1 %2285  ;;  %v9689_v16 = vrot.slane %v12687_v55, 10  ;;  %v2019_v55 = vrot.slane %v12488_v46, 7  ;;  %v2028_v46 = vrot.slane %v2026_v4, 4  ;;  %v9937_v10 = vld [vmem:[%s11907_s28 + $0x140] sm:$0x8]  ;;  %v10082_v23 = vcombine.low %v2013_v39, %v2016_v15 }
  0xbd   : > { %18945 = vst [vmem:[#allocation22_spill] sm:$0xff] %v12690_v33  ;;  %v2027_v40 = vsel %vm11909_vm2, %v9956_v49, %v2026_v4  ;;  %v9958_v5 = vrot.slane %v9939_v36, 11  ;;  %v2043_v53 = vrot.slane %v9940_v35, 7  ;;  %v2054_v24 = vrot.slane %v12537_v19, 7  ;;  %v9943_v36 = vld [vmem:[%s11907_s28 + $0x170] sm:$0x8] }
  0xbe   : > { %v12700_v32 = vpop.permute.xlu0 %2283  ;;  %2609 = vrot.lane.b32.xlu1 %v10076_v6, %s11845_s10  ;;  %v18954_v39 = vrot.slane %v12624_v54, 6  ;;  %v9944_v35 = vld [vmem:[%s11907_s28 + $0x178] sm:$0x7]  ;;  %v11762_v22 = vld [vmem:[%s11907_s28 + $0xe4] sm:$0xf] }
  0xbf   : > { %18946 = vst [vmem:[#allocation23_spill] sm:$0xff] %v12700_v32  ;;  %v12722_v32 = vld [vmem:[%s11907_s28 + $0x74] sm:$0xf]  ;;  %v9966_v42 = vld [vmem:[%s11907_s28 + $0xd8] sm:$0xf] }
  0xc0   : > { %2607 = vrot.lane.b32.xlu0 %v10075_v2, %s11845_s10  ;;  %v12712_v6 = vpop.permute.xlu1 %2289  ;;  %v2040_v2 = vrot.slane %v12497_v51, 7  ;;  %v2009_v51 = vsel %vm11909_vm2, %v2007_v58, %v2008_v14  ;;  %v9938_v58 = vld [vmem:[%s11907_s28 + $0x148] sm:$0x7]  ;;  %v12779_v4 = vsel %vm12149_vm5, %v9689_v16, %v18954_v39  ;;  %v9960_v39 = vrot.slane %v9943_v36, 11 }
  0xc1   : > { %18947 = vst [vmem:[#allocation24_spill] sm:$0xff] %v12712_v6  ;;  %v18949_v6 = vrot.slane %v12638_v12, 6  ;;  %v2021_v12 = vrot.slane %v2019_v55, 4  ;;  %v10081_v15 = vcombine.low %v2006_v21, %v2009_v51  ;;  %v18956_v51 = vrot.slane %v12722_v32, 6 }
  0xc2   : > { %v12725_v25 = vpop.permute.xlu0 %2287  ;;  %2613 = vrot.lane.b32.xlu1 %v10078_v50, %s11845_s10  ;;  %v2042_v14 = vrot.slane %v2040_v2, 4 }
  0xc3   : > { %18948 = vst [vmem:[#allocation25_spill] sm:$0xff] %v12725_v25  ;;  %v12740_v50 = vsel %vm12149_vm5, %v12642_v52, %v18949_v6  ;;  %v2033_v52 = vrot.slane %v12521_v3, 7  ;;  %v18951_v6 = vrot.slane %v12502_v59, 6  ;;  %v12767_v59 = vld [vmem:[%s11907_s28 + $0x70] sm:$0xc]  ;;  %v2023_v54 = vsel %vm11909_vm2, %v2021_v12, %v2022_v31 }
  0xc4   : > { %2611 = vrot.lane.b32.xlu0 %v10077_v11, %s11845_s10  ;;  %v12743_v26 = vpop.permute.xlu1 %2293  ;;  %v18952_v11 = vrot.slane %v12655_v34, 10  ;;  %v2030_v34 = vsel %vm11909_vm2, %v2028_v46, %v2029_v60  ;;  %v2020_v46 = vsel %vm11909_vm2, %v9955_v61, %v2019_v55  ;;  %v9957_v60 = vrot.slane %v9937_v10, 11  ;;  %v9941_v31 = vld [vmem:[%s11907_s28 + $0x160] sm:$0x8]  ;;  %v9963_v25 = vld [vmem:[%s11907_s28 + $0xa8] sm:$0xf] }
  0xc5   : > { %18950 = vst [vmem:[#allocation26_spill] sm:$0xff] %v12743_v26  ;;  %v2035_v16 = vrot.slane %v2033_v52, 4  ;;  %v9692_v21 = vrot.slane %v12767_v59, 10  ;;  %v1168_v55 = vrot.slane %v18956_v51, 4  ;;  %v10084_v10 = vcombine.low %v2027_v40, %v2030_v34  ;;  %v12811_v34 = vld [vmem:[%s11907_s28 + $0x58] sm:$0x3] }
  0xc6   : > { %v12758_v17 = vsel %vm12149_vm5, %v18952_v11, %v18951_v6  ;;  %v12760_v37 = vpop.permute.xlu0 %2291  ;;  %2617 = vrot.lane.b32.xlu1 %v10080_v57, %s11845_s10  ;;  %v11700_v57 = vld [vmem:[%s18820_s2 + $0x8] sm:$0xff]   ;;  %v9652_v6 = vld [vmem:[%s11907_s28 + $0x78] sm:$0x3]  ;;  %v2036_v11 = vrot.slane %v9938_v58, 7  ;;  %v2041_v12 = vsel %vm11909_vm2, %v9958_v5, %v2040_v2  ;;  %v2044_v59 = vsel %vm11909_vm2, %v2042_v14, %v2043_v53  ;;  %v11754_v2 = vld [vmem:[%s11907_s28 + $0x54] sm:$0xf] }
  0xc7   : > { %18953 = vst [vmem:[#allocation27_spill] sm:$0xff] %v12760_v37  ;;  %11510 = vmatprep.subr.bf16.mxu1 %v11700_v57  ;;  %v9942_v58 = vld [vmem:[%s11907_s28 + $0x168] sm:$0x7]  ;;  %v2056_v51 = vrot.slane %v2054_v24, 4  ;;  %v1169_v40 = vrot.slane %v9652_v6, 6  ;;  %v1152_v5 = vrot.slane %v11754_v2, 6  ;;  %v2034_v14 = vsel %vm11909_vm2, %v9957_v60, %v2033_v52 }
  0xc8   : > { %2615 = vrot.lane.b32.xlu0 %v10079_v41, %s11845_s10  ;;  %v12782_v49 = vpop.permute.xlu1 %2297  ;;  %v2047_v41 = vrot.slane %v12546_v8, 7  ;;  %11511 = vmatpush3.bf16.msra.mxu1 %v11700_v57  ;;  %v12803_v8 = vld [vmem:[%s11907_s28 + $0x50] sm:$0xc]  ;;  %v2037_v36 = vsel %vm11909_vm2, %v2035_v16, %v2036_v11  ;;  %v2050_v26 = vrot.slane %v9942_v58, 7  ;;  %v18959_v2 = vrot.slane %v12673_v43, 6 }
  0xc9   : > { %18955 = vst [vmem:[#allocation28_spill] sm:$0xff] %v12782_v49  ;;  %v2057_v49 = vrot.slane %v9944_v35, 7  ;;  %v12820_v53 = vld [vmem:[%s11907_s28 + $0x90] sm:$0xc]  ;;  %v9959_v35 = vrot.slane %v9941_v31, 11  ;;  %v9690_v52 = vrot.slane %v12803_v8, 10  ;;  %v10086_v16 = vcombine.low %v2041_v12, %v2044_v59 }
  0xca   : > { %v12795_v61 = vpop.permute.xlu0 %2295  ;;  %2621 = vrot.lane.b32.xlu1 %v10082_v23, %s11845_s10  ;;  %v11701_v23 = vld [vmem:[%s18820_s2] sm:$0xff]   ;;  %v2049_v6 = vrot.slane %v2047_v41, 4  ;;  %v11755_v60 = vld [vmem:[%s11907_s28 + $0x94] sm:$0xf]  ;;  %v1155_v43 = vrot.slane %v12811_v34, 6  ;;  %v12852_v12 = vsel %vm12149_vm5, %v1168_v55, %v1169_v40  ;;  %v9694_v59 = vrot.slane %v12820_v53, 10 }
  0xcb   : > { %18957 = vst [vmem:[#allocation29_spill] sm:$0xff] %v12795_v61  ;;  %v10083_v61 = vcombine.low %v2020_v46, %v2023_v54  ;;  %11512 = vmatprep.subr.bf16.mxu1 %v11701_v23  ;;  %v9658_v46 = vld [vmem:[%s11907_s28 + $0x98] sm:$0x3]  ;;  %v1180_v54 = vrot.slane %v11755_v60, 6  ;;  %v9653_v11 = vld [vmem:[%s11907_s28 + $0x80] sm:$0xc]  ;;  %v2058_v8 = vsel %vm11909_vm2, %v2056_v51, %v2057_v49 }
  0xcc   : > { %2619 = vrot.lane.b32.xlu0 %v10081_v15, %s11845_s10  ;;  %v12815_v57 = vpop.permute.xlu1 %2349  ;;  %v12829_v15 = vsel %vm12149_vm5, %v12659_v1, %v18959_v2  ;;  %11513 = vmatpush3.bf16.msra.mxu1 %v11701_v23  ;;  %v11756_v31 = vld [vmem:[%s11907_s28 + $0x84] sm:$0xf]  ;;  %v2055_v1 = vsel %vm11909_vm2, %v9960_v39, %v2054_v24  ;;  %v18961_v2 = vrot.slane %v12722_v32, 6  ;;  %v9655_v23 = vld [vmem:[%s11907_s28 + $0x88] sm:$0x3]  ;;  %v10085_v39 = vcombine.low %v2034_v14, %v2037_v36 }
  0xcd   : > { %18958 = vst [vmem:[#allocation30_spill] sm:$0xff] %v12815_v57  ;;  %v1173_v58 = vrot.slane %v11756_v31, 6  ;;  %v1154_v49 = vrot.slane %v1152_v5, 4  ;;  %v1183_v32 = vrot.slane %v9658_v46, 6  ;;  %v9662_v51 = vld [vmem:[%s11907_s28 + $0xb0] sm:$0xc]  ;;  %v2051_v55 = vsel %vm11909_vm2, %v2049_v6, %v2050_v26 }
  0xce   : > { %v12834_v37 = vpop.permute.xlu0 %2347  ;;  %2625 = vrot.lane.b32.xlu1 %v10084_v10, %s11845_s10  ;;  %v12848_v10 = vsel %vm12149_vm5, %v9692_v21, %v18961_v2  ;;  %v2048_v21 = vsel %vm11909_vm2, %v9959_v35, %v2047_v41  ;;  %v1182_v40 = vrot.slane %v1180_v54, 4  ;;  %v9693_v34 = vrot.slane %v9653_v11, 10  ;;  %v11757_v53 = vld [vmem:[%s11907_s28 + $0xb4] sm:$0xf]  ;;  %v9664_v31 = vld [vmem:[%s11907_s28 + $0xb8] sm:$0x3] }
  0xcf   : > { %18960 = vst [vmem:[#allocation31_spill] sm:$0xff] %v12834_v37  ;;  %v1194_v60 = vrot.slane %v11757_v53, 6  ;;  %v10088_v14 = vcombine.low %v2055_v1, %v2058_v8  ;;  %v1175_v36 = vrot.slane %v1173_v58, 4  ;;  %v1176_v46 = vrot.slane %v9655_v23, 6  ;;  %v9962_v41 = vld [vmem:[%s11907_s28 + $0x98] sm:$0xf] }
  0xd0   : > { %2623 = vrot.lane.b32.xlu0 %v10083_v61, %s11845_s10  ;;  %v12857_v24 = vpop.permute.xlu1 %2353  ;;  %v9696_v6 = vrot.slane %v9662_v51, 10  ;;  %v12875_v11 = vld [vmem:[%s11907_s28 + $0xa0] sm:$0xc]  ;;  %v10087_v1 = vcombine.low %v2048_v21, %v2051_v55  ;;  %v12884_v2 = vsel %vm12149_vm5, %v9690_v52, %v1152_v5  ;;  %v12887_v23 = vld [vmem:[%s11907_s28 + $0xa8] sm:$0x3]  ;;  %v12900_v55 = vsel %vm12149_vm5, %v1154_v49, %v1155_v43 }
  0xd1   : > { %18962 = vst [vmem:[#allocation32_spill] sm:$0xff] %v12857_v24  ;;  %v12890_v53 = vld [vmem:[%s11907_s28 + $0xa4] sm:$0xf]  ;;  %v12894_v35 = vld [vmem:[%s11907_s28 + $0xd4] sm:$0xf]  ;;  %v1196_v5 = vrot.slane %v1194_v60, 4  ;;  %v12915_v43 = vsel %vm12149_vm5, %v1182_v40, %v1183_v32  ;;  %v12919_v49 = vsel %vm12149_vm5, %v9693_v34, %v1173_v58 }
  0xd2   : > { %v12865_v61 = vpop.permute.xlu0 %2351  ;;  %2629 = vrot.lane.b32.xlu1 %v10086_v16, %s11845_s10  ;;  %v1187_v51 = vrot.slane %v12890_v53, 6  ;;  %v9961_v21 = vld [vmem:[%s11907_s28 + $0x88] sm:$0xf]  ;;  %v1197_v52 = vrot.slane %v9664_v31, 6  ;;  %v12903_v8 = vld [vmem:[%s11907_s28 + $0xd0] sm:$0xc]  ;;  %v10090_v53 = vcombine.low %v12346_v44, %v9962_v41  ;;  %v12923_v31 = vsel %vm12149_vm5, %v1175_v36, %v1176_v46 }
  0xd3   : > { %18963 = vst [vmem:[#allocation33_spill] sm:$0xff] %v12865_v61  ;;  %v9964_v44 = vld [vmem:[%s11907_s28 + $0xb8] sm:$0xf]  ;;  %v1190_v32 = vrot.slane %v12887_v23, 6  ;;  %v12936_v58 = vld [vmem:[%s11907_s28 + $0xc0] sm:$0xc]  ;;  %v10089_v36 = vcombine.low %v12350_v47, %v9961_v21 }
  0xd4   : > { %2627 = vrot.lane.b32.xlu0 %v10085_v39, %s11845_s10  ;;  %v12878_v16 = vpop.permute.xlu1 %2357  ;;  %v12911_v39 = vsel %vm12149_vm5, %v9694_v59, %v1180_v54  ;;  %v12931_v54 = vsel %vm12149_vm5, %v9696_v6, %v1194_v60  ;;  %v9695_v59 = vrot.slane %v12875_v11, 10  ;;  %v12939_v40 = vld [vmem:[%s11907_s28 + $0xc8] sm:$0x3]  ;;  %v1189_v46 = vrot.slane %v1187_v51, 4  ;;  %v12951_v11 = vld [vmem:[%s11907_s28 + $0xc4] sm:$0xf] }
  0xd5   : > { %18964 = vst [vmem:[#allocation34_spill] sm:$0xff] %v12878_v16  ;;  %v18967_v41 = vrot.slane %v12894_v35, 6  ;;  %v12961_v21 = vld [vmem:[%s11907_s28 + $0xf0] sm:$0xc]  ;;  %v12964_v60 = vld [vmem:[%s11907_s28 + $0xf8] sm:$0x3] }
  0xd6   : > { %v12905_v26 = vpop.permute.xlu0 %2355  ;;  %2633 = vrot.lane.b32.xlu1 %v10088_v14, %s11845_s10  ;;  %v12926_v14 = vld [vmem:[%s11907_s28 + $0xd8] sm:$0x3]  ;;  %v9697_v33 = vrot.slane %v12936_v58, 10  ;;  %v9671_v16 = vld [vmem:[%s11907_s28 + $0xe0] sm:$0xc]  ;;  %v18970_v61 = vrot.slane %v12951_v11, 6 }
  0xd7   : > { %18965 = vst [vmem:[#allocation35_spill] sm:$0xff] %v12905_v26  ;;  %v12948_v6 = vrot.slane %v18967_v41, 4  ;;  %v1211_v47 = vrot.slane %v12926_v14, 6  ;;  %v12967_v41 = vld [vmem:[%s11907_s28 + $0xf4] sm:$0xf]  ;;  %v1225_v0 = vrot.slane %v12964_v60, 6 }
  0xd8   : > { %2631 = vrot.lane.b32.xlu0 %v10087_v1, %s11845_s10  ;;  %v12942_v34 = vpop.permute.xlu1 %2361  ;;  %v12957_v1 = vsel %vm12149_vm5, %v1196_v5, %v1197_v52  ;;  %v10092_v5 = vcombine.low %v12365_v56, %v9964_v44  ;;  %v1204_v56 = vrot.slane %v12939_v40, 6  ;;  %v9673_v44 = vld [vmem:[%s11907_s28 + $0xe8] sm:$0x3]  ;;  %v11763_v52 = vld [vmem:[%s11907_s28 + $0x114] sm:$0xf]  ;;  %v12996_v40 = vsel %vm12149_vm5, %v9695_v59, %v1187_v51 }
  0xd9   : > { %18966 = vst [vmem:[#allocation36_spill] sm:$0xff] %v12942_v34  ;;  %v1215_v34 = vrot.slane %v11762_v22, 6  ;;  %v1236_v26 = vrot.slane %v11763_v52, 6  ;;  %v11764_v22 = vld [vmem:[%s11907_s28 + $0xa4] sm:$0xf]  ;;  %v1203_v52 = vrot.slane %v18970_v61, 4 }
  0xda   : > { %v12970_v23 = vpop.permute.xlu0 %2359  ;;  %2701 = vrot.lane.b32.xlu1 %v10090_v53, %s11846_s15  ;;  %v10091_v14 = vcombine.low %v11764_v22, %v9963_v25  ;;  %v9682_v24 = vld [vmem:[%s11907_s28 + $0x118] sm:$0x3]  ;;  %v11765_v37 = vld [vmem:[%s11907_s28 + $0x104] sm:$0xf]  ;;  %v9965_v57 = vld [vmem:[%s11907_s28 + $0xc8] sm:$0xf]  ;;  %v13005_v25 = vsel %vm12149_vm5, %v1189_v46, %v1190_v32 }
  0xdb   : > { %18968 = vst [vmem:[#allocation37_spill] sm:$0xff] %v12970_v23  ;;  %v9680_v23 = vld [vmem:[%s11907_s28 + $0x110] sm:$0xc]  ;;  %v9700_v22 = vrot.slane %v12961_v21, 10  ;;  %v18971_v53 = vrot.slane %v12967_v41, 6  ;;  %v9699_v19 = vrot.slane %v9671_v16, 10 }
  0xdc   : > { %2699 = vrot.lane.b32.xlu0 %v10089_v36, %s11846_s15  ;;  %v12989_v58 = vpop.permute.xlu1 %2365  ;;  %v1229_v36 = vrot.slane %v11765_v37, 6  ;;  %v9677_v51 = vld [vmem:[%s11907_s28 + $0x100] sm:$0xc]  ;;  %v9679_v59 = vld [vmem:[%s11907_s28 + $0x108] sm:$0x3]  ;;  %v1217_v32 = vrot.slane %v1215_v34, 4 }
  0xdd   : > { %18969 = vst [vmem:[#allocation38_spill] sm:$0xff] %v12989_v58  ;;  %v1224_v58 = vrot.slane %v18971_v53, 4  ;;  %v11766_v61 = vld [vmem:[%s11907_s28 + $0xd4] sm:$0xf]  ;;  %v1218_v46 = vrot.slane %v9673_v44, 6  ;;  %v9702_v3 = vrot.slane %v9680_v23, 10 }
  0xde   : > { %v13012_v7 = vpop.permute.xlu0 %2363  ;;  %2705 = vrot.lane.b32.xlu1 %v10092_v5, %s11846_s15  ;;  %v10094_v37 = vcombine.low %v11766_v61, %v9966_v42  ;;  %v9968_v21 = vld [vmem:[%s11907_s28 + $0xf8] sm:$0xf]  ;;  %v1238_v18 = vrot.slane %v1236_v26, 4  ;;  %v1239_v20 = vrot.slane %v9682_v24, 6  ;;  %v9683_v53 = vld [vmem:[%s11907_s28 + $0x120] sm:$0xc] }
  0xdf   : > { %18972 = vst [vmem:[#allocation39_spill] sm:$0xff] %v13012_v7  ;;  %v11767_v7 = vld [vmem:[%s11907_s28 + $0xc4] sm:$0xf]  ;;  %v18974_v42 = vrot.slane %v12894_v35, 6  ;;  %v18975_v60 = vrot.slane %v12903_v8, 10  ;;  %v9701_v23 = vrot.slane %v9677_v51, 10  ;;  %v13045_v35 = vsel %vm12149_vm5, %v1203_v52, %v1204_v56 }
  0xe0   : > { %2703 = vrot.lane.b32.xlu0 %v10091_v14, %s11846_s15  ;;  %v13020_v38 = vpop.permute.xlu1 %2369  ;;  %v10093_v5 = vcombine.low %v11767_v7, %v9965_v57  ;;  %v1231_v44 = vrot.slane %v1229_v36, 4  ;;  %v1232_v24 = vrot.slane %v9679_v59, 6  ;;  %v9967_v61 = vld [vmem:[%s11907_s28 + $0xe8] sm:$0xf]  ;;  %v13035_v14 = vsel %vm12149_vm5, %v12948_v6, %v1211_v47  ;;  %v11768_v51 = vld [vmem:[%s11907_s28 + $0xf4] sm:$0xf] }
  0xe1   : > { %18973 = vst [vmem:[#allocation40_spill] sm:$0xff] %v13020_v38  ;;  %v13029_v16 = vsel %vm12149_vm5, %v18975_v60, %v18974_v42  ;;  %v18976_v7 = vrot.slane %v12951_v11, 6  ;;  %v10096_v59 = vcombine.low %v11768_v51, %v9968_v21  ;;  %v18978_v6 = vrot.slane %v12967_v41, 6  ;;  %v9970_v52 = vld [vmem:[%s11907_s28 + $0x118] sm:$0xf] }
  0xe2   : > { %v13047_v8 = vpop.permute.xlu0 %2367  ;;  %2709 = vrot.lane.b32.xlu1 %v10094_v37, %s11846_s15  ;;  %v13063_v47 = vsel %vm12149_vm5, %v9699_v19, %v1215_v34  ;;  %v13067_v56 = vsel %vm12149_vm5, %v1217_v32, %v1218_v46  ;;  %v13072_v41 = vsel %vm12149_vm5, %v9702_v3, %v1236_v26  ;;  %v11769_v34 = vld [vmem:[%s11907_s28 + $0xe4] sm:$0xf]  ;;  %v9983_v32 = vcombine.low %v12996_v40, %v13005_v25  ;;  %v9969_v26 = vld [vmem:[%s11907_s28 + $0x108] sm:$0xf]  ;;  %v13111_v42 = vld [vmem:[%s11907_s28 + $0x34] sm:$0xf] }
  0xe3   : > { %v13041_v57 = vsel %vm12149_vm5, %v9697_v33, %v18976_v7  ;;  %18977 = vst [vmem:[#allocation41_spill] sm:$0xff] %v13047_v8  ;;  %v13055_v11 = vsel %vm12149_vm5, %v9700_v22, %v18978_v6  ;;  %v13059_v33 = vsel %vm12149_vm5, %v1224_v58, %v1225_v0  ;;  %18981 = vst [vmem:[#allocation44_spill] sm:$0xff] %v13063_v47  ;;  %v9703_v0 = vrot.slane %v9683_v53, 10  ;;  %v13083_v37 = vld [vmem:[%s11907_s28 + $0x24] sm:$0xf] }
  0xe4   : > { %18979 = vst [vmem:[#allocation42_spill] sm:$0xff] %v13055_v11  ;;  %18980 = vst [vmem:[#allocation43_spill] sm:$0xff] %v13059_v33  ;;  %v13076_v22 = vsel %vm12149_vm5, %v1238_v18, %v1239_v20  ;;  %2707 = vrot.lane.b32.xlu0 %v10093_v5, %s11846_s15  ;;  %v13079_v19 = vpop.permute.xlu1 %2373  ;;  %v10095_v58 = vcombine.low %v11769_v34, %v9967_v61  ;;  %v13091_v20 = vsel %vm12149_vm5, %v9701_v23, %v1229_v36  ;;  %v13103_v40 = vld [vmem:[%s11907_s28 + $0x124] sm:$0xf]  ;;  %v11771_v36 = vld [vmem:[%s11907_s28 + $0x114] sm:$0xf] }
  0xe5   : > { %18982 = vst [vmem:[#allocation45_spill] sm:$0xff] %v13067_v56  ;;  %18983 = vst [vmem:[#allocation46_spill] sm:$0xff] %v13072_v41  ;;  %v13095_v18 = vsel %vm12149_vm5, %v1231_v44, %v1232_v24  ;;  %v18830_v25 = vrot.slane %v13103_v40, 6  ;;  %v10098_v5 = vcombine.low %v11771_v36, %v9970_v52  ;;  %v9972_v44 = vld [vmem:[%s11907_s28 + $0x138] sm:$0xf]  ;;  %v3885_v24 = vrot.slane %v13083_v37, 7 }
  0xe6   : > { %18984 = vst [vmem:[#allocation47_spill] sm:$0xff] %v13076_v22  ;;  %18985 = vst [vmem:[#allocation48_spill] sm:$0xff] %v13079_v19  ;;  %v13106_v53 = vpop.permute.xlu0 %2371  ;;  %2713 = vrot.lane.b32.xlu1 %v10096_v59, %s11846_s15  ;;  %v18990_v61 = vcombine.low %v12758_v17, %v12740_v50  ;;  %v11772_v52 = vld [vmem:[%s11907_s28 + $0x104] sm:$0xf]  ;;  %v9971_v37 = vld [vmem:[%s11907_s28 + $0x128] sm:$0xf]  ;;  %v18993_v17 = vcombine.low %v12779_v4, %v12829_v15  ;;  %v18996_v15 = vcombine.low %v12911_v39, %v12915_v43 }
  0xe7   : > { %18986 = vst [vmem:[#allocation49_spill] sm:$0xff] %v13091_v20  ;;  %18987 = vst [vmem:[#allocation50_spill] sm:$0xff] %v13095_v18  ;;  %v13130_v59 = vsel %vm12149_vm5, %v9703_v0, %v18830_v25  ;;  %v10097_v34 = vcombine.low %v11772_v52, %v9969_v26  ;;  %v10219_v50 = vld [vmem:[%s11907_s28 + $0x20] sm:$0x8]  ;;  %v18994_v0 = vcombine.low %v12848_v10, %v12852_v12  ;;  %v13155_v52 = vld [vmem:[%s11907_s28 + $0x158] sm:$0xf] }
  0xe8   : > { %18988 = vst [vmem:[#allocation51_spill] sm:$0xff] %v13103_v40  ;;  %18989 = vst [vmem:[#allocation52_spill] sm:$0xff] %v13106_v53  ;;  %v2739_v7 = vsel %vm557_vm6, %v18990_v61, %v12368_v27  ;;  %2711 = vrot.lane.b32.xlu0 %v10095_v58, %s11846_s15  ;;  %v13133_v6 = vpop.permute.xlu1 %2377  ;;  %v10220_v27 = vld [vmem:[%s11907_s28 + $0x28] sm:$0x7]  ;;  %v2733_v36 = vsel %vm557_vm6, %v18993_v17, %v12376_v62  ;;  %v18995_v26 = vcombine.low %v12884_v2, %v12900_v55  ;;  %v13158_v23 = vld [vmem:[%s11907_s28 + $0x44] sm:$0xf] }
  0xe9   : > { %18991 = vst [vmem:[#allocation53_spill] sm:$0xff] %v13130_v59  ;;  %18992 = vst [vmem:[#allocation54_spill] sm:$0xff] %v13133_v6  ;;  %v2742_v58 = vsel %vm557_vm6, %v18994_v0, %v12389_v63  ;;  %v10221_v4 = vld [vmem:[%s11907_s28 + $0x30] sm:$0x8]  ;;  %v3892_v62 = vrot.slane %v13111_v42, 7  ;;  %v13167_v63 = vsel %vm557_vm6, %v18996_v15, %v12419_v29  ;;  %v18997_v10 = vcombine.low %v12919_v49, %v12923_v31  ;;  %v19015_v20 = vld [vmem:[#allocation33_spill] sm:$0xff] }
  0xea   : > { %v2736_v61 = vsel %vm557_vm6, %v18995_v26, %v12407_v45  ;;  %v18998_v12 = vcombine.low %v12931_v54, %v12957_v1  ;;  %v13181_v55 = vpop.permute.xlu0 %2375  ;;  %2717 = vrot.lane.b32.xlu1 %v10098_v5, %s11846_s15  ;;  %v10100_v29 = vcombine.low %v12475_v13, %v9972_v44  ;;  %v13186_v39 = vld [vmem:[%s11907_s28 + $0x148] sm:$0xf]  ;;  %v10222_v43 = vld [vmem:[%s11907_s28 + $0x38] sm:$0x7]  ;;  %v19001_v49 = vld [vmem:[#allocation4_spill] sm:$0xff]  ;;  %v10251_v54 = vrot.slane %v10219_v50, 11 }
  0xeb   : > { %v2745_v45 = vsel %vm557_vm6, %v18997_v10, %v12427_v48  ;;  %19000 = vst [vmem:[#allocation56_spill] sm:$0xff] %v13181_v55  ;;  %v13190_v48 = vld [vmem:[%s11907_s28 + $0x54] sm:$0xf]  ;;  %v13194_v31 = vsel %vm557_vm6, %v9983_v32, %v19001_v49  ;;  %v3887_v1 = vrot.slane %v3885_v24, 4  ;;  %v3888_v42 = vrot.slane %v10220_v27, 7  ;;  %v19002_v26 = vld [vmem:[#allocation15_spill] sm:$0xff] }
  0xec   : > { %v13179_v2 = vsel %vm557_vm6, %v18998_v12, %v12450_v28  ;;  %v13197_v28 = vld [vmem:[%s11907_s28 + $0x178] sm:$0xf]  ;;  %v13201_v5 = vsel %vm2779_vm7, %v2736_v61, %v12588_v9  ;;  %2715 = vrot.lane.b32.xlu0 %v10097_v34, %s11846_s15  ;;  %v13204_v13 = vpop.permute.xlu1 %2445  ;;  %v11773_v44 = vld [vmem:[%s11907_s28 + $0x124] sm:$0xf]  ;;  %v10223_v32 = vld [vmem:[%s11907_s28 + $0x40] sm:$0x8]  ;;  %v13214_v9 = vsel %vm2779_vm7, %v2733_v36, %v19002_v26  ;;  %v13244_v21 = vsel %vm11909_vm2, %v10251_v54, %v3885_v24 }
  0xed   : > { %18999 = vst [vmem:[#allocation55_spill] sm:$0xff] %v13179_v2  ;;  %v10099_v17 = vcombine.low %v11773_v44, %v9971_v37  ;;  %v3899_v0 = vrot.slane %v13158_v23, 7  ;;  %v10252_v50 = vrot.slane %v10221_v4, 11  ;;  %v13210_v27 = vld [vmem:[%s11907_s28 + $0x64] sm:$0xf]  ;;  %v3894_v34 = vrot.slane %v3892_v62, 4 }
  0xee   : > { %v10224_v61 = vld [vmem:[%s11907_s28 + $0x48] sm:$0x7]  ;;  %v3895_v15 = vrot.slane %v10222_v43, 7  ;;  %v3906_v10 = vrot.slane %v13190_v48, 7  ;;  %v19003_v37 = vld [vmem:[#allocation16_spill] sm:$0xff]  ;;  %v19004_v23 = vld [vmem:[#allocation17_spill] sm:$0xff]  ;;  %v13226_v49 = vpop.permute.xlu0 %2443  ;;  %2721 = vrot.lane.b32.xlu1 %v10100_v29, %s11846_s15  ;;  %v13256_v25 = vsel %vm11909_vm2, %v3887_v1, %v3888_v42 }
  0xef   : > { %v13220_v12 = vsel %vm2779_vm7, %v2742_v58, %v19003_v37  ;;  %v13224_v4 = vsel %vm2779_vm7, %v2739_v7, %v19004_v23  ;;  %v11774_v36 = vld [vmem:[%s11907_s28 + $0x154] sm:$0xf]  ;;  %v13234_v48 = vld [vmem:[%s11907_s28 + $0x168] sm:$0xf]  ;;  %v10225_v58 = vld [vmem:[%s11907_s28 + $0x50] sm:$0x8]  ;;  %v13260_v54 = vsel %vm11909_vm2, %v10252_v50, %v3892_v62  ;;  %v10651_v1 = vcombine.low %v13244_v21, %v13256_v25 }
  0xf0   : > { %v10102_v44 = vcombine.low %v11774_v36, %v13155_v52  ;;  %v19005_v43 = vld [vmem:[#allocation8_spill] sm:$0xff]  ;;  %v13238_v37 = vld [vmem:[%s11907_s28 + $0x84] sm:$0xf]  ;;  %v10253_v29 = vrot.slane %v10223_v32, 11  ;;  %v3913_v52 = vrot.slane %v13210_v27, 7  ;;  %2719 = vrot.lane.b32.xlu0 %v10099_v17, %s11846_s15  ;;  %v3902_v24 = vrot.slane %v10224_v61, 7 }
  0xf1   : > { %v10101_v26 = vcombine.low %v19005_v43, %v13186_v39  ;;  %v19006_v7 = vld [vmem:[#allocation10_spill] sm:$0xff]  ;;  %v10226_v36 = vld [vmem:[%s11907_s28 + $0x58] sm:$0x7]  ;;  %v13249_v39 = vld [vmem:[%s11907_s28 + $0x74] sm:$0xf]  ;;  %v13252_v43 = vpop.permute.xlu1 %2449  ;;  %v3896_v17 = vsel %vm11909_vm2, %v3894_v34, %v3895_v15  ;;  %v3908_v60 = vrot.slane %v3906_v10, 4 }
  0xf2   : > { %v10104_v23 = vcombine.low %v19006_v7, %v13197_v28  ;;  %v3901_v28 = vrot.slane %v3899_v0, 4  ;;  %v10227_v32 = vld [vmem:[%s11907_s28 + $0x60] sm:$0x8]  ;;  %v10228_v27 = vld [vmem:[%s11907_s28 + $0x68] sm:$0x7]  ;;  %v10254_v7 = vrot.slane %v10225_v58, 11  ;;  %v13274_v62 = vpop.permute.xlu0 %2447  ;;  %2725 = vrot.lane.b32.xlu1 %v10102_v44, %s11846_s15  ;;  %v10652_v21 = vcombine.low %v13260_v54, %v3896_v17 }
  0xf3   : > { %v13267_v46 = vld [vmem:[%s11907_s28 + $0x80] sm:$0x8]  ;;  %v19008_v42 = vld [vmem:[#allocation19_spill] sm:$0xff]  ;;  %v11775_v50 = vld [vmem:[%s11907_s28 + $0x164] sm:$0xf]  ;;  %v3909_v34 = vrot.slane %v10226_v36, 7 }
  0xf4   : > { %v13272_v61 = vsel %vm2779_vm7, %v2745_v45, %v19008_v42  ;;  %v10103_v3 = vcombine.low %v11775_v50, %v13234_v48  ;;  %v10229_v15 = vld [vmem:[%s11907_s28 + $0x70] sm:$0x8]  ;;  %v3920_v58 = vrot.slane %v13249_v39, 7  ;;  %v13282_v6 = vld [vmem:[%s11907_s28 + $0xa4] sm:$0xf]  ;;  %v13288_v45 = vsel %vm11909_vm2, %v10253_v29, %v3899_v0  ;;  %2723 = vrot.lane.b32.xlu0 %v10101_v26, %s11846_s15 }
  0xf5   : > { %v10255_v42 = vrot.slane %v10227_v32, 11  ;;  %v3915_v44 = vrot.slane %v3913_v52, 4  ;;  %v10230_v55 = vld [vmem:[%s11907_s28 + $0x78] sm:$0x7]  ;;  %v13292_v19 = vld [vmem:[%s11907_s28 + $0x94] sm:$0xf]  ;;  %v13295_v48 = vpop.permute.xlu1 %2453  ;;  %v13299_v36 = vsel %vm11909_vm2, %v3901_v28, %v3902_v24  ;;  %v3907_v26 = vsel %vm11909_vm2, %v10254_v7, %v3906_v10 }
  0xf6   : > { %v3916_v25 = vrot.slane %v10228_v27, 7  ;;  %v10232_v39 = vld [vmem:[%s11907_s28 + $0x88] sm:$0x7]  ;;  %v10257_v0 = vrot.slane %v13267_v46, 11  ;;  %v13305_v29 = vld [vmem:[%s11907_s28 + $0xc4] sm:$0xf]  ;;  %v13312_v24 = vpop.permute.xlu0 %2451  ;;  %2729 = vrot.lane.b32.xlu1 %v10104_v23, %s11846_s15  ;;  %v3910_v46 = vsel %vm11909_vm2, %v3908_v60, %v3909_v34 }
  0xf7   : > { %v19009_v32 = vrot.slane %v13238_v37, 7  ;;  %v10256_v22 = vrot.slane %v10229_v15, 11  ;;  %v3941_v28 = vrot.slane %v13282_v6, 7  ;;  %v3922_v54 = vrot.slane %v3920_v58, 4  ;;  %v10235_v17 = vld [vmem:[%s11907_s28 + $0xa0] sm:$0x8] }
  0xf8   : > { %v3923_v27 = vrot.slane %v10230_v55, 7  ;;  %v3934_v10 = vrot.slane %v13292_v19, 7  ;;  %v19010_v7 = vld [vmem:[#allocation30_spill] sm:$0xff]  ;;  %v19011_v6 = vld [vmem:[#allocation31_spill] sm:$0xff]  ;;  %v10233_v34 = vld [vmem:[%s11907_s28 + $0x90] sm:$0x8]  ;;  %2727 = vrot.lane.b32.xlu0 %v10103_v3, %s11846_s15  ;;  %v10654_v3 = vcombine.low %v3907_v26, %v3910_v46 }
  0xf9   : > { %v3929_v50 = vrot.slane %v19009_v32, 4  ;;  %v13322_v15 = vsel %vm2812_vm8, %v13201_v5, %v19010_v7  ;;  %v13327_v23 = vsel %vm2812_vm8, %v13214_v9, %v19011_v6  ;;  %v3930_v32 = vrot.slane %v10232_v39, 7  ;;  %v10236_v60 = vld [vmem:[%s11907_s28 + $0xa8] sm:$0x7]  ;;  %v19012_v41 = vld [vmem:[#allocation32_spill] sm:$0xff]  ;;  %v13338_v5 = vpop.permute.xlu1 %2457 }
  0xfa   : > { %v13335_v19 = vsel %vm2812_vm8, %v13220_v12, %v19012_v41  ;;  %19013 = vst [vmem:[#allocation4_spill] sm:$0xff] %v13338_v5  ;;  %v10653_v9 = vcombine.low %v13288_v45, %v13299_v36  ;;  %v13344_v39 = vsel %vm11909_vm2, %v10255_v42, %v3913_v52  ;;  %v13348_v7 = vsel %vm11909_vm2, %v3915_v44, %v3916_v25  ;;  %v10234_v6 = vld [vmem:[%s11907_s28 + $0x98] sm:$0x7]  ;;  %v13352_v55 = vld [vmem:[%s11907_s28 + $0xc0] sm:$0x8]  ;;  %v13365_v42 = vpop.permute.xlu0 %2455 }
  0xfb   : > { %v13355_v41 = vld [vmem:[%s11907_s28 + $0xb4] sm:$0xf]  ;;  %v3921_v12 = vsel %vm11909_vm2, %v10256_v22, %v3920_v58  ;;  %v10259_v45 = vrot.slane %v10235_v17, 11  ;;  %v3943_v36 = vrot.slane %v3941_v28, 4  ;;  %v13360_v59 = vld [vmem:[%s11907_s28 + $0xe4] sm:$0xf]  ;;  %5313 = vrot.lane.b32.xlu1 %v10652_v21, %s11840_s29  ;;  %v3924_v44 = vsel %vm11909_vm2, %v3922_v54, %v3923_v27 }
  0xfc   : > { %v13363_v52 = vld [vmem:[%s11907_s28 + $0xd4] sm:$0xf]  ;;  %v3944_v25 = vrot.slane %v10236_v60, 7  ;;  %v10258_v26 = vrot.slane %v10233_v34, 11  ;;  %v3936_v46 = vrot.slane %v3934_v10, 4  ;;  %v3937_v22 = vrot.slane %v10234_v6, 7  ;;  %5311 = vrot.lane.b32.xlu0 %v10651_v1, %s11840_s29 }
  0xfd   : > { %v13371_v53 = vld [vmem:[%s11907_s28 + $0xc8] sm:$0x7]  ;;  %v19014_v17 = vrot.slane %v13305_v29, 7  ;;  %v10237_v18 = vld [vmem:[%s11907_s28 + $0xb0] sm:$0x8]  ;;  %v3948_v21 = vrot.slane %v13355_v41, 7  ;;  %v13383_v54 = vsel %vm2812_vm8, %v13224_v4, %v19015_v20  ;;  %v13385_v27 = vpop.permute.xlu1 %2461  ;;  %v10655_v60 = vcombine.low %v13344_v39, %v13348_v7 }
  0xfe   : > { %19016 = vst [vmem:[#allocation15_spill] sm:$0xff] %v13385_v27  ;;  %v10238_v34 = vld [vmem:[%s11907_s28 + $0xb8] sm:$0x7]  ;;  %v13392_v6 = vld [vmem:[%s11907_s28 + $0xe0] sm:$0x8]  ;;  %v3962_v41 = vrot.slane %v13363_v52, 7  ;;  %v13404_v4 = vsel %vm11909_vm2, %v3929_v50, %v3930_v32  ;;  %v10656_v1 = vcombine.low %v3921_v12, %v3924_v44  ;;  %v13408_v39 = vsel %vm11909_vm2, %v10259_v45, %v3941_v28  ;;  %v13415_v52 = vpop.permute.xlu0 %2459 }
  0xff   : > { %v13376_v38 = vrot.slane %v19014_v17, 4  ;;  %v19017_v58 = vrot.slane %v13238_v37, 7  ;;  %v10241_v7 = vld [vmem:[%s11907_s28 + $0xd0] sm:$0x8]  ;;  %v10242_v17 = vld [vmem:[%s11907_s28 + $0xd8] sm:$0x7]  ;;  %5317 = vrot.lane.b32.xlu1 %v10654_v3, %s11840_s29  ;;  %v13420_v37 = vsel %vm11909_vm2, %v3943_v36, %v3944_v25  ;;  %v3938_v45 = vsel %vm11909_vm2, %v3936_v46, %v3937_v22 }
 0x100   : > { %v13413_v33 = vld [vmem:[%s11907_s28 + $0x104] sm:$0xf]  ;;  %19018 = vst [vmem:[#allocation16_spill] sm:$0xff] %v13415_v52  ;;  %v3958_v50 = vrot.slane %v13371_v53, 7  ;;  %v10260_v28 = vrot.slane %v10237_v18, 11  ;;  %v3950_v3 = vrot.slane %v3948_v21, 4  ;;  %5315 = vrot.lane.b32.xlu0 %v10653_v9, %s11840_s29 }
 0x101   : > { %v13400_v20 = vsel %vm11909_vm2, %v10257_v0, %v19017_v58  ;;  %v3935_v0 = vsel %vm11909_vm2, %v10258_v26, %v3934_v10  ;;  %v13426_v32 = vld [vmem:[%s11907_s28 + $0xe8] sm:$0x7]  ;;  %v13429_v12 = vld [vmem:[%s11907_s28 + $0xf4] sm:$0xf]  ;;  %v3951_v44 = vrot.slane %v10238_v34, 7  ;;  %v10263_v36 = vrot.slane %v13392_v6, 11  ;;  %v13437_v58 = vpop.permute.xlu1 %2465 }
 0x102   : > { %v13435_v25 = vld [vmem:[%s11907_s28 + $0x28] sm:$0xf]  ;;  %19019 = vst [vmem:[#allocation17_spill] sm:$0xff] %v13437_v58  ;;  %v10262_v18 = vrot.slane %v10241_v7, 11  ;;  %v3964_v53 = vrot.slane %v3962_v41, 4  ;;  %v3965_v10 = vrot.slane %v10242_v17, 7  ;;  %v10657_v46 = vcombine.low %v13400_v20, %v13404_v4  ;;  %v13451_v30 = vpop.permute.xlu0 %2463 }
 0x103   : > { %v10247_v26 = vld [vmem:[%s11907_s28 + $0x100] sm:$0x8]  ;;  %v3983_v11 = vrot.slane %v13413_v33, 7  ;;  %v19020_v34 = vrot.slane %v13360_v59, 7  ;;  %v10248_v58 = vld [vmem:[%s11907_s28 + $0x108] sm:$0x7]  ;;  %5321 = vrot.lane.b32.xlu1 %v10656_v1, %s11840_s29  ;;  %v10658_v17 = vcombine.low %v3935_v0, %v3938_v45  ;;  %v3949_v33 = vsel %vm11909_vm2, %v10260_v28, %v3948_v21 }
 0x104   : > { %v10245_v9 = vld [vmem:[%s11907_s28 + $0xf0] sm:$0x8]  ;;  %v3976_v7 = vrot.slane %v13429_v12, 7  ;;  %19021 = vst [vmem:[#allocation8_spill] sm:$0xff] %v13451_v30  ;;  %v3972_v20 = vrot.slane %v13426_v32, 7  ;;  %v3952_v12 = vsel %vm11909_vm2, %v3950_v3, %v3951_v44  ;;  %v10265_v27 = vrot.slane %v10247_v26, 11  ;;  %5319 = vrot.lane.b32.xlu0 %v10655_v60, %s11840_s29 }
 0x105   : > { %v3971_v6 = vrot.slane %v19020_v34, 4  ;;  %v10246_v4 = vld [vmem:[%s11907_s28 + $0xf8] sm:$0x7]  ;;  %v10267_v22 = vld [vmem:[%s11907_s28 + $0x24] sm:$0xe]  ;;  %v4093_v34 = vrot.slane %v13435_v25, 5  ;;  %v13463_v0 = vpop.permute.xlu1 %2469  ;;  %v13468_v21 = vsel %vm11909_vm2, %v10262_v18, %v3962_v41  ;;  %v13472_v28 = vsel %vm11909_vm2, %v3964_v53, %v3965_v10 }
 0x106   : > { %v10269_v1 = vld [vmem:[%s11907_s28 + $0x2c] sm:$0x1]  ;;  %19022 = vst [vmem:[#allocation10_spill] sm:$0xff] %v13463_v0  ;;  %v3985_v32 = vrot.slane %v3983_v11, 4  ;;  %v3986_v45 = vrot.slane %v10248_v58, 7  ;;  %v10264_v25 = vrot.slane %v10245_v9, 11  ;;  %v13483_v41 = vpop.permute.xlu0 %2467  ;;  %v10660_v10 = vcombine.low %v3949_v33, %v3952_v12 }
 0x107   : > { %v13475_v3 = vld [vmem:[%s11907_s28 + $0x114] sm:$0xf]  ;;  %v13478_v44 = vld [vmem:[%s11907_s28 + $0x48] sm:$0xf]  ;;  %v3978_v26 = vrot.slane %v3976_v7, 4  ;;  %v3979_v60 = vrot.slane %v10246_v4, 7  ;;  %5325 = vrot.lane.b32.xlu1 %v10658_v17, %s11840_s29 }
 0x108   : > { %v10315_v0 = vrot.slane %v10267_v22, 9  ;;  %v13481_v30 = vld [vmem:[%s11907_s28 + $0x38] sm:$0xf]  ;;  %19023 = vst [vmem:[#allocation2_spill] sm:$0xff] %v13483_v41  ;;  %v19024_v18 = vrot.slane %v13305_v29, 7  ;;  %v19025_v58 = vrot.slane %v13352_v55, 11  ;;  %v3959_v29 = vsel %vm11909_vm2, %v13376_v38, %v3958_v50  ;;  %5323 = vrot.lane.b32.xlu0 %v10657_v46, %s11840_s29 }
 0x109   : > { %v4095_v9 = vrot.slane %v4093_v34, 4  ;;  %v4096_v4 = vrot.slane %v10269_v1, 5  ;;  %v10249_v17 = vld [vmem:[%s11907_s28 + $0x110] sm:$0x8]  ;;  %v19028_v55 = vrot.slane %v13360_v59, 7  ;;  %v4107_v41 = vrot.slane %v13478_v44, 5  ;;  %v13514_v8 = vpop.permute.xlu1 %2473 }
 0x10a   : > { %v13492_v53 = vsel %vm11909_vm2, %v19025_v58, %v19024_v18  ;;  %v10250_v12 = vld [vmem:[%s11907_s28 + $0x118] sm:$0x7]  ;;  %v3990_v18 = vrot.slane %v13475_v3, 7  ;;  %v10273_v58 = vld [vmem:[%s11907_s28 + $0x44] sm:$0xe]  ;;  %19029 = vst [vmem:[#allocation19_spill] sm:$0xff] %v13514_v8  ;;  %v13519_v38 = vsel %vm11909_vm2, %v3971_v6, %v3972_v20  ;;  %v10662_v59 = vcombine.low %v13468_v21, %v13472_v28 }
 0x10b   : > { %v13508_v33 = vsel %vm11909_vm2, %v10263_v36, %v19028_v55  ;;  %v13525_v50 = vsel %vm11909_vm2, %v10265_v27, %v3983_v11  ;;  %v10275_v36 = vld [vmem:[%s11907_s28 + $0x4c] sm:$0x1]  ;;  %v10270_v1 = vld [vmem:[%s11907_s28 + $0x34] sm:$0xe]  ;;  %v4100_v3 = vrot.slane %v13481_v30, 5  ;;  %v13532_v44 = vsel %vm11909_vm2, %v3985_v32, %v3986_v45  ;;  %v13543_v27 = vpop.permute.xlu0 %2471  ;;  %5329 = vrot.lane.b32.xlu1 %v10660_v10, %s11840_s29 }
 0x10c   : > { %v3977_v46 = vsel %vm11909_vm2, %v10264_v25, %v3976_v7  ;;  %v3980_v6 = vsel %vm11909_vm2, %v3978_v26, %v3979_v60  ;;  %v13540_v20 = vsel %vm13496_vm12, %v10315_v0, %v4093_v34  ;;  %v10272_v11 = vld [vmem:[%s11907_s28 + $0x3c] sm:$0x1]  ;;  %19030 = vst [vmem:[#allocation30_spill] sm:$0xff] %v13543_v27  ;;  %v13548_v30 = vsel %vm13496_vm12, %v4095_v9, %v4096_v4  ;;  %v13551_v32 = vld [vmem:[%s11907_s28 + $0x68] sm:$0xf] }
 0x10d   : > { %v10266_v21 = vrot.slane %v10249_v17, 11  ;;  %v3993_v7 = vrot.slane %v10250_v12, 7  ;;  %v10317_v28 = vrot.slane %v10273_v58, 9  ;;  %v3992_v45 = vrot.slane %v3990_v18, 4  ;;  %v13554_v26 = vld [vmem:[%s11907_s28 + $0x58] sm:$0xf]  ;;  %v13561_v9 = vpop.permute.xlu1 %2525 }
 0x10e   : > { %v4109_v25 = vrot.slane %v4107_v41, 4  ;;  %v4110_v34 = vrot.slane %v10275_v36, 5  ;;  %v10316_v0 = vrot.slane %v10270_v1, 9  ;;  %v19031_v60 = vld [vmem:[#allocation35_spill] sm:$0xff]  ;;  %v19032_v4 = vcombine.low %v13408_v39, %v13420_v37  ;;  %v10279_v58 = vld [vmem:[%s11907_s28 + $0x64] sm:$0xe] }
 0x10f   : > { %v13559_v10 = vsel %vm2812_vm8, %v13272_v61, %v19031_v60  ;;  %v10661_v17 = vcombine.low %v13492_v53, %v3959_v29  ;;  %v4102_v55 = vrot.slane %v4100_v3, 4  ;;  %v4103_v12 = vrot.slane %v10272_v11, 5  ;;  %v10281_v36 = vld [vmem:[%s11907_s28 + $0x6c] sm:$0x1]  ;;  %v13576_v39 = vld [vmem:[%s11907_s28 + $0x88] sm:$0xf]  ;;  %v13586_v29 = vpop.permute.xlu0 %2523  ;;  %5333 = vrot.lane.b32.xlu1 %v10662_v59, %s11840_s29 }
 0x110   : > { %5327 = vrot.lane.b32.xlu0 %v19032_v4, %s11840_s29  ;;  %v10663_v1 = vcombine.low %v13508_v33, %v13519_v38  ;;  %v10664_v60 = vcombine.low %v3977_v46, %v3980_v6  ;;  %v4121_v8 = vrot.slane %v13551_v32, 5  ;;  %v13579_v37 = vld [vmem:[%s11907_s28 + $0x78] sm:$0xf]  ;;  %v13584_v53 = vsel %vm2845_vm9, %v13322_v15, %v13204_v13  ;;  %v10276_v46 = vld [vmem:[%s11907_s28 + $0x54] sm:$0xe] }
 0x111   : > { %v3991_v38 = vsel %vm11909_vm2, %v10266_v21, %v3990_v18  ;;  %v10278_v6 = vld [vmem:[%s11907_s28 + $0x5c] sm:$0x1]  ;;  %v4114_v11 = vrot.slane %v13554_v26, 5  ;;  %v3994_v13 = vsel %vm11909_vm2, %v3992_v45, %v3993_v7  ;;  %v13600_v15 = vsel %vm13496_vm12, %v10317_v28, %v4107_v41  ;;  %v13607_v4 = vld [vmem:[%s11907_s28 + $0x84] sm:$0xe]  ;;  %v13609_v18 = vpop.permute.xlu1 %2529 }
 0x112   : > { %v13604_v59 = vsel %vm13496_vm12, %v4109_v25, %v4110_v34  ;;  %v10319_v32 = vrot.slane %v10279_v58, 9  ;;  %v13614_v21 = vsel %vm13496_vm12, %v10316_v0, %v4100_v3  ;;  %v13618_v41 = vsel %vm13496_vm12, %v4102_v55, %v4103_v12  ;;  %v13621_v28 = vld [vmem:[%s11907_s28 + $0x8c] sm:$0x1]  ;;  %v10282_v45 = vld [vmem:[%s11907_s28 + $0x74] sm:$0xe] }
 0x113   : > { %v4124_v7 = vrot.slane %v10281_v36, 5  ;;  %v4128_v25 = vrot.slane %v13579_v37, 5  ;;  %v13626_v34 = vld [vmem:[%s11907_s28 + $0xa8] sm:$0xf]  ;;  %v4123_v26 = vrot.slane %v4121_v8, 4  ;;  %v4117_v58 = vrot.slane %v10278_v6, 5  ;;  %v13635_v12 = vpop.permute.xlu0 %2527  ;;  %5337 = vrot.lane.b32.xlu1 %v10664_v60, %s11840_s29 }
 0x114   : > { %5331 = vrot.lane.b32.xlu0 %v10661_v17, %s11840_s29  ;;  %v10318_v17 = vrot.slane %v10276_v46, 9  ;;  %v4135_v3 = vrot.slane %v13576_v39, 5  ;;  %v10284_v0 = vld [vmem:[%s11907_s28 + $0x7c] sm:$0x1]  ;;  %v13633_v55 = vsel %vm2845_vm9, %v13327_v23, %v13226_v49  ;;  %v10666_v36 = vcombine.low %v3991_v38, %v3994_v13  ;;  %v13640_v46 = vld [vmem:[%s11907_s28 + $0xa4] sm:$0xe] }
 0x115   : > { %v4116_v37 = vrot.slane %v4114_v11, 4  ;;  %v10321_v33 = vrot.slane %v13607_v4, 9  ;;  %v13643_v6 = vld [vmem:[%s11907_s28 + $0x98] sm:$0xf]  ;;  %v13648_v39 = vsel %vm2845_vm9, %v13335_v19, %v13252_v43  ;;  %v10320_v23 = vrot.slane %v10282_v45, 9  ;;  %v13657_v4 = vpop.permute.xlu1 %2533 }
 0x116   : > { %v10293_v60 = vld [vmem:[%s11907_s28 + $0xac] sm:$0x1]  ;;  %v4149_v38 = vrot.slane %v13626_v34, 5  ;;  %v13655_v13 = vld [vmem:[%s11907_s28 + $0xc8] sm:$0xf]  ;;  %19033 = vst [vmem:[#allocation31_spill] sm:$0xff] %v13657_v4  ;;  %v10668_v61 = vcombine.low %v13614_v21, %v13618_v41  ;;  %v13664_v43 = vsel %vm13496_vm12, %v10319_v32, %v4121_v8  ;;  %v13672_v34 = vsel %vm13496_vm12, %v4123_v26, %v4124_v7 }
 0x117   : > { %v4130_v19 = vrot.slane %v4128_v25, 4  ;;  %v4131_v45 = vrot.slane %v10284_v0, 5  ;;  %v10288_v49 = vld [vmem:[%s11907_s28 + $0x94] sm:$0xe]  ;;  %v13668_v27 = vld [vmem:[%s11907_s28 + $0xb8] sm:$0xf]  ;;  %v13677_v5 = vpop.permute.xlu0 %2531  ;;  %5341 = vrot.lane.b32.xlu1 %v10666_v36, %s11840_s29  ;;  %v4115_v8 = vsel %vm13496_vm12, %v10318_v17, %v4114_v11  ;;  %v4118_v32 = vsel %vm13496_vm12, %v4116_v37, %v4117_v58 }
 0x118   : > { %5335 = vrot.lane.b32.xlu0 %v10663_v1, %s11840_s29  ;;  %v4137_v52 = vrot.slane %v4135_v3, 4  ;;  %v4138_v1 = vrot.slane %v13621_v28, 5  ;;  %v10290_v21 = vld [vmem:[%s11907_s28 + $0x9c] sm:$0x1]  ;;  %v4142_v41 = vrot.slane %v13643_v6, 5  ;;  %v10323_v7 = vrot.slane %v13640_v46, 9 }
 0x119   : > { %v10297_v26 = vld [vmem:[%s11907_s28 + $0xc4] sm:$0xe]  ;;  %v10299_v28 = vld [vmem:[%s11907_s28 + $0xcc] sm:$0x1]  ;;  %v4163_v0 = vrot.slane %v13655_v13, 5  ;;  %v4151_v6 = vrot.slane %v4149_v38, 4  ;;  %v13695_v11 = vsel %vm2845_vm9, %v13383_v54, %v13274_v62  ;;  %v13697_v17 = vpop.permute.xlu1 %2537  ;;  %v19035_v58 = vcombine.low %v13525_v50, %v13532_v44 }
 0x11a   : > { %v4152_v40 = vrot.slane %v10293_v60, 5  ;;  %v10322_v2 = vrot.slane %v10288_v49, 9  ;;  %v4156_v36 = vrot.slane %v13668_v27, 5  ;;  %v13690_v56 = vld [vmem:[%s11907_s28 + $0xe8] sm:$0xf]  ;;  %19034 = vst [vmem:[#allocation32_spill] sm:$0xff] %v13697_v17  ;;  %v13707_v27 = vsel %vm13496_vm12, %v10320_v23, %v4128_v25 }
 0x11b   : > { %v13711_v62 = vsel %vm13496_vm12, %v4130_v19, %v4131_v45  ;;  %v10294_v54 = vld [vmem:[%s11907_s28 + $0xb4] sm:$0xe]  ;;  %v10296_v46 = vld [vmem:[%s11907_s28 + $0xbc] sm:$0x1]  ;;  %v13716_v49 = vld [vmem:[%s11907_s28 + $0xd8] sm:$0xf]  ;;  %5393 = vrot.lane.b32.xlu1 %v10668_v61, %s11841_s30  ;;  %v10670_v37 = vcombine.low %v4115_v8, %v4118_v32  ;;  %v13723_v25 = vsel %vm13496_vm12, %v10321_v33, %v4135_v3  ;;  %v19038_v3 = vcombine.low %v13540_v20, %v13548_v30 }
 0x11c   : > { %5339 = vrot.lane.b32.xlu0 %v19035_v58, %s11840_s29  ;;  %v4144_v60 = vrot.slane %v4142_v41, 4  ;;  %v4145_v50 = vrot.slane %v10290_v21, 5  ;;  %v10325_v44 = vrot.slane %v10297_v26, 9  ;;  %v4166_v13 = vrot.slane %v10299_v28, 5  ;;  %v13718_v58 = vpop.permute.xlu0 %2535  ;;  %v10303_v19 = vld [vmem:[%s11907_s28 + $0xe4] sm:$0xe] }
 0x11d   : > { %19036 = vst [vmem:[#allocation33_spill] sm:$0xff] %v13718_v58  ;;  %v4165_v23 = vrot.slane %v4163_v0, 4  ;;  %v13727_v45 = vld [vmem:[%s11907_s28 + $0xec] sm:$0x1]  ;;  %v4177_v21 = vrot.slane %v13690_v56, 5  ;;  %v10324_v26 = vrot.slane %v10294_v54, 9  ;;  %v13734_v33 = vpop.permute.xlu1 %2541  ;;  %v13742_v32 = vsel %vm13496_vm12, %v4137_v52, %v4138_v1 }
 0x11e   : > { %v4158_v28 = vrot.slane %v4156_v36, 4  ;;  %v4159_v17 = vrot.slane %v10296_v46, 5  ;;  %v4170_v61 = vrot.slane %v13716_v49, 5  ;;  %v13732_v8 = vld [vmem:[%s11907_s28 + $0x108] sm:$0xf]  ;;  %19037 = vst [vmem:[#allocation35_spill] sm:$0xff] %v13734_v33  ;;  %v10672_v56 = vcombine.low %v13707_v27, %v13711_v62 }
 0x11f   : > { %v13748_v54 = vsel %vm13496_vm12, %v10323_v7, %v4149_v38  ;;  %v13752_v46 = vsel %vm13496_vm12, %v4151_v6, %v4152_v40  ;;  %v10300_v49 = vld [vmem:[%s11907_s28 + $0xd4] sm:$0xe]  ;;  %v10302_v33 = vld [vmem:[%s11907_s28 + $0xdc] sm:$0x1]  ;;  %v13757_v47 = vld [vmem:[%s11907_s28 + $0xf8] sm:$0xf]  ;;  %v4143_v20 = vsel %vm13496_vm12, %v10322_v2, %v4142_v41  ;;  %v4146_v52 = vsel %vm13496_vm12, %v4144_v60, %v4145_v50  ;;  %5397 = vrot.lane.b32.xlu1 %v10670_v37, %s11841_s30 }
 0x120   : > { %5391 = vrot.lane.b32.xlu0 %v19038_v3, %s11841_s30  ;;  %v13765_v30 = vsel %vm13496_vm12, %v10325_v44, %v4163_v0  ;;  %v10327_v38 = vrot.slane %v10303_v19, 9  ;;  %v10309_v1 = vld [vmem:[%s11907_s28 + $0x104] sm:$0xe]  ;;  %v10311_v7 = vld [vmem:[%s11907_s28 + $0x10c] sm:$0x1]  ;;  %v13769_v40 = vpop.permute.xlu0 %2539  ;;  %v13774_v6 = vsel %vm13496_vm12, %v4165_v23, %v4166_v13  ;;  %v4179_v2 = vrot.slane %v4177_v21, 4 }
 0x121   : > { %19039 = vst [vmem:[#allocation57_spill] sm:$0xff] %v13769_v40  ;;  %v4180_v41 = vrot.slane %v13727_v45, 5  ;;  %v4191_v27 = vrot.slane %v13732_v8, 5  ;;  %v10326_v0 = vrot.slane %v10300_v49, 9  ;;  %v4172_v62 = vrot.slane %v4170_v61, 4  ;;  %v13782_v37 = vpop.permute.xlu1 %2545 }
 0x122   : > { %v4173_v60 = vrot.slane %v10302_v33, 5  ;;  %v4184_v50 = vrot.slane %v13757_v47, 5  ;;  %v13780_v44 = vld [vmem:[%s11907_s28 + $0x64] sm:$0xf]  ;;  %19040 = vst [vmem:[#allocation58_spill] sm:$0xff] %v13782_v37  ;;  %v19041_v13 = vcombine.low %v13600_v15, %v13604_v59  ;;  %v13790_v23 = vsel %vm13496_vm12, %v10324_v26, %v4156_v36 }
 0x123   : > { %v13794_v19 = vsel %vm13496_vm12, %v4158_v28, %v4159_v17  ;;  %v10329_v47 = vrot.slane %v10309_v1, 9  ;;  %v4194_v45 = vrot.slane %v10311_v7, 5  ;;  %v10306_v8 = vld [vmem:[%s11907_s28 + $0xf4] sm:$0xe]  ;;  %v10308_v33 = vld [vmem:[%s11907_s28 + $0xfc] sm:$0x1]  ;;  %v13801_v3 = vsel %vm2845_vm9, %v13559_v10, %v13312_v24  ;;  %5401 = vrot.lane.b32.xlu1 %v10672_v56, %s11841_s30 }
 0x124   : > { %5395 = vrot.lane.b32.xlu0 %v19041_v13, %s11841_s30  ;;  %v10673_v15 = vcombine.low %v13723_v25, %v13742_v32  ;;  %v10674_v36 = vcombine.low %v4143_v20, %v4146_v52  ;;  %v10331_v17 = vld [vmem:[%s11907_s28 + $0x60] sm:$0xe]  ;;  %v13809_v26 = vld [vmem:[%s11907_s28 + $0x118] sm:$0xf]  ;;  %v13812_v28 = vld [vmem:[%s11907_s28 + $0x84] sm:$0xf]  ;;  %v13814_v49 = vpop.permute.xlu0 %2543  ;;  %v13821_v10 = vsel %vm13496_vm12, %v10327_v38, %v4177_v21  ;;  %v10676_v1 = vcombine.low %v13790_v23, %v13794_v19 }
 0x125   : > { %19042 = vst [vmem:[#allocation59_spill] sm:$0xff] %v13814_v49  ;;  %v4193_v25 = vrot.slane %v4191_v27, 4  ;;  %v10333_v32 = vld [vmem:[%s11907_s28 + $0x68] sm:$0x1]  ;;  %v4301_v20 = vrot.slane %v13780_v44, 5  ;;  %v10328_v7 = vrot.slane %v10306_v8, 9  ;;  %v13831_v59 = vpop.permute.xlu1 %2549  ;;  %v19044_v21 = vcombine.low %v13664_v43, %v13672_v34 }
 0x126   : > { %v13826_v52 = vld [vmem:[%s11907_s28 + $0x114] sm:$0xe]  ;;  %v4186_v56 = vrot.slane %v4184_v50, 4  ;;  %v4187_v13 = vrot.slane %v10308_v33, 5  ;;  %v10314_v24 = vld [vmem:[%s11907_s28 + $0x11c] sm:$0x1]  ;;  %v13839_v38 = vsel %vm13496_vm12, %v4179_v2, %v4180_v41  ;;  %v13843_v44 = vsel %vm13496_vm12, %v10326_v0, %v4170_v61 }
 0x127   : > { %19043 = vst [vmem:[#allocation60_spill] sm:$0xff] %v13831_v59  ;;  %v4198_v23 = vrot.slane %v13809_v26, 5  ;;  %v10337_v19 = vld [vmem:[%s11907_s28 + $0x80] sm:$0xe]  ;;  %v10339_v8 = vld [vmem:[%s11907_s28 + $0x88] sm:$0x1]  ;;  %v4174_v43 = vsel %vm13496_vm12, %v4172_v62, %v4173_v60  ;;  %5405 = vrot.lane.b32.xlu1 %v10674_v36, %s11841_s30  ;;  %v13860_v0 = vsel %vm13496_vm12, %v10329_v47, %v4191_v27  ;;  %v13864_v26 = vsel %vm13496_vm12, %v4193_v25, %v4194_v45 }
 0x128   : > { %5399 = vrot.lane.b32.xlu0 %v19044_v21, %s11841_s30  ;;  %v4315_v33 = vrot.slane %v13812_v28, 5  ;;  %v10379_v34 = vrot.slane %v10331_v17, 9  ;;  %v4304_v21 = vrot.slane %v10333_v32, 5  ;;  %v10330_v2 = vrot.slane %v13826_v52, 9  ;;  %v13853_v41 = vld [vmem:[%s11907_s28 + $0x70] sm:$0xe]  ;;  %v13855_v61 = vpop.permute.xlu0 %2547 }
 0x129   : > { %19045 = vst [vmem:[#allocation61_spill] sm:$0xff] %v13855_v61  ;;  %v4303_v62 = vrot.slane %v4301_v20, 4  ;;  %v4201_v60 = vrot.slane %v10314_v24, 5  ;;  %v13867_v17 = vld [vmem:[%s11907_s28 + $0x74] sm:$0xf]  ;;  %v13874_v32 = vsel %vm13496_vm12, %v10328_v7, %v4184_v50  ;;  %v13878_v27 = vsel %vm13496_vm12, %v4186_v56, %v4187_v13  ;;  %v13886_v24 = vpop.permute.xlu1 %2553 }
 0x12a   : > { %v13870_v28 = vld [vmem:[%s11907_s28 + $0xa4] sm:$0xf]  ;;  %v10381_v47 = vrot.slane %v10337_v19, 9  ;;  %v4318_v36 = vrot.slane %v10339_v8, 5  ;;  %v13881_v45 = vld [vmem:[%s11907_s28 + $0x78] sm:$0x1]  ;;  %v10678_v50 = vcombine.low %v13843_v44, %v4174_v43  ;;  %v10680_v44 = vcombine.low %v13874_v32, %v13878_v27 }
 0x12b   : > { %v13884_v25 = vld [vmem:[%s11907_s28 + $0x94] sm:$0xf]  ;;  %19046 = vst [vmem:[#allocation62_spill] sm:$0xff] %v13886_v24  ;;  %v4200_v7 = vrot.slane %v4198_v23, 4  ;;  %v4317_v56 = vrot.slane %v4315_v33, 4  ;;  %v10380_v24 = vrot.slane %v13853_v41, 9  ;;  %5409 = vrot.lane.b32.xlu1 %v10676_v1, %s11841_s30  ;;  %v13908_v43 = vsel %vm13496_vm12, %v10379_v34, %v4301_v20 }
 0x12c   : > { %5403 = vrot.lane.b32.xlu0 %v10673_v15, %s11841_s30  ;;  %v10343_v13 = vld [vmem:[%s11907_s28 + $0xa0] sm:$0xe]  ;;  %v13894_v19 = vld [vmem:[%s11907_s28 + $0xc4] sm:$0xf]  ;;  %v4308_v15 = vrot.slane %v13867_v17, 5  ;;  %v4329_v59 = vrot.slane %v13870_v28, 5  ;;  %v13901_v52 = vpop.permute.xlu0 %2551  ;;  %v13917_v28 = vsel %vm2878_vm13, %v13584_v53, %v13561_v9  ;;  %v13921_v1 = vsel %vm13496_vm12, %v4303_v62, %v4304_v21 }
 0x12d   : > { %19047 = vst [vmem:[#allocation63_spill] sm:$0xff] %v13901_v52  ;;  %v4311_v8 = vrot.slane %v13881_v45, 5  ;;  %v10345_v61 = vld [vmem:[%s11907_s28 + $0xa8] sm:$0x1]  ;;  %v10340_v41 = vld [vmem:[%s11907_s28 + $0x90] sm:$0xe]  ;;  %v13926_v45 = vpop.permute.xlu1 %2605  ;;  %v13934_v9 = vsel %vm13496_vm12, %v10330_v2, %v4198_v23  ;;  %v13938_v53 = vsel %vm13496_vm12, %v4200_v7, %v4201_v60  ;;  %v13942_v21 = vsel %vm13496_vm12, %v10381_v47, %v4315_v33 }
 0x12e   : > { %v4322_v17 = vrot.slane %v13884_v25, 5  ;;  %v10383_v32 = vrot.slane %v10343_v13, 9  ;;  %v10342_v20 = vld [vmem:[%s11907_s28 + $0x98] sm:$0x1]  ;;  %v10349_v34 = vld [vmem:[%s11907_s28 + $0xc0] sm:$0xe]  ;;  %v19048_v25 = vcombine.low %v13748_v54, %v13752_v46  ;;  %v13946_v62 = vsel %vm13496_vm12, %v4317_v56, %v4318_v36 }
 0x12f   : > { %v4343_v27 = vrot.slane %v13894_v19, 5  ;;  %v10351_v54 = vld [vmem:[%s11907_s28 + $0xc8] sm:$0x1]  ;;  %v13950_v46 = vld [vmem:[%s11907_s28 + $0xb4] sm:$0xf]  ;;  %v4310_v2 = vrot.slane %v4308_v15, 4  ;;  %v13959_v33 = vsel %vm2878_vm13, %v13633_v55, %v13586_v29  ;;  %5413 = vrot.lane.b32.xlu1 %v10678_v50, %s11841_s30  ;;  %v13973_v55 = vsel %vm2878_vm13, %v13648_v39, %v13609_v18 }
 0x130   : > { %5407 = vrot.lane.b32.xlu0 %v19048_v25, %s11841_s30  ;;  %v508_v23 = vld [vmem:[%s18819_s1] sm:$0x3]  ;;  %v4331_v60 = vrot.slane %v4329_v59, 4  ;;  %v4332_v7 = vrot.slane %v10345_v61, 5  ;;  %v10382_v13 = vrot.slane %v10340_v41, 9  ;;  %v13961_v47 = vpop.permute.xlu0 %2603  ;;  %v4324_v56 = vrot.slane %v4322_v17, 4 }
 0x131   : > { %11618 = vmatprep.subr.msk.bf16.mxu0 %vm606_vm3, %v508_v23  ;;  %v4325_v19 = vrot.slane %v10342_v20, 5  ;;  %v10346_v25 = vld [vmem:[%s11907_s28 + $0xb0] sm:$0xe]  ;;  %v10356_v61 = vld [vmem:[%s11907_s28 + $0xe4] sm:$0xf]  ;;  %v10385_v41 = vrot.slane %v10349_v34, 9  ;;  %v13975_v50 = vpop.permute.xlu1 %2609  ;;  %v19049_v20 = vcombine.low %v13765_v30, %v13774_v6  ;;  %v10682_v34 = vcombine.low %v13934_v9, %v13938_v53 }
 0x132   : > { %v4345_v52 = vrot.slane %v4343_v27, 4  ;;  %v4346_v37 = vrot.slane %v10351_v54, 5  ;;  %v10348_v49 = vld [vmem:[%s11907_s28 + $0xb8] sm:$0x1]  ;;  %v4336_v29 = vrot.slane %v13950_v46, 5  ;;  %v13987_v46 = vsel %vm13496_vm12, %v10380_v24, %v4308_v15 }
 0x133   : > { %v10355_v18 = vld [vmem:[%s11907_s28 + $0xe0] sm:$0xe]  ;;  %v13992_v39 = vsel %vm13496_vm12, %v4310_v2, %v4311_v8  ;;  %v13996_v30 = vsel %vm13496_vm12, %v10383_v32, %v4329_v59  ;;  %v14000_v6 = vsel %vm13496_vm12, %v4331_v60, %v4332_v7  ;;  %v14003_v9 = vld [vmem:[%s11907_s28 + $0xe8] sm:$0x1]  ;;  %v4357_v24 = vrot.slane %v10356_v61, 5  ;;  %5417 = vrot.lane.b32.xlu1 %v10680_v44, %s11841_s30 }
 0x134   : > { %5411 = vrot.lane.b32.xlu0 %v19049_v20, %s11841_s30  ;;  %v14005_v15 = vpop.permute.xlu0 %2607  ;;  %v14010_v8 = vsel %vm13496_vm12, %v10382_v13, %v4322_v17  ;;  %v14014_v59 = vsel %vm13496_vm12, %v4324_v56, %v4325_v19  ;;  %v10384_v32 = vrot.slane %v10346_v25, 9  ;;  %v4339_v53 = vrot.slane %v10348_v49, 5  ;;  %v14017_v2 = vld [vmem:[%s11907_s28 + $0xd0] sm:$0xe]  ;;  %v14020_v60 = vld [vmem:[%s11907_s28 + $0xd4] sm:$0xf] }
 0x135   : > { %v14024_v44 = vsel %vm13496_vm12, %v10385_v41, %v4343_v27  ;;  %v14028_v17 = vsel %vm13496_vm12, %v4345_v52, %v4346_v37  ;;  %v4338_v7 = vrot.slane %v4336_v29, 4  ;;  %v10387_v13 = vrot.slane %v10355_v18, 9  ;;  %v14031_v56 = vld [vmem:[%s11907_s28 + $0xd8] sm:$0x1]  ;;  %v14034_v49 = vld [vmem:[%s11907_s28 + $0x100] sm:$0xe]  ;;  %v14044_v27 = vpop.permute.xlu1 %2613 }
 0x136   : > { %v14037_v19 = vld [vmem:[%s11907_s28 + $0x104] sm:$0xf]  ;;  %v14042_v25 = vsel %vm2878_vm13, %v13695_v11, %v13635_v12  ;;  %19050 = vst [vmem:[#allocation64_spill] sm:$0xff] %v14044_v27  ;;  %v19051_v37 = vcombine.low %v13821_v10, %v13839_v38  ;;  %v10684_v52 = vcombine.low %v13987_v46, %v13992_v39  ;;  %v4360_v61 = vrot.slane %v14003_v9, 5  ;;  %v14054_v41 = vld [vmem:[%s11907_s28 + $0x108] sm:$0x1] }
 0x137   : > { %v608_v20 = vsel %vm606_vm3, %v508_v23, 0  ;;  %v9511_v18 = vld [vmem:[%s11907_s28 + $0x60] sm:$0x8]  ;;  %v9512_v12 = vld [vmem:[%s11907_s28 + $0x64] sm:$0xf]  ;;  %v10686_v10 = vcombine.low %v14010_v8, %v14014_v59  ;;  %v4359_v38 = vrot.slane %v4357_v24, 4  ;;  %5421 = vrot.lane.b32.xlu1 %v10682_v34, %s11841_s30  ;;  %v14075_v11 = vsel %vm13496_vm12, %v10384_v32, %v4336_v29 }
 0x138   : > { %5415 = vrot.lane.b32.xlu0 %v19051_v37, %s11841_s30  ;;  %v4350_v46 = vrot.slane %v14020_v60, 5  ;;  %v14065_v39 = vld [vmem:[%s11907_s28 + $0xf4] sm:$0xf]  ;;  %11477 = vmatpush3.bf16.msra.mxu0 %v608_v20  ;;  %v9513_v23 = vld [vmem:[%s11907_s28 + $0x68] sm:$0x7]  ;;  %v14068_v9 = vpop.permute.xlu0 %2611  ;;  %v10386_v8 = vrot.slane %v14017_v2, 9  ;;  %v14088_v34 = vsel %vm13496_vm12, %v4338_v7, %v4339_v53  ;;  %v14092_v37 = vsel %vm13496_vm12, %v10387_v13, %v4357_v24 }
 0x139   : > { %v4371_v59 = vrot.slane %v14037_v19, 5  ;;  %v14080_v60 = vld [vmem:[%s11907_s28 + $0xf0] sm:$0xe]  ;;  %v14083_v20 = vld [vmem:[%s11907_s28 + $0xf8] sm:$0x1]  ;;  %v9559_v29 = vrot.slane %v9511_v18, 11  ;;  %v14096_v40 = vpop.permute.xlu1 %2617  ;;  %v19053_v19 = vcombine.low %v13860_v0, %v13864_v26 }
 0x13a   : > { %v9514_v54 = vld [vmem:[%s11907_s28 + $0x70] sm:$0x8]  ;;  %v398_v32 = vrot.slane %v9512_v12, 7  ;;  %v9515_v36 = vld [vmem:[%s11907_s28 + $0x74] sm:$0xf]  ;;  %19052 = vst [vmem:[#allocation65_spill] sm:$0xff] %v14096_v40 }
 0x13b   : > { %v9516_v2 = vld [vmem:[%s11907_s28 + $0x78] sm:$0x7]  ;;  %v4353_v27 = vrot.slane %v14031_v56, 5  ;;  %v10389_v53 = vrot.slane %v14034_v49, 9  ;;  %v4364_v7 = vrot.slane %v14065_v39, 5  ;;  %v401_v13 = vrot.slane %v9513_v23, 7  ;;  %5473 = vrot.lane.b32.xlu1 %v10684_v52, %s11842_s7 }
 0x13c   : > { %5419 = vrot.lane.b32.xlu0 %v19053_v19, %s11841_s30  ;;  %v14106_v24 = vld [vmem:[%s11907_s28 + $0x124] sm:$0xf]  ;;  %v4352_v18 = vrot.slane %v4350_v46, 4  ;;  %v4374_v12 = vrot.slane %v14054_v41, 5  ;;  %v399_v40 = vsel %vm11909_vm2, %v9559_v29, %v398_v32  ;;  %v400_v58 = vrot.slane %v398_v32, 4  ;;  %v14111_v0 = vpop.permute.xlu0 %2615 }
 0x13d   : > { %19054 = vst [vmem:[#allocation66_spill] sm:$0xff] %v14111_v0  ;;  %v4373_v26 = vrot.slane %v4371_v59, 4  ;;  %v10367_v56 = vld [vmem:[%s11907_s28 + $0x120] sm:$0xe]  ;;  %v9560_v49 = vrot.slane %v9514_v54, 11  ;;  %v405_v39 = vrot.slane %v9515_v36, 7  ;;  %v14123_v52 = vpop.permute.xlu1 %2621  ;;  %v19055_v36 = vcombine.low %v13908_v43, %v13921_v1 }
 0x13e   : > { %v408_v19 = vrot.slane %v9516_v2, 7  ;;  %v10388_v4 = vrot.slane %v14080_v60, 9  ;;  %v4367_v23 = vrot.slane %v14083_v20, 5  ;;  %v4385_v41 = vrot.slane %v14106_v24, 5  ;;  %v14119_v29 = vld [vmem:[%s11907_s28 + $0x114] sm:$0xf] }
 0x13f   : > { %v402_v32 = vsel %vm11909_vm2, %v400_v58, %v401_v13  ;;  %v4366_v54 = vrot.slane %v4364_v7, 4  ;;  %v10369_v60 = vld [vmem:[%s11907_s28 + $0x128] sm:$0x1]  ;;  %v406_v2 = vsel %vm11909_vm2, %v9560_v49, %v405_v39  ;;  %v407_v24 = vrot.slane %v405_v39, 4  ;;  %v14148_v13 = vld [vmem:[%s11907_s28 + $0x118] sm:$0x1]  ;;  %5477 = vrot.lane.b32.xlu1 %v10686_v10, %s11842_s7 }
 0x140   : > { %5471 = vrot.lane.b32.xlu0 %v19055_v36, %s11842_s7  ;;  %v9575_v20 = vcombine.low %v399_v40, %v402_v32  ;;  %v10688_v0 = vcombine.low %v14075_v11, %v14088_v34  ;;  %v14136_v58 = vsel %vm13496_vm12, %v4359_v38, %v4360_v61  ;;  %v14140_v43 = vsel %vm13496_vm12, %v10386_v8, %v4350_v46  ;;  %v10364_v40 = vld [vmem:[%s11907_s28 + $0x110] sm:$0xe]  ;;  %v14151_v49 = vld [vmem:[%s11907_s28 + $0x140] sm:$0xe]  ;;  %v14153_v11 = vpop.permute.xlu0 %2619  ;;  %v14160_v8 = vld [vmem:[%s11907_s28 + $0x144] sm:$0xf] }
 0x141   : > { %v14144_v1 = vsel %vm13496_vm12, %v10389_v53, %v4371_v59  ;;  %v4354_v61 = vsel %vm13496_vm12, %v4352_v18, %v4353_v27  ;;  %v10391_v38 = vrot.slane %v10367_v56, 9  ;;  %v4378_v46 = vrot.slane %v14119_v29, 5  ;;  %v14163_v59 = vld [vmem:[%s11907_s28 + $0x134] sm:$0xf]  ;;  %v14173_v18 = vld [vmem:[%s11907_s28 + $0x130] sm:$0xe]  ;;  %v14178_v29 = vpop.permute.xlu1 %2625 }
 0x142   : > { %11478 = vmatprep.mubr.msk.bf16.mxu0 %vm557_vm6, %v9575_v20  ;;  %v409_v34 = vsel %vm11909_vm2, %v407_v24, %v408_v19  ;;  %v14170_v10 = vsel %vm13496_vm12, %v4373_v26, %v4374_v12  ;;  %v4387_v53 = vrot.slane %v4385_v41, 4  ;;  %v4388_v27 = vrot.slane %v10369_v60, 5  ;;  %v14176_v56 = vld [vmem:[%s11907_s28 + $0x138] sm:$0x1]  ;;  %19056 = vst [vmem:[#allocation67_spill] sm:$0xff] %v14178_v29 }
 0x143   : > { %v9576_v39 = vcombine.low %v406_v2, %v409_v34  ;;  %v19057_v32 = vcombine.low %v13942_v21, %v13946_v62  ;;  %v14188_v26 = vsel %vm13496_vm12, %v10388_v4, %v4364_v7  ;;  %v14192_v19 = vsel %vm13496_vm12, %v4366_v54, %v4367_v23  ;;  %v9517_v60 = vld [vmem:[%s11907_s28 + $0x80] sm:$0x8]  ;;  %v9518_v20 = vld [vmem:[%s11907_s28 + $0x84] sm:$0xf]  ;;  %v14199_v2 = vld [vmem:[%s11907_s28 + $0x148] sm:$0x1]  ;;  %5481 = vrot.lane.b32.xlu1 %v10688_v0, %s11842_s7 }
 0x144   : > { %v10390_v36 = vrot.slane %v10364_v40, 9  ;;  %v10690_v21 = vcombine.low %v14140_v43, %v4354_v61  ;;  %v4381_v62 = vrot.slane %v14148_v13, 5  ;;  %v4392_v4 = vrot.slane %v14163_v59, 5  ;;  %v9519_v7 = vld [vmem:[%s11907_s28 + $0x88] sm:$0x7]  ;;  %v14205_v23 = vpop.permute.xlu0 %2623 }
 0x145   : > { %5475 = vrot.lane.b32.xlu0 %v19057_v32, %s11842_s7  ;;  %11479 = vmatmul.mubr.msk.bf16.vlgmr.msra.gmra.mxu0 %vm557_vm6, %v9576_v39  ;;  %v14212_v43 = vsel %vm13496_vm12, %v10391_v38, %v4385_v41  ;;  %v4380_v40 = vrot.slane %v4378_v46, 4  ;;  %v4399_v13 = vrot.slane %v14160_v8, 5  ;;  %v14216_v61 = vld [vmem:[%s11907_s28 + $0x154] sm:$0xf]  ;;  %v9520_v59 = vld [vmem:[%s11907_s28 + $0x90] sm:$0x8]  ;;  %v10692_v34 = vcombine.low %v14188_v26, %v14192_v19  ;;  %v14227_v54 = vpop.permute.xlu1 %2629 }
 0x146   : > { %v14223_v0 = vsel %vm13496_vm12, %v4387_v53, %v4388_v27  ;;  %v9561_v39 = vrot.slane %v9517_v60, 11  ;;  %v412_v32 = vrot.slane %v9518_v20, 7  ;;  %v9521_v41 = vld [vmem:[%s11907_s28 + $0x94] sm:$0xf]  ;;  %v9522_v38 = vld [vmem:[%s11907_s28 + $0x98] sm:$0x7]  ;;  %v19059_v8 = vcombine.low %v13996_v30, %v14000_v6 }
 0x147   : > { %19058 = vst [vmem:[#allocation68_spill] sm:$0xff] %v14227_v54  ;;  %v14235_v12 = vsel %vm13496_vm12, %v10390_v36, %v4378_v46  ;;  %v10392_v26 = vrot.slane %v14173_v18, 9  ;;  %v4395_v53 = vrot.slane %v14176_v56, 5  ;;  %v14240_v27 = vld [vmem:[%s11907_s28 + $0x68] sm:$0xf]  ;;  %v415_v19 = vrot.slane %v9519_v7, 7  ;;  %5485 = vrot.lane.b32.xlu1 %v10690_v21, %s11842_s7 }
 0x148   : > { %v4394_v60 = vrot.slane %v4392_v4, 4  ;;  %v10376_v20 = vld [vmem:[%s11907_s28 + $0x150] sm:$0xe]  ;;  %v4406_v30 = vrot.slane %v14216_v61, 5  ;;  %v413_v6 = vsel %vm11909_vm2, %v9561_v39, %v412_v32  ;;  %v14246_v46 = vpop.permute.xlu0 %2627  ;;  %v4402_v18 = vrot.slane %v14199_v2, 5 }
 0x149   : > { %5479 = vrot.lane.b32.xlu0 %v19059_v8, %s11842_s7  ;;  %v414_v8 = vrot.slane %v412_v32, 4  ;;  %v10378_v56 = vld [vmem:[%s11907_s28 + $0x158] sm:$0x1]  ;;  %v9562_v36 = vrot.slane %v9520_v59, 11  ;;  %v419_v7 = vrot.slane %v9521_v41, 7  ;;  %v422_v24 = vrot.slane %v9522_v38, 7  ;;  %v14262_v2 = vpop.permute.xlu1 %2633 }
 0x14a   : > { %v4382_v54 = vsel %vm13496_vm12, %v4380_v40, %v4381_v62  ;;  %v4401_v29 = vrot.slane %v4399_v13, 4  ;;  %v14254_v61 = vld [vmem:[%s11907_s28 + $0x64] sm:$0xe]  ;;  %v14258_v32 = vld [vmem:[%s11907_s28 + $0x78] sm:$0xf]  ;;  %v19060_v59 = vcombine.low %v14024_v44, %v14028_v17  ;;  %v14270_v62 = vsel %vm13496_vm12, %v10392_v26, %v4392_v4 }
 0x14b   : > { %v416_v21 = vsel %vm11909_vm2, %v414_v8, %v415_v19  ;;  %v420_v41 = vsel %vm11909_vm2, %v9562_v36, %v419_v7  ;;  %v421_v38 = vrot.slane %v419_v7, 4  ;;  %v14276_v19 = vsel %vm13496_vm12, %v4394_v60, %v4395_v53  ;;  %v14279_v8 = vld [vmem:[%s11907_s28 + $0x6c] sm:$0x1]  ;;  %5489 = vrot.lane.b32.xlu1 %v10692_v34, %s11842_s7  ;;  %v10398_v36 = vld [vmem:[%s11907_s28 + $0x74] sm:$0xe] }
 0x14c   : > { %v9577_v40 = vcombine.low %v413_v6, %v416_v21  ;;  %v10394_v39 = vrot.slane %v10376_v20, 9  ;;  %v4408_v44 = vrot.slane %v4406_v30, 4  ;;  %v4409_v17 = vrot.slane %v10378_v56, 5  ;;  %v14281_v4 = vpop.permute.xlu0 %2631  ;;  %v14304_v34 = vld [vmem:[%s11907_s28 + $0x88] sm:$0xf] }
 0x14d   : > { %5483 = vrot.lane.b32.xlu0 %v19060_v59, %s11842_s7  ;;  %v10694_v26 = vcombine.low %v14235_v12, %v4382_v54  ;;  %v10443_v6 = vrot.slane %v14254_v61, 9  ;;  %v4516_v53 = vrot.slane %v14258_v32, 5  ;;  %v423_v60 = vsel %vm11909_vm2, %v421_v38, %v422_v24  ;;  %v10400_v7 = vld [vmem:[%s11907_s28 + $0x7c] sm:$0x1]  ;;  %v14308_v32 = vld [vmem:[%s11907_s28 + $0x94] sm:$0xe] }
 0x14e   : > { %11482 = vmatprep.mubr.msk.bf16.mxu0 %vm557_vm6, %v9577_v40  ;;  %v10695_v20 = vcombine.low %v14212_v43, %v14223_v0  ;;  %v19061_v56 = vrot.slane %v14151_v49, 9  ;;  %v14301_v54 = vsel %vm13496_vm12, %v4401_v29, %v4402_v18  ;;  %v14311_v24 = vld [vmem:[%s11907_s28 + $0x98] sm:$0xf]  ;;  %v9578_v43 = vcombine.low %v420_v41, %v423_v60  ;;  %v9523_v40 = vld [vmem:[%s11907_s28 + $0xa0] sm:$0x8] }
 0x14f   : > { %v2915_v49 = vsel %vm2911_vm14, %v13917_v28, %v13926_v45  ;;  %v19062_v29 = vcombine.low %v14092_v37, %v14136_v58  ;;  %v10696_v0 = vcombine.low %v14270_v62, %v14276_v19  ;;  %v19063_v18 = vrot.slane %v14240_v27, 5  ;;  %v9524_v41 = vld [vmem:[%s11907_s28 + $0xa4] sm:$0xf]  ;;  %v10406_v62 = vld [vmem:[%s11907_s28 + $0x9c] sm:$0x1]  ;;  %5493 = vrot.lane.b32.xlu1 %v10694_v26, %s11842_s7 }
 0x150   : > { %v14297_v12 = vsel %vm13496_vm12, %v19061_v56, %v4399_v13  ;;  %v2702_v13 = vpop.permute.xlu1 %2701  ;;  %v4512_v59 = vrot.slane %v14279_v8, 5  ;;  %v2913_v28 = vsel %vm2911_vm14, %v13959_v33, %v13961_v47  ;;  %v4407_v45 = vsel %vm13496_vm12, %v10394_v39, %v4406_v30  ;;  %11483 = vmatmul.mubr.msk.bf16.gmra.mxu0 %vm557_vm6, %v9578_v43  ;;  %v9525_v38 = vld [vmem:[%s11907_s28 + $0xa8] sm:$0x7]  ;;  %v2700_v8 = vpop.permute.xlu0 %2699  ;;  %v9526_v30 = vld [vmem:[%s11907_s28 + $0xb0] sm:$0x8] }
 0x151   : > { %5487 = vrot.lane.b32.xlu0 %v19062_v29, %s11842_s7  ;;  %v4511_v21 = vrot.slane %v19063_v18, 4  ;;  %v4410_v37 = vsel %vm13496_vm12, %v4408_v44, %v4409_v17  ;;  %v10444_v58 = vrot.slane %v10398_v36, 9  ;;  %v2948_v19 = vsel %vm2944_vm15, %v2915_v49, %v2702_v13  ;;  %v9527_v56 = vld [vmem:[%s11907_s28 + $0xb4] sm:$0xf]  ;;  %v9528_v43 = vld [vmem:[%s11907_s28 + $0xb8] sm:$0x7] }
 0x152   : > { %v4518_v60 = vrot.slane %v4516_v53, 4  ;;  %v4519_v33 = vrot.slane %v10400_v7, 5  ;;  %v4530_v47 = vrot.slane %v14311_v24, 5  ;;  %v2946_v39 = vsel %vm2944_vm15, %v2913_v28, %v2700_v8 }
 0x153   : > { %v10697_v44 = vcombine.low %v14297_v12, %v14301_v54  ;;  %v9563_v17 = vrot.slane %v9523_v40, 11  ;;  %v426_v36 = vrot.slane %v9524_v41, 7  ;;  %11514 = vmatprep.mubr.msk.bf16.mxu1 %vm2993_vm0, %v2946_v39  ;;  %v19064_v26 = vcombine.low %v14144_v1, %v14170_v10  ;;  %v10401_v12 = vld [vmem:[%s11907_s28 + $0x84] sm:$0xe]  ;;  %5497 = vrot.lane.b32.xlu1 %v10696_v0, %s11842_s7 }
 0x154   : > { %v10698_v7 = vcombine.low %v4407_v45, %v4410_v37  ;;  %v4523_v24 = vrot.slane %v14304_v34, 5  ;;  %v10446_v49 = vrot.slane %v14308_v32, 9  ;;  %v429_v13 = vrot.slane %v9525_v38, 7  ;;  %11515 = vmatmul.mubr.msk.bf16.vlgmr.msra.gmra.mxu1 %vm2993_vm0, %v2948_v19  ;;  %v2704_v10 = vpop.permute.xlu0 %2703  ;;  %v10403_v34 = vld [vmem:[%s11907_s28 + $0x8c] sm:$0x1]  ;;  %v2706_v19 = vpop.permute.xlu1 %2705 }
 0x155   : > { %5491 = vrot.lane.b32.xlu0 %v19064_v26, %s11842_s7  ;;  %v4517_v54 = vsel %vm13496_vm12, %v10444_v58, %v4516_v53  ;;  %v4533_v29 = vrot.slane %v10406_v62, 5  ;;  %v427_v18 = vsel %vm11909_vm2, %v9563_v17, %v426_v36  ;;  %v428_v40 = vrot.slane %v426_v36, 4  ;;  %v19066_v17 = vld [vmem:[#allocation5_spill] sm:$0xff] }
 0x156   : > { %v2917_v1 = vsel %vm2911_vm14, %v14042_v25, %v14005_v15  ;;  %v9564_v32 = vrot.slane %v9526_v30, 11  ;;  %v433_v41 = vrot.slane %v9527_v56, 7  ;;  %v436_v28 = vrot.slane %v9528_v43, 7 }
 0x157   : > { %v2950_v45 = vsel %vm2944_vm15, %v2917_v1, %v2704_v10  ;;  %v4520_v53 = vsel %vm13496_vm12, %v4518_v60, %v4519_v33  ;;  %v4532_v37 = vrot.slane %v4530_v47, 4  ;;  %v430_v58 = vsel %vm11909_vm2, %v428_v40, %v429_v13  ;;  %5501 = vrot.lane.b32.xlu1 %v10698_v7, %s11842_s7  ;;  %v14410_v7 = vld [vmem:[%s11907_s28 + $0x134] sm:$0xf]  ;;  %v9532_v1 = vld [vmem:[%s11907_s28 + $0xd0] sm:$0x8]  ;;  %v19071_v10 = vld [vmem:[#allocation21_spill] sm:$0xff] }
 0x158   : > { %11518 = vmatprep.mubr.msk.bf16.mxu1 %vm2993_vm0, %v2950_v45  ;;  %v19065_v15 = vrot.slane %v14240_v27, 5  ;;  %v9579_v0 = vcombine.low %v427_v18, %v430_v58  ;;  %v434_v62 = vsel %vm11909_vm2, %v9564_v32, %v433_v41  ;;  %v435_v38 = vrot.slane %v433_v41, 4  ;;  %v2708_v61 = vpop.permute.xlu0 %2707  ;;  %v19070_v18 = vld [vmem:[#allocation18_spill] sm:$0xff]  ;;  %v9534_v45 = vld [vmem:[%s11907_s28 + $0xd8] sm:$0x7] }
 0x159   : > { %5495 = vrot.lane.b32.xlu0 %v10695_v20, %s11842_s7  ;;  %v4513_v8 = vsel %vm13496_vm12, %v4511_v21, %v4512_v59  ;;  %v10445_v60 = vrot.slane %v10401_v12, 9  ;;  %v4525_v33 = vrot.slane %v4523_v24, 4  ;;  %v4526_v20 = vrot.slane %v10403_v34, 5  ;;  %v14389_v21 = vld [vmem:[%s11907_s28 + $0x128] sm:$0x3]  ;;  %v19072_v32 = vld [vmem:[#allocation34_spill] sm:$0xff] }
 0x15a   : > { %v4510_v25 = vsel %vm13496_vm12, %v10443_v6, %v19065_v15  ;;  %v2888_v27 = vsel %vm2878_vm13, %v13801_v3, %v13677_v5  ;;  %v10700_v6 = vcombine.low %v4517_v54, %v4520_v53  ;;  %11486 = vmatprep.mubr.msk.bf16.mxu0 %vm557_vm6, %v9579_v0  ;;  %v437_v30 = vsel %vm11909_vm2, %v435_v38, %v436_v28  ;;  %v9533_v28 = vld [vmem:[%s11907_s28 + $0xd4] sm:$0xf]  ;;  %v19073_v53 = vld [vmem:[#allocation37_spill] sm:$0xff] }
 0x15b   : > { %v2919_v59 = vsel %vm2911_vm14, %v13973_v55, %v13975_v50  ;;  %v4531_v5 = vsel %vm13496_vm12, %v10446_v49, %v4530_v47  ;;  %v4534_v3 = vsel %vm13496_vm12, %v4532_v37, %v4533_v29  ;;  %v9580_v39 = vcombine.low %v434_v62, %v437_v30  ;;  %v9529_v50 = vld [vmem:[%s11907_s28 + $0xc0] sm:$0x8]  ;;  %v9530_v47 = vld [vmem:[%s11907_s28 + $0xc4] sm:$0xf]  ;;  %v2710_v62 = vpop.permute.xlu1 %2709 }
 0x15c   : > { %v19067_v36 = vcombine.low %v13029_v16, %v13035_v14  ;;  %v2921_v43 = vsel %vm2911_vm14, %v2888_v27, %v14068_v9  ;;  %v2952_v26 = vsel %vm2944_vm15, %v2919_v59, %v2706_v19  ;;  %v10699_v55 = vcombine.low %v4510_v25, %v4513_v8  ;;  %v9531_v9 = vld [vmem:[%s11907_s28 + $0xc8] sm:$0x7]  ;;  %5553 = vrot.lane.b32.xlu1 %v10700_v6, %s11843_s8  ;;  %v19075_v8 = vld [vmem:[#allocation33_spill] sm:$0xff] }
 0x15d   : > { %5499 = vrot.lane.b32.xlu0 %v10697_v44, %s11842_s7  ;;  %v1250_v49 = vrot.slane %v14410_v7, 6  ;;  %v2954_v13 = vsel %vm2944_vm15, %v2921_v43, %v2708_v61  ;;  %11519 = vmatmul.mubr.msk.bf16.gmra.mxu1 %vm2993_vm0, %v2952_v26  ;;  %v4524_v16 = vsel %vm13496_vm12, %v10445_v60, %v4523_v24  ;;  %v4527_v14 = vsel %vm13496_vm12, %v4525_v33, %v4526_v20  ;;  %v19068_v44 = vld [vmem:[#allocation6_spill] sm:$0xff]  ;;  %v19074_v25 = vld [vmem:[#allocation31_spill] sm:$0xff]  ;;  %v2712_v33 = vpop.permute.xlu0 %2711  ;;  %v19076_v61 = vld [vmem:[#allocation9_spill] sm:$0xff] }
 0x15e   : > { %v2760_v56 = vsel %vm557_vm6, %v19067_v36, %v19066_v17  ;;  %11487 = vmatmul.mubr.msk.bf16.gmra.mxu0 %vm557_vm6, %v9580_v39  ;;  %v19069_v12 = vcombine.low %v13041_v57, %v13045_v35  ;;  %v1246_v29 = vrot.slane %v14389_v21, 6  ;;  %v2791_v40 = vsel %vm2779_vm7, %v13167_v63, %v19070_v18  ;;  %11522 = vmatprep.mubr.msk.bf16.mxu1 %vm2993_vm0, %v2954_v13  ;;  %v19078_v6 = vld [vmem:[#allocation45_spill] sm:$0xff]  ;;  %v19081_v39 = vld [vmem:[#allocation66_spill] sm:$0xff]  ;;  %v19083_v13 = vld [vmem:[#allocation55_spill] sm:$0xff] }
 0x15f   : > { %v10702_v24 = vcombine.low %v4531_v5, %v4534_v3  ;;  %v2793_v34 = vsel %vm2779_vm7, %v13194_v31, %v19071_v10  ;;  %v2824_v57 = vsel %vm2812_vm8, %v2791_v40, %v19072_v32  ;;  %v9565_v35 = vrot.slane %v9529_v50, 11  ;;  %v19080_v5 = vld [vmem:[#allocation64_spill] sm:$0xff]  ;;  %v9535_v40 = vld [vmem:[%s11907_s28 + $0xe0] sm:$0x8]  ;;  %v19086_v10 = vld [vmem:[#allocation51_spill] sm:$0xff] }
 0x160   : > { %v2757_v54 = vsel %vm557_vm6, %v19069_v12, %v19068_v44  ;;  %v440_v41 = vrot.slane %v9530_v47, 7  ;;  %v2826_v63 = vsel %vm2812_vm8, %v2793_v34, %v19073_v53  ;;  %v2857_v37 = vsel %vm2845_vm9, %v2824_v57, %v13295_v48  ;;  %v19082_v47 = vld [vmem:[#allocation20_spill] sm:$0xff]  ;;  %v19085_v44 = vld [vmem:[#allocation23_spill] sm:$0xff] }
 0x161   : > { %5551 = vrot.lane.b32.xlu0 %v10699_v55, %s11843_s8  ;;  %v10701_v58 = vcombine.low %v4524_v16, %v4527_v14  ;;  %v443_v15 = vrot.slane %v9531_v9, 7  ;;  %v2859_v31 = vsel %vm2845_vm9, %v2826_v63, %v13365_v42  ;;  %v2890_v0 = vsel %vm2878_vm13, %v2857_v37, %v19074_v25  ;;  %5557 = vrot.lane.b32.xlu1 %v10702_v24, %s11843_s8  ;;  %v19077_v42 = vld [vmem:[#allocation44_spill] sm:$0xff]  ;;  %v19084_v14 = vld [vmem:[#allocation22_spill] sm:$0xff] }
 0x162   : > { %v441_v38 = vsel %vm11909_vm2, %v9565_v35, %v440_v41  ;;  %v442_v19 = vrot.slane %v440_v41, 4  ;;  %v2892_v60 = vsel %vm2878_vm13, %v2859_v31, %v19075_v8  ;;  %v9566_v48 = vrot.slane %v9532_v1, 11  ;;  %v9536_v24 = vld [vmem:[%s11907_s28 + $0xe4] sm:$0xf]  ;;  %v9537_v1 = vld [vmem:[%s11907_s28 + $0xe8] sm:$0x7]  ;;  %v2714_v8 = vpop.permute.xlu1 %2713 }
 0x163   : > { %v447_v20 = vrot.slane %v9533_v28, 7  ;;  %v450_v27 = vrot.slane %v9534_v45, 7  ;;  %v19079_v30 = vcombine.low %v19077_v42, %v19078_v6  ;;  %v2923_v3 = vsel %vm2911_vm14, %v2890_v0, %v19080_v5  ;;  %v19088_v57 = vld [vmem:[#allocation36_spill] sm:$0xff]  ;;  %v19089_v35 = vld [vmem:[#allocation39_spill] sm:$0xff]  ;;  %v19090_v45 = vld [vmem:[#allocation25_spill] sm:$0xff] }
 0x164   : > { %v2925_v17 = vsel %vm2911_vm14, %v2892_v60, %v19081_v39  ;;  %v444_v36 = vsel %vm11909_vm2, %v442_v19, %v443_v15  ;;  %v2956_v43 = vsel %vm2944_vm15, %v2923_v3, %v2710_v62  ;;  %v2795_v16 = vsel %vm2779_vm7, %v19083_v13, %v19082_v47  ;;  %v9538_v28 = vld [vmem:[%s11907_s28 + $0xf0] sm:$0x8]  ;;  %v9539_v25 = vld [vmem:[%s11907_s28 + $0xf4] sm:$0xf]  ;;  %v9540_v0 = vld [vmem:[%s11907_s28 + $0xf8] sm:$0x7] }
 0x165   : > { %v2763_v59 = vsel %vm557_vm6, %v19079_v30, %v19076_v61  ;;  %5555 = vrot.lane.b32.xlu0 %v10701_v58, %s11843_s8  ;;  %v9581_v26 = vcombine.low %v441_v38, %v444_v36  ;;  %v448_v55 = vsel %vm11909_vm2, %v9566_v48, %v447_v20  ;;  %v449_v50 = vrot.slane %v447_v20, 4  ;;  %11523 = vmatmul.mubr.msk.bf16.gmra.mxu1 %vm2993_vm0, %v2956_v43  ;;  %v19091_v63 = vld [vmem:[#allocation4_spill] sm:$0xff]  ;;  %v9541_v62 = vld [vmem:[%s11907_s28 + $0x100] sm:$0x8]  ;;  %v9542_v20 = vld [vmem:[%s11907_s28 + $0x104] sm:$0xf] }
 0x166   : > { %v2799_v9 = vsel %vm2779_vm7, %v2760_v56, %v19084_v14  ;;  %v2797_v12 = vsel %vm2779_vm7, %v2757_v54, %v19085_v44  ;;  %v2958_v18 = vsel %vm2944_vm15, %v2925_v17, %v2712_v33  ;;  %v19087_v34 = vrot.slane %v19086_v10, 6  ;;  %v19092_v58 = vld [vmem:[#allocation16_spill] sm:$0xff]  ;;  %v19095_v42 = vld [vmem:[#allocation57_spill] sm:$0xff]  ;;  %v9543_v3 = vld [vmem:[%s11907_s28 + $0x108] sm:$0x7]  ;;  %v2716_v17 = vpop.permute.xlu0 %2715 }
 0x167   : > { %v2828_v56 = vsel %vm2812_vm8, %v2795_v16, %v19088_v57  ;;  %v2830_v54 = vsel %vm2812_vm8, %v2797_v12, %v19089_v35  ;;  %11526 = vmatprep.mubr.msk.bf16.mxu1 %vm2993_vm0, %v2958_v18  ;;  %11490 = vmatprep.mubr.msk.bf16.mxu0 %vm557_vm6, %v9581_v26  ;;  %v451_v41 = vsel %vm11909_vm2, %v449_v50, %v450_v27  ;;  %v19093_v38 = vld [vmem:[#allocation32_spill] sm:$0xff]  ;;  %v9567_v60 = vrot.slane %v9535_v40, 11  ;;  %v19094_v27 = vld [vmem:[#allocation38_spill] sm:$0xff]  ;;  %v19096_v30 = vld [vmem:[#allocation65_spill] sm:$0xff] }
 0x168   : > { %v14483_v32 = vrot.slane %v19087_v34, 4  ;;  %v2801_v53 = vsel %vm2779_vm7, %v2763_v59, %v19090_v45  ;;  %v2861_v37 = vsel %vm2845_vm9, %v2828_v56, %v19091_v63  ;;  %v2863_v15 = vsel %vm2845_vm9, %v2830_v54, %v19092_v58  ;;  %v9545_v50 = vld [vmem:[%s11907_s28 + $0x114] sm:$0xf]  ;;  %v9547_v40 = vld [vmem:[%s11907_s28 + $0x120] sm:$0x8]  ;;  %v19097_v45 = vld [vmem:[#allocation41_spill] sm:$0xff] }
 0x169   : > { %v9582_v31 = vcombine.low %v448_v55, %v451_v41  ;;  %v2894_v19 = vsel %vm2878_vm13, %v2861_v37, %v19093_v38  ;;  %v454_v33 = vrot.slane %v9536_v24, 7  ;;  %v457_v48 = vrot.slane %v9537_v1, 7  ;;  %v9544_v55 = vld [vmem:[%s11907_s28 + $0x110] sm:$0x8]  ;;  %v9548_v57 = vld [vmem:[%s11907_s28 + $0x124] sm:$0xf] }
 0x16a   : > { %v2832_v61 = vsel %vm2812_vm8, %v2799_v9, %v19094_v27  ;;  %v2896_v6 = vsel %vm2878_vm13, %v2863_v15, %v19095_v42  ;;  %v2927_v59 = vsel %vm2911_vm14, %v2894_v19, %v19096_v30  ;;  %v9568_v5 = vrot.slane %v9538_v28, 11  ;;  %v9546_v9 = vld [vmem:[%s11907_s28 + $0x118] sm:$0x7]  ;;  %v9549_v28 = vld [vmem:[%s11907_s28 + $0x128] sm:$0x7]  ;;  %v2718_v27 = vpop.permute.xlu1 %2717  ;;  %v2720_v21 = vpop.permute.xlu0 %2719 }
 0x16b   : > { %11491 = vmatmul.mubr.msk.bf16.gmra.mxu0 %vm557_vm6, %v9582_v31  ;;  %v2929_v39 = vsel %vm2911_vm14, %v2896_v6, %v14153_v11  ;;  %v455_v36 = vsel %vm11909_vm2, %v9567_v60, %v454_v33  ;;  %v456_v43 = vrot.slane %v454_v33, 4  ;;  %v461_v26 = vrot.slane %v9539_v25, 7  ;;  %v9551_v31 = vld [vmem:[%s11907_s28 + $0x134] sm:$0xf]  ;;  %v19098_v25 = vld [vmem:[#allocation15_spill] sm:$0xff] }
 0x16c   : > { %v2960_v47 = vsel %vm2944_vm15, %v2927_v59, %v2714_v8  ;;  %v464_v13 = vrot.slane %v9540_v0, 7  ;;  %v9569_v16 = vrot.slane %v9541_v62, 11  ;;  %v468_v14 = vrot.slane %v9542_v20, 7  ;;  %v19100_v60 = vld [vmem:[#allocation8_spill] sm:$0xff]  ;;  %v9554_v42 = vld [vmem:[%s11907_s28 + $0x144] sm:$0xf] }
 0x16d   : > { %v458_v44 = vsel %vm11909_vm2, %v456_v43, %v457_v48  ;;  %v462_v11 = vsel %vm11909_vm2, %v9568_v5, %v461_v26  ;;  %v463_v12 = vrot.slane %v461_v26, 4  ;;  %v471_v18 = vrot.slane %v9543_v3, 7  ;;  %11527 = vmatmul.mubr.msk.bf16.gmra.mxu1 %vm2993_vm0, %v2960_v47  ;;  %v19101_v48 = vld [vmem:[#allocation35_spill] sm:$0xff]  ;;  %v19103_v5 = vld [vmem:[#allocation42_spill] sm:$0xff]  ;;  %v9552_v47 = vld [vmem:[%s11907_s28 + $0x138] sm:$0x7] }
 0x16e   : > { %v2962_v24 = vsel %vm2944_vm15, %v2929_v39, %v2716_v17  ;;  %v9583_v1 = vcombine.low %v455_v36, %v458_v44  ;;  %v469_v10 = vsel %vm11909_vm2, %v9569_v16, %v468_v14  ;;  %v470_v34 = vrot.slane %v468_v14, 4  ;;  %v19102_v59 = vld [vmem:[#allocation7_spill] sm:$0xff] }
 0x16f   : > { %11530 = vmatprep.mubr.msk.bf16.mxu1 %vm2993_vm0, %v2962_v24  ;;  %v465_v56 = vsel %vm11909_vm2, %v463_v12, %v464_v13  ;;  %v9570_v35 = vrot.slane %v9544_v55, 11  ;;  %v475_v54 = vrot.slane %v9545_v50, 7  ;;  %v478_v41 = vrot.slane %v9546_v9, 7  ;;  %v19104_v3 = vld [vmem:[#allocation43_spill] sm:$0xff]  ;;  %v9550_v50 = vld [vmem:[%s11907_s28 + $0x130] sm:$0x8] }
 0x170   : > { %v2834_v63 = vsel %vm2812_vm8, %v2801_v53, %v19097_v45  ;;  %11494 = vmatprep.mubr.msk.bf16.mxu0 %vm557_vm6, %v9583_v1  ;;  %v9584_v37 = vcombine.low %v462_v11, %v465_v56  ;;  %v472_v58 = vsel %vm11909_vm2, %v470_v34, %v471_v18  ;;  %v9571_v15 = vrot.slane %v9547_v40, 11  ;;  %v19106_v36 = vld [vmem:[#allocation59_spill] sm:$0xff]  ;;  %v9553_v9 = vld [vmem:[%s11907_s28 + $0x140] sm:$0x8]  ;;  %v19107_v12 = vld [vmem:[#allocation12_spill] sm:$0xff] }
 0x171   : > { %v2865_v0 = vsel %vm2845_vm9, %v2832_v61, %v19098_v25  ;;  %v9585_v62 = vcombine.low %v469_v10, %v472_v58  ;;  %v477_v38 = vrot.slane %v475_v54, 4  ;;  %v482_v19 = vrot.slane %v9548_v57, 7  ;;  %v9555_v44 = vld [vmem:[%s11907_s28 + $0x148] sm:$0x7]  ;;  %v19108_v18 = vld [vmem:[#allocation49_spill] sm:$0xff]  ;;  %v19111_v10 = vld [vmem:[#allocation24_spill] sm:$0xff] }
 0x172   : > { %v14549_v53 = vsel %vm12149_vm5, %v14483_v32, %v1246_v29  ;;  %v2867_v33 = vsel %vm2845_vm9, %v2834_v63, %v19100_v60  ;;  %v2898_v20 = vsel %vm2878_vm13, %v2865_v0, %v19101_v48  ;;  %v485_v61 = vrot.slane %v9549_v28, 7  ;;  %v9686_v1 = vld [vmem:[%s11907_s28 + $0x130] sm:$0xc]  ;;  %v9688_v56 = vld [vmem:[%s11907_s28 + $0x138] sm:$0x3]  ;;  %v19112_v45 = vld [vmem:[#allocation27_spill] sm:$0xff] }
 0x173   : > { %11495 = vmatmul.mubr.msk.bf16.gmra.mxu0 %vm557_vm6, %v9584_v37  ;;  %v476_v29 = vsel %vm11909_vm2, %v9570_v35, %v475_v54  ;;  %v479_v32 = vsel %vm11909_vm2, %v477_v38, %v478_v41  ;;  %v484_v6 = vrot.slane %v482_v19, 4  ;;  %v489_v30 = vrot.slane %v9551_v31, 7  ;;  %v9557_v31 = vld [vmem:[%s11907_s28 + $0x154] sm:$0xf]  ;;  %v19115_v48 = vld [vmem:[#allocation53_spill] sm:$0xff] }
 0x174   : > { %11498 = vmatprep.mubr.msk.bf16.mxu0 %vm557_vm6, %v9585_v62  ;;  %v19105_v39 = vcombine.low %v19103_v5, %v19104_v3  ;;  %v2900_v43 = vsel %vm2878_vm13, %v2867_v33, %v19106_v36  ;;  %v2931_v26 = vsel %vm2911_vm14, %v2898_v20, %v14123_v52  ;;  %v483_v55 = vsel %vm11909_vm2, %v9571_v15, %v482_v19  ;;  %v19109_v52 = vld [vmem:[#allocation50_spill] sm:$0xff]  ;;  %v19113_v62 = vld [vmem:[#allocation40_spill] sm:$0xff]  ;;  %v19120_v36 = vld [vmem:[#allocation67_spill] sm:$0xff] }
 0x175   : > { %v2933_v13 = vsel %vm2911_vm14, %v2900_v43, %v14205_v23  ;;  %v2964_v16 = vsel %vm2944_vm15, %v2931_v26, %v2718_v27  ;;  %v486_v14 = vsel %vm11909_vm2, %v484_v6, %v485_v61  ;;  %v496_v11 = vrot.slane %v9554_v42, 7  ;;  %v19114_v19 = vld [vmem:[#allocation52_spill] sm:$0xff]  ;;  %v19116_v27 = vld [vmem:[#allocation17_spill] sm:$0xff]  ;;  %v19117_v42 = vld [vmem:[#allocation2_spill] sm:$0xff] }
 0x176   : > { %v2766_v17 = vsel %vm557_vm6, %v19105_v39, %v19102_v59  ;;  %v19110_v40 = vcombine.low %v19108_v18, %v19109_v52  ;;  %v2966_v23 = vsel %vm2944_vm15, %v2933_v13, %v2720_v21  ;;  %11531 = vmatmul.mubr.msk.bf16.gmra.mxu1 %vm2993_vm0, %v2964_v16  ;;  %v9586_v57 = vcombine.low %v476_v29, %v479_v32  ;;  %v2722_v29 = vpop.permute.xlu1 %2721  ;;  %v19118_v32 = vld [vmem:[#allocation58_spill] sm:$0xff]  ;;  %v2724_v59 = vpop.permute.xlu0 %2723  ;;  %v19119_v39 = vld [vmem:[#allocation61_spill] sm:$0xff] }
 0x177   : > { %v2803_v34 = vsel %vm2779_vm7, %v2766_v17, %v19111_v10  ;;  %11534 = vmatprep.mubr.msk.bf16.mxu1 %vm2993_vm0, %v2966_v23  ;;  %v9587_v35 = vcombine.low %v483_v55, %v486_v14  ;;  %v9572_v54 = vrot.slane %v9550_v50, 11  ;;  %v491_v41 = vrot.slane %v489_v30, 4  ;;  %v9556_v50 = vld [vmem:[%s11907_s28 + $0x150] sm:$0x8]  ;;  %v19121_v14 = vld [vmem:[#allocation11_spill] sm:$0xff] }
 0x178   : > { %v2769_v24 = vsel %vm557_vm6, %v19110_v40, %v19107_v12  ;;  %v492_v28 = vrot.slane %v9552_v47, 7  ;;  %v9573_v37 = vrot.slane %v9553_v9, 11  ;;  %v498_v58 = vrot.slane %v496_v11, 4  ;;  %v9558_v47 = vld [vmem:[%s11907_s28 + $0x158] sm:$0x7]  ;;  %v19122_v9 = vld [vmem:[#allocation46_spill] sm:$0xff] }
 0x179   : > { %v2805_v63 = vsel %vm2779_vm7, %v2769_v24, %v19112_v45  ;;  %v499_v15 = vrot.slane %v9555_v44, 7  ;;  %v9704_v25 = vrot.slane %v9686_v1, 10  ;;  %v1252_v0 = vrot.slane %v1250_v49, 4  ;;  %v19123_v44 = vld [vmem:[#allocation47_spill] sm:$0xff]  ;;  %v19125_v1 = vld [vmem:[#allocation14_spill] sm:$0xff] }
 0x17a   : > { %v2836_v38 = vsel %vm2812_vm8, %v2803_v34, %v19113_v62  ;;  %v2838_v60 = vsel %vm2812_vm8, %v2805_v63, %v19114_v19  ;;  %v1253_v33 = vrot.slane %v9688_v56, 6  ;;  %v9991_v20 = vcombine.low %v19115_v48, %v14549_v53  ;;  %v19126_v34 = vld [vmem:[#allocation26_spill] sm:$0xff]  ;;  %v2728_v62 = vpop.permute.xlu0 %2727  ;;  %v19134_v48 = vld [vmem:[#allocation68_spill] sm:$0xff] }
 0x17b   : > { %v2869_v61 = vsel %vm2845_vm9, %v2836_v38, %v19116_v27  ;;  %v2871_v21 = vsel %vm2845_vm9, %v2838_v60, %v19117_v42  ;;  %11499 = vmatmul.mubr.msk.bf16.gmra.mxu0 %vm557_vm6, %v9586_v57  ;;  %v490_v5 = vsel %vm11909_vm2, %v9572_v54, %v489_v30  ;;  %v493_v53 = vsel %vm11909_vm2, %v491_v41, %v492_v28  ;;  %v19127_v57 = vld [vmem:[#allocation29_spill] sm:$0xff]  ;;  %v19129_v28 = vld [vmem:[#allocation56_spill] sm:$0xff]  ;;  %v19130_v63 = vld [vmem:[#allocation10_spill] sm:$0xff] }
 0x17c   : > { %v2902_v6 = vsel %vm2878_vm13, %v2869_v61, %v19118_v32  ;;  %11502 = vmatprep.mubr.msk.bf16.mxu0 %vm557_vm6, %v9587_v35  ;;  %v503_v3 = vrot.slane %v9557_v31, 7  ;;  %v2904_v17 = vsel %vm2878_vm13, %v2871_v21, %v19119_v39  ;;  %v497_v26 = vsel %vm11909_vm2, %v9573_v37, %v496_v11  ;;  %v19128_v35 = vld [vmem:[#allocation48_spill] sm:$0xff]  ;;  %v19133_v60 = vld [vmem:[#allocation63_spill] sm:$0xff] }
 0x17d   : > { %v2935_v43 = vsel %vm2911_vm14, %v2902_v6, %v19120_v36  ;;  %v500_v55 = vsel %vm11909_vm2, %v498_v58, %v499_v15  ;;  %v1251_v30 = vsel %vm12149_vm5, %v9704_v25, %v1250_v49  ;;  %v2937_v13 = vsel %vm2911_vm14, %v2904_v17, %v14246_v46  ;;  %v2726_v58 = vpop.permute.xlu1 %2725  ;;  %v19131_v15 = vld [vmem:[#allocation30_spill] sm:$0xff]  ;;  %v19132_v25 = vld [vmem:[#allocation60_spill] sm:$0xff] }
 0x17e   : > { %v2968_v16 = vsel %vm2944_vm15, %v2935_v43, %v2722_v29  ;;  %v19124_v12 = vcombine.low %v19122_v9, %v19123_v44  ;;  %v1254_v18 = vsel %vm12149_vm5, %v1252_v0, %v1253_v33  ;;  %v2970_v52 = vsel %vm2944_vm15, %v2937_v13, %v2724_v59  ;;  %v19135_v29 = vld [vmem:[#allocation13_spill] sm:$0xff]  ;;  %v19136_v6 = vld [vmem:[#allocation28_spill] sm:$0xff]  ;;  %v19139_v17 = vld [vmem:[#allocation62_spill] sm:$0xff] }
 0x17f   : > { %11535 = vmatmul.mubr.msk.bf16.gmra.mxu1 %vm2993_vm0, %v2968_v16  ;;  %v9588_v7 = vcombine.low %v490_v5, %v493_v53  ;;  %v9589_v49 = vcombine.low %v497_v26, %v500_v55  ;;  %v9574_v46 = vrot.slane %v9556_v50, 11  ;;  %v505_v40 = vrot.slane %v503_v3, 4  ;;  %v19137_v5 = vld [vmem:[#allocation54_spill] sm:$0xff]  ;;  %v14691_v55 = vpop.permute.xlu0 %5311 }
 0x180   : > { %v2772_v11 = vsel %vm557_vm6, %v19124_v12, %v19121_v14  ;;  %11538 = vmatprep.mubr.msk.bf16.mxu1 %vm2993_vm0, %v2970_v52  ;;  %v506_v24 = vrot.slane %v9558_v47, 7  ;;  %v2775_v10 = vsel %vm557_vm6, %v9991_v20, %v19125_v1  ;;  %v9992_v41 = vcombine.low %v1251_v30, %v1254_v18  ;;  %19140 = vst [vmem:[#allocation5_spill] sm:$0xff] %v14691_v55  ;;  %v14712_v44 = vld [vmem:[%s18822_s4] ss:$0 sm:$0xff] }
 0x181   : > { %v2807_v23 = vsel %vm2779_vm7, %v2772_v11, %v19126_v34  ;;  %v2809_v56 = vsel %vm2779_vm7, %v2775_v10, %v19127_v57  ;;  %v504_v38 = vsel %vm11909_vm2, %v9574_v46, %v503_v3  ;;  %v19138_v3 = vld [vmem:[#allocation19_spill] sm:$0xff]  ;;  %v2730_v39 = vpop.permute.xlu1 %2729  ;;  %v14717_v12 = vld [vmem:[%s18823_s5] ss:$0 sm:$0xff]  ;;  %vm3571_vm3 = vcmask 126016  }
 0x182   : > { %v2840_v54 = vsel %vm2812_vm8, %v2807_v23, %v19128_v35  ;;  %v2842_v45 = vsel %vm2812_vm8, %v2809_v56, %v19129_v28  ;;  %v507_v19 = vsel %vm11909_vm2, %v505_v40, %v506_v24  ;;  %v2778_v32 = vsel %vm557_vm6, %v9992_v41, %v19135_v29 }
 0x183   : > { %v2873_v37 = vsel %vm2845_vm9, %v2840_v54, %v19130_v63  ;;  %11503 = vmatmul.mubr.msk.bf16.gmra.mxu0 %vm557_vm6, %v9588_v7  ;;  %v2875_v31 = vsel %vm2845_vm9, %v2842_v45, %v19131_v15  ;;  %v9590_v21 = vcombine.low %v504_v38, %v507_v19  ;;  %v2811_v59 = vsel %vm2779_vm7, %v2778_v32, %v19136_v6  ;;  %v14695_v47 = vpop.permute.xlu0 %5315 }
 0x184   : > { %v2906_v0 = vsel %vm2878_vm13, %v2873_v37, %v19132_v25  ;;  %11506 = vmatprep.mubr.msk.bf16.mxu0 %vm557_vm6, %v9589_v49  ;;  %v2908_v33 = vsel %vm2878_vm13, %v2875_v31, %v19133_v60  ;;  %v2844_v53 = vsel %vm2812_vm8, %v2811_v59, %v19137_v5  ;;  %19142 = vst [vmem:[#allocation18_spill] sm:$0xff] %v14695_v47 }
 0x185   : > { %v2939_v20 = vsel %vm2911_vm14, %v2906_v0, %v19134_v48  ;;  %v2941_v27 = vsel %vm2911_vm14, %v2908_v33, %v14281_v4  ;;  %v2877_v4 = vsel %vm2845_vm9, %v2844_v53, %v19138_v3  ;;  %v14693_v50 = vpop.permute.xlu1 %5313 }
 0x186   : > { %v2972_v61 = vsel %vm2944_vm15, %v2939_v20, %v2726_v58  ;;  %v2974_v42 = vsel %vm2944_vm15, %v2941_v27, %v2728_v62  ;;  %v2910_v36 = vsel %vm2878_vm13, %v2877_v4, %v19139_v17  ;;  %19141 = vst [vmem:[#allocation6_spill] sm:$0xff] %v14693_v50 }
 0x187   : > { %11539 = vmatmul.mubr.msk.bf16.gmra.mxu1 %vm2993_vm0, %v2972_v61  ;;  %v2943_v43 = vsel %vm2911_vm14, %v2910_v36, %v14262_v2  ;;  %v14699_v13 = vpop.permute.xlu0 %5319 }
 0x188   : > { %11542 = vmatprep.mubr.msk.bf16.mxu1 %vm2993_vm0, %v2974_v42  ;;  %v2976_v26 = vsel %vm2944_vm15, %v2943_v43, %v2730_v39  ;;  %19144 = vst [vmem:[#allocation34_spill] sm:$0xff] %v14699_v13 }
 0x189   : > { %v14697_v30 = vpop.permute.xlu1 %5317 }
 0x18a   : > { %19143 = vst [vmem:[#allocation21_spill] sm:$0xff] %v14697_v30 }
 0x18b   : > { %11507 = vmatmul.mubr.msk.bf16.gmra.mxu0 %vm557_vm6, %v9590_v21  ;;  %v14703_v14 = vpop.permute.xlu0 %5323 }
 0x18c   : > { %19146 = vst [vmem:[#allocation31_spill] sm:$0xff] %v14703_v14 }
 0x18d   : > { %v14701_v16 = vpop.permute.xlu1 %5321 }
 0x18e   : > { %19145 = vst [vmem:[#allocation37_spill] sm:$0xff] %v14701_v16 }
 0x18f   : > { %11543 = vmatmul.mubr.msk.bf16.gmra.mxu1 %vm2993_vm0, %v2976_v26  ;;  %v14707_v9 = vpop.permute.xlu0 %5327 }
 0x190   : > { %19148 = vst [vmem:[#allocation9_spill] sm:$0xff] %v14707_v9 }
 0x191   : > { %v14705_v2 = vpop.permute.xlu1 %5325 }
 0x192   : > { %19147 = vst [vmem:[#allocation33_spill] sm:$0xff] %v14705_v2 }
 0x193   : > { %v14729_v46 = vpop.permute.xlu0 %5331 }
 0x194   : > { %19152 = vst [vmem:[#allocation66_spill] sm:$0xff] %v14729_v46 }
 0x195   : > { %v14723_v52 = vpop.permute.xlu1 %5329 }
 0x196   : > { %19150 = vst [vmem:[#allocation45_spill] sm:$0xff] %v14723_v52 }
 0x197   : > { %v14752_v41 = vpop.permute.xlu0 %5335 }
 0x198   : > { %19157 = vst [vmem:[#allocation51_spill] sm:$0xff] %v14752_v41  ;;  %v14930_v41 = vld [vmem:[%s11907_s28 + $0xd4] sm:$0xe] }
 0x199   : > { %v14744_v57 = vpop.permute.xlu1 %5333 }
 0x19a   : > { %19155 = vst [vmem:[#allocation22_spill] sm:$0xff] %v14744_v57 }
 0x19b   : > { %v14775_v61 = vpop.permute.xlu0 %5339 }
 0x19c   : > { %19161 = vst [vmem:[#allocation4_spill] sm:$0xff] %v14775_v61 }
 0x19d   : > { %v14764_v19 = vpop.permute.xlu1 %5337 }
 0x19e   : > { %19160 = vst [vmem:[#allocation25_spill] sm:$0xff] %v14764_v19  ;;  %v10421_v19 = vld [vmem:[%s11907_s28 + $0xec] sm:$0x1] }
 0x1a1   : > { %v14789_v39 = vpop.permute.xlu1 %5341 }
 0x1a2   : > { %19163 = vst [vmem:[#allocation32_spill] sm:$0xff] %v14789_v39 }
 0x205   : > { %v14719_v11 = vpop.f32.mrf.mxu0 }
 0x206   : > { %19149 = vst [vmem:[#allocation44_spill] sm:$0xff] %v14719_v11  ;;  %v779_v18 = vmul.f32 %v14719_v11, %v14712_v44  ;;  %v15446_v11 = vld [vmem:[%s11907_s28 + $0x154] sm:$0xf] }
 0x207   : > { %v14725_v7 = vpop.f32.mrf.mxu0  ;;  %19233 = vst [vmem:[#allocation79_spill] sm:$0xff] %v15446_v11 }
 0x208   : > { %19151 = vst [vmem:[#allocation64_spill] sm:$0xff] %v14725_v7  ;;  %v817_v49 = vadd.f32 %v14717_v12, %v779_v18  ;;  %v777_v1 = vmul.f32 %v14712_v44, %v14725_v7  ;;  %v15414_v7 = vld [vmem:[%s11907_s28 + $0x148] sm:$0x1] }
 0x209   : > { %v14731_v40 = vpop.f32.mrf.mxu0 }
 0x20a   : > { %19153 = vst [vmem:[#allocation20_spill] sm:$0xff] %v14731_v40  ;;  %v849_v24 = vmax.f32 %v817_v49, 0.0  ;;  %v780_v10 = vmul.f32 %v14731_v40, %v14712_v44  ;;  %v815_v56 = vadd.f32 %v14717_v12, %v777_v1  ;;  %v14794_v49 = vpop.permute.xlu0 %5391 }
 0x20b   : > { %v14742_v34 = vpop.f32.mrf.mxu0  ;;  %19165 = vst [vmem:[#allocation57_spill] sm:$0xff] %v14794_v49 }
 0x20c   : > { %19154 = vst [vmem:[#allocation55_spill] sm:$0xff] %v14742_v34  ;;  %v11278_v23 = vpack.c.bf16 %v849_v24, %v849_v24  ;;  %v818_v35 = vadd.f32 %v14717_v12, %v780_v10  ;;  %v847_v28 = vmax.f32 %v815_v56, 0.0  ;;  %v778_v63 = vmul.f32 %v14712_v44, %v14742_v34 }
 0x20e   : > { %1010 = vst.msk [vmem:[%s14736_s12 + $0x8] sm:$0xf] %vm1007_vm1, %v11278_v23  ;;  %v850_v45 = vmax.f32 %v818_v35, 0.0  ;;  %v11276_v15 = vpack.c.bf16 %v847_v28, %v847_v28  ;;  %v816_v25 = vadd.f32 %v14717_v12, %v778_v63 }
 0x210   : > { %v14750_v54 = vpop.f32.mrf.mxu0  ;;  %v11279_v31 = vpack.c.bf16 %v850_v45, %v850_v45  ;;  %1008 = vst.msk [vmem:[%s14736_s12] sm:$0xf] %vm1007_vm1, %v11276_v15  ;;  %v848_v60 = vmax.f32 %v816_v25, 0.0  ;;  %v10411_v15 = vld [vmem:[%s11907_s28 + $0xb8] sm:$0xf] }
 0x211   : > { %19156 = vst [vmem:[#allocation23_spill] sm:$0xff] %v14750_v54  ;;  %v783_v37 = vmul.f32 %v14750_v54, %v14712_v44 }
 0x212   : > { %v14758_v58 = vpop.f32.mrf.mxu0  ;;  %1011 = vst.msk [vmem:[%s14736_s12 + $0xc] sm:$0xf] %vm1007_vm1, %v11279_v31  ;;  %v11277_v42 = vpack.c.bf16 %v848_v60, %v848_v60  ;;  %v14821_v60 = vpop.permute.xlu0 %5395 }
 0x213   : > { %19158 = vst [vmem:[#allocation36_spill] sm:$0xff] %v14758_v58  ;;  %v821_v0 = vadd.f32 %v14717_v12, %v783_v37  ;;  %v781_v20 = vmul.f32 %v14712_v44, %v14758_v58  ;;  %v14811_v37 = vpop.permute.xlu1 %5393  ;;  %19169 = vst [vmem:[#allocation8_spill] sm:$0xff] %v14821_v60 }
 0x214   : > { %v11516_v62 = vpop.f32.mrf.mxu1  ;;  %v14762_v38 = vpop.f32.mrf.mxu0  ;;  %1009 = vst.msk [vmem:[%s14736_s12 + $0x4] sm:$0xf] %vm1007_vm1, %v11277_v42  ;;  %19168 = vst [vmem:[#allocation15_spill] sm:$0xff] %v14811_v37 }
 0x215   : > { %19159 = vst [vmem:[#allocation39_spill] sm:$0xff] %v14762_v38  ;;  %3223 = vrot.lane.b32.xlu0 %v11516_v62, %s11841_s30  ;;  %v853_v33 = vmax.f32 %v821_v0, 0.0  ;;  %v784_v27 = vmul.f32 %v14762_v38, %v14712_v44  ;;  %v819_v32 = vadd.f32 %v14717_v12, %v781_v20 }
 0x216   : > { %v3060_v48 = vpop.f32.mrf.mxu1  ;;  %v14779_v59 = vpop.f32.mrf.mxu0 }
 0x217   : > { %v11282_v21 = vpack.c.bf16 %v853_v33, %v853_v33  ;;  %v822_v6 = vadd.f32 %v14717_v12, %v784_v27  ;;  %19162 = vst [vmem:[#allocation16_spill] sm:$0xff] %v14779_v59  ;;  %v851_v53 = vmax.f32 %v819_v32, 0.0  ;;  %v782_v4 = vmul.f32 %v14712_v44, %v14779_v59  ;;  %v10408_v32 = vld [vmem:[%s11907_s28 + $0xa8] sm:$0xf]  ;;  %v15273_v59 = vld [vmem:[%s11907_s28 + $0xf4] sm:$0xf] }
 0x218   : > { %v11517_v29 = vpop.f32.mrf.mxu1 }
 0x219   : > { %3219 = vrot.lane.b32.xlu0 %v3060_v48, %s11841_s30  ;;  %3225 = vrot.lane.b32.xlu1 %v11517_v29, %s11841_s30  ;;  %1014 = vst.msk [vmem:[%s14736_s12 + $0x18] sm:$0xf] %vm1007_vm1, %v11282_v21  ;;  %v854_v3 = vmax.f32 %v822_v6, 0.0  ;;  %v11280_v36 = vpack.c.bf16 %v851_v53, %v851_v53  ;;  %v820_v26 = vadd.f32 %v14717_v12, %v782_v4  ;;  %v10410_v21 = vld [vmem:[%s11907_s28 + $0xb4] sm:$0xe]  ;;  %v4544_v29 = vrot.slane %v10411_v15, 5 }
 0x21a   : > { %v3063_v5 = vpop.f32.mrf.mxu1  ;;  %v14834_v53 = vld [vmem:[%s11907_s28 + $0xc8] sm:$0xf] }
 0x21b   : > { %v11283_v43 = vpack.c.bf16 %v854_v3, %v854_v3  ;;  %1012 = vst.msk [vmem:[%s14736_s12 + $0x10] sm:$0xf] %vm1007_vm1, %v11280_v36  ;;  %v852_v10 = vmax.f32 %v820_v26, 0.0  ;;  %v10448_v26 = vrot.slane %v10410_v21, 9  ;;  %v4551_v15 = vrot.slane %v14834_v53, 5 }
 0x21c   : > { %v14861_v53 = vld [vmem:[%s11907_s28 + $0xe8] sm:$0xf] }
 0x21d   : > { %v11520_v17 = vpop.f32.mrf.mxu1  ;;  %3221 = vrot.lane.b32.xlu1 %v3063_v5, %s11841_s30  ;;  %1015 = vst.msk [vmem:[%s14736_s12 + $0x1c] sm:$0xf] %vm1007_vm1, %v11283_v43  ;;  %v11281_v45 = vpack.c.bf16 %v852_v10, %v852_v10  ;;  %v10412_v5 = vld [vmem:[%s11907_s28 + $0xbc] sm:$0x1]  ;;  %v14839_v43 = vpop.permute.xlu1 %5397 }
 0x21e   : > { %v14792_v18 = vpop.f32.mrf.mxu0  ;;  %3231 = vrot.lane.b32.xlu0 %v11520_v17, %s11841_s30  ;;  %19171 = vst [vmem:[#allocation7_spill] sm:$0xff] %v14839_v43 }
 0x21f   : > { %19164 = vst [vmem:[#allocation38_spill] sm:$0xff] %v14792_v18  ;;  %v787_v24 = vmul.f32 %v14792_v18, %v14712_v44  ;;  %v3076_v1 = vpop.f32.mrf.mxu1  ;;  %1013 = vst.msk [vmem:[%s14736_s12 + $0x14] sm:$0xf] %vm1007_vm1, %v11281_v45  ;;  %v10409_v45 = vld [vmem:[%s11907_s28 + $0xac] sm:$0x1] }
 0x220   : > { %v14804_v23 = vpop.f32.mrf.mxu0  ;;  %v15246_v18 = vld [vmem:[%s11907_s28 + $0xe0] sm:$0xe] }
 0x221   : > { %19166 = vst [vmem:[#allocation65_spill] sm:$0xff] %v14804_v23  ;;  %v825_v56 = vadd.f32 %v14717_v12, %v787_v24  ;;  %v785_v35 = vmul.f32 %v14712_v44, %v14804_v23  ;;  %v11521_v28 = vpop.f32.mrf.mxu1  ;;  %v10407_v24 = vld [vmem:[%s11907_s28 + $0xa4] sm:$0xe] }
 0x222   : > { %v14809_v63 = vpop.f32.mrf.mxu0  ;;  %3227 = vrot.lane.b32.xlu0 %v3076_v1, %s11841_s30  ;;  %3233 = vrot.lane.b32.xlu1 %v11521_v28, %s11841_s30  ;;  %v4537_v1 = vrot.slane %v10408_v32, 5  ;;  %v4547_v28 = vrot.slane %v10412_v5, 5  ;;  %v4540_v5 = vrot.slane %v10409_v45, 5 }
 0x223   : > { %19167 = vst [vmem:[#allocation41_spill] sm:$0xff] %v14809_v63  ;;  %v857_v31 = vmax.f32 %v825_v56, 0.0  ;;  %v823_v25 = vadd.f32 %v14717_v12, %v785_v35  ;;  %v788_v0 = vmul.f32 %v14809_v63, %v14712_v44  ;;  %v3079_v62 = vpop.f32.mrf.mxu1  ;;  %v4546_v35 = vrot.slane %v4544_v29, 4 }
 0x224   : > { %v14824_v27 = vpop.f32.mrf.mxu0 }
 0x225   : > { %v11286_v33 = vpack.c.bf16 %v857_v31, %v857_v31  ;;  %v855_v48 = vmax.f32 %v823_v25, 0.0  ;;  %v826_v20 = vadd.f32 %v14717_v12, %v788_v0  ;;  %19170 = vst [vmem:[#allocation35_spill] sm:$0xff] %v14824_v27  ;;  %v11524_v42 = vpop.f32.mrf.mxu1  ;;  %v786_v6 = vmul.f32 %v14712_v44, %v14824_v27  ;;  %v14848_v0 = vpop.permute.xlu0 %5399  ;;  %v10464_v27 = vld [vmem:[%s11907_s28 + $0xb8] sm:$0x1] }
 0x226   : > { %3229 = vrot.lane.b32.xlu1 %v3079_v62, %s11841_s30  ;;  %3239 = vrot.lane.b32.xlu0 %v11524_v42, %s11841_s30  ;;  %19173 = vst [vmem:[#allocation43_spill] sm:$0xff] %v14848_v0  ;;  %v10413_v62 = vld [vmem:[%s11907_s28 + $0xc4] sm:$0xe]  ;;  %v10415_v42 = vld [vmem:[%s11907_s28 + $0xcc] sm:$0x1] }
 0x227   : > { %1018 = vst.msk [vmem:[%s14736_s12 + $0x28] sm:$0xf] %vm1007_vm1, %v11286_v33  ;;  %v11284_v3 = vpack.c.bf16 %v855_v48, %v855_v48  ;;  %v858_v4 = vmax.f32 %v826_v20, 0.0  ;;  %v3092_v17 = vpop.f32.mrf.mxu1  ;;  %v824_v36 = vadd.f32 %v14717_v12, %v786_v6  ;;  %v10447_v20 = vrot.slane %v10407_v24, 9 }
 0x228   : > { %v4539_v6 = vrot.slane %v4537_v1, 4  ;;  %v14872_v24 = vsel %vm13496_vm12, %v4546_v35, %v4547_v28 }
 0x229   : > { %1016 = vst.msk [vmem:[%s14736_s12 + $0x20] sm:$0xf] %vm1007_vm1, %v11284_v3  ;;  %v11287_v10 = vpack.c.bf16 %v858_v4, %v858_v4  ;;  %v11525_v56 = vpop.f32.mrf.mxu1  ;;  %v856_v31 = vmax.f32 %v824_v36, 0.0  ;;  %v14868_v36 = vsel %vm13496_vm12, %v10448_v26, %v4544_v29 }
 0x22a   : > { %3235 = vrot.lane.b32.xlu0 %v3092_v17, %s11841_s30  ;;  %3241 = vrot.lane.b32.xlu1 %v11525_v56, %s11841_s30  ;;  %v4553_v56 = vrot.slane %v4551_v15, 4 }
 0x22b   : > { %v14846_v25 = vpop.f32.mrf.mxu0  ;;  %1019 = vst.msk [vmem:[%s14736_s12 + $0x2c] sm:$0xf] %vm1007_vm1, %v11287_v10  ;;  %v3095_v48 = vpop.f32.mrf.mxu1  ;;  %v11285_v21 = vpack.c.bf16 %v856_v31, %v856_v31  ;;  %v10449_v10 = vrot.slane %v10413_v62, 9  ;;  %v14887_v62 = vsel %vm13496_vm12, %v10447_v20, %v4537_v1 }
 0x22c   : > { %19172 = vst [vmem:[#allocation42_spill] sm:$0xff] %v14846_v25  ;;  %v791_v33 = vmul.f32 %v14846_v25, %v14712_v44  ;;  %v14878_v31 = vpop.permute.xlu1 %5401 }
 0x22d   : > { %v14858_v32 = vpop.f32.mrf.mxu0  ;;  %v11528_v17 = vpop.f32.mrf.mxu1  ;;  %1017 = vst.msk [vmem:[%s14736_s12 + $0x24] sm:$0xf] %vm1007_vm1, %v11285_v21  ;;  %19176 = vst [vmem:[#allocation49_spill] sm:$0xff] %v14878_v31  ;;  %v4565_v21 = vrot.slane %v14861_v53, 5  ;;  %v14904_v53 = vsel %vm13496_vm12, %v10449_v10, %v4551_v15  ;;  %v14921_v15 = vld [vmem:[%s11907_s28 + $0x108] sm:$0xf] }
 0x22e   : > { %19174 = vst [vmem:[#allocation59_spill] sm:$0xff] %v14858_v32  ;;  %v829_v3 = vadd.f32 %v14717_v12, %v791_v33  ;;  %v789_v4 = vmul.f32 %v14712_v44, %v14858_v32  ;;  %3237 = vrot.lane.b32.xlu1 %v3095_v48, %s11841_s30  ;;  %3247 = vrot.lane.b32.xlu0 %v11528_v17, %s11841_s30  ;;  %v4554_v33 = vrot.slane %v10415_v42, 5  ;;  %v14892_v48 = vpop.permute.xlu0 %5403 }
 0x22f   : > { %v14876_v45 = vpop.f32.mrf.mxu0  ;;  %v3108_v28 = vpop.f32.mrf.mxu1  ;;  %19178 = vst [vmem:[#allocation24_spill] sm:$0xff] %v14892_v48  ;;  %v14896_v42 = vsel %vm13496_vm12, %v4539_v6, %v4540_v5  ;;  %v4579_v48 = vrot.slane %v14921_v15, 5 }
 0x230   : > { %19175 = vst [vmem:[#allocation12_spill] sm:$0xff] %v14876_v45  ;;  %v861_v29 = vmax.f32 %v829_v3, 0.0  ;;  %v827_v26 = vadd.f32 %v14717_v12, %v789_v4  ;;  %v792_v35 = vmul.f32 %v14876_v45, %v14712_v44  ;;  %v10419_v3 = vld [vmem:[%s11907_s28 + $0xe4] sm:$0xe]  ;;  %v14935_v52 = vpop.permute.xlu1 %5405 }
 0x231   : > { %v14890_v39 = vpop.f32.mrf.mxu0  ;;  %v11529_v1 = vpop.f32.mrf.mxu1  ;;  %19181 = vst [vmem:[#allocation52_spill] sm:$0xff] %v14935_v52 }
 0x232   : > { %19177 = vst [vmem:[#allocation50_spill] sm:$0xff] %v14890_v39  ;;  %v11290_v4 = vpack.c.bf16 %v861_v29, %v861_v29  ;;  %v859_v17 = vmax.f32 %v827_v26, 0.0  ;;  %v830_v61 = vadd.f32 %v14717_v12, %v792_v35  ;;  %v790_v6 = vmul.f32 %v14712_v44, %v14890_v39  ;;  %3243 = vrot.lane.b32.xlu0 %v3108_v28, %s11841_s30  ;;  %v14918_v26 = vld [vmem:[%s11907_s28 + $0xd8] sm:$0xf]  ;;  %v14954_v31 = vpop.permute.xlu0 %5407 }
 0x233   : > { %v14909_v5 = vpop.f32.mrf.mxu0  ;;  %3249 = vrot.lane.b32.xlu1 %v11529_v1, %s11841_s30  ;;  %v14915_v29 = vsel %vm13496_vm12, %v4553_v56, %v4554_v33  ;;  %v3111_v20 = vpop.f32.mrf.mxu1  ;;  %v10451_v56 = vrot.slane %v10419_v3, 9  ;;  %v4567_v33 = vrot.slane %v4565_v21, 4  ;;  %19183 = vst [vmem:[#allocation17_spill] sm:$0xff] %v14954_v31 }
 0x234   : > { %19179 = vst [vmem:[#allocation27_spill] sm:$0xff] %v14909_v5  ;;  %1022 = vst.msk [vmem:[%s14736_s12 + $0x38] sm:$0xf] %vm1007_vm1, %v11290_v4  ;;  %v11288_v10 = vpack.c.bf16 %v859_v17, %v859_v17  ;;  %v862_v35 = vmax.f32 %v830_v61, 0.0  ;;  %v795_v28 = vmul.f32 %v14909_v5, %v14712_v44  ;;  %v828_v57 = vadd.f32 %v14717_v12, %v790_v6  ;;  %v14938_v17 = vld [vmem:[%s11907_s28 + $0xdc] sm:$0x1] }
 0x235   : > { %v14933_v46 = vpop.f32.mrf.mxu0  ;;  %v4568_v4 = vrot.slane %v10421_v19, 5  ;;  %v14941_v61 = vld [vmem:[%s11907_s28 + $0xf8] sm:$0xf]  ;;  %v4558_v19 = vrot.slane %v14918_v26, 5 }
 0x236   : > { %19180 = vst [vmem:[#allocation40_spill] sm:$0xff] %v14933_v46  ;;  %1020 = vst.msk [vmem:[%s14736_s12 + $0x30] sm:$0xf] %vm1007_vm1, %v11288_v10  ;;  %v11291_v3 = vpack.c.bf16 %v862_v35, %v862_v35  ;;  %v833_v1 = vadd.f32 %v14717_v12, %v795_v28  ;;  %v793_v6 = vmul.f32 %v14712_v44, %v14933_v46  ;;  %v11532_v9 = vpop.f32.mrf.mxu1  ;;  %v860_v2 = vmax.f32 %v828_v57, 0.0  ;;  %v10425_v35 = vld [vmem:[%s11907_s28 + $0x104] sm:$0xe] }
 0x237   : > { %v14952_v14 = vpop.f32.mrf.mxu0  ;;  %3245 = vrot.lane.b32.xlu1 %v3111_v20, %s11841_s30  ;;  %3255 = vrot.lane.b32.xlu0 %v11532_v9, %s11841_s30  ;;  %v10450_v10 = vrot.slane %v14930_v41, 9  ;;  %v10427_v28 = vld [vmem:[%s11907_s28 + $0x10c] sm:$0x1]  ;;  %v14968_v20 = vsel %vm13496_vm12, %v10451_v56, %v4565_v21  ;;  %v4561_v9 = vrot.slane %v14938_v17, 5  ;;  %v4572_v41 = vrot.slane %v14941_v61, 5  ;;  %v14985_v61 = vpop.permute.xlu1 %5409 }
 0x238   : > { %19182 = vst [vmem:[#allocation53_spill] sm:$0xff] %v14952_v14  ;;  %1023 = vst.msk [vmem:[%s14736_s12 + $0x3c] sm:$0xf] %vm1007_vm1, %v11291_v3  ;;  %v865_v26 = vmax.f32 %v833_v1, 0.0  ;;  %v831_v15 = vadd.f32 %v14717_v12, %v793_v6  ;;  %v796_v57 = vmul.f32 %v14952_v14, %v14712_v44  ;;  %v3124_v52 = vpop.f32.mrf.mxu1  ;;  %v11289_v31 = vpack.c.bf16 %v860_v2, %v860_v2  ;;  %v10422_v3 = vld [vmem:[%s11907_s28 + $0xf4] sm:$0xe] }
 0x239   : > { %v14972_v0 = vpop.f32.mrf.mxu0  ;;  %v14976_v1 = vsel %vm13496_vm12, %v4567_v33, %v4568_v4  ;;  %v10424_v6 = vld [vmem:[%s11907_s28 + $0xfc] sm:$0x1]  ;;  %v4560_v60 = vrot.slane %v4558_v19, 4  ;;  %v10453_v43 = vrot.slane %v10425_v35, 9  ;;  %v4581_v17 = vrot.slane %v4579_v48, 4  ;;  %19186 = vst [vmem:[#allocation61_spill] sm:$0xff] %v14985_v61 }
 0x23a   : > { %19184 = vst [vmem:[#allocation2_spill] sm:$0xff] %v14972_v0  ;;  %v11294_v16 = vpack.c.bf16 %v865_v26, %v865_v26  ;;  %v863_v13 = vmax.f32 %v831_v15, 0.0  ;;  %v834_v21 = vadd.f32 %v14717_v12, %v796_v57  ;;  %v11533_v56 = vpop.f32.mrf.mxu1  ;;  %v4582_v30 = vrot.slane %v10427_v28, 5  ;;  %1021 = vst.msk [vmem:[%s14736_s12 + $0x34] sm:$0xf] %vm1007_vm1, %v11289_v31 }
 0x23b   : > { %v14983_v2 = vpop.f32.mrf.mxu0  ;;  %3251 = vrot.lane.b32.xlu0 %v3124_v52, %s11841_s30  ;;  %3257 = vrot.lane.b32.xlu1 %v11533_v56, %s11841_s30  ;;  %v794_v35 = vmul.f32 %v14712_v44, %v14972_v0  ;;  %v10452_v15 = vrot.slane %v10422_v3, 9  ;;  %v4574_v52 = vrot.slane %v4572_v41, 4  ;;  %v4575_v57 = vrot.slane %v10424_v6, 5  ;;  %v14998_v56 = vld [vmem:[%s11907_s28 + $0x128] sm:$0xf] }
 0x23c   : > { %19185 = vst [vmem:[#allocation58_spill] sm:$0xff] %v14983_v2  ;;  %1026 = vst.msk [vmem:[%s14736_s12 + $0x48] sm:$0xf] %vm1007_vm1, %v11294_v16  ;;  %v11292_v33 = vpack.c.bf16 %v863_v13, %v863_v13  ;;  %v866_v4 = vmax.f32 %v834_v21, 0.0  ;;  %v799_v31 = vmul.f32 %v14983_v2, %v14712_v44  ;;  %v3127_v28 = vpop.f32.mrf.mxu1  ;;  %v15002_v13 = vpop.permute.xlu0 %5411  ;;  %v15006_v16 = vsel %vm13496_vm12, %v10450_v10, %v4558_v19  ;;  %v15009_v21 = vld [vmem:[%s11907_s28 + $0x118] sm:$0xf] }
 0x23d   : > { %v15000_v61 = vpop.f32.mrf.mxu0  ;;  %19188 = vst [vmem:[#allocation11_spill] sm:$0xff] %v15002_v13  ;;  %v832_v26 = vadd.f32 %v14717_v12, %v794_v35  ;;  %v15017_v49 = vsel %vm13496_vm12, %v4560_v60, %v4561_v9  ;;  %v15021_v13 = vsel %vm13496_vm12, %v10453_v43, %v4579_v48  ;;  %v15025_v19 = vsel %vm13496_vm12, %v4581_v17, %v4582_v30  ;;  %v10431_v10 = vld [vmem:[%s11907_s28 + $0x124] sm:$0xe]  ;;  %v10433_v60 = vld [vmem:[%s11907_s28 + $0x12c] sm:$0x1] }
 0x23e   : > { %19187 = vst [vmem:[#allocation67_spill] sm:$0xff] %v15000_v61  ;;  %1024 = vst.msk [vmem:[%s14736_s12 + $0x40] sm:$0xf] %vm1007_vm1, %v11292_v33  ;;  %v11295_v3 = vpack.c.bf16 %v866_v4, %v866_v4  ;;  %v837_v6 = vadd.f32 %v14717_v12, %v799_v31  ;;  %v797_v33 = vmul.f32 %v14712_v44, %v15000_v61  ;;  %v4593_v9 = vrot.slane %v14998_v56, 5  ;;  %v15096_v14 = vld [vmem:[%s11907_s28 + $0xa4] sm:$0xf] }
 0x23f   : > { %v11536_v47 = vpop.f32.mrf.mxu1  ;;  %v15030_v4 = vpop.f32.mrf.mxu0  ;;  %3253 = vrot.lane.b32.xlu1 %v3127_v28, %s11841_s30  ;;  %v864_v43 = vmax.f32 %v832_v26, 0.0  ;;  %v15042_v35 = vsel %vm13496_vm12, %v10452_v15, %v4572_v41  ;;  %v15046_v31 = vsel %vm13496_vm12, %v4574_v52, %v4575_v57  ;;  %v4596_v57 = vrot.slane %v10433_v60, 5  ;;  %v10437_v52 = vld [vmem:[%s11907_s28 + $0x144] sm:$0xe]  ;;  %v15135_v5 = vld [vmem:[%s11907_s28 + $0x158] sm:$0xf] }
 0x240   : > { %19189 = vst [vmem:[#allocation46_spill] sm:$0xff] %v15030_v4  ;;  %3263 = vrot.lane.b32.xlu0 %v11536_v47, %s11841_s30  ;;  %1027 = vst.msk [vmem:[%s14736_s12 + $0x4c] sm:$0xf] %vm1007_vm1, %v11295_v3  ;;  %v869_v48 = vmax.f32 %v837_v6, 0.0  ;;  %v800_v30 = vmul.f32 %v15030_v4, %v14712_v44  ;;  %v835_v28 = vadd.f32 %v14717_v12, %v797_v33  ;;  %v15052_v26 = vpop.permute.xlu1 %5413  ;;  %v10455_v3 = vrot.slane %v10431_v10, 9 }
 0x241   : > { %v3140_v17 = vpop.f32.mrf.mxu1  ;;  %v15050_v56 = vpop.f32.mrf.mxu0  ;;  %19191 = vst [vmem:[#allocation14_spill] sm:$0xff] %v15052_v26  ;;  %v15055_v6 = vld [vmem:[%s11907_s28 + $0x148] sm:$0xf]  ;;  %v11293_v37 = vpack.c.bf16 %v864_v43, %v864_v43  ;;  %v10428_v33 = vld [vmem:[%s11907_s28 + $0x114] sm:$0xe]  ;;  %v19207_v25 = vrot.slane %v15096_v14, 5 }
 0x242   : > { %19190 = vst [vmem:[#allocation47_spill] sm:$0xff] %v15050_v56  ;;  %v11298_v50 = vpack.c.bf16 %v869_v48, %v869_v48  ;;  %v838_v41 = vadd.f32 %v14717_v12, %v800_v30  ;;  %v867_v47 = vmax.f32 %v835_v28, 0.0  ;;  %v798_v10 = vmul.f32 %v14712_v44, %v15050_v56  ;;  %v15065_v43 = vpop.permute.xlu0 %5415  ;;  %v10430_v28 = vld [vmem:[%s11907_s28 + $0x11c] sm:$0x1] }
 0x243   : > { %v11537_v15 = vpop.f32.mrf.mxu1  ;;  %v15063_v26 = vpop.f32.mrf.mxu0  ;;  %19193 = vst [vmem:[#allocation29_spill] sm:$0xff] %v15065_v43  ;;  %v4595_v30 = vrot.slane %v4593_v9, 4  ;;  %1025 = vst.msk [vmem:[%s14736_s12 + $0x44] sm:$0xf] %vm1007_vm1, %v11293_v37  ;;  %v15090_v37 = vsel %vm13496_vm12, %v10455_v3, %v4593_v9  ;;  %v4589_v0 = vrot.slane %v10430_v28, 5 }
 0x244   : > { %19192 = vst [vmem:[#allocation26_spill] sm:$0xff] %v15063_v26  ;;  %3259 = vrot.lane.b32.xlu0 %v3140_v17, %s11841_s30  ;;  %3265 = vrot.lane.b32.xlu1 %v11537_v15, %s11841_s30  ;;  %1030 = vst.msk [vmem:[%s14736_s12 + $0x58] sm:$0xf] %vm1007_vm1, %v11298_v50  ;;  %v870_v55 = vmax.f32 %v838_v41, 0.0  ;;  %v4607_v17 = vrot.slane %v15055_v6, 5  ;;  %v11296_v48 = vpack.c.bf16 %v867_v47, %v867_v47  ;;  %v10454_v50 = vrot.slane %v10428_v33, 9  ;;  %v15103_v33 = vpop.permute.xlu1 %5417 }
 0x245   : > { %v3143_v43 = vpop.f32.mrf.mxu1  ;;  %v15081_v15 = vld [vmem:[%s11907_s28 + $0x138] sm:$0xf]  ;;  %v836_v56 = vadd.f32 %v14717_v12, %v798_v10  ;;  %v803_v60 = vmul.f32 %v15063_v26, %v14712_v44  ;;  %v15086_v4 = vpop.f32.mrf.mxu0  ;;  %v19195_v41 = vrot.slane %v15009_v21, 5  ;;  %v10439_v6 = vld [vmem:[%s11907_s28 + $0x14c] sm:$0x1]  ;;  %v10457_v10 = vrot.slane %v10437_v52, 9 }
 0x246   : > { %19194 = vst [vmem:[#allocation48_spill] sm:$0xff] %v15086_v4  ;;  %v11299_v2 = vpack.c.bf16 %v870_v55, %v870_v55  ;;  %1028 = vst.msk [vmem:[%s14736_s12 + $0x50] sm:$0xf] %vm1007_vm1, %v11296_v48  ;;  %v15109_v55 = vsel %vm13496_vm12, %v4595_v30, %v4596_v57  ;;  %v10434_v52 = vld [vmem:[%s11907_s28 + $0x134] sm:$0xe]  ;;  %v4600_v48 = vrot.slane %v15081_v15, 5  ;;  %v15122_v46 = vpop.permute.xlu0 %5419 }
 0x247   : > { %v4588_v61 = vrot.slane %v19195_v41, 4  ;;  %v11540_v47 = vpop.f32.mrf.mxu1  ;;  %v868_v26 = vmax.f32 %v836_v56, 0.0  ;;  %v841_v9 = vadd.f32 %v14717_v12, %v803_v60  ;;  %v15101_v3 = vpop.f32.mrf.mxu0  ;;  %19197 = vst [vmem:[#allocation10_spill] sm:$0xff] %v15103_v33  ;;  %v801_v56 = vmul.f32 %v14712_v44, %v15086_v4  ;;  %19199 = vst [vmem:[#allocation60_spill] sm:$0xff] %v15122_v46  ;;  %v15131_v4 = vld [vmem:[%s11907_s28 + $0xa0] sm:$0xe] }
 0x248   : > { %19196 = vst [vmem:[#allocation56_spill] sm:$0xff] %v15101_v3  ;;  %3261 = vrot.lane.b32.xlu1 %v3143_v43, %s11841_s30  ;;  %3271 = vrot.lane.b32.xlu0 %v11540_v47, %s11841_s30  ;;  %1031 = vst.msk [vmem:[%s14736_s12 + $0x5c] sm:$0xf] %vm1007_vm1, %v11299_v2  ;;  %v804_v60 = vmul.f32 %v15101_v3, %v14712_v44  ;;  %v4609_v28 = vrot.slane %v4607_v17, 4  ;;  %v4610_v41 = vrot.slane %v10439_v6, 5  ;;  %v19200_v15 = vrot.slane %v15009_v21, 5 }
 0x249   : > { %v3156_v43 = vpop.f32.mrf.mxu1  ;;  %v10436_v47 = vld [vmem:[%s11907_s28 + $0x13c] sm:$0x1]  ;;  %v11297_v33 = vpack.c.bf16 %v868_v26, %v868_v26  ;;  %v873_v57 = vmax.f32 %v841_v9, 0.0  ;;  %v15120_v30 = vpop.f32.mrf.mxu0  ;;  %v839_v6 = vadd.f32 %v14717_v12, %v801_v56  ;;  %v15141_v46 = vsel %vm13496_vm12, %v4588_v61, %v4589_v0 }
 0x24a   : > { %19198 = vst [vmem:[#allocation30_spill] sm:$0xff] %v15120_v30  ;;  %v15128_v2 = vsel %vm13496_vm12, %v10454_v50, %v19200_v15  ;;  %v842_v26 = vadd.f32 %v14717_v12, %v804_v60  ;;  %v15145_v21 = vsel %vm13496_vm12, %v10457_v10, %v4607_v17  ;;  %v10456_v50 = vrot.slane %v10434_v52, 9  ;;  %v10461_v10 = vld [vmem:[%s11907_s28 + $0xa8] sm:$0x1]  ;;  %v10440_v52 = vld [vmem:[%s11907_s28 + $0x154] sm:$0xe]  ;;  %v15191_v45 = vpop.permute.xlu0 %5471 }
 0x24b   : > { %v11541_v9 = vpop.f32.mrf.mxu1  ;;  %1029 = vst.msk [vmem:[%s14736_s12 + $0x54] sm:$0xf] %vm1007_vm1, %v11297_v33  ;;  %v11302_v15 = vpack.c.bf16 %v873_v57, %v873_v57  ;;  %v15149_v3 = vpop.f32.mrf.mxu0  ;;  %v4602_v56 = vrot.slane %v4600_v48, 4  ;;  %v4603_v60 = vrot.slane %v10436_v47, 5  ;;  %v871_v0 = vmax.f32 %v839_v6, 0.0  ;;  %19205 = vst [vmem:[#allocation28_spill] sm:$0xff] %v15191_v45 }
 0x24c   : > { %19201 = vst [vmem:[#allocation63_spill] sm:$0xff] %v15149_v3  ;;  %3267 = vrot.lane.b32.xlu0 %v3156_v43, %s11841_s30  ;;  %3273 = vrot.lane.b32.xlu1 %v11541_v9, %s11841_s30  ;;  %v874_v61 = vmax.f32 %v842_v26, 0.0  ;;  %v15155_v17 = vsel %vm13496_vm12, %v4609_v28, %v4610_v41  ;;  %v10507_v33 = vrot.slane %v15131_v4, 9  ;;  %v4614_v43 = vrot.slane %v15135_v5, 5  ;;  %v15165_v57 = vpop.permute.xlu1 %5421  ;;  %v15208_v45 = vld [vmem:[%s11907_s28 + $0xe4] sm:$0xf] }
 0x24d   : > { %v3159_v39 = vpop.f32.mrf.mxu1  ;;  %1034 = vst.msk [vmem:[%s14736_s12 + $0x68] sm:$0xf] %vm1007_vm1, %v11302_v15  ;;  %v802_v47 = vmul.f32 %v14712_v44, %v15120_v30  ;;  %19202 = vst [vmem:[#allocation68_spill] sm:$0xff] %v15165_v57  ;;  %v19203_v6 = vrot.slane %v15096_v14, 5  ;;  %v11300_v41 = vpack.c.bf16 %v871_v0, %v871_v0  ;;  %v807_v4 = vmul.f32 %v15149_v3, %v14712_v44  ;;  %v15171_v9 = vpop.f32.mrf.mxu0  ;;  %v15182_v0 = vld [vmem:[%s11907_s28 + $0x15c] sm:$0x1] }
 0x24e   : > { %v11303_v26 = vpack.c.bf16 %v874_v61, %v874_v61  ;;  %19204 = vst [vmem:[#allocation13_spill] sm:$0xff] %v15171_v9  ;;  %v15179_v57 = vsel %vm13496_vm12, %v10456_v50, %v4600_v48  ;;  %v15185_v61 = vld [vmem:[%s11907_s28 + $0xc4] sm:$0xf]  ;;  %v15197_v48 = vsel %vm13496_vm12, %v4602_v56, %v4603_v60  ;;  %v4724_v50 = vrot.slane %v10461_v10, 5 }
 0x24f   : > { %v4723_v28 = vrot.slane %v19203_v6, 4  ;;  %v11544_v5 = vpop.f32.mrf.mxu1  ;;  %v15188_v6 = vld [vmem:[%s11907_s28 + $0xb4] sm:$0xf]  ;;  %v840_v3 = vadd.f32 %v14717_v12, %v802_v47  ;;  %v10458_v30 = vrot.slane %v10440_v52, 9  ;;  %1032 = vst.msk [vmem:[%s14736_s12 + $0x60] sm:$0xf] %vm1007_vm1, %v11300_v41  ;;  %v845_v15 = vadd.f32 %v14717_v12, %v807_v4  ;;  %v15218_v47 = vpop.f32.mrf.mxu0 }
 0x250   : > { %3269 = vrot.lane.b32.xlu1 %v3159_v39, %s11841_s30  ;;  %3279 = vrot.lane.b32.xlu0 %v11544_v5, %s11841_s30  ;;  %1035 = vst.msk [vmem:[%s14736_s12 + $0x6c] sm:$0xf] %vm1007_vm1, %v11303_v26  ;;  %v4616_v39 = vrot.slane %v4614_v43, 4  ;;  %v10465_v5 = vld [vmem:[%s11907_s28 + $0xc0] sm:$0xe]  ;;  %v805_v60 = vmul.f32 %v14712_v44, %v15171_v9  ;;  %v4617_v10 = vrot.slane %v15182_v0, 5  ;;  %v15226_v0 = vsel %vm13496_vm12, %v10507_v33, %v19207_v25  ;;  %v15234_v23 = vpop.permute.xlu1 %5473 }
 0x251   : > { %v872_v56 = vmax.f32 %v840_v3, 0.0  ;;  %v15214_v52 = vld [vmem:[%s11907_s28 + $0xc8] sm:$0x1]  ;;  %v4735_v41 = vrot.slane %v15185_v61, 5  ;;  %v877_v4 = vmax.f32 %v845_v15, 0.0  ;;  %19206 = vst [vmem:[#allocation54_spill] sm:$0xff] %v15218_v47  ;;  %v3172_v32 = vpop.f32.mrf.mxu1  ;;  %v19209_v3 = vcombine.low %v14868_v36, %v14872_v24  ;;  %v15285_v58 = vpop.f32.mrf.mxu0 }
 0x252   : > { %v10462_v9 = vld [vmem:[%s11907_s28 + $0xb0] sm:$0xe]  ;;  %v15231_v26 = vld [vmem:[%s11907_s28 + $0xd4] sm:$0xf]  ;;  %v843_v63 = vadd.f32 %v14717_v12, %v805_v60  ;;  %19208 = vst [vmem:[#allocation19_spill] sm:$0xff] %v15234_v23  ;;  %v15243_v25 = vsel %vm13496_vm12, %v4723_v28, %v4724_v50  ;;  %v10509_v33 = vrot.slane %v10465_v5, 9  ;;  %v15254_v36 = vsel %vm13496_vm12, %v10458_v30, %v4614_v43 }
 0x253   : > { %v11301_v15 = vpack.c.bf16 %v872_v56, %v872_v56  ;;  %v15249_v56 = vld [vmem:[%s11907_s28 + $0xe8] sm:$0x1]  ;;  %v11306_v23 = vpack.c.bf16 %v877_v4, %v877_v4  ;;  %v15258_v24 = vld [vmem:[%s11907_s28 + $0xd0] sm:$0xe]  ;;  %v15261_v28 = vld [vmem:[%s11907_s28 + $0x104] sm:$0xf]  ;;  %v808_v5 = vmul.f32 %v15218_v47, %v14712_v44  ;;  %v11545_v38 = vpop.f32.mrf.mxu1  ;;  %v806_v34 = vmul.f32 %v14712_v44, %v15285_v58 }
 0x254   : > { %5561 = vrot.lane.b32.xlu1 %v19209_v3, %s11843_s8  ;;  %3275 = vrot.lane.b32.xlu0 %v3172_v32, %s11841_s30  ;;  %v4738_v32 = vrot.slane %v15214_v52, 5  ;;  %v875_v50 = vmax.f32 %v843_v63, 0.0  ;;  %v15267_v3 = vpop.permute.xlu0 %5475  ;;  %v4737_v4 = vrot.slane %v4735_v41, 4  ;;  %v10508_v60 = vrot.slane %v10462_v9, 9  ;;  %v15279_v47 = vld [vmem:[%s11907_s28 + $0xd8] sm:$0x1] }
 0x255   : > { %1033 = vst.msk [vmem:[%s14736_s12 + $0x64] sm:$0xf] %vm1007_vm1, %v11301_v15  ;;  %19210 = vst [vmem:[#allocation62_spill] sm:$0xff] %v15267_v3  ;;  %v19211_v30 = vrot.slane %v15188_v6, 5  ;;  %v4731_v15 = vrot.slane %v10464_v27, 5  ;;  %v10511_v63 = vrot.slane %v15246_v18, 9  ;;  %v3175_v8 = vpop.f32.mrf.mxu1 }
 0x256   : > { %1038 = vst.msk [vmem:[%s14736_s12 + $0x78] sm:$0xf] %vm1007_vm1, %v11306_v23  ;;  %v15282_v3 = vld [vmem:[%s11907_s28 + $0x100] sm:$0xe]  ;;  %v11304_v9 = vpack.c.bf16 %v875_v50, %v875_v50  ;;  %19212 = vst [vmem:[#allocation69_spill] sm:$0xff] %v15285_v58  ;;  %v19213_v23 = vcombine.low %v14887_v62, %v14896_v42  ;;  %v19214_v27 = vrot.slane %v15208_v45, 5  ;;  %v15303_v62 = vsel %vm13496_vm12, %v10509_v33, %v4735_v41 }
 0x257   : > { %v4730_v43 = vrot.slane %v19211_v30, 4  ;;  %v846_v30 = vadd.f32 %v14717_v12, %v808_v5  ;;  %v4752_v52 = vrot.slane %v15249_v56, 5  ;;  %v10510_v54 = vrot.slane %v15258_v24, 9  ;;  %v15309_v42 = vld [vmem:[%s11907_s28 + $0xf0] sm:$0xe] }
 0x258   : > { %5559 = vrot.lane.b32.xlu0 %v19213_v23, %s11843_s8  ;;  %3281 = vrot.lane.b32.xlu1 %v11545_v38, %s11841_s30  ;;  %v4751_v18 = vrot.slane %v19214_v27, 4  ;;  %v4763_v50 = vrot.slane %v15261_v28, 5  ;;  %v15299_v5 = vsel %vm13496_vm12, %v4616_v39, %v4617_v10  ;;  %v15306_v38 = vld [vmem:[%s11907_s28 + $0x108] sm:$0x1]  ;;  %1036 = vst.msk [vmem:[%s14736_s12 + $0x70] sm:$0xf] %vm1007_vm1, %v11304_v9  ;;  %v15314_v23 = vpop.permute.xlu1 %5477  ;;  %v15327_v56 = vsel %vm13496_vm12, %v4737_v4, %v4738_v32  ;;  %v15346_v4 = vpop.permute.xlu0 %5479 }
 0x259   : > { %v878_v24 = vmax.f32 %v846_v30, 0.0  ;;  %19215 = vst [vmem:[#allocation70_spill] sm:$0xff] %v15314_v23  ;;  %v19216_v39 = vrot.slane %v15231_v26, 5  ;;  %v4745_v41 = vrot.slane %v15279_v47, 5  ;;  %v10513_v33 = vrot.slane %v15282_v3, 9  ;;  %19220 = vst [vmem:[#allocation73_spill] sm:$0xff] %v15346_v4 }
 0x25a   : > { %v15321_v27 = vld [vmem:[%s11907_s28 + $0x124] sm:$0xf]  ;;  %v19218_v9 = vrot.slane %v15188_v6, 5  ;;  %v15337_v47 = vsel %vm13496_vm12, %v4730_v43, %v4731_v15  ;;  %v10476_v3 = vld [vmem:[%s11907_s28 + $0xf8] sm:$0x1]  ;;  %v4765_v43 = vrot.slane %v4763_v50, 4  ;;  %v844_v23 = vadd.f32 %v14717_v12, %v806_v34 }
 0x25b   : > { %v4744_v10 = vrot.slane %v19216_v39, 4  ;;  %19217 = vst [vmem:[#allocation71_spill] sm:$0xff] %v15321_v27  ;;  %v15341_v39 = vld [vmem:[%s11907_s28 + $0x120] sm:$0xe]  ;;  %v15344_v44 = vld [vmem:[%s11907_s28 + $0x114] sm:$0xf]  ;;  %v11307_v32 = vpack.c.bf16 %v878_v24, %v878_v24  ;;  %v19226_v58 = vcombine.low %v14968_v20, %v14976_v1  ;;  %v15426_v1 = vsel %vm13496_vm12, %v10513_v33, %v4763_v50 }
 0x25c   : > { %v15333_v30 = vsel %vm13496_vm12, %v10508_v60, %v19218_v9  ;;  %19219 = vst [vmem:[#allocation72_spill] sm:$0xff] %v15344_v44  ;;  %v19221_v60 = vcombine.low %v14904_v53, %v14915_v29  ;;  %3277 = vrot.lane.b32.xlu1 %v3175_v8, %s11841_s30  ;;  %v4766_v15 = vrot.slane %v15306_v38, 5  ;;  %v10512_v9 = vrot.slane %v15309_v42, 9  ;;  %v10485_v8 = vld [vmem:[%s11907_s28 + $0x128] sm:$0x1]  ;;  %v15397_v42 = vpop.permute.xlu1 %5481 }
 0x25d   : > { %v19222_v53 = vrot.slane %v15273_v59, 5  ;;  %v15365_v38 = vld [vmem:[%s11907_s28 + $0x144] sm:$0xf]  ;;  %1039 = vst.msk [vmem:[%s14736_s12 + $0x7c] sm:$0xf] %vm1007_vm1, %v11307_v32  ;;  %v4759_v12 = vrot.slane %v10476_v3, 5 }
 0x25e   : > { %5563 = vrot.lane.b32.xlu0 %v19221_v60, %s11843_s8  ;;  %v4777_v60 = vrot.slane %v15321_v27, 5  ;;  %19223 = vst [vmem:[#allocation74_spill] sm:$0xff] %v15365_v38  ;;  %v10515_v34 = vrot.slane %v15341_v39, 9  ;;  %v15372_v24 = vld [vmem:[%s11907_s28 + $0x134] sm:$0xf]  ;;  %v876_v4 = vmax.f32 %v844_v23, 0.0  ;;  %v15386_v39 = vsel %vm13496_vm12, %v4751_v18, %v4752_v52 }
 0x25f   : > { %v4758_v29 = vrot.slane %v19222_v53, 4  ;;  %v19224_v40 = vrot.slane %v15208_v45, 5  ;;  %v15389_v32 = vld [vmem:[%s11907_s28 + $0x110] sm:$0xe]  ;;  %v15392_v23 = vld [vmem:[%s11907_s28 + $0x118] sm:$0x1] }
 0x260   : > { %v15395_v53 = vld [vmem:[%s11907_s28 + $0x140] sm:$0xe]  ;;  %19225 = vst [vmem:[#allocation75_spill] sm:$0xff] %v15397_v42  ;;  %v19228_v52 = vrot.slane %v15231_v26, 5  ;;  %v4780_v18 = vrot.slane %v10485_v8, 5  ;;  %v4791_v42 = vrot.slane %v15365_v38, 5 }
 0x261   : > { %v15382_v3 = vsel %vm13496_vm12, %v10511_v63, %v19224_v40  ;;  %v19227_v40 = vcombine.low %v15006_v16, %v15017_v49  ;;  %v15418_v20 = vld [vmem:[%s11907_s28 + $0x164] sm:$0xf]  ;;  %v15422_v49 = vsel %vm13496_vm12, %v4744_v10, %v4745_v41  ;;  %v15429_v16 = vld [vmem:[%s11907_s28 + $0x130] sm:$0xe]  ;;  %v15432_v8 = vld [vmem:[%s11907_s28 + $0x138] sm:$0x1] }
 0x262   : > { %5567 = vrot.lane.b32.xlu0 %v19226_v58, %s11843_s8  ;;  %v15411_v63 = vsel %vm13496_vm12, %v10510_v54, %v19228_v52  ;;  %19229 = vst [vmem:[#allocation76_spill] sm:$0xff] %v15418_v20  ;;  %v11305_v58 = vpack.c.bf16 %v876_v4, %v876_v4  ;;  %19230 = vst [vmem:[#allocation77_spill] sm:$0xff] %v15422_v49  ;;  %v4779_v54 = vrot.slane %v4777_v60, 4  ;;  %v15435_v52 = vpop.permute.xlu0 %5483  ;;  %v10514_v10 = vrot.slane %v15389_v32, 9  ;;  %v15462_v32 = vld [vmem:[%s11907_s28 + $0x160] sm:$0xe] }
 0x263   : > { %5565 = vrot.lane.b32.xlu1 %v19227_v40, %s11843_s8  ;;  %19231 = vst [vmem:[#allocation78_spill] sm:$0xff] %v15435_v52  ;;  %v15439_v4 = vsel %vm13496_vm12, %v4765_v43, %v4766_v15  ;;  %v19232_v41 = vrot.slane %v15344_v44, 5  ;;  %v4773_v33 = vrot.slane %v15392_v23, 5  ;;  %v19234_v40 = vrot.slane %v15273_v59, 5  ;;  %v10503_v27 = vld [vmem:[%s11907_s28 + $0x188] sm:$0x1] }
 0x264   : > { %1037 = vst.msk [vmem:[%s14736_s12 + $0x74] sm:$0xf] %vm1007_vm1, %v11305_v58  ;;  %v15458_v43 = vsel %vm13496_vm12, %v4758_v29, %v4759_v12  ;;  %v10517_v15 = vrot.slane %v15395_v53, 9  ;;  %v4805_v23 = vrot.slane %v15418_v20, 5  ;;  %v19237_v58 = vcombine.low %v15021_v13, %v15025_v19  ;;  %v15480_v20 = vld [vmem:[%s11907_s28 + $0x174] sm:$0xf] }
 0x265   : > { %v4772_v50 = vrot.slane %v19232_v41, 4  ;;  %v15454_v52 = vsel %vm13496_vm12, %v10512_v9, %v19234_v40  ;;  %19236 = vst [vmem:[#allocation81_spill] sm:$0xff] %v15458_v43  ;;  %v15466_v41 = vld [vmem:[%s11907_s28 + $0x184] sm:$0xf]  ;;  %v19238_v9 = vcombine.low %v15042_v35, %v15046_v31  ;;  %v4793_v29 = vrot.slane %v4791_v42, 4  ;;  %19239 = vst [vmem:[#allocation82_spill] sm:$0xff] %v15480_v20 }
 0x266   : > { %19235 = vst [vmem:[#allocation80_spill] sm:$0xff] %v15454_v52  ;;  %5571 = vrot.lane.b32.xlu0 %v19237_v58, %s11843_s8  ;;  %v4794_v12 = vrot.slane %v15414_v7, 5  ;;  %v10516_v53 = vrot.slane %v15429_v16, 9  ;;  %v4787_v40 = vrot.slane %v15432_v8, 5  ;;  %v15484_v13 = vsel %vm13496_vm12, %v10515_v34, %v4777_v60  ;;  %v10497_v7 = vld [vmem:[%s11907_s28 + $0x168] sm:$0x1]  ;;  %v15495_v8 = vpop.permute.xlu1 %5485 }
 0x267   : > { %5569 = vrot.lane.b32.xlu1 %v19238_v9, %s11843_s8  ;;  %19240 = vst [vmem:[#allocation83_spill] sm:$0xff] %v15484_v13  ;;  %v15488_v19 = vsel %vm13496_vm12, %v4779_v54, %v4780_v18  ;;  %v19242_v35 = vrot.slane %v15372_v24, 5  ;;  %v10492_v58 = vld [vmem:[%s11907_s28 + $0x150] sm:$0xe]  ;;  %v4798_v16 = vrot.slane %v15446_v11, 5  ;;  %19243 = vst [vmem:[#allocation85_spill] sm:$0xff] %v15495_v8  ;;  %v19245_v49 = vcombine.low %v15090_v37, %v15109_v55 }
 0x268   : > { %19241 = vst [vmem:[#allocation84_spill] sm:$0xff] %v15488_v19  ;;  %v10519_v34 = vrot.slane %v15462_v32, 9  ;;  %v10494_v18 = vld [vmem:[%s11907_s28 + $0x158] sm:$0x1]  ;;  %v10501_v54 = vld [vmem:[%s11907_s28 + $0x180] sm:$0xe]  ;;  %v15512_v32 = vpop.permute.xlu0 %5487  ;;  %v15537_v55 = vsel %vm13496_vm12, %v4772_v50, %v4773_v33 }
 0x269   : > { %v4786_v31 = vrot.slane %v19242_v35, 4  ;;  %v4819_v35 = vrot.slane %v15466_v41, 5  ;;  %v4807_v11 = vrot.slane %v4805_v23, 4  ;;  %v10498_v9 = vld [vmem:[%s11907_s28 + $0x170] sm:$0xe]  ;;  %v4812_v60 = vrot.slane %v15480_v20, 5 }
 0x26a   : > { %19244 = vst [vmem:[#allocation86_spill] sm:$0xff] %v15512_v32  ;;  %5575 = vrot.lane.b32.xlu0 %v19245_v49, %s11843_s8  ;;  %v19246_v41 = vcombine.low %v15128_v2, %v15141_v46  ;;  %v19247_v38 = vrot.slane %v15344_v44, 5  ;;  %v4808_v32 = vrot.slane %v10497_v7, 5  ;;  %v10500_v43 = vld [vmem:[%s11907_s28 + $0x178] sm:$0x1]  ;;  %v4897_v52 = vrot.slane %v15096_v14, 7  ;;  %v15546_v33 = vpop.permute.xlu1 %5489 }
 0x26b   : > { %v15533_v37 = vld [vmem:[%s11907_s28 + $0x194] sm:$0xf]  ;;  %v15541_v46 = vsel %vm13496_vm12, %v10517_v15, %v4791_v42  ;;  %v10518_v2 = vrot.slane %v10492_v58, 9  ;;  %v4800_v49 = vrot.slane %v4798_v16, 4  ;;  %v10524_v8 = vld [vmem:[%s11907_s28 + $0xa8] sm:$0x7]  ;;  %v19249_v42 = vcombine.low %v15145_v21, %v15155_v17 }
 0x26c   : > { %5573 = vrot.lane.b32.xlu1 %v19246_v41, %s11843_s8  ;;  %v15528_v20 = vsel %vm13496_vm12, %v10514_v10, %v19247_v38  ;;  %v10523_v41 = vld [vmem:[%s11907_s28 + $0xa0] sm:$0x8]  ;;  %v4801_v38 = vrot.slane %v10494_v18, 5  ;;  %v10521_v10 = vrot.slane %v10501_v54, 9  ;;  %v4821_v7 = vrot.slane %v4819_v35, 4  ;;  %19248 = vst [vmem:[#allocation87_spill] sm:$0xff] %v15546_v33 }
 0x26d   : > { %v4822_v19 = vrot.slane %v10503_v27, 5  ;;  %v10520_v14 = vrot.slane %v10498_v9, 9  ;;  %v4814_v13 = vrot.slane %v4812_v60, 4  ;;  %v4815_v44 = vrot.slane %v10500_v43, 5  ;;  %v10504_v18 = vld [vmem:[%s11907_s28 + $0x190] sm:$0xe] }
 0x26e   : > { %v4826_v50 = vrot.slane %v15533_v37, 5  ;;  %5579 = vrot.lane.b32.xlu0 %v19249_v42, %s11843_s8  ;;  %v19250_v15 = vcombine.low %v15179_v57, %v15197_v48  ;;  %v15558_v27 = vsel %vm13496_vm12, %v4793_v29, %v4794_v12  ;;  %v10555_v58 = vrot.slane %v10523_v41, 11  ;;  %v10506_v48 = vld [vmem:[%s11907_s28 + $0x198] sm:$0x1]  ;;  %v15580_v29 = vpop.permute.xlu0 %5491 }
 0x26f   : > { %v4899_v43 = vrot.slane %v4897_v52, 4  ;;  %v4900_v9 = vrot.slane %v10524_v8, 7  ;;  %v19251_v54 = vrot.slane %v15372_v24, 5  ;;  %v15569_v21 = vsel %vm13496_vm12, %v4786_v31, %v4787_v40  ;;  %19252 = vst [vmem:[#allocation88_spill] sm:$0xff] %v15580_v29 }
 0x270   : > { %5577 = vrot.lane.b32.xlu1 %v19250_v15, %s11843_s8  ;;  %v15573_v17 = vsel %vm13496_vm12, %v10519_v34, %v4805_v23  ;;  %v15577_v57 = vsel %vm13496_vm12, %v4807_v11, %v4808_v32  ;;  %v15584_v12 = vsel %vm13496_vm12, %v10518_v2, %v4798_v16  ;;  %v15592_v23 = vsel %vm13496_vm12, %v10521_v10, %v4819_v35  ;;  %v10527_v35 = vld [vmem:[%s11907_s28 + $0xc0] sm:$0x8]  ;;  %v10525_v32 = vld [vmem:[%s11907_s28 + $0xb0] sm:$0x8]  ;;  %v10526_v10 = vld [vmem:[%s11907_s28 + $0xb8] sm:$0x7] }
 0x271   : > { %v15565_v37 = vsel %vm13496_vm12, %v10516_v53, %v19251_v54  ;;  %v15588_v53 = vsel %vm13496_vm12, %v4800_v49, %v4801_v38  ;;  %v15596_v11 = vsel %vm13496_vm12, %v4821_v7, %v4822_v19  ;;  %v15600_v40 = vsel %vm13496_vm12, %v10520_v14, %v4812_v60  ;;  %v15633_v49 = vpop.permute.xlu1 %5493  ;;  %v10531_v7 = vld [vmem:[%s11907_s28 + $0xe0] sm:$0x8] }
 0x272   : > { %v15604_v31 = vsel %vm13496_vm12, %v4814_v13, %v4815_v44  ;;  %v10522_v16 = vrot.slane %v10504_v18, 9  ;;  %v4828_v8 = vrot.slane %v4826_v50, 4  ;;  %v19253_v34 = vcombine.low %v15226_v0, %v15243_v25  ;;  %19255 = vst [vmem:[#allocation89_spill] sm:$0xff] %v15633_v49  ;;  %v15651_v18 = vpop.permute.xlu0 %5495  ;;  %v19274_v25 = vld [vmem:[#allocation84_spill] sm:$0xff] }
 0x273   : > { %v19254_v19 = vcombine.low %v15254_v36, %v15299_v5  ;;  %v15616_v60 = vsel %vm11909_vm2, %v10555_v58, %v4897_v52  ;;  %v15620_v44 = vsel %vm11909_vm2, %v4899_v43, %v4900_v9  ;;  %v4829_v13 = vrot.slane %v10506_v48, 5  ;;  %v10528_v52 = vld [vmem:[%s11907_s28 + $0xc8] sm:$0x7]  ;;  %v10529_v43 = vld [vmem:[%s11907_s28 + $0xd0] sm:$0x8]  ;;  %19256 = vst [vmem:[#allocation90_spill] sm:$0xff] %v15651_v18 }
 0x274   : > { %5631 = vrot.lane.b32.xlu0 %v19253_v34, %s11844_s9  ;;  %v4911_v0 = vrot.slane %v15185_v61, 7  ;;  %v4904_v2 = vrot.slane %v15188_v6, 7  ;;  %v4925_v14 = vrot.slane %v15208_v45, 7  ;;  %v10557_v15 = vrot.slane %v10527_v35, 11  ;;  %v10532_v58 = vld [vmem:[%s11907_s28 + $0xe8] sm:$0x7] }
 0x275   : > { %5581 = vrot.lane.b32.xlu1 %v19254_v19, %s11843_s8  ;;  %v4918_v9 = vrot.slane %v15231_v26, 7  ;;  %v19257_v54 = vcombine.low %v15303_v62, %v15327_v56  ;;  %v19258_v45 = vcombine.low %v15333_v30, %v15337_v47  ;;  %v15663_v48 = vsel %vm13496_vm12, %v10522_v16, %v4826_v50  ;;  %v10530_v19 = vld [vmem:[%s11907_s28 + $0xd8] sm:$0x7]  ;;  %v10535_v35 = vld [vmem:[%s11907_s28 + $0x100] sm:$0x8]  ;;  %v15675_v5 = vpop.permute.xlu1 %5497  ;;  %v19273_v36 = vld [vmem:[#allocation83_spill] sm:$0xff] }
 0x276   : > { %v15667_v34 = vsel %vm13496_vm12, %v4828_v8, %v4829_v13  ;;  %v4913_v26 = vrot.slane %v4911_v0, 4  ;;  %v4939_v62 = vrot.slane %v15261_v28, 7  ;;  %v4914_v56 = vrot.slane %v10528_v52, 7  ;;  %v10536_v30 = vld [vmem:[%s11907_s28 + $0x108] sm:$0x7]  ;;  %19259 = vst [vmem:[#allocation91_spill] sm:$0xff] %v15675_v5 }
 0x277   : > { %v4906_v42 = vrot.slane %v4904_v2, 4  ;;  %v4907_v6 = vrot.slane %v10526_v10, 7  ;;  %v10559_v47 = vrot.slane %v10531_v7, 11  ;;  %v4928_v50 = vrot.slane %v10532_v58, 7  ;;  %v10533_v13 = vld [vmem:[%s11907_s28 + $0xf0] sm:$0x8] }
 0x278   : > { %5635 = vrot.lane.b32.xlu0 %v19257_v54, %s11844_s9  ;;  %v10556_v54 = vrot.slane %v10525_v32, 11  ;;  %v10558_v16 = vrot.slane %v10529_v43, 11  ;;  %v4920_v38 = vrot.slane %v4918_v9, 4  ;;  %v4921_v41 = vrot.slane %v10530_v19, 7  ;;  %v19261_v52 = vld [vmem:[#allocation77_spill] sm:$0xff]  ;;  %v19263_v19 = vld [vmem:[#allocation71_spill] sm:$0xff] }
 0x279   : > { %5633 = vrot.lane.b32.xlu1 %v19258_v45, %s11844_s9  ;;  %v4927_v45 = vrot.slane %v4925_v14, 4  ;;  %v10561_v8 = vrot.slane %v10535_v35, 11  ;;  %v4932_v61 = vrot.slane %v15273_v59, 7  ;;  %v19260_v28 = vcombine.low %v15382_v3, %v15386_v39  ;;  %v10534_v43 = vld [vmem:[%s11907_s28 + $0xf8] sm:$0x7]  ;;  %v19272_v10 = vld [vmem:[#allocation76_spill] sm:$0xff] }
 0x27a   : > { %v19262_v32 = vcombine.low %v15411_v63, %v19261_v52  ;;  %v4941_v7 = vrot.slane %v4939_v62, 4  ;;  %v4942_v58 = vrot.slane %v10536_v30, 7  ;;  %v4953_v59 = vrot.slane %v19263_v19, 7  ;;  %v10539_v30 = vld [vmem:[%s11907_s28 + $0x120] sm:$0x8]  ;;  %v15707_v52 = vpop.permute.xlu0 %5499 }
 0x27b   : > { %v15691_v35 = vsel %vm11909_vm2, %v10557_v15, %v4911_v0  ;;  %v15695_v3 = vsel %vm11909_vm2, %v4913_v26, %v4914_v56  ;;  %v15699_v39 = vsel %vm11909_vm2, %v10556_v54, %v4904_v2  ;;  %v15703_v63 = vsel %vm11909_vm2, %v4906_v42, %v4907_v6  ;;  %19264 = vst [vmem:[#allocation77_spill] sm:$0xff] %v15707_v52  ;;  %v10537_v54 = vld [vmem:[%s11907_s28 + $0x110] sm:$0x8]  ;;  %v10544_v19 = vld [vmem:[%s11907_s28 + $0x148] sm:$0x7] }
 0x27c   : > { %5639 = vrot.lane.b32.xlu0 %v19260_v28, %s11844_s9  ;;  %v10540_v28 = vld [vmem:[%s11907_s28 + $0x128] sm:$0x7]  ;;  %v15711_v0 = vsel %vm11909_vm2, %v10559_v47, %v4925_v14  ;;  %v15715_v15 = vsel %vm11909_vm2, %v4927_v45, %v4928_v50  ;;  %v15719_v2 = vsel %vm11909_vm2, %v10558_v16, %v4918_v9  ;;  %v10560_v26 = vrot.slane %v10533_v13, 11  ;;  %v19266_v9 = vld [vmem:[#allocation80_spill] sm:$0xff]  ;;  %v19267_v45 = vld [vmem:[#allocation81_spill] sm:$0xff] }
 0x27d   : > { %5637 = vrot.lane.b32.xlu1 %v19262_v32, %s11844_s9  ;;  %v15723_v6 = vsel %vm11909_vm2, %v4920_v38, %v4921_v41  ;;  %v15727_v42 = vsel %vm11909_vm2, %v10561_v8, %v4939_v62  ;;  %v4934_v14 = vrot.slane %v4932_v61, 4  ;;  %v4935_v56 = vrot.slane %v10534_v43, 7  ;;  %v10538_v8 = vld [vmem:[%s11907_s28 + $0x118] sm:$0x7]  ;;  %v10543_v43 = vld [vmem:[%s11907_s28 + $0x140] sm:$0x8] }
 0x27e   : > { %v19265_v47 = vcombine.low %v15426_v1, %v15439_v4  ;;  %v19268_v50 = vcombine.low %v19266_v9, %v19267_v45  ;;  %v15740_v41 = vsel %vm11909_vm2, %v4941_v7, %v4942_v58  ;;  %v10563_v38 = vrot.slane %v10539_v30, 11  ;;  %v19269_v4 = vld [vmem:[#allocation72_spill] sm:$0xff]  ;;  %v15751_v58 = vpop.permute.xlu1 %5501  ;;  %v10547_v13 = vld [vmem:[%s11907_s28 + $0x160] sm:$0x8] }
 0x27f   : > { %v4955_v62 = vrot.slane %v4953_v59, 4  ;;  %v4956_v16 = vrot.slane %v10540_v28, 7  ;;  %v4946_v32 = vrot.slane %v19269_v4, 7  ;;  %19271 = vst [vmem:[#allocation71_spill] sm:$0xff] %v15751_v58  ;;  %v15759_v9 = vsel %vm11909_vm2, %v10560_v26, %v4932_v61  ;;  %v10541_v45 = vld [vmem:[%s11907_s28 + $0x130] sm:$0x8]  ;;  %v15773_v26 = vpop.permute.xlu0 %5551 }
 0x280   : > { %5643 = vrot.lane.b32.xlu0 %v19265_v47, %s11844_s9  ;;  %v19270_v47 = vld [vmem:[#allocation74_spill] sm:$0xff]  ;;  %v4960_v4 = vrot.slane %v15372_v24, 7  ;;  %v15768_v1 = vsel %vm11909_vm2, %v4934_v14, %v4935_v56  ;;  %v10562_v30 = vrot.slane %v10537_v54, 11  ;;  %v10548_v28 = vld [vmem:[%s11907_s28 + $0x168] sm:$0x7]  ;;  %v4981_v61 = vrot.slane %v19272_v10, 7 }
 0x281   : > { %5641 = vrot.lane.b32.xlu1 %v19268_v50, %s11844_s9  ;;  %v4967_v7 = vrot.slane %v19270_v47, 7  ;;  %v10542_v50 = vld [vmem:[%s11907_s28 + $0x138] sm:$0x7]  ;;  %v19275_v58 = vcombine.low %v19273_v36, %v19274_v25  ;;  %v19276_v24 = vcombine.low %v15528_v20, %v15537_v55  ;;  %v15785_v14 = vsel %vm11909_vm2, %v10563_v38, %v4953_v59  ;;  %v10545_v54 = vld [vmem:[%s11907_s28 + $0x150] sm:$0x8]  ;;  %v19277_v47 = vld [vmem:[#allocation79_spill] sm:$0xff] }
 0x282   : > { %v15789_v56 = vsel %vm11909_vm2, %v4955_v62, %v4956_v16  ;;  %v4949_v10 = vrot.slane %v10538_v8, 7  ;;  %v4974_v52 = vrot.slane %v19277_v47, 7  ;;  %v15794_v25 = vld [vmem:[%s11907_s28 + $0x4] sm:$0xf]  ;;  %v4948_v36 = vrot.slane %v4946_v32, 4  ;;  %v15801_v29 = vpop.permute.xlu1 %5553 }
 0x283   : > { %v4969_v5 = vrot.slane %v4967_v7, 4  ;;  %v4970_v20 = vrot.slane %v10544_v19, 7  ;;  %v10546_v55 = vld [vmem:[%s11907_s28 + $0x158] sm:$0x7]  ;;  %v4962_v59 = vrot.slane %v4960_v4, 4  ;;  %v4963_v38 = vrot.slane %v10542_v50, 7 }
 0x284   : > { %5647 = vrot.lane.b32.xlu0 %v19275_v58, %s11844_s9  ;;  %v10565_v58 = vrot.slane %v10543_v43, 11  ;;  %v10567_v18 = vrot.slane %v10547_v13, 11  ;;  %v4983_v16 = vrot.slane %v4981_v61, 4  ;;  %v4984_v8 = vrot.slane %v10548_v28, 7  ;;  %v6725_v47 = vld [vmem:[%s11907_s28] sm:$0x8] }
 0x285   : > { %5645 = vrot.lane.b32.xlu1 %v19276_v24, %s11844_s9  ;;  %v10564_v24 = vrot.slane %v10541_v45, 11  ;;  %v6807_v49 = vrot.slane %v15794_v25, 7  ;;  %v19278_v43 = vcombine.low %v15541_v46, %v15558_v27  ;;  %v19279_v13 = vcombine.low %v15565_v37, %v15569_v21  ;;  %v6726_v25 = vld [vmem:[%s11907_s28 + $0x8] sm:$0x7]  ;;  %v10549_v37 = vld [vmem:[%s11907_s28 + $0x170] sm:$0x8] }
 0x286   : > { %v10566_v28 = vrot.slane %v10545_v54, 11  ;;  %v4976_v45 = vrot.slane %v4974_v52, 4  ;;  %v4977_v50 = vrot.slane %v10546_v55, 7  ;;  %v15816_v62 = vsel %vm11909_vm2, %v10562_v30, %v4946_v32  ;;  %v19280_v21 = vld [vmem:[#allocation82_spill] sm:$0xff]  ;;  %v15831_v55 = vpop.permute.xlu0 %5555  ;;  %v6922_v19 = vld [vmem:[%s11907_s28 + $0x1c] sm:$0x3] }
 0x287   : > { %v15820_v46 = vsel %vm11909_vm2, %v4948_v36, %v4949_v10  ;;  %v15824_v27 = vsel %vm11909_vm2, %v10565_v58, %v4967_v7  ;;  %v4988_v54 = vrot.slane %v19280_v21, 7  ;;  %v15835_v32 = vsel %vm11909_vm2, %v4969_v5, %v4970_v20  ;;  %v10550_v36 = vld [vmem:[%s11907_s28 + $0x178] sm:$0x7]  ;;  %v15851_v58 = vld [vmem:[%s11907_s28 + $0x14] sm:$0xf] }
 0x288   : > { %5651 = vrot.lane.b32.xlu0 %v19278_v43, %s11844_s9  ;;  %v15829_v43 = vld [vmem:[%s11907_s28 + $0x8] sm:$0xf]  ;;  %v15839_v30 = vsel %vm11909_vm2, %v10564_v24, %v4960_v4  ;;  %v15843_v10 = vsel %vm11909_vm2, %v4962_v59, %v4963_v38  ;;  %v15847_v7 = vsel %vm11909_vm2, %v10567_v18, %v4981_v61  ;;  %v15855_v5 = vsel %vm11909_vm2, %v4983_v16, %v4984_v8  ;;  %v6728_v21 = vld [vmem:[%s11907_s28 + $0x18] sm:$0x7] }
 0x289   : > { %5649 = vrot.lane.b32.xlu1 %v19279_v13, %s11844_s9  ;;  %v10817_v20 = vrot.slane %v6725_v47, 11  ;;  %v6809_v4 = vrot.slane %v6807_v49, 4  ;;  %v6810_v24 = vrot.slane %v6726_v25, 7  ;;  %v15858_v13 = vld [vmem:[%s11907_s28 + $0x18] sm:$0xf]  ;;  %v19281_v59 = vcombine.low %v15573_v17, %v15577_v57 }
 0x28a   : > { %v19282_v18 = vcombine.low %v15584_v12, %v15588_v53  ;;  %v15870_v61 = vsel %vm11909_vm2, %v10566_v28, %v4974_v52  ;;  %v15874_v38 = vsel %vm11909_vm2, %v4976_v45, %v4977_v50  ;;  %v10568_v16 = vrot.slane %v10549_v37, 11  ;;  %v6917_v47 = vld [vmem:[%s11907_s28 + $0x4] sm:$0xc]  ;;  %v6919_v52 = vld [vmem:[%s11907_s28 + $0xc] sm:$0x3]  ;;  %v15883_v28 = vpop.permute.xlu1 %5557  ;;  %v3224_v25 = vpop.permute.xlu0 %3223 }
 0x28b   : > { %v7015_v8 = vrot.slane %v15829_v43, 6  ;;  %v4990_v12 = vrot.slane %v4988_v54, 4  ;;  %v4991_v53 = vrot.slane %v10550_v36, 7  ;;  %v6727_v37 = vld [vmem:[%s11907_s28 + $0x10] sm:$0x8]  ;;  %v6814_v43 = vrot.slane %v15851_v58, 7 }
 0x28c   : > { %5655 = vrot.lane.b32.xlu0 %v19281_v59, %s11844_s9  ;;  %v7022_v59 = vrot.slane %v15858_v13, 6  ;;  %v15898_v17 = vsel %vm11909_vm2, %v10817_v20, %v6807_v49  ;;  %v15902_v45 = vsel %vm11909_vm2, %v6809_v4, %v6810_v24  ;;  %v6920_v50 = vld [vmem:[%s11907_s28 + $0x14] sm:$0xc]  ;;  %v19284_v58 = vcombine.low %v15592_v23, %v15596_v11 }
 0x28d   : > { %5653 = vrot.lane.b32.xlu1 %v19282_v18, %s11844_s9  ;;  %v19283_v18 = vld [vmem:[#allocation44_spill] sm:$0xff]  ;;  %v19285_v13 = vcombine.low %v15600_v40, %v15604_v31  ;;  %v15916_v49 = vsel %vm11909_vm2, %v10568_v16, %v4988_v54  ;;  %v10833_v20 = vrot.slane %v6917_v47, 10  ;;  %v7017_v4 = vrot.slane %v7015_v8, 4 }
 0x28e   : > { %v3317_v36 = vadd.f32 %v19283_v18, %v3224_v25  ;;  %v7018_v24 = vrot.slane %v6919_v52, 6  ;;  %v15921_v25 = vld [vmem:[%s18822_s4] ss:$0 sm:$0xff]  ;;  %v15926_v11 = vsel %vm11909_vm2, %v4990_v12, %v4991_v53  ;;  %v10818_v40 = vrot.slane %v6727_v37, 11  ;;  %v10882_v52 = vld [vmem:[%s11907_s28 + $0x68] sm:$0xf] }
 0x28f   : > { %v6817_v31 = vrot.slane %v6728_v21, 7  ;;  %v6816_v54 = vrot.slane %v6814_v43, 4  ;;  %v10834_v16 = vrot.slane %v6920_v50, 10  ;;  %v7024_v47 = vrot.slane %v7022_v59, 4  ;;  %v15932_v18 = vld [vmem:[%s18823_s5] ss:$0 sm:$0xff] }
 0x290   : > { %5659 = vrot.lane.b32.xlu0 %v19284_v58, %s11844_s9  ;;  %v3349_v23 = vmul.f32 %v15921_v25, %v3317_v36  ;;  %v3220_v58 = vpop.permute.xlu0 %3219  ;;  %v7025_v57 = vrot.slane %v6922_v19, 6  ;;  %v19286_v12 = vld [vmem:[#allocation64_spill] sm:$0xff]  ;;  %v19288_v19 = vcombine.low %v15616_v60, %v15620_v44  ;;  %v19289_v50 = vcombine.low %v15663_v48, %v15667_v34  ;;  %v10883_v48 = vld [vmem:[%s11907_s28 + $0x6c] sm:$0x3] }
 0x291   : > { %5657 = vrot.lane.b32.xlu1 %v19285_v13, %s11844_s9  ;;  %v3226_v13 = vpop.permute.xlu1 %3225  ;;  %v3315_v53 = vadd.f32 %v3220_v58, %v19286_v12  ;;  %v19287_v37 = vld [vmem:[#allocation20_spill] sm:$0xff]  ;;  %v15955_v33 = vsel %vm12149_vm5, %v7017_v4, %v7018_v24  ;;  %v7255_v34 = vrot.slane %v10882_v52, 6  ;;  %v15971_v4 = vsel %vm12149_vm5, %v10834_v16, %v7022_v59  ;;  %v19434_v58 = vld [vmem:[#allocation86_spill] sm:$0xff] }
 0x292   : > { %v3381_v36 = vadd.f32 %v15932_v18, %v3349_v23  ;;  %v3318_v21 = vadd.f32 %v19287_v37, %v3226_v13  ;;  %v15951_v13 = vsel %vm12149_vm5, %v10833_v20, %v7015_v8  ;;  %v15963_v8 = vsel %vm11909_vm2, %v10818_v40, %v6814_v43  ;;  %v15981_v40 = vld [vmem:[%s11907_s28 + $0x78] sm:$0xf]  ;;  %v19292_v23 = vld [vmem:[#allocation23_spill] sm:$0xff] }
 0x293   : > { %v3347_v60 = vmul.f32 %v15921_v25, %v3315_v53  ;;  %v15967_v20 = vsel %vm11909_vm2, %v6816_v54, %v6817_v31  ;;  %v15975_v24 = vsel %vm12149_vm5, %v7024_v47, %v7025_v57  ;;  %v19293_v59 = vcombine.low %v15691_v35, %v15695_v3  ;;  %v19296_v54 = vld [vmem:[#allocation39_spill] sm:$0xff] }
 0x294   : > { %5711 = vrot.lane.b32.xlu0 %v19288_v19, %s11845_s10  ;;  %v3413_v37 = vmax.f32 %v3381_v36, 0.0  ;;  %v3350_v44 = vmul.f32 %v15921_v25, %v3318_v21  ;;  %v10881_v19 = vld [vmem:[%s11907_s28 + $0x64] sm:$0xc]  ;;  %v3232_v12 = vpop.permute.xlu0 %3231  ;;  %v19291_v21 = vld [vmem:[#allocation55_spill] sm:$0xff]  ;;  %v19294_v57 = vcombine.low %v15699_v39, %v15703_v63  ;;  %v7258_v47 = vrot.slane %v10883_v48, 6 }
 0x295   : > { %5661 = vrot.lane.b32.xlu1 %v19289_v50, %s11844_s9  ;;  %v3222_v50 = vpop.permute.xlu1 %3221  ;;  %v3379_v36 = vadd.f32 %v15932_v18, %v3347_v60  ;;  %v3321_v31 = vadd.f32 %v19292_v23, %v3232_v12  ;;  %v10929_v16 = vrot.slane %v10881_v19, 10  ;;  %v7257_v35 = vrot.slane %v7255_v34, 4  ;;  %v10884_v19 = vld [vmem:[%s11907_s28 + $0x74] sm:$0xc] }
 0x296   : > { %v11310_v52 = vpack.c.bf16 %v3413_v37, %v3413_v37  ;;  %v3382_v53 = vadd.f32 %v15932_v18, %v3350_v44  ;;  %v3316_v43 = vadd.f32 %v3222_v50, %v19291_v21  ;;  %v7262_v48 = vrot.slane %v15981_v40, 6  ;;  %v16081_v39 = vld [vmem:[%s11907_s28 + $0xd4] sm:$0xf] }
 0x297   : > { %v3411_v12 = vmax.f32 %v3379_v36, 0.0  ;;  %v3353_v3 = vmul.f32 %v15921_v25, %v3321_v31  ;;  %v19297_v63 = vcombine.low %v15711_v0, %v15715_v15  ;;  %v19298_v40 = vcombine.low %v15719_v2, %v15723_v6  ;;  %v16031_v15 = vld [vmem:[%s11907_s28 + $0xc0] sm:$0xf]  ;;  %v16034_v2 = vld [vmem:[%s11907_s28 + $0xc4] sm:$0xf] }
 0x298   : > { %5715 = vrot.lane.b32.xlu0 %v19293_v59, %s11845_s10  ;;  %3574 = vst.msk [vmem:[%s14736_s12 + $0x8] sm:$0xf] %vm3571_vm3, %v11310_v52  ;;  %v3414_v37 = vmax.f32 %v3382_v53, 0.0  ;;  %v3348_v60 = vmul.f32 %v15921_v25, %v3316_v43  ;;  %v3228_v44 = vpop.permute.xlu0 %3227  ;;  %v19295_v43 = vld [vmem:[#allocation36_spill] sm:$0xff]  ;;  %v10886_v59 = vld [vmem:[%s11907_s28 + $0x7c] sm:$0x3]  ;;  %v16028_v0 = vsel %vm12149_vm5, %v7257_v35, %v7258_v47 }
 0x299   : > { %5713 = vrot.lane.b32.xlu1 %v19294_v57, %s11845_s10  ;;  %v3234_v50 = vpop.permute.xlu1 %3233  ;;  %v11308_v52 = vpack.c.bf16 %v3411_v12, %v3411_v12  ;;  %v3319_v31 = vadd.f32 %v3228_v44, %v19295_v43  ;;  %v3385_v57 = vadd.f32 %v15932_v18, %v3353_v3  ;;  %v16019_v12 = vsel %vm12149_vm5, %v10929_v16, %v7255_v34  ;;  %v19299_v35 = vld [vmem:[#allocation16_spill] sm:$0xff] }
 0x29a   : > { %v11311_v36 = vpack.c.bf16 %v3414_v37, %v3414_v37  ;;  %v3380_v53 = vadd.f32 %v15932_v18, %v3348_v60  ;;  %v3322_v23 = vadd.f32 %v19296_v54, %v3234_v50  ;;  %v10930_v6 = vrot.slane %v10884_v19, 10 }
 0x29b   : > { %3572 = vst.msk [vmem:[%s14736_s12] sm:$0xf] %vm3571_vm3, %v11308_v52  ;;  %v3351_v60 = vmul.f32 %v15921_v25, %v3319_v31  ;;  %v3417_v3 = vmax.f32 %v3385_v57, 0.0  ;;  %v7264_v50 = vrot.slane %v7262_v48, 4  ;;  %v16038_v52 = vld [vmem:[%s11907_s28 + $0xa8] sm:$0xf] }
 0x29c   : > { %5719 = vrot.lane.b32.xlu0 %v19297_v63, %s11845_s10  ;;  %3575 = vst.msk [vmem:[%s14736_s12 + $0xc] sm:$0xf] %vm3571_vm3, %v11311_v36  ;;  %v3412_v37 = vmax.f32 %v3380_v53, 0.0  ;;  %v3354_v34 = vmul.f32 %v15921_v25, %v3322_v23  ;;  %v3240_v44 = vpop.permute.xlu0 %3239  ;;  %v7265_v63 = vrot.slane %v10886_v59, 6  ;;  %v19300_v31 = vld [vmem:[#allocation38_spill] sm:$0xff]  ;;  %v19302_v59 = vcombine.low %v15759_v9, %v15768_v1 }
 0x29d   : > { %5717 = vrot.lane.b32.xlu1 %v19298_v40, %s11845_s10  ;;  %v3230_v16 = vpop.permute.xlu1 %3229  ;;  %v3383_v47 = vadd.f32 %v15932_v18, %v3351_v60  ;;  %v3325_v19 = vadd.f32 %v19300_v31, %v3240_v44  ;;  %v11314_v57 = vpack.c.bf16 %v3417_v3, %v3417_v3  ;;  %v19301_v40 = vcombine.low %v15727_v42, %v15740_v41  ;;  %v10571_v42 = vld [vmem:[%s11907_s28 + $0xa4] sm:$0xe]  ;;  %v10573_v41 = vld [vmem:[%s11907_s28 + $0xac] sm:$0x1]  ;;  %v16078_v60 = vld [vmem:[%s11907_s28 + $0xd0] sm:$0xf] }
 0x29e   : > { %v11309_v36 = vpack.c.bf16 %v3412_v37, %v3412_v37  ;;  %v3320_v53 = vadd.f32 %v3230_v16, %v19299_v35  ;;  %v3386_v23 = vadd.f32 %v15932_v18, %v3354_v34  ;;  %v5105_v44 = vrot.slane %v16038_v52, 5  ;;  %v19304_v37 = vld [vmem:[#allocation41_spill] sm:$0xff] }
 0x29f   : > { %v3415_v3 = vmax.f32 %v3383_v47, 0.0  ;;  %v3357_v16 = vmul.f32 %v15921_v25, %v3325_v19  ;;  %3578 = vst.msk [vmem:[%s14736_s12 + $0x18] sm:$0xf] %vm3571_vm3, %v11314_v57  ;;  %v16068_v47 = vsel %vm12149_vm5, %v10930_v6, %v7262_v48  ;;  %v19305_v6 = vcombine.low %v15785_v14, %v15789_v56 }
 0x2a0   : > { %5723 = vrot.lane.b32.xlu0 %v19301_v40, %s11845_s10  ;;  %3573 = vst.msk [vmem:[%s14736_s12 + $0x4] sm:$0xf] %vm3571_vm3, %v11309_v36  ;;  %v3352_v34 = vmul.f32 %v15921_v25, %v3320_v53  ;;  %v3418_v1 = vmax.f32 %v3386_v23, 0.0  ;;  %v3236_v9 = vpop.permute.xlu0 %3235  ;;  %v16072_v53 = vsel %vm12149_vm5, %v7264_v50, %v7265_v63  ;;  %v19303_v23 = vld [vmem:[#allocation65_spill] sm:$0xff]  ;;  %v19306_v50 = vcombine.low %v15816_v62, %v15820_v46 }
 0x2a1   : > { %5721 = vrot.lane.b32.xlu1 %v19302_v59, %s11845_s10  ;;  %v3242_v40 = vpop.permute.xlu1 %3241  ;;  %v11312_v19 = vpack.c.bf16 %v3415_v3, %v3415_v3  ;;  %v3389_v57 = vadd.f32 %v15932_v18, %v3357_v16  ;;  %v3323_v59 = vadd.f32 %v3236_v9, %v19303_v23  ;;  %v10619_v63 = vrot.slane %v10571_v42, 9 }
 0x2a2   : > { %v3384_v52 = vadd.f32 %v15932_v18, %v3352_v34  ;;  %v11315_v36 = vpack.c.bf16 %v3418_v1, %v3418_v1  ;;  %v3326_v48 = vadd.f32 %v19304_v37, %v3242_v40  ;;  %v5108_v3 = vrot.slane %v10573_v41, 5  ;;  %v19309_v37 = vld [vmem:[#allocation42_spill] sm:$0xff] }
 0x2a3   : > { %3576 = vst.msk [vmem:[%s14736_s12 + $0x10] sm:$0xf] %vm3571_vm3, %v11312_v19  ;;  %v3421_v16 = vmax.f32 %v3389_v57, 0.0  ;;  %v3355_v1 = vmul.f32 %v15921_v25, %v3323_v59  ;;  %v5107_v9 = vrot.slane %v5105_v44, 4  ;;  %v19307_v62 = vrot.slane %v16034_v2, 7  ;;  %v19308_v59 = vld [vmem:[#allocation35_spill] sm:$0xff] }
 0x2a4   : > { %5727 = vrot.lane.b32.xlu0 %v19305_v6, %s11845_s10  ;;  %v3416_v34 = vmax.f32 %v3384_v52, 0.0  ;;  %3579 = vst.msk [vmem:[%s14736_s12 + $0x1c] sm:$0xf] %vm3571_vm3, %v11315_v36  ;;  %v3358_v14 = vmul.f32 %v15921_v25, %v3326_v48  ;;  %v3248_v40 = vpop.permute.xlu0 %3247  ;;  %v10574_v19 = vld [vmem:[%s11907_s28 + $0xb4] sm:$0xe]  ;;  %v19310_v42 = vcombine.low %v15824_v27, %v15835_v32 }
 0x2a5   : > { %5725 = vrot.lane.b32.xlu1 %v19306_v50, %s11845_s10  ;;  %v3238_v56 = vpop.permute.xlu1 %3237  ;;  %v16100_v46 = vrot.slane %v19307_v62, 4  ;;  %v11318_v57 = vpack.c.bf16 %v3421_v16, %v3421_v16  ;;  %v3387_v36 = vadd.f32 %v15932_v18, %v3355_v1  ;;  %v10575_v6 = vld [vmem:[%s11907_s28 + $0xb8] sm:$0xf]  ;;  %v10977_v50 = vld [vmem:[%s11907_s28 + $0xc0] sm:$0x8]  ;;  %v3329_v31 = vadd.f32 %v19309_v37, %v3248_v40  ;;  %v19313_v16 = vld [vmem:[#allocation12_spill] sm:$0xff] }
 0x2a6   : > { %v11313_v52 = vpack.c.bf16 %v3416_v34, %v3416_v34  ;;  %v3324_v48 = vadd.f32 %v3238_v56, %v19308_v59  ;;  %v3390_v62 = vadd.f32 %v15932_v18, %v3358_v14  ;;  %v19311_v34 = vcombine.low %v15839_v30, %v15843_v10  ;;  %v10576_v32 = vld [vmem:[%s11907_s28 + $0xbc] sm:$0x1]  ;;  %v10978_v10 = vld [vmem:[%s11907_s28 + $0xc8] sm:$0x7]  ;;  %v6706_v59 = vld [vmem:[%s11907_s28 + $0x64] sm:$0xf] }
 0x2a7   : > { %v16124_v1 = vsel %vm13496_vm12, %v10619_v63, %v5105_v44  ;;  %3582 = vst.msk [vmem:[%s14736_s12 + $0x28] sm:$0xf] %vm3571_vm3, %v11318_v57  ;;  %v3419_v14 = vmax.f32 %v3387_v36, 0.0  ;;  %v16133_v27 = vsel %vm13496_vm12, %v5107_v9, %v5108_v3  ;;  %v10620_v30 = vrot.slane %v10574_v19, 9 }
 0x2a8   : > { %5731 = vrot.lane.b32.xlu0 %v19310_v42, %s11845_s10  ;;  %3577 = vst.msk [vmem:[%s14736_s12 + $0x14] sm:$0xf] %vm3571_vm3, %v11313_v52  ;;  %v3356_v56 = vmul.f32 %v15921_v25, %v3324_v48  ;;  %v3422_v40 = vmax.f32 %v3390_v62, 0.0  ;;  %v3361_v42 = vmul.f32 %v15921_v25, %v3329_v31  ;;  %v3244_v44 = vpop.permute.xlu0 %3243  ;;  %v11009_v52 = vrot.slane %v10977_v50, 11  ;;  %v19312_v48 = vld [vmem:[#allocation59_spill] sm:$0xff] }
 0x2a9   : > { %5729 = vrot.lane.b32.xlu1 %v19311_v34, %s11845_s10  ;;  %v3250_v63 = vpop.permute.xlu1 %3249  ;;  %v5112_v34 = vrot.slane %v10575_v6, 5  ;;  %v11316_v57 = vpack.c.bf16 %v3419_v14, %v3419_v14  ;;  %v3327_v41 = vadd.f32 %v3244_v44, %v19312_v48  ;;  %v19314_v62 = vcombine.low %v15847_v7, %v15855_v5  ;;  %v16169_v44 = vld [vmem:[%s11907_s28 + $0xc8] sm:$0xf]  ;;  %v10987_v48 = vld [vmem:[%s11907_s28 + $0x110] sm:$0x8] }
 0x2aa   : > { %v3388_v36 = vadd.f32 %v15932_v18, %v3356_v56  ;;  %v3330_v3 = vadd.f32 %v19313_v16, %v3250_v63  ;;  %v11319_v9 = vpack.c.bf16 %v3422_v40, %v3422_v40  ;;  %v3393_v19 = vadd.f32 %v15932_v18, %v3361_v42 }
 0x2ab   : > { %v19315_v31 = vcombine.low %v15870_v61, %v15874_v38  ;;  %v5115_v6 = vrot.slane %v10576_v32, 5  ;;  %v7486_v50 = vrot.slane %v10978_v10, 7  ;;  %3580 = vst.msk [vmem:[%s14736_s12 + $0x20] sm:$0xf] %vm3571_vm3, %v11316_v57  ;;  %v3359_v56 = vmul.f32 %v15921_v25, %v3327_v41 }
 0x2ac   : > { %5735 = vrot.lane.b32.xlu0 %v19314_v62, %s11845_s10  ;;  %v3420_v14 = vmax.f32 %v3388_v36, 0.0  ;;  %v3362_v40 = vmul.f32 %v15921_v25, %v3330_v3  ;;  %3583 = vst.msk [vmem:[%s14736_s12 + $0x2c] sm:$0xf] %vm3571_vm3, %v11319_v9  ;;  %v3425_v5 = vmax.f32 %v3393_v19, 0.0  ;;  %v3256_v38 = vpop.permute.xlu0 %3255  ;;  %v16160_v32 = vsel %vm13496_vm12, %v10620_v30, %v5112_v34  ;;  %v19317_v3 = vld [vmem:[#allocation50_spill] sm:$0xff]  ;;  %v19318_v62 = vld [vmem:[#allocation27_spill] sm:$0xff] }
 0x2ad   : > { %5733 = vrot.lane.b32.xlu1 %v19315_v31, %s11845_s10  ;;  %v3246_v61 = vpop.permute.xlu1 %3245  ;;  %v5114_v10 = vrot.slane %v5112_v34, 4  ;;  %v19316_v42 = vrot.slane %v16034_v2, 7  ;;  %v3391_v57 = vadd.f32 %v15932_v18, %v3359_v56  ;;  %v10979_v9 = vld [vmem:[%s11907_s28 + $0xd0] sm:$0x8]  ;;  %v10980_v19 = vld [vmem:[%s11907_s28 + $0xd8] sm:$0x7]  ;;  %v3333_v31 = vadd.f32 %v19318_v62, %v3256_v38 }
 0x2ae   : > { %v11317_v63 = vpack.c.bf16 %v3420_v14, %v3420_v14  ;;  %v3394_v36 = vadd.f32 %v15932_v18, %v3362_v40  ;;  %v3328_v30 = vadd.f32 %v3246_v61, %v19317_v3  ;;  %v11322_v34 = vpack.c.bf16 %v3425_v5, %v3425_v5 }
 0x2af   : > { %v16166_v41 = vsel %vm11909_vm2, %v11009_v52, %v19316_v42  ;;  %v19319_v52 = vcombine.low %v15898_v17, %v15902_v45  ;;  %v19320_v14 = vcombine.low %v15916_v49, %v15926_v11  ;;  %v19321_v56 = vrot.slane %v16081_v39, 7  ;;  %v11025_v45 = vld [vmem:[%s11907_s28 + $0xc4] sm:$0xc] }
 0x2b0   : > { %v16190_v5 = vsel %vm11909_vm2, %v16100_v46, %v7486_v50  ;;  %3581 = vst.msk [vmem:[%s14736_s12 + $0x24] sm:$0xf] %vm3571_vm3, %v11317_v63  ;;  %v3423_v61 = vmax.f32 %v3391_v57, 0.0  ;;  %v3426_v38 = vmax.f32 %v3394_v36, 0.0  ;;  %v3360_v17 = vmul.f32 %v15921_v25, %v3328_v30  ;;  %3586 = vst.msk [vmem:[%s14736_s12 + $0x38] sm:$0xf] %vm3571_vm3, %v11322_v34  ;;  %v3252_v11 = vpop.permute.xlu0 %3251 }
 0x2b1   : > { %7913 = vrot.lane.b32.xlu0 %v19319_v52, %s11840_s29  ;;  %5737 = vrot.lane.b32.xlu1 %v19320_v14, %s11845_s10  ;;  %v7492_v40 = vrot.slane %v19321_v56, 4  ;;  %v7691_v42 = vrot.slane %v16169_v44, 6  ;;  %v3365_v49 = vmul.f32 %v15921_v25, %v3333_v31  ;;  %v3258_v52 = vpop.permute.xlu1 %3257  ;;  %v16202_v46 = vsel %vm13496_vm12, %v5114_v10, %v5115_v6  ;;  %v11027_v50 = vld [vmem:[%s11907_s28 + $0xcc] sm:$0x3]  ;;  %v19322_v34 = vld [vmem:[#allocation40_spill] sm:$0xff]  ;;  %v11718_v31 = vld [vmem:[%s18820_s2 + $0x18] sm:$0xff]  }
 0x2b2   : > { %v11010_v63 = vrot.slane %v10979_v9, 11  ;;  %v7493_v57 = vrot.slane %v10980_v19, 7  ;;  %v11320_v36 = vpack.c.bf16 %v3423_v61, %v3423_v61  ;;  %v11323_v30 = vpack.c.bf16 %v3426_v38, %v3426_v38  ;;  %v19323_v10 = vld [vmem:[#allocation53_spill] sm:$0xff]  ;;  %v11702_v61 = vld [vmem:[%s11907_s28 + $0x60] sm:$0xff]   ;;  %11546 = vmatprep.subr.bf16.mxu0 %v11718_v31 }
 0x2b3   : > { %v3392_v44 = vadd.f32 %v15932_v18, %v3360_v17  ;;  %v3331_v14 = vadd.f32 %v3252_v11, %v19322_v34  ;;  %v3397_v6 = vadd.f32 %v15932_v18, %v3365_v49  ;;  %v3334_v56 = vadd.f32 %v19323_v10, %v3258_v52  ;;  %v6698_v11 = vld [vmem:[%s11907_s28 + $0x24] sm:$0xf]  ;;  %11547 = vmatpush3.bf16.msra.mxu0 %v11718_v31  ;;  %v11720_v10 = vld [vmem:[%s18820_s2 + $0x10] sm:$0xff]  }
 0x2b4   : > { %v19324_v9 = vcombine.low %v15951_v13, %v15955_v33  ;;  %v19325_v19 = vcombine.low %v15963_v8, %v15967_v20  ;;  %v11073_v17 = vrot.slane %v11025_v45, 10  ;;  %3584 = vst.msk [vmem:[%s14736_s12 + $0x30] sm:$0xf] %vm3571_vm3, %v11320_v36  ;;  %3587 = vst.msk [vmem:[%s14736_s12 + $0x3c] sm:$0xf] %vm3571_vm3, %v11323_v30  ;;  %v7693_v33 = vrot.slane %v7691_v42, 4  ;;  %11548 = vmatprep.subr.bf16.mxu0 %v11720_v10 }
 0x2b5   : > { %v3424_v49 = vmax.f32 %v3392_v44, 0.0  ;;  %v3363_v52 = vmul.f32 %v15921_v25, %v3331_v14  ;;  %v7694_v13 = vrot.slane %v11027_v50, 6  ;;  %v3429_v7 = vmax.f32 %v3397_v6, 0.0  ;;  %v3254_v20 = vpop.permute.xlu1 %3253  ;;  %v19327_v14 = vld [vmem:[#allocation2_spill] sm:$0xff] }
 0x2b6   : > { %7993 = vrot.lane.b32.xlu0 %v19324_v9, %s11841_s30  ;;  %7915 = vrot.lane.b32.xlu1 %v19325_v19, %s11840_s29  ;;  %v6729_v9 = vld [vmem:[%s11907_s28 + $0x20] sm:$0x8]  ;;  %v3366_v8 = vmul.f32 %v15921_v25, %v3334_v56  ;;  %v3264_v19 = vpop.permute.xlu0 %3263  ;;  %v19326_v45 = vrot.slane %v16081_v39, 7  ;;  %v16239_v30 = vsel %vm11909_vm2, %v7492_v40, %v7493_v57  ;;  %v3332_v6 = vadd.f32 %v3254_v20, %v19327_v14  ;;  %v11703_v57 = vld [vmem:[%s11907_s28 + $0x70] sm:$0xff]  }
 0x2b7   : > { %v11321_v50 = vpack.c.bf16 %v3424_v49, %v3424_v49  ;;  %v3395_v44 = vadd.f32 %v15932_v18, %v3363_v52  ;;  %v19328_v56 = vld [vmem:[#allocation58_spill] sm:$0xff]  ;;  %v11326_v62 = vpack.c.bf16 %v3429_v7, %v3429_v7  ;;  %v19329_v40 = vcombine.low %v15971_v4, %v15975_v24  ;;  %11549 = vmatpush3.bf16.msra.mxu0 %v11720_v10 }
 0x2b8   : > { %v16235_v36 = vsel %vm11909_vm2, %v11010_v63, %v19326_v45  ;;  %v3337_v38 = vadd.f32 %v19328_v56, %v3264_v19  ;;  %v3398_v63 = vadd.f32 %v15932_v18, %v3366_v8  ;;  %v10819_v31 = vrot.slane %v6729_v9, 11  ;;  %v6730_v19 = vld [vmem:[%s11907_s28 + $0x28] sm:$0x7]  ;;  %v10586_v56 = vld [vmem:[%s11907_s28 + $0xf4] sm:$0xe] }
 0x2b9   : > { %v6821_v49 = vrot.slane %v6698_v11, 7  ;;  %3585 = vst.msk [vmem:[%s14736_s12 + $0x34] sm:$0xf] %vm3571_vm3, %v11321_v50  ;;  %v3427_v52 = vmax.f32 %v3395_v44, 0.0  ;;  %v3364_v20 = vmul.f32 %v15921_v25, %v3332_v6  ;;  %3590 = vst.msk [vmem:[%s14736_s12 + $0x48] sm:$0xf] %vm3571_vm3, %v11326_v62  ;;  %v3266_v8 = vpop.permute.xlu1 %3265  ;;  %v16264_v11 = vsel %vm12149_vm5, %v11073_v17, %v7691_v42 }
 0x2ba   : > { %8105 = vrot.lane.b32.xlu0 %v11702_v61, %s11842_s7  ;;  %7995 = vrot.lane.b32.xlu1 %v19329_v40, %s11841_s30  ;;  %v3369_v7 = vmul.f32 %v15921_v25, %v3337_v38  ;;  %v3430_v4 = vmax.f32 %v3398_v63, 0.0  ;;  %v3260_v24 = vpop.permute.xlu0 %3259  ;;  %v16268_v9 = vsel %vm12149_vm5, %v7693_v33, %v7694_v13  ;;  %v19330_v44 = vld [vmem:[#allocation67_spill] sm:$0xff]  ;;  %v16277_v42 = vld [vmem:[%s11907_s28 + $0xd4] sm:$0xc]  ;;  %v16280_v17 = vld [vmem:[%s11907_s28 + $0xd8] sm:$0xf]  ;;  %v19332_v40 = vcombine.low %v16019_v12, %v16028_v0 }
 0x2bb   : > { %v11324_v45 = vpack.c.bf16 %v3427_v52, %v3427_v52  ;;  %v3396_v62 = vadd.f32 %v15932_v18, %v3364_v20  ;;  %v3335_v6 = vadd.f32 %v3260_v24, %v19330_v44  ;;  %v11721_v33 = vld [vmem:[%s18820_s2 + $0x28] sm:$0xff]   ;;  %v19331_v63 = vld [vmem:[#allocation46_spill] sm:$0xff]  ;;  %v16293_v52 = vsel %vm11909_vm2, %v10819_v31, %v6821_v49 }
 0x2bc   : > { %v3401_v50 = vadd.f32 %v15932_v18, %v3369_v7  ;;  %v11327_v13 = vpack.c.bf16 %v3430_v4, %v3430_v4  ;;  %v3338_v10 = vadd.f32 %v19331_v63, %v3266_v8  ;;  %v6823_v20 = vrot.slane %v6821_v49, 4  ;;  %v16296_v7 = vld [vmem:[%s11907_s28 + $0xdc] sm:$0x3]  ;;  %v16302_v12 = vld [vmem:[%s11907_s28 + $0x24] sm:$0xc]  ;;  %11582 = vmatprep.subr.bf16.mxu1 %v11721_v33 }
 0x2bd   : > { %3588 = vst.msk [vmem:[%s14736_s12 + $0x40] sm:$0xf] %vm3571_vm3, %v11324_v45  ;;  %v3428_v4 = vmax.f32 %v3396_v62, 0.0  ;;  %v3367_v8 = vmul.f32 %v15921_v25, %v3335_v6  ;;  %v6824_v38 = vrot.slane %v6730_v19, 7  ;;  %v11074_v45 = vrot.slane %v16277_v42, 10  ;;  %11583 = vmatpush3.bf16.msra.mxu1 %v11721_v33  ;;  %v11723_v42 = vld [vmem:[%s18820_s2 + $0x20] sm:$0xff]  }
 0x2be   : > { %8185 = vrot.lane.b32.xlu0 %v19332_v40, %s11843_s8  ;;  %8107 = vrot.lane.b32.xlu1 %v11703_v57, %s11842_s7  ;;  %v3433_v24 = vmax.f32 %v3401_v50, 0.0  ;;  %3591 = vst.msk [vmem:[%s14736_s12 + $0x4c] sm:$0xf] %vm3571_vm3, %v11327_v13  ;;  %v3370_v0 = vmul.f32 %v15921_v25, %v3338_v10  ;;  %v3262_v57 = vpop.permute.xlu1 %3261  ;;  %v3272_v31 = vpop.permute.xlu0 %3271  ;;  %v7698_v62 = vrot.slane %v16280_v17, 6  ;;  %v16312_v19 = vld [vmem:[%s11907_s28 + $0x28] sm:$0xf]  ;;  %v19335_v33 = vcombine.low %v16031_v15, %v16034_v2 }
 0x2bf   : > { %v11325_v50 = vpack.c.bf16 %v3428_v4, %v3428_v4  ;;  %v3399_v13 = vadd.f32 %v15932_v18, %v3367_v8  ;;  %v19333_v40 = vld [vmem:[#allocation47_spill] sm:$0xff]  ;;  %v19334_v17 = vld [vmem:[#allocation26_spill] sm:$0xff]  ;;  %v19336_v4 = vcombine.low %v16068_v47, %v16072_v53  ;;  %v16341_v15 = vsel %vm11909_vm2, %v6823_v20, %v6824_v38  ;;  %v16345_v47 = vld [vmem:[%s11907_s28 + $0x34] sm:$0xf]  ;;  %11584 = vmatprep.subr.bf16.mxu1 %v11723_v42 }
 0x2c0   : > { %v11330_v6 = vpack.c.bf16 %v3433_v24, %v3433_v24  ;;  %v3336_v10 = vadd.f32 %v3262_v57, %v19333_v40  ;;  %v16317_v61 = vld [vmem:[%s11907_s28 + $0x2c] sm:$0x3]  ;;  %v3402_v49 = vadd.f32 %v15932_v18, %v3370_v0  ;;  %v3341_v63 = vadd.f32 %v19334_v17, %v3272_v31  ;;  %v19337_v20 = vld [vmem:[#allocation48_spill] sm:$0xff]  ;;  %v10985_v44 = vld [vmem:[%s11907_s28 + $0x100] sm:$0x8] }
 0x2c1   : > { %v7701_v24 = vrot.slane %v16296_v7, 6  ;;  %3589 = vst.msk [vmem:[%s14736_s12 + $0x44] sm:$0xf] %vm3571_vm3, %v11325_v50  ;;  %v3431_v0 = vmax.f32 %v3399_v13, 0.0  ;;  %v7029_v2 = vrot.slane %v16312_v19, 6  ;;  %v7032_v13 = vrot.slane %v16317_v61, 6  ;;  %11585 = vmatpush3.bf16.msra.mxu1 %v11723_v42 }
 0x2c2   : > { %8281 = vrot.lane.b32.xlu0 %v19335_v33, %s11844_s9  ;;  %8187 = vrot.lane.b32.xlu1 %v19336_v4, %s11843_s8  ;;  %3594 = vst.msk [vmem:[%s14736_s12 + $0x58] sm:$0xf] %vm3571_vm3, %v11330_v6  ;;  %v3368_v57 = vmul.f32 %v15921_v25, %v3336_v10  ;;  %v3434_v53 = vmax.f32 %v3402_v49, 0.0  ;;  %v3373_v7 = vmul.f32 %v15921_v25, %v3341_v63  ;;  %v3268_v31 = vpop.permute.xlu0 %3267  ;;  %v3274_v50 = vpop.permute.xlu1 %3273  ;;  %v7700_v6 = vrot.slane %v7698_v62, 4  ;;  %v19338_v33 = vld [vmem:[#allocation56_spill] sm:$0xff] }
 0x2c3   : > { %v11328_v10 = vpack.c.bf16 %v3431_v0, %v3431_v0  ;;  %v3339_v19 = vadd.f32 %v3268_v31, %v19337_v20  ;;  %v3342_v4 = vadd.f32 %v19338_v33, %v3274_v50  ;;  %v6731_v8 = vld [vmem:[%s11907_s28 + $0x30] sm:$0x8]  ;;  %v19339_v17 = vcombine.low %v16078_v60, %v16081_v39  ;;  %v10984_v20 = vld [vmem:[%s11907_s28 + $0xf8] sm:$0x7] }
 0x2c4   : > { %v3400_v38 = vadd.f32 %v15932_v18, %v3368_v57  ;;  %v11331_v49 = vpack.c.bf16 %v3434_v53, %v3434_v53  ;;  %v3405_v63 = vadd.f32 %v15932_v18, %v3373_v7  ;;  %v19340_v61 = vcombine.low %v16124_v1, %v16133_v27  ;;  %v6732_v1 = vld [vmem:[%s11907_s28 + $0x38] sm:$0x7] }
 0x2c5   : > { %v6828_v0 = vrot.slane %v16345_v47, 7  ;;  %3592 = vst.msk [vmem:[%s14736_s12 + $0x50] sm:$0xf] %vm3571_vm3, %v11328_v10  ;;  %v3371_v53 = vmul.f32 %v15921_v25, %v3339_v19  ;;  %v3374_v39 = vmul.f32 %v15921_v25, %v3342_v4  ;;  %v16371_v60 = vsel %vm12149_vm5, %v11074_v45, %v7698_v62  ;;  %v16379_v10 = vld [vmem:[%s11907_s28 + $0x38] sm:$0xf]  ;;  %v19341_v62 = vld [vmem:[#allocation30_spill] sm:$0xff] }
 0x2c6   : > { %8283 = vrot.lane.b32.xlu0 %v19339_v17, %s11844_s9  ;;  %5791 = vrot.lane.b32.xlu1 %v19340_v61, %s11846_s15  ;;  %v3432_v57 = vmax.f32 %v3400_v38, 0.0  ;;  %3595 = vst.msk [vmem:[%s14736_s12 + $0x5c] sm:$0xf] %vm3571_vm3, %v11331_v49  ;;  %v3437_v27 = vmax.f32 %v3405_v63, 0.0  ;;  %v3270_v17 = vpop.permute.xlu1 %3269  ;;  %v3280_v7 = vpop.permute.xlu0 %3279  ;;  %v7702_v47 = vsel %vm12149_vm5, %v7700_v6, %v7701_v24  ;;  %v7031_v31 = vrot.slane %v7029_v2, 4  ;;  %v19342_v61 = vld [vmem:[#allocation63_spill] sm:$0xff] }
 0x2c7   : > { %v10820_v50 = vrot.slane %v6731_v8, 11  ;;  %v3403_v19 = vadd.f32 %v15932_v18, %v3371_v53  ;;  %v3406_v45 = vadd.f32 %v15932_v18, %v3374_v39  ;;  %v3340_v4 = vadd.f32 %v3270_v17, %v19341_v62  ;;  %v6926_v49 = vld [vmem:[%s11907_s28 + $0x34] sm:$0xc]  ;;  %v11033_v62 = vld [vmem:[%s11907_s28 + $0xec] sm:$0x3] }
 0x2c8   : > { %v11329_v38 = vpack.c.bf16 %v3432_v57, %v3432_v57  ;;  %v11334_v63 = vpack.c.bf16 %v3437_v27, %v3437_v27  ;;  %v3345_v42 = vadd.f32 %v19342_v61, %v3280_v7  ;;  %v19343_v24 = vcombine.low %v16160_v32, %v16202_v46  ;;  %v10888_v7 = vld [vmem:[%s11907_s28 + $0x88] sm:$0xf] }
 0x2c9   : > { %v19344_v8 = vcombine.low %v16166_v41, %v16190_v5  ;;  %v6830_v6 = vrot.slane %v6828_v0, 4  ;;  %v6831_v57 = vrot.slane %v6732_v1, 7  ;;  %v3435_v53 = vmax.f32 %v3403_v19, 0.0 }
 0x2ca   : > { %5793 = vrot.lane.b32.xlu0 %v19343_v24, %s11846_s15  ;;  %3593 = vst.msk [vmem:[%s14736_s12 + $0x54] sm:$0xf] %vm3571_vm3, %v11329_v38  ;;  %v3438_v39 = vmax.f32 %v3406_v45, 0.0  ;;  %v3372_v27 = vmul.f32 %v15921_v25, %v3340_v4  ;;  %v7036_v17 = vrot.slane %v16379_v10, 6  ;;  %3598 = vst.msk [vmem:[%s14736_s12 + $0x68] sm:$0xf] %vm3571_vm3, %v11334_v63  ;;  %v3377_v32 = vmul.f32 %v15921_v25, %v3345_v42  ;;  %v16402_v46 = vpop.permute.xlu1 %5561  ;;  %v3276_v41 = vpop.permute.xlu0 %3275 }
 0x2cb   : > { %8361 = vrot.lane.b32.xlu1 %v19344_v8, %s11845_s10  ;;  %v11202_v5 = vcombine.low %v16371_v60, %v7702_v47  ;;  %v19345_v1 = vrot.slane %v16302_v12, 10  ;;  %v6928_v10 = vld [vmem:[%s11907_s28 + $0x3c] sm:$0x3]  ;;  %v10836_v19 = vrot.slane %v6926_v49, 10  ;;  %v11332_v45 = vpack.c.bf16 %v3435_v53, %v3435_v53  ;;  %v10887_v49 = vld [vmem:[%s11907_s28 + $0x84] sm:$0xc] }
 0x2cc   : > { %v11335_v4 = vpack.c.bf16 %v3438_v39, %v3438_v39  ;;  %v3404_v42 = vadd.f32 %v15932_v18, %v3372_v27  ;;  %v7033_v63 = vsel %vm12149_vm5, %v7031_v31, %v7032_v13  ;;  %v3409_v24 = vadd.f32 %v15932_v18, %v3377_v32  ;;  %v19346_v8 = vld [vmem:[#allocation13_spill] sm:$0xff]  ;;  %v10889_v13 = vld [vmem:[%s11907_s28 + $0x8c] sm:$0x3] }
 0x2cd   : > { %v7030_v38 = vsel %vm12149_vm5, %v19345_v1, %v7029_v2  ;;  %v3343_v60 = vadd.f32 %v3276_v41, %v19346_v8  ;;  %v19347_v12 = vcombine.low %v16264_v11, %v16268_v9  ;;  %v19348_v2 = vcombine.low %v16235_v36, %v16239_v30  ;;  %3596 = vst.msk [vmem:[%s14736_s12 + $0x60] sm:$0xf] %vm3571_vm3, %v11332_v45  ;;  %v19349_v41 = vld [vmem:[#allocation54_spill] sm:$0xff]  ;;  %v10983_v8 = vld [vmem:[%s11907_s28 + $0xf0] sm:$0x8] }
 0x2ce   : > { %v6829_v47 = vsel %vm11909_vm2, %v10820_v50, %v6828_v0  ;;  %v7269_v31 = vrot.slane %v10888_v7, 6  ;;  %3599 = vst.msk [vmem:[%s14736_s12 + $0x6c] sm:$0xf] %vm3571_vm3, %v11335_v4  ;;  %v3436_v53 = vmax.f32 %v3404_v42, 0.0  ;;  %v6832_v11 = vsel %vm11909_vm2, %v6830_v6, %v6831_v57  ;;  %v16434_v30 = vpop.permute.xlu0 %5559  ;;  %v3282_v0 = vpop.permute.xlu1 %3281  ;;  %v10891_v7 = vld [vmem:[%s11907_s28 + $0x98] sm:$0xf] }
 0x2cf   : > { %8441 = vrot.lane.b32.xlu0 %v19347_v12, %s11846_s15  ;;  %8363 = vrot.lane.b32.xlu1 %v19348_v2, %s11845_s10  ;;  %v7038_v9 = vrot.slane %v7036_v17, 4  ;;  %v7039_v39 = vrot.slane %v6928_v10, 6  ;;  %v3441_v27 = vmax.f32 %v3409_v24, 0.0  ;;  %v3375_v36 = vmul.f32 %v15921_v25, %v3343_v60 }
 0x2d0   : > { %v11123_v50 = vcombine.low %v7030_v38, %v7033_v63  ;;  %v11333_v32 = vpack.c.bf16 %v3436_v53, %v3436_v53  ;;  %v3346_v1 = vadd.f32 %v19349_v41, %v3282_v0  ;;  %v10931_v45 = vrot.slane %v10887_v49, 10  ;;  %v10890_v63 = vld [vmem:[%s11907_s28 + $0x94] sm:$0xc]  ;;  %v16458_v49 = vld [vmem:[%s11907_s28 + $0xc8] sm:$0xf]  ;;  %v19352_v53 = vld [vmem:[#allocation69_spill] sm:$0xff] }
 0x2d1   : > { %v7272_v4 = vrot.slane %v10889_v13, 6  ;;  %v11338_v6 = vpack.c.bf16 %v3441_v27, %v3441_v27  ;;  %v3407_v57 = vadd.f32 %v15932_v18, %v3375_v36  ;;  %v19350_v10 = vcombine.low %v16293_v52, %v16341_v15  ;;  %v10892_v52 = vld [vmem:[%s11907_s28 + $0x9c] sm:$0x3] }
 0x2d2   : > { %v11108_v38 = vcombine.low %v6829_v47, %v6832_v11  ;;  %v7271_v42 = vrot.slane %v7269_v31, 4  ;;  %3597 = vst.msk [vmem:[%s14736_s12 + $0x64] sm:$0xf] %vm3571_vm3, %v11333_v32  ;;  %v3378_v24 = vmul.f32 %v15921_v25, %v3346_v1  ;;  %v7037_v60 = vsel %vm12149_vm5, %v10836_v19, %v7036_v17  ;;  %v16455_v2 = vpop.permute.xlu0 %5563  ;;  %v3278_v47 = vpop.permute.xlu1 %3277  ;;  %v11706_v17 = vld [vmem:[%s11907_s28 + $0x80] sm:$0xff]  }
 0x2d3   : > { %7917 = vrot.lane.b32.xlu0 %v19350_v10, %s11840_s29  ;;  %8443 = vrot.lane.b32.xlu1 %v11202_v5, %s11846_s15  ;;  %v7040_v12 = vsel %vm12149_vm5, %v7038_v9, %v7039_v39  ;;  %v7276_v15 = vrot.slane %v10891_v7, 6  ;;  %3602 = vst.msk [vmem:[%s14736_s12 + $0x78] sm:$0xf] %vm3571_vm3, %v11338_v6  ;;  %v3439_v5 = vmax.f32 %v3407_v57, 0.0  ;;  %19351 = vst [vmem:[#allocation80_spill] sm:$0xff] %v16455_v2  ;;  %v10932_v39 = vrot.slane %v10890_v63, 10 }
 0x2d4   : > { %v3410_v13 = vadd.f32 %v15932_v18, %v3378_v24  ;;  %v3344_v11 = vadd.f32 %v3278_v47, %v19352_v53  ;;  %v7270_v19 = vsel %vm12149_vm5, %v10931_v45, %v7269_v31  ;;  %v16466_v9 = vld [vmem:[%s11907_s28 + $0xe4] sm:$0xf]  ;;  %v11124_v36 = vcombine.low %v7037_v60, %v7040_v12  ;;  %v10581_v31 = vld [vmem:[%s11907_s28 + $0xd8] sm:$0xf]  ;;  %v10580_v63 = vld [vmem:[%s11907_s28 + $0xd4] sm:$0xe] }
 0x2d5   : > { %v11336_v27 = vpack.c.bf16 %v3439_v5, %v3439_v5  ;;  %v7273_v0 = vsel %vm12149_vm5, %v7271_v42, %v7272_v4  ;;  %v7279_v7 = vrot.slane %v10892_v52, 6  ;;  %v10577_v32 = vld [vmem:[%s11907_s28 + $0xc4] sm:$0xe]  ;;  %v7278_v6 = vrot.slane %v7276_v15, 4  ;;  %v16485_v42 = vld [vmem:[%s11907_s28 + $0xf4] sm:$0xf] }
 0x2d6   : > { %v3442_v1 = vmax.f32 %v3410_v13, 0.0  ;;  %v3376_v45 = vmul.f32 %v15921_v25, %v3344_v11  ;;  %v5119_v57 = vrot.slane %v16458_v49, 5  ;;  %v16479_v10 = vpop.permute.xlu0 %5567  ;;  %v7497_v4 = vrot.slane %v16466_v9, 7  ;;  %v11707_v60 = vld [vmem:[%s11907_s28 + $0x90] sm:$0xff]   ;;  %v10949_v12 = vld [vmem:[%s11907_s28 + $0xe0] sm:$0xf] }
 0x2d7   : > { %7997 = vrot.lane.b32.xlu0 %v11123_v50, %s11841_s30  ;;  %7919 = vrot.lane.b32.xlu1 %v11108_v38, %s11840_s29  ;;  %v10579_v50 = vld [vmem:[%s11907_s28 + $0xcc] sm:$0x1]  ;;  %3600 = vst.msk [vmem:[%s14736_s12 + $0x70] sm:$0xf] %vm3571_vm3, %v11336_v27  ;;  %19353 = vst [vmem:[#allocation81_spill] sm:$0xff] %v16479_v10  ;;  %v16481_v38 = vpop.permute.xlu1 %5565  ;;  %v5126_v5 = vrot.slane %v10581_v31, 5  ;;  %v11155_v49 = vcombine.low %v7270_v19, %v7273_v0  ;;  %v7277_v13 = vsel %vm12149_vm5, %v10932_v39, %v7276_v15 }
 0x2d8   : > { %19354 = vst [vmem:[#allocation72_spill] sm:$0xff] %v16481_v38  ;;  %v11339_v25 = vpack.c.bf16 %v3442_v1, %v3442_v1  ;;  %v3408_v24 = vadd.f32 %v15932_v18, %v3376_v45  ;;  %v10582_v52 = vld [vmem:[%s11907_s28 + $0xdc] sm:$0x1]  ;;  %v10981_v47 = vld [vmem:[%s11907_s28 + $0xe0] sm:$0x8]  ;;  %v7504_v11 = vrot.slane %v16485_v42, 7  ;;  %v7280_v31 = vsel %vm12149_vm5, %v7278_v6, %v7279_v7 }
 0x2d9   : > { %v10621_v27 = vrot.slane %v10577_v32, 9  ;;  %v10982_v1 = vld [vmem:[%s11907_s28 + $0xe8] sm:$0x7]  ;;  %v5121_v41 = vrot.slane %v5119_v57, 4  ;;  %v7499_v39 = vrot.slane %v7497_v4, 4  ;;  %v10622_v0 = vrot.slane %v10580_v63, 9 }
 0x2da   : > { %v11032_v18 = vld [vmem:[%s11907_s28 + $0xe8] sm:$0xf]  ;;  %3603 = vst.msk [vmem:[%s14736_s12 + $0x7c] sm:$0xf] %vm3571_vm3, %v11339_v25  ;;  %v3440_v45 = vmax.f32 %v3408_v24, 0.0  ;;  %v16505_v19 = vpop.permute.xlu0 %5571  ;;  %v5129_v32 = vrot.slane %v10582_v52, 5  ;;  %v11156_v33 = vcombine.low %v7277_v13, %v7280_v31 }
 0x2db   : > { %8109 = vrot.lane.b32.xlu0 %v11706_v17, %s11842_s7  ;;  %7999 = vrot.lane.b32.xlu1 %v11124_v36, %s11841_s30  ;;  %v10951_v17 = vld [vmem:[%s11907_s28 + $0xf0] sm:$0xf]  ;;  %v5122_v36 = vrot.slane %v10579_v50, 5  ;;  %19355 = vst [vmem:[#allocation74_spill] sm:$0xff] %v16505_v19  ;;  %v16507_v15 = vpop.permute.xlu1 %5569  ;;  %v11011_v53 = vrot.slane %v10981_v47, 11  ;;  %v5128_v61 = vrot.slane %v5126_v5, 4  ;;  %v11171_v50 = vcombine.low %v10949_v12, %v16466_v9 }
 0x2dc   : > { %19356 = vst [vmem:[#allocation76_spill] sm:$0xff] %v16507_v15  ;;  %v11031_v25 = vld [vmem:[%s11907_s28 + $0xe4] sm:$0xc]  ;;  %v11337_v24 = vpack.c.bf16 %v3440_v45, %v3440_v45  ;;  %v7500_v7 = vrot.slane %v10982_v1, 7  ;;  %v7705_v6 = vrot.slane %v11032_v18, 6  ;;  %v7506_v63 = vrot.slane %v7504_v11, 4 }
 0x2dd   : > { %v11172_v52 = vcombine.low %v10951_v17, %v16485_v42  ;;  %v5120_v47 = vsel %vm13496_vm12, %v10621_v27, %v5119_v57  ;;  %v6702_v1 = vld [vmem:[%s11907_s28 + $0x44] sm:$0xf]  ;;  %v5127_v12 = vsel %vm13496_vm12, %v10622_v0, %v5126_v5  ;;  %v7498_v42 = vsel %vm11909_vm2, %v11011_v53, %v7497_v4  ;;  %v6733_v17 = vld [vmem:[%s11907_s28 + $0x40] sm:$0x8]  ;;  %v10991_v10 = vld [vmem:[%s11907_s28 + $0x130] sm:$0x8] }
 0x2de   : > { %3601 = vst.msk [vmem:[%s14736_s12 + $0x74] sm:$0xf] %vm3571_vm3, %v11337_v24  ;;  %v16525_v18 = vpop.permute.xlu0 %5575  ;;  %v11075_v13 = vrot.slane %v11031_v25, 10  ;;  %v11012_v45 = vrot.slane %v10983_v8, 11  ;;  %v5130_v57 = vsel %vm13496_vm12, %v5128_v61, %v5129_v32  ;;  %v7707_v27 = vrot.slane %v7705_v6, 4 }
 0x2df   : > { %8189 = vrot.lane.b32.xlu0 %v11155_v49, %s11843_s8  ;;  %8111 = vrot.lane.b32.xlu1 %v11707_v60, %s11842_s7  ;;  %v5123_v49 = vsel %vm13496_vm12, %v5121_v41, %v5122_v36  ;;  %v11035_v60 = vld [vmem:[%s11907_s28 + $0xf8] sm:$0xf]  ;;  %19357 = vst [vmem:[#allocation83_spill] sm:$0xff] %v16525_v18  ;;  %v16527_v9 = vpop.permute.xlu1 %5573  ;;  %v7501_v41 = vsel %vm11909_vm2, %v7499_v39, %v7500_v7  ;;  %v7708_v31 = vrot.slane %v11033_v62, 6  ;;  %v6734_v36 = vld [vmem:[%s11907_s28 + $0x48] sm:$0x7] }
 0x2e0   : > { %19358 = vst [vmem:[#allocation84_spill] sm:$0xff] %v16527_v9  ;;  %v10749_v53 = vcombine.low %v5120_v47, %v5123_v49  ;;  %v7507_v4 = vrot.slane %v10984_v20, 7  ;;  %v6835_v5 = vrot.slane %v6702_v1, 7  ;;  %v11034_v8 = vld [vmem:[%s11907_s28 + $0xf4] sm:$0xc]  ;;  %v7712_v0 = vrot.slane %v11035_v60, 6 }
 0x2e1   : > { %v11036_v25 = vld [vmem:[%s11907_s28 + $0xfc] sm:$0x3]  ;;  %v10750_v39 = vcombine.low %v5127_v12, %v5130_v57  ;;  %v11187_v62 = vcombine.low %v7498_v42, %v7501_v41  ;;  %v7706_v24 = vsel %vm12149_vm5, %v11075_v13, %v7705_v6  ;;  %v6930_v20 = vld [vmem:[%s11907_s28 + $0x48] sm:$0xf]  ;;  %v6704_v7 = vld [vmem:[%s11907_s28 + $0x54] sm:$0xf] }
 0x2e2   : > { %v16543_v61 = vpop.permute.xlu0 %5579  ;;  %v10821_v47 = vrot.slane %v6733_v17, 11  ;;  %v6838_v49 = vrot.slane %v6734_v36, 7  ;;  %v11076_v1 = vrot.slane %v11034_v8, 10  ;;  %v7508_v6 = vsel %vm11909_vm2, %v7506_v63, %v7507_v4  ;;  %v6929_v42 = vld [vmem:[%s11907_s28 + $0x44] sm:$0xc] }
 0x2e3   : > { %8285 = vrot.lane.b32.xlu0 %v11171_v50, %s11844_s9  ;;  %8191 = vrot.lane.b32.xlu1 %v11156_v33, %s11843_s8  ;;  %19359 = vst [vmem:[#allocation79_spill] sm:$0xff] %v16543_v61  ;;  %v16545_v32 = vpop.permute.xlu1 %5577  ;;  %v7505_v33 = vsel %vm11909_vm2, %v11012_v45, %v7504_v11  ;;  %v7709_v50 = vsel %vm12149_vm5, %v7707_v27, %v7708_v31  ;;  %v6837_v60 = vrot.slane %v6835_v5, 4  ;;  %v7714_v11 = vrot.slane %v7712_v0, 4  ;;  %v6931_v13 = vld [vmem:[%s11907_s28 + $0x4c] sm:$0x3] }
 0x2e4   : > { %19360 = vst [vmem:[#allocation82_spill] sm:$0xff] %v16545_v32  ;;  %v7715_v12 = vrot.slane %v11036_v25, 6  ;;  %v7043_v45 = vrot.slane %v6930_v20, 6  ;;  %v6735_v57 = vld [vmem:[%s11907_s28 + $0x50] sm:$0x8]  ;;  %v6842_v41 = vrot.slane %v6704_v7, 7  ;;  %v11203_v17 = vcombine.low %v7706_v24, %v7709_v50 }
 0x2e5   : > { %v6933_v36 = vld [vmem:[%s11907_s28 + $0x58] sm:$0xf]  ;;  %v6836_v63 = vsel %vm11909_vm2, %v10821_v47, %v6835_v5  ;;  %v7713_v4 = vsel %vm12149_vm5, %v11076_v1, %v7712_v0  ;;  %v10837_v8 = vrot.slane %v6929_v42, 10  ;;  %v6839_v25 = vsel %vm11909_vm2, %v6837_v60, %v6838_v49  ;;  %v6932_v7 = vld [vmem:[%s11907_s28 + $0x54] sm:$0xc] }
 0x2e6   : > { %v16562_v27 = vpop.permute.xlu0 %5631  ;;  %v7716_v24 = vsel %vm12149_vm5, %v7714_v11, %v7715_v12  ;;  %v7046_v20 = vrot.slane %v6931_v13, 6  ;;  %v7045_v5 = vrot.slane %v7043_v45, 4  ;;  %v6844_v50 = vrot.slane %v6842_v41, 4  ;;  %v10894_v1 = vld [vmem:[%s11907_s28 + $0xa8] sm:$0xf] }
 0x2e7   : > { %8287 = vrot.lane.b32.xlu0 %v11172_v52, %s11844_s9  ;;  %5795 = vrot.lane.b32.xlu1 %v10749_v53, %s11846_s15  ;;  %v16564_v31 = vpop.permute.xlu1 %5581  ;;  %v6736_v52 = vld [vmem:[%s11907_s28 + $0x58] sm:$0x7]  ;;  %v11188_v53 = vcombine.low %v7505_v33, %v7508_v6  ;;  %v10822_v33 = vrot.slane %v6735_v57, 11  ;;  %v7050_v47 = vrot.slane %v6933_v36, 6  ;;  %v11109_v49 = vcombine.low %v6836_v63, %v6839_v25  ;;  %v10893_v13 = vld [vmem:[%s11907_s28 + $0xa4] sm:$0xc] }
 0x2e8   : > { %19361 = vst [vmem:[#allocation3_spill] sm:$0xff] %v16564_v31  ;;  %v6845_v0 = vrot.slane %v6736_v52, 7  ;;  %v11204_v60 = vcombine.low %v7713_v4, %v7716_v24  ;;  %v7044_v11 = vsel %vm12149_vm5, %v10837_v8, %v7043_v45  ;;  %v10838_v42 = vrot.slane %v6932_v7, 10  ;;  %v10895_v57 = vld [vmem:[%s11907_s28 + $0xac] sm:$0x3] }
 0x2e9   : > { %v6843_v12 = vsel %vm11909_vm2, %v10822_v33, %v6842_v41  ;;  %v7283_v52 = vrot.slane %v10894_v1, 6  ;;  %v7047_v36 = vsel %vm12149_vm5, %v7045_v5, %v7046_v20  ;;  %v10897_v4 = vld [vmem:[%s11907_s28 + $0xb8] sm:$0xf]  ;;  %v10933_v41 = vrot.slane %v10893_v13, 10  ;;  %v10896_v24 = vld [vmem:[%s11907_s28 + $0xb4] sm:$0xc] }
 0x2ea   : > { %v16580_v6 = vpop.permute.xlu0 %5635  ;;  %v7286_v8 = vrot.slane %v10895_v57, 6  ;;  %v11125_v20 = vcombine.low %v7044_v11, %v7047_v36  ;;  %v10898_v5 = vld [vmem:[%s11907_s28 + $0xbc] sm:$0x3]  ;;  %v7051_v1 = vsel %vm12149_vm5, %v10838_v42, %v7050_v47  ;;  %v10934_v57 = vrot.slane %v10896_v24, 10  ;;  %v10160_v18 = vld [vmem:[%s11907_s28 + $0x38] sm:$0x1] }
 0x2eb   : > { %5797 = vrot.lane.b32.xlu0 %v10750_v39, %s11846_s15  ;;  %8365 = vrot.lane.b32.xlu1 %v11187_v62, %s11845_s10  ;;  %v16582_v39 = vpop.permute.xlu1 %5633  ;;  %v6934_v62 = vld [vmem:[%s11907_s28 + $0x5c] sm:$0x3]  ;;  %v7285_v7 = vrot.slane %v7283_v52, 4  ;;  %v7284_v11 = vsel %vm12149_vm5, %v10933_v41, %v7283_v52  ;;  %v10583_v52 = vld [vmem:[%s11907_s28 + $0xe4] sm:$0xe]  ;;  %v10624_v23 = vrot.slane %v10586_v56, 9 }
 0x2ec   : > { %v7053_v63 = vrot.slane %v6934_v62, 6  ;;  %v10587_v41 = vld [vmem:[%s11907_s28 + $0xf8] sm:$0xf]  ;;  %v11014_v21 = vrot.slane %v10987_v48, 11  ;;  %v6849_v56 = vrot.slane %v6706_v59, 7 }
 0x2ed   : > { %v11042_v59 = vld [vmem:[%s11907_s28 + $0x11c] sm:$0x3] }
 0x2ee   : > { %v16598_v25 = vpop.permute.xlu0 %5639 }
 0x2ef   : > { %8445 = vrot.lane.b32.xlu0 %v11203_v17, %s11846_s15  ;;  %8367 = vrot.lane.b32.xlu1 %v11188_v53, %s11845_s10  ;;  %v6846_v17 = vsel %vm11909_vm2, %v6844_v50, %v6845_v0  ;;  %v7052_v53 = vrot.slane %v7050_v47, 4  ;;  %v16600_v45 = vpop.permute.xlu1 %5637  ;;  %v7290_v50 = vrot.slane %v10897_v4, 6  ;;  %v10584_v0 = vld [vmem:[%s11907_s28 + $0xe8] sm:$0xf]  ;;  %v7293_v47 = vrot.slane %v10898_v5, 6 }
 0x2f0   : > { %v11110_v33 = vcombine.low %v6843_v12, %v6846_v17  ;;  %v16619_v12 = vld [vmem:[%s11907_s28 + $0x104] sm:$0xf]  ;;  %v5133_v42 = vrot.slane %v10584_v0, 5  ;;  %v7287_v17 = vsel %vm12149_vm5, %v7285_v7, %v7286_v8  ;;  %v10585_v4 = vld [vmem:[%s11907_s28 + $0xec] sm:$0x1]  ;;  %v10623_v8 = vrot.slane %v10583_v52, 9 }
 0x2f1   : > { %v7054_v62 = vsel %vm12149_vm5, %v7052_v53, %v7053_v63  ;;  %v18918_v53 = vrot.slane %v16619_v12, 7  ;;  %v7292_v63 = vrot.slane %v7290_v50, 4  ;;  %v16634_v0 = vld [vmem:[%s11907_s28 + $0x108] sm:$0xf]  ;;  %v16647_v52 = vld [vmem:[%s11907_s28 + $0x114] sm:$0xf] }
 0x2f2   : > { %v16611_v13 = vpop.permute.xlu0 %5643  ;;  %v11126_v36 = vcombine.low %v7051_v1, %v7054_v62  ;;  %v10953_v1 = vld [vmem:[%s11907_s28 + $0x100] sm:$0xf]  ;;  %v5135_v7 = vrot.slane %v5133_v42, 4  ;;  %v5136_v62 = vrot.slane %v10585_v4, 5  ;;  %v5140_v4 = vrot.slane %v10587_v41, 5 }
 0x2f3   : > { %7921 = vrot.lane.b32.xlu0 %v11109_v49, %s11840_s29  ;;  %8447 = vrot.lane.b32.xlu1 %v11204_v60, %s11846_s15  ;;  %19362 = vst [vmem:[#allocation92_spill] sm:$0xff] %v16611_v13  ;;  %v16613_v49 = vpop.permute.xlu1 %5641  ;;  %v11710_v60 = vld [vmem:[%s11907_s28 + $0xa0] sm:$0xff]   ;;  %v7513_v40 = vrot.slane %v18918_v53, 4  ;;  %v7719_v14 = vrot.slane %v16634_v0, 6  ;;  %v11173_v16 = vcombine.low %v10953_v1, %v16619_v12  ;;  %v5134_v3 = vsel %vm13496_vm12, %v10623_v8, %v5133_v42  ;;  %v10988_v0 = vld [vmem:[%s11907_s28 + $0x118] sm:$0x7] }
 0x2f4   : > { %19363 = vst [vmem:[#allocation93_spill] sm:$0xff] %v16613_v49  ;;  %v5137_v37 = vsel %vm13496_vm12, %v5135_v7, %v5136_v62  ;;  %v5142_v54 = vrot.slane %v5140_v4, 4  ;;  %v11013_v1 = vrot.slane %v10985_v44, 11  ;;  %v6738_v44 = vld [vmem:[%s11907_s28 + $0x68] sm:$0x7]  ;;  %v19395_v13 = vld [vmem:[#allocation57_spill] sm:$0xff] }
 0x2f5   : > { %v7721_v42 = vrot.slane %v7719_v14, 4  ;;  %v11051_v49 = vld [vmem:[%s11907_s28 + $0x14c] sm:$0x3] }
 0x2f6   : > { %v16629_v24 = vpop.permute.xlu0 %5647 }
 0x2f7   : > { %8001 = vrot.lane.b32.xlu0 %v11125_v20, %s11841_s30  ;;  %7923 = vrot.lane.b32.xlu1 %v11110_v33, %s11840_s29  ;;  %19364 = vst [vmem:[#allocation94_spill] sm:$0xff] %v16629_v24  ;;  %v16631_v5 = vpop.permute.xlu1 %5645  ;;  %v11157_v20 = vcombine.low %v7284_v11, %v7287_v17  ;;  %v11711_v33 = vld [vmem:[%s11907_s28 + $0xb0] sm:$0xff]   ;;  %v7291_v11 = vsel %vm12149_vm5, %v10934_v57, %v7290_v50  ;;  %v10986_v57 = vld [vmem:[%s11907_s28 + $0x108] sm:$0x7] }
 0x2f8   : > { %19365 = vst [vmem:[#allocation95_spill] sm:$0xff] %v16631_v5  ;;  %v7294_v17 = vsel %vm12149_vm5, %v7292_v63, %v7293_v47  ;;  %v10955_v50 = vld [vmem:[%s11907_s28 + $0x110] sm:$0xf]  ;;  %v11037_v47 = vld [vmem:[%s11907_s28 + $0x104] sm:$0xc] }
 0x2f9   : > { %v11039_v63 = vld [vmem:[%s11907_s28 + $0x10c] sm:$0x3]  ;;  %v11158_v41 = vcombine.low %v7291_v11, %v7294_v17  ;;  %v11041_v11 = vld [vmem:[%s11907_s28 + $0x118] sm:$0xf]  ;;  %v7514_v17 = vrot.slane %v10986_v57, 7  ;;  %v11077_v43 = vrot.slane %v11037_v47, 10  ;;  %v11174_v31 = vcombine.low %v10955_v50, %v16647_v52 }
 0x2fa   : > { %v16654_v53 = vpop.permute.xlu0 %5651  ;;  %v7722_v8 = vrot.slane %v11039_v63, 6  ;;  %v7726_v61 = vrot.slane %v11041_v11, 6  ;;  %v10751_v57 = vcombine.low %v5134_v3, %v5137_v37  ;;  %v5141_v47 = vsel %vm13496_vm12, %v10624_v23, %v5140_v4  ;;  %v11040_v63 = vld [vmem:[%s11907_s28 + $0x114] sm:$0xc]  ;;  %v6936_v23 = vld [vmem:[%s11907_s28 + $0x68] sm:$0xf] }
 0x2fb   : > { %8113 = vrot.lane.b32.xlu0 %v11710_v60, %s11842_s7  ;;  %8003 = vrot.lane.b32.xlu1 %v11126_v36, %s11841_s30  ;;  %v7518_v60 = vrot.slane %v16647_v52, 7  ;;  %v10588_v36 = vld [vmem:[%s11907_s28 + $0xfc] sm:$0x1]  ;;  %19366 = vst [vmem:[#allocation96_spill] sm:$0xff] %v16654_v53  ;;  %v16656_v34 = vpop.permute.xlu1 %5649  ;;  %v7720_v37 = vsel %vm12149_vm5, %v11077_v43, %v7719_v14  ;;  %v6851_v43 = vrot.slane %v6849_v56, 4  ;;  %v6852_v50 = vrot.slane %v6738_v44, 7 }
 0x2fc   : > { %19367 = vst [vmem:[#allocation97_spill] sm:$0xff] %v16656_v34  ;;  %v5143_v35 = vrot.slane %v10588_v36, 5  ;;  %v6737_v36 = vld [vmem:[%s11907_s28 + $0x60] sm:$0x8]  ;;  %v7723_v3 = vsel %vm12149_vm5, %v7721_v42, %v7722_v8  ;;  %v6708_v14 = vld [vmem:[%s11907_s28 + $0x74] sm:$0xf] }
 0x2fd   : > { %v7729_v11 = vrot.slane %v11042_v59, 6  ;;  %v7057_v8 = vrot.slane %v6936_v23, 6  ;;  %v6938_v23 = vld [vmem:[%s11907_s28 + $0x74] sm:$0xc]  ;;  %v11045_v24 = vld [vmem:[%s11907_s28 + $0x12c] sm:$0x3] }
 0x2fe   : > { %v16673_v7 = vpop.permute.xlu0 %5655  ;;  %v5144_v48 = vsel %vm13496_vm12, %v5142_v54, %v5143_v35  ;;  %v7519_v35 = vsel %vm11909_vm2, %v11014_v21, %v7518_v60  ;;  %v6935_v21 = vld [vmem:[%s11907_s28 + $0x64] sm:$0xc] }
 0x2ff   : > { %8193 = vrot.lane.b32.xlu0 %v11157_v20, %s11843_s8  ;;  %8115 = vrot.lane.b32.xlu1 %v11711_v33, %s11842_s7  ;;  %19368 = vst [vmem:[#allocation98_spill] sm:$0xff] %v16673_v7  ;;  %v16675_v62 = vpop.permute.xlu1 %5653  ;;  %v7520_v20 = vrot.slane %v7518_v60, 4  ;;  %v7521_v33 = vrot.slane %v10988_v0, 7  ;;  %v19370_v0 = vrot.slane %v16619_v12, 7  ;;  %v10823_v12 = vrot.slane %v6737_v36, 11 }
 0x300   : > { %19369 = vst [vmem:[#allocation99_spill] sm:$0xff] %v16675_v62  ;;  %v6937_v60 = vld [vmem:[%s11907_s28 + $0x6c] sm:$0x3] }
 0x301   : > { %v7512_v52 = vsel %vm11909_vm2, %v11013_v1, %v19370_v0  ;;  %v7728_v1 = vrot.slane %v7726_v61, 4  ;;  %v6739_v0 = vld [vmem:[%s11907_s28 + $0x70] sm:$0x8] }
 0x302   : > { %v16699_v4 = vpop.permute.xlu0 %5659 }
 0x303   : > { %8289 = vrot.lane.b32.xlu0 %v11173_v16, %s11844_s9  ;;  %8195 = vrot.lane.b32.xlu1 %v11158_v41, %s11843_s8  ;;  %v7515_v16 = vsel %vm11909_vm2, %v7513_v40, %v7514_v17  ;;  %19371 = vst [vmem:[#allocation100_spill] sm:$0xff] %v16699_v4  ;;  %v16701_v54 = vpop.permute.xlu1 %5657  ;;  %v7522_v40 = vsel %vm11909_vm2, %v7520_v20, %v7521_v33  ;;  %v11078_v41 = vrot.slane %v11040_v63, 10  ;;  %v6856_v20 = vrot.slane %v6708_v14, 7  ;;  %v6939_v33 = vld [vmem:[%s11907_s28 + $0x78] sm:$0xf] }
 0x304   : > { %19372 = vst [vmem:[#allocation101_spill] sm:$0xff] %v16701_v54  ;;  %v10752_v17 = vcombine.low %v5141_v47, %v5144_v48  ;;  %v11189_v42 = vcombine.low %v7512_v52, %v7515_v16  ;;  %v11205_v63 = vcombine.low %v7720_v37, %v7723_v3  ;;  %v11190_v59 = vcombine.low %v7519_v35, %v7522_v40  ;;  %v10900_v14 = vld [vmem:[%s11907_s28 + $0xc8] sm:$0xf]  ;;  %v10902_v54 = vld [vmem:[%s11907_s28 + $0xd4] sm:$0xc] }
 0x305   : > { %v6853_v47 = vsel %vm11909_vm2, %v6851_v43, %v6852_v50  ;;  %v7727_v48 = vsel %vm12149_vm5, %v11078_v41, %v7726_v61  ;;  %v7730_v52 = vsel %vm12149_vm5, %v7728_v1, %v7729_v11  ;;  %v10839_v16 = vrot.slane %v6935_v21, 10  ;;  %v6940_v43 = vld [vmem:[%s11907_s28 + $0x7c] sm:$0x3]  ;;  %v16737_v41 = vld [vmem:[%s11907_s28 + $0x20] sm:$0xe] }
 0x306   : > { %v16714_v36 = vpop.permute.xlu0 %5711  ;;  %v7059_v37 = vrot.slane %v7057_v8, 4  ;;  %v7060_v3 = vrot.slane %v6937_v60, 6  ;;  %v7064_v35 = vrot.slane %v6939_v33, 6  ;;  %v6858_v40 = vrot.slane %v6856_v20, 4  ;;  %v10899_v33 = vld [vmem:[%s11907_s28 + $0xc4] sm:$0xc] }
 0x307   : > { %8291 = vrot.lane.b32.xlu0 %v11174_v31, %s11844_s9  ;;  %5799 = vrot.lane.b32.xlu1 %v10751_v57, %s11846_s15  ;;  %v16716_v44 = vpop.permute.xlu1 %5661  ;;  %v6850_v31 = vsel %vm11909_vm2, %v10823_v12, %v6849_v56  ;;  %v6740_v57 = vld [vmem:[%s11907_s28 + $0x78] sm:$0x7]  ;;  %v10824_v56 = vrot.slane %v6739_v0, 11  ;;  %v11206_v11 = vcombine.low %v7727_v48, %v7730_v52  ;;  %v7067_v0 = vrot.slane %v6940_v43, 6  ;;  %v16754_v52 = vld [vmem:[%s11907_s28 + $0x44] sm:$0xf] }
 0x308   : > { %19373 = vst [vmem:[#allocation102_spill] sm:$0xff] %v16716_v44  ;;  %v6859_v12 = vrot.slane %v6740_v57, 7  ;;  %v11111_v1 = vcombine.low %v6850_v31, %v6853_v47  ;;  %v7061_v21 = vsel %vm12149_vm5, %v7059_v37, %v7060_v3  ;;  %v7066_v60 = vrot.slane %v7064_v35, 4  ;;  %v10157_v47 = vld [vmem:[%s11907_s28 + $0x28] sm:$0x1] }
 0x309   : > { %v7297_v31 = vrot.slane %v10900_v14, 6  ;;  %v6857_v57 = vsel %vm11909_vm2, %v10824_v56, %v6856_v20  ;;  %v10203_v20 = vrot.slane %v16737_v41, 9  ;;  %v16764_v56 = vld [vmem:[%s11907_s28 + $0x40] sm:$0xe]  ;;  %v10935_v14 = vrot.slane %v10899_v33, 10 }
 0x30a   : > { %v16732_v61 = vpop.permute.xlu0 %5715  ;;  %v7068_v41 = vsel %vm12149_vm5, %v7066_v60, %v7067_v0  ;;  %v10936_v62 = vrot.slane %v10902_v54, 10 }
 0x30b   : > { %5801 = vrot.lane.b32.xlu0 %v10752_v17, %s11846_s15  ;;  %8369 = vrot.lane.b32.xlu1 %v11189_v42, %s11845_s10  ;;  %v16734_v50 = vpop.permute.xlu1 %5713  ;;  %v7058_v17 = vsel %vm12149_vm5, %v10839_v16, %v7057_v8  ;;  %v10840_v42 = vrot.slane %v6938_v23, 10  ;;  %v6860_v8 = vsel %vm11909_vm2, %v6858_v40, %v6859_v12  ;;  %v10903_v23 = vld [vmem:[%s11907_s28 + $0xd8] sm:$0xf]  ;;  %v16767_v40 = vld [vmem:[%s11907_s28 + $0x48] sm:$0x1]  ;;  %v7299_v44 = vrot.slane %v7297_v31, 4 }
 0x30c   : > { %v11127_v12 = vcombine.low %v7058_v17, %v7061_v21  ;;  %v11112_v16 = vcombine.low %v6857_v57, %v6860_v8  ;;  %v3712_v17 = vrot.slane %v10157_v47, 5  ;;  %v10904_v21 = vld [vmem:[%s11907_s28 + $0xdc] sm:$0x3]  ;;  %v3726_v8 = vrot.slane %v16767_v40, 5  ;;  %v11714_v40 = vld [vmem:[%s11907_s28 + $0xc0] sm:$0xff]  }
 0x30d   : > { %v7065_v43 = vsel %vm12149_vm5, %v10840_v42, %v7064_v35  ;;  %v7304_v35 = vrot.slane %v10903_v23, 6  ;;  %v16781_v42 = vld [vmem:[%s11907_s28 + $0x108] sm:$0xf]  ;;  %v11781_v23 = vld [vmem:[%s11907_s28 + $0x34] sm:$0xf] }
 0x30e   : > { %v16757_v37 = vpop.permute.xlu0 %5719  ;;  %v3716_v32 = vrot.slane %v11781_v23, 5  ;;  %v11128_v7 = vcombine.low %v7065_v43, %v7068_v41  ;;  %v5147_v23 = vrot.slane %v16781_v42, 5  ;;  %v10589_v41 = vld [vmem:[%s11907_s28 + $0x104] sm:$0xe]  ;;  %v10594_v42 = vld [vmem:[%s11907_s28 + $0x11c] sm:$0x1] }
 0x30f   : > { %8449 = vrot.lane.b32.xlu0 %v11205_v63, %s11846_s15  ;;  %8371 = vrot.lane.b32.xlu1 %v11190_v59, %s11845_s10  ;;  %v10901_v63 = vld [vmem:[%s11907_s28 + $0xcc] sm:$0x3]  ;;  %v11779_v59 = vld [vmem:[%s11907_s28 + $0x24] sm:$0xf]  ;;  %19374 = vst [vmem:[#allocation103_spill] sm:$0xff] %v16757_v37  ;;  %v16759_v3 = vpop.permute.xlu1 %5717  ;;  %v7306_v43 = vrot.slane %v7304_v35, 4 }
 0x310   : > { %v3709_v48 = vrot.slane %v11779_v59, 5  ;;  %v16772_v59 = vld [vmem:[%s11907_s28 + $0x30] sm:$0xe]  ;;  %v7300_v4 = vrot.slane %v10901_v63, 6  ;;  %v16792_v63 = vld [vmem:[%s11907_s28 + $0x118] sm:$0xf] }
 0x311   : > { %v10204_v47 = vrot.slane %v16772_v59, 9  ;;  %v7307_v59 = vrot.slane %v10904_v21, 6  ;;  %v10592_v21 = vld [vmem:[%s11907_s28 + $0x114] sm:$0xe]  ;;  %v3718_v9 = vrot.slane %v3716_v32, 4  ;;  %v10625_v34 = vrot.slane %v10589_v41, 9 }
 0x312   : > { %v3711_v33 = vrot.slane %v3709_v48, 4  ;;  %v16787_v60 = vpop.permute.xlu0 %5723  ;;  %v5149_v15 = vrot.slane %v5147_v23, 4  ;;  %v10626_v19 = vrot.slane %v10592_v21, 9  ;;  %v16849_v41 = vld [vmem:[%s11907_s28 + $0x60] sm:$0xe] }
 0x313   : > { %7925 = vrot.lane.b32.xlu0 %v11111_v1, %s11840_s29  ;;  %8451 = vrot.lane.b32.xlu1 %v11206_v11, %s11846_s15  ;;  %v10205_v1 = vrot.slane %v16764_v56, 9  ;;  %v19375_v11 = vrot.slane %v16754_v52, 5  ;;  %19376 = vst [vmem:[#allocation104_spill] sm:$0xff] %v16787_v60  ;;  %v16789_v0 = vpop.permute.xlu1 %5721  ;;  %v7298_v56 = vsel %vm12149_vm5, %v10935_v14, %v7297_v31  ;;  %v10591_v31 = vld [vmem:[%s11907_s28 + $0x10c] sm:$0x1]  ;;  %v5154_v14 = vrot.slane %v16792_v63, 5 }
 0x314   : > { %19377 = vst [vmem:[#allocation105_spill] sm:$0xff] %v16789_v0  ;;  %v3719_v63 = vrot.slane %v10160_v18, 5  ;;  %v5150_v18 = vrot.slane %v10591_v31, 5  ;;  %v10989_v21 = vld [vmem:[%s11907_s28 + $0x120] sm:$0x8] }
 0x315   : > { %v3725_v57 = vrot.slane %v19375_v11, 4  ;;  %v7301_v11 = vsel %vm12149_vm5, %v7299_v44, %v7300_v4  ;;  %v16821_v44 = vld [vmem:[%s11907_s28 + $0x124] sm:$0xf] }
 0x316   : > { %v16816_v4 = vpop.permute.xlu0 %5727  ;;  %v11159_v53 = vcombine.low %v7298_v56, %v7301_v11  ;;  %v7308_v56 = vsel %vm12149_vm5, %v7306_v43, %v7307_v59  ;;  %v16838_v11 = vld [vmem:[%s11907_s28 + $0x134] sm:$0xf] }
 0x317   : > { %8005 = vrot.lane.b32.xlu0 %v11127_v12, %s11841_s30  ;;  %7927 = vrot.lane.b32.xlu1 %v11112_v16, %s11840_s29  ;;  %v16810_v16 = vsel %vm13496_vm12, %v10203_v20, %v3709_v48  ;;  %v16814_v12 = vsel %vm13496_vm12, %v3711_v33, %v3712_v17  ;;  %19378 = vst [vmem:[#allocation106_spill] sm:$0xff] %v16816_v4  ;;  %v16818_v54 = vpop.permute.xlu1 %5725  ;;  %v16827_v48 = vld [vmem:[%s11907_s28 + $0x128] sm:$0xf]  ;;  %v11715_v20 = vld [vmem:[%s11907_s28 + $0xd0] sm:$0xff]   ;;  %v7532_v31 = vrot.slane %v16838_v11, 7 }
 0x318   : > { %19379 = vst [vmem:[#allocation107_spill] sm:$0xff] %v16818_v54  ;;  %v10957_v17 = vld [vmem:[%s11907_s28 + $0x120] sm:$0xf]  ;;  %v7305_v33 = vsel %vm12149_vm5, %v10936_v62, %v7304_v35  ;;  %v19380_v62 = vrot.slane %v16754_v52, 5  ;;  %v7733_v4 = vrot.slane %v16827_v48, 6  ;;  %v16861_v52 = vsel %vm13496_vm12, %v3725_v57, %v3726_v8 }
 0x319   : > { %v19383_v57 = vrot.slane %v16821_v44, 7  ;;  %v11160_v48 = vcombine.low %v7305_v33, %v7308_v56  ;;  %v11015_v33 = vrot.slane %v10989_v21, 11  ;;  %v7736_v54 = vrot.slane %v11045_v24, 6  ;;  %v16907_v21 = vld [vmem:[%s11907_s28 + $0x64] sm:$0xf] }
 0x31a   : > { %v16846_v35 = vsel %vm13496_vm12, %v10205_v1, %v19380_v62  ;;  %v16851_v59 = vpop.permute.xlu0 %5731  ;;  %v16865_v1 = vsel %vm13496_vm12, %v10204_v47, %v3716_v32  ;;  %v16869_v62 = vsel %vm13496_vm12, %v3718_v9, %v3719_v63  ;;  %v5148_v32 = vsel %vm13496_vm12, %v10625_v34, %v5147_v23  ;;  %v10992_v47 = vld [vmem:[%s11907_s28 + $0x138] sm:$0x7]  ;;  %v16885_v63 = vld [vmem:[%s11907_s28 + $0x84] sm:$0xf] }
 0x31b   : > { %8117 = vrot.lane.b32.xlu0 %v11714_v40, %s11842_s7  ;;  %8007 = vrot.lane.b32.xlu1 %v11128_v7, %s11841_s30  ;;  %v5156_v40 = vrot.slane %v5154_v14, 4  ;;  %v5157_v7 = vrot.slane %v10594_v42, 5  ;;  %19381 = vst [vmem:[#allocation108_spill] sm:$0xff] %v16851_v59  ;;  %v16853_v43 = vpop.permute.xlu1 %5729  ;;  %v10990_v42 = vld [vmem:[%s11907_s28 + $0x128] sm:$0x7]  ;;  %v11175_v59 = vcombine.low %v10957_v17, %v16821_v44  ;;  %v7527_v8 = vrot.slane %v19383_v57, 4 }
 0x31c   : > { %19382 = vst [vmem:[#allocation109_spill] sm:$0xff] %v16853_v43  ;;  %v11043_v43 = vld [vmem:[%s11907_s28 + $0x124] sm:$0xc]  ;;  %v5151_v9 = vsel %vm13496_vm12, %v5149_v15, %v5150_v18  ;;  %v10959_v17 = vld [vmem:[%s11907_s28 + $0x130] sm:$0xf]  ;;  %v7528_v56 = vrot.slane %v10990_v42, 7 }
 0x31d   : > { %v16897_v34 = vld [vmem:[%s11907_s28 + $0x138] sm:$0xf]  ;;  %v11079_v18 = vrot.slane %v11043_v43, 10  ;;  %v7735_v57 = vrot.slane %v7733_v4, 4  ;;  %v7534_v60 = vrot.slane %v7532_v31, 4  ;;  %v7535_v5 = vrot.slane %v10992_v47, 7 }
 0x31e   : > { %v16899_v23 = vpop.permute.xlu0 %5735  ;;  %v10753_v24 = vcombine.low %v5148_v32, %v5151_v9  ;;  %v6742_v43 = vld [vmem:[%s11907_s28 + $0x88] sm:$0x7]  ;;  %v11046_v47 = vld [vmem:[%s11907_s28 + $0x134] sm:$0xc]  ;;  %v19386_v42 = vrot.slane %v16821_v44, 7 }
 0x31f   : > { %8197 = vrot.lane.b32.xlu0 %v11159_v53, %s11843_s8  ;;  %8119 = vrot.lane.b32.xlu1 %v11715_v20, %s11842_s7  ;;  %v16890_v53 = vsel %vm13496_vm12, %v10626_v19, %v5154_v14  ;;  %v16894_v20 = vsel %vm13496_vm12, %v5156_v40, %v5157_v7  ;;  %19384 = vst [vmem:[#allocation110_spill] sm:$0xff] %v16899_v23  ;;  %v16901_v15 = vpop.permute.xlu1 %5733  ;;  %v11016_v19 = vrot.slane %v10991_v10, 11  ;;  %v6741_v40 = vld [vmem:[%s11907_s28 + $0x80] sm:$0x8]  ;;  %v6863_v7 = vrot.slane %v16885_v63, 7 }
 0x320   : > { %19385 = vst [vmem:[#allocation111_spill] sm:$0xff] %v16901_v15  ;;  %v11176_v10 = vcombine.low %v10959_v17, %v16838_v11  ;;  %v7740_v14 = vrot.slane %v16897_v34, 6  ;;  %v10636_v63 = vcombine.low %v16865_v1, %v16869_v62  ;;  %v10754_v23 = vcombine.low %v16890_v53, %v16894_v20  ;;  %v16928_v32 = vld [vmem:[%s11907_s28 + $0x88] sm:$0xf]  ;;  %v6712_v20 = vld [vmem:[%s11907_s28 + $0x94] sm:$0xf] }
 0x321   : > { %v7529_v11 = vsel %vm11909_vm2, %v7527_v8, %v7528_v56  ;;  %v16931_v9 = vld [vmem:[%s11907_s28 + $0x68] sm:$0x1]  ;;  %v7734_v62 = vsel %vm12149_vm5, %v11079_v18, %v7733_v4  ;;  %v7737_v44 = vsel %vm12149_vm5, %v7735_v57, %v7736_v54  ;;  %v7533_v53 = vsel %vm11909_vm2, %v11016_v19, %v7532_v31  ;;  %v6941_v31 = vld [vmem:[%s11907_s28 + $0x84] sm:$0xc]  ;;  %v16968_v15 = vld [vmem:[%s11907_s28 + $0x98] sm:$0xf] }
 0x322   : > { %v10825_v8 = vrot.slane %v6741_v40, 11  ;;  %v6865_v56 = vrot.slane %v6863_v7, 4  ;;  %v6866_v34 = vrot.slane %v6742_v43, 7  ;;  %v7742_v54 = vrot.slane %v7740_v14, 4  ;;  %v6743_v40 = vld [vmem:[%s11907_s28 + $0x90] sm:$0x8] }
 0x323   : > { %8293 = vrot.lane.b32.xlu0 %v11175_v59, %s11844_s9  ;;  %8199 = vrot.lane.b32.xlu1 %v11160_v48, %s11843_s8  ;;  %v7526_v59 = vsel %vm11909_vm2, %v11015_v33, %v19386_v42  ;;  %v11048_v48 = vld [vmem:[%s11907_s28 + $0x13c] sm:$0x3]  ;;  %v16933_v17 = vpop.permute.xlu0 %7913  ;;  %v16935_v1 = vpop.permute.xlu1 %5737  ;;  %v7536_v33 = vsel %vm11909_vm2, %v7534_v60, %v7535_v5  ;;  %v11080_v42 = vrot.slane %v11046_v47, 10  ;;  %v7071_v57 = vrot.slane %v16928_v32, 6  ;;  %v6943_v60 = vld [vmem:[%s11907_s28 + $0x8c] sm:$0x3] }
 0x324   : > { %19387 = vst [vmem:[#allocation112_spill] sm:$0xff] %v16935_v1  ;;  %v11191_v4 = vcombine.low %v7526_v59, %v7529_v11  ;;  %v7743_v18 = vrot.slane %v11048_v48, 6  ;;  %v3740_v5 = vrot.slane %v16931_v9, 5  ;;  %v6870_v43 = vrot.slane %v6712_v20, 7  ;;  %v19390_v59 = vld [vmem:[#allocation6_spill] sm:$0xff] }
 0x325   : > { %v5828_v11 = vsel %vm557_vm6, %v10636_v63, %v19390_v59  ;;  %v11207_v19 = vcombine.low %v7734_v62, %v7737_v44  ;;  %v11192_v1 = vcombine.low %v7533_v53, %v7536_v33  ;;  %v6744_v9 = vld [vmem:[%s11907_s28 + $0x98] sm:$0x7]  ;;  %v16971_v20 = vld [vmem:[%s11907_s28 + $0x50] sm:$0xe]  ;;  %v7741_v63 = vsel %vm12149_vm5, %v11080_v42, %v7740_v14  ;;  %v6944_v42 = vld [vmem:[%s11907_s28 + $0x94] sm:$0xc] }
 0x326   : > { %v7744_v62 = vsel %vm12149_vm5, %v7742_v54, %v7743_v18  ;;  %v7073_v44 = vrot.slane %v7071_v57, 4  ;;  %v7074_v53 = vrot.slane %v6943_v60, 6  ;;  %v19391_v33 = vrot.slane %v16907_v21, 5  ;;  %v11783_v60 = vld [vmem:[%s11907_s28 + $0x54] sm:$0xf] }
 0x327   : > { %8295 = vrot.lane.b32.xlu0 %v11176_v10, %s11844_s9  ;;  %5803 = vrot.lane.b32.xlu1 %v10753_v24, %s11846_s15  ;;  %v19388_v10 = vld [vmem:[#allocation5_spill] sm:$0xff]  ;;  %v19389_v24 = vcombine.low %v16810_v16, %v16814_v12  ;;  %v6864_v16 = vsel %vm11909_vm2, %v10825_v8, %v6863_v7  ;;  %v6867_v12 = vsel %vm11909_vm2, %v6865_v56, %v6866_v34  ;;  %v10826_v7 = vrot.slane %v6743_v40, 11  ;;  %v16984_v8 = vld [vmem:[%s11907_s28 + $0xe8] sm:$0xf] }
 0x328   : > { %v16962_v48 = vpop.permute.xlu0 %7993  ;;  %v16964_v32 = vpop.permute.xlu1 %7915  ;;  %v3739_v14 = vrot.slane %v19391_v33, 4  ;;  %v6872_v56 = vrot.slane %v6870_v43, 4  ;;  %v6873_v34 = vrot.slane %v6744_v9, 7  ;;  %v19393_v54 = vrot.slane %v16849_v41, 9  ;;  %v6946_v21 = vld [vmem:[%s11907_s28 + $0x9c] sm:$0x3] }
 0x329   : > { %v5825_v47 = vsel %vm557_vm6, %v19389_v24, %v19388_v10  ;;  %v10841_v10 = vrot.slane %v6941_v31, 10  ;;  %v10206_v31 = vrot.slane %v16971_v20, 9  ;;  %v3730_v40 = vrot.slane %v11783_v60, 5  ;;  %v19394_v24 = vld [vmem:[#allocation15_spill] sm:$0xff]  ;;  %v10166_v41 = vld [vmem:[%s11907_s28 + $0x58] sm:$0x1] }
 0x32a   : > { %v5874_v59 = vsel %vm2779_vm7, %v5828_v11, %v19394_v24  ;;  %v11208_v20 = vcombine.low %v7741_v63, %v7744_v62  ;;  %v7311_v60 = vrot.slane %v16984_v8, 6  ;;  %v7075_v24 = vsel %vm12149_vm5, %v7073_v44, %v7074_v53  ;;  %v19396_v44 = vld [vmem:[#allocation19_spill] sm:$0xff]  ;;  %v10908_v8 = vld [vmem:[%s11907_s28 + $0xf4] sm:$0xc] }
 0x32b   : > { %5805 = vrot.lane.b32.xlu0 %v10754_v23, %s11846_s15  ;;  %8373 = vrot.lane.b32.xlu1 %v11191_v4, %s11845_s10  ;;  %v7078_v23 = vrot.slane %v16968_v15, 6  ;;  %v19392_v4 = vmov %v19391_v33  ;;  %v17008_v33 = vld [vmem:[%s11907_s28 + $0xf8] sm:$0xf]  ;;  %v7072_v11 = vsel %vm12149_vm5, %v10841_v10, %v7071_v57  ;;  %v6871_v38 = vsel %vm11909_vm2, %v10826_v7, %v6870_v43 }
 0x32c   : > { %v16996_v18 = vsel %vm13496_vm12, %v19393_v54, %v19392_v4  ;;  %v17002_v9 = vpop.permute.xlu0 %8105  ;;  %v17004_v15 = vpop.permute.xlu1 %7995  ;;  %v5872_v4 = vsel %vm2779_vm7, %v5825_v47, %v19395_v13  ;;  %v11113_v54 = vcombine.low %v6864_v16, %v6867_v12  ;;  %v10842_v13 = vrot.slane %v6944_v42, 10  ;;  %v10905_v47 = vld [vmem:[%s11907_s28 + $0xe4] sm:$0xc]  ;;  %v10907_v16 = vld [vmem:[%s11907_s28 + $0xec] sm:$0x3] }
 0x32d   : > { %v7080_v12 = vrot.slane %v7078_v23, 4  ;;  %v7318_v57 = vrot.slane %v17008_v33, 6  ;;  %v17029_v63 = vsel %vm13496_vm12, %v3739_v14, %v3740_v5  ;;  %v3732_v10 = vrot.slane %v3730_v40, 4 }
 0x32e   : > { %v3733_v62 = vrot.slane %v10166_v41, 5  ;;  %v5906_v43 = vsel %vm2812_vm8, %v5874_v59, %v19396_v44  ;;  %v10937_v5 = vrot.slane %v10905_v47, 10  ;;  %v7313_v14 = vrot.slane %v7311_v60, 4  ;;  %v17045_v41 = vld [vmem:[%s11907_s28 + $0x10] sm:$0xf] }
 0x32f   : > { %8453 = vrot.lane.b32.xlu0 %v11207_v19, %s11846_s15  ;;  %8375 = vrot.lane.b32.xlu1 %v11192_v1, %s11845_s10  ;;  %v6874_v19 = vsel %vm11909_vm2, %v6872_v56, %v6873_v34  ;;  %v7081_v1 = vrot.slane %v6946_v21, 6  ;;  %v10910_v56 = vld [vmem:[%s11907_s28 + $0xfc] sm:$0x3]  ;;  %v19397_v34 = vld [vmem:[#allocation28_spill] sm:$0xff]  ;;  %v17042_v21 = vld [vmem:[%s11907_s28] sm:$0xf]  ;;  %v11129_v59 = vcombine.low %v7072_v11, %v7075_v24  ;;  %v7079_v2 = vsel %vm12149_vm5, %v10842_v13, %v7078_v23 }
 0x330   : > { %v17033_v53 = vpop.permute.xlu0 %8185  ;;  %v17035_v7 = vpop.permute.xlu1 %8107  ;;  %v5904_v42 = vsel %vm2812_vm8, %v5872_v4, %v19397_v34  ;;  %v7314_v33 = vrot.slane %v10907_v16, 6  ;;  %v11114_v44 = vcombine.low %v6871_v38, %v6874_v19  ;;  %v17052_v4 = vld [vmem:[%s11907_s28 + $0x128] sm:$0xf]  ;;  %v17057_v16 = vld [vmem:[%s11907_s28 + $0x144] sm:$0xf]  ;;  %v10938_v34 = vrot.slane %v10908_v8, 10 }
 0x331   : > { %v7082_v47 = vsel %vm12149_vm5, %v7080_v12, %v7081_v1  ;;  %v7321_v0 = vrot.slane %v10910_v56, 6  ;;  %v17065_v38 = vsel %vm13496_vm12, %v3732_v10, %v3733_v62  ;;  %v5938_v23 = vsel %vm2845_vm9, %v5906_v43, %v15801_v29  ;;  %v17074_v13 = vld [vmem:[%s11907_s28 + $0x140] sm:$0xf]  ;;  %v17089_v62 = vld [vmem:[%s11907_s28 + $0x138] sm:$0xf] }
 0x332   : > { %v11719_v12 = vld [vmem:[%s11907_s28 + $0xe0] sm:$0xff]   ;;  %v7312_v1 = vsel %vm12149_vm5, %v10937_v5, %v7311_v60  ;;  %v7315_v29 = vsel %vm12149_vm5, %v7313_v14, %v7314_v33  ;;  %v11785_v56 = vld [vmem:[%s11907_s28 + $0x14] sm:$0xf]  ;;  %v17098_v60 = vld [vmem:[%s11907_s28 + $0x150] sm:$0xf]  ;;  %v5161_v5 = vrot.slane %v17052_v4, 5  ;;  %v17108_v33 = vsel %vm12149_vm5, %v10938_v34, %v7318_v57 }
 0x333   : > { %7929 = vrot.lane.b32.xlu0 %v11113_v54, %s11840_s29  ;;  %8455 = vrot.lane.b32.xlu1 %v11208_v20, %s11846_s15  ;;  %v7320_v54 = vrot.slane %v7318_v57, 4  ;;  %v17061_v20 = vsel %vm13496_vm12, %v10206_v31, %v3730_v40  ;;  %v17078_v31 = vld [vmem:[%s11907_s28 + $0x154] sm:$0xf]  ;;  %v5936_v40 = vsel %vm2845_vm9, %v5904_v42, %v15773_v26  ;;  %v11784_v43 = vld [vmem:[%s11907_s28 + $0x4] sm:$0xf]  ;;  %v11090_v19 = vcombine.low %v17045_v41, %v11785_v56 }
 0x334   : > { %v17069_v11 = vpop.permute.xlu0 %8281  ;;  %v17071_v24 = vpop.permute.xlu1 %8187  ;;  %v18919_v10 = vrot.slane %v17078_v31, 7  ;;  %v11089_v8 = vcombine.low %v17042_v21, %v11784_v43  ;;  %v11130_v26 = vcombine.low %v7079_v2, %v7082_v47  ;;  %v10595_v42 = vld [vmem:[%s11907_s28 + $0x124] sm:$0xe]  ;;  %v5968_v14 = vsel %vm2878_vm13, %v5936_v40, %v16562_v27  ;;  %v10597_v41 = vld [vmem:[%s11907_s28 + $0x12c] sm:$0x1] }
 0x335   : > { %v17112_v2 = vsel %vm12149_vm5, %v7320_v54, %v7321_v0  ;;  %v11161_v47 = vcombine.low %v7312_v1, %v7315_v29  ;;  %v19398_v40 = vrot.slane %v17057_v16, 7  ;;  %v10600_v57 = vld [vmem:[%s11907_s28 + $0x13c] sm:$0x1]  ;;  %v5168_v34 = vrot.slane %v17089_v62, 5  ;;  %v10993_v56 = vld [vmem:[%s11907_s28 + $0x140] sm:$0x8] }
 0x336   : > { %v17128_v54 = vrot.slane %v18919_v10, 4  ;;  %v17133_v1 = vld [vmem:[%s11907_s28 + $0x148] sm:$0xf]  ;;  %v11722_v29 = vld [vmem:[%s11907_s28 + $0xf0] sm:$0xff]   ;;  %v11162_v62 = vcombine.low %v17108_v33, %v17112_v2  ;;  %v11017_v21 = vrot.slane %v10993_v56, 11 }
 0x337   : > { %8009 = vrot.lane.b32.xlu0 %v11129_v59, %s11841_s30  ;;  %7931 = vrot.lane.b32.xlu1 %v11114_v44, %s11840_s29  ;;  %v10598_v59 = vld [vmem:[%s11907_s28 + $0x134] sm:$0xe]  ;;  %v6000_v44 = vsel %vm2911_vm14, %v5968_v14, %v16714_v36  ;;  %v7541_v43 = vrot.slane %v19398_v40, 4  ;;  %v10627_v14 = vrot.slane %v10595_v42, 9  ;;  %v10994_v10 = vld [vmem:[%s11907_s28 + $0x148] sm:$0x7]  ;;  %v5970_v36 = vsel %vm2878_vm13, %v5938_v23, %v16582_v39 }
 0x338   : > { %v17118_v4 = vpop.permute.xlu0 %8283  ;;  %v5792_v27 = vpop.permute.xlu1 %5791  ;;  %v10628_v40 = vrot.slane %v10598_v59, 9  ;;  %v8475_v42 = vsel %vm557_vm6, %v11089_v8, %v16933_v17  ;;  %v6002_v37 = vsel %vm2911_vm14, %v5970_v36, %v16734_v50  ;;  %v5170_v59 = vrot.slane %v5168_v34, 4  ;;  %v10995_v56 = vld [vmem:[%s11907_s28 + $0x150] sm:$0x8] }
 0x339   : > { %v6032_v0 = vsel %vm2944_vm15, %v6000_v44, %v5792_v27  ;;  %v5163_v44 = vrot.slane %v5161_v5, 4  ;;  %v5164_v27 = vrot.slane %v10597_v41, 5  ;;  %v8522_v33 = vsel %vm2779_vm7, %v8475_v42, %v16962_v48 }
 0x33a   : > { %11550 = vmatprep.mubr.msk.bf16.mxu0 %vm2993_vm0, %v6032_v0  ;;  %v7747_v39 = vrot.slane %v17133_v1, 6  ;;  %v8478_v17 = vsel %vm557_vm6, %v11090_v19, %v16964_v32  ;;  %v8554_v23 = vsel %vm2812_vm8, %v8522_v33, %v17002_v9  ;;  %v7542_v8 = vrot.slane %v10994_v10, 7  ;;  %v17167_v9 = vld [vmem:[%s11907_s28 + $0xa4] sm:$0xf]  ;;  %v10996_v0 = vld [vmem:[%s11907_s28 + $0x158] sm:$0x7] }
 0x33b   : > { %8121 = vrot.lane.b32.xlu0 %v11719_v12, %s11842_s7  ;;  %8011 = vrot.lane.b32.xlu1 %v11130_v26, %s11841_s30  ;;  %v5171_v12 = vrot.slane %v10600_v57, 5  ;;  %v11049_v26 = vld [vmem:[%s11907_s28 + $0x144] sm:$0xc]  ;;  %v8586_v48 = vsel %vm2845_vm9, %v8554_v23, %v17033_v53  ;;  %v5162_v57 = vsel %vm13496_vm12, %v10627_v14, %v5161_v5  ;;  %v5165_v32 = vsel %vm13496_vm12, %v5163_v44, %v5164_v27  ;;  %v17192_v44 = vld [vmem:[%s11907_s28 + $0x158] sm:$0xf] }
 0x33c   : > { %v5794_v2 = vpop.permute.xlu0 %5793  ;;  %v11081_v19 = vrot.slane %v11049_v26, 10  ;;  %v17174_v53 = vsel %vm13496_vm12, %v10628_v40, %v5168_v34  ;;  %v19399_v10 = vrot.slane %v17057_v16, 7  ;;  %v8524_v36 = vsel %vm2779_vm7, %v8478_v17, %v17004_v15  ;;  %v6745_v33 = vld [vmem:[%s11907_s28 + $0xa0] sm:$0x8] }
 0x33d   : > { %v8362_v41 = vpop.permute.xlu1 %8361  ;;  %v6034_v50 = vsel %vm2944_vm15, %v6002_v37, %v5794_v2  ;;  %v8618_v37 = vsel %vm2878_vm13, %v8586_v48, %v17069_v11  ;;  %v17189_v34 = vsel %vm13496_vm12, %v5170_v59, %v5171_v12  ;;  %v7543_v15 = vsel %vm11909_vm2, %v7541_v43, %v7542_v8  ;;  %v6746_v43 = vld [vmem:[%s11907_s28 + $0xa8] sm:$0x7]  ;;  %v17224_v59 = vld [vmem:[%s11907_s28 + $0x80] sm:$0xe]  ;;  %v17236_v8 = vld [vmem:[%s11907_s28 + $0xb4] sm:$0xf] }
 0x33e   : > { %11551 = vmatmul.mubr.msk.bf16.vlgmr.msra.gmra.mxu0 %vm2993_vm0, %v6034_v50  ;;  %v17180_v5 = vsel %vm11909_vm2, %v11017_v21, %v19399_v10  ;;  %v8650_v11 = vsel %vm2911_vm14, %v8618_v37, %v8362_v41  ;;  %v6877_v27 = vrot.slane %v17167_v9, 7  ;;  %v19400_v42 = vcombine.low %v17074_v13, %v17057_v16  ;;  %v11052_v13 = vld [vmem:[%s11907_s28 + $0x154] sm:$0xc]  ;;  %v17221_v41 = vld [vmem:[%s11907_s28 + $0xa8] sm:$0xf] }
 0x33f   : > { %8201 = vrot.lane.b32.xlu0 %v11161_v47, %s11843_s8  ;;  %8123 = vrot.lane.b32.xlu1 %v11722_v29, %s11842_s7  ;;  %v7750_v47 = vrot.slane %v11051_v49, 6  ;;  %v7749_v29 = vrot.slane %v7747_v39, 4  ;;  %v8556_v49 = vsel %vm2812_vm8, %v8524_v36, %v17035_v7  ;;  %v10755_v7 = vcombine.low %v5162_v57, %v5165_v32  ;;  %v11054_v50 = vld [vmem:[%s11907_s28 + $0x15c] sm:$0x3] }
 0x340   : > { %v8588_v40 = vsel %vm2845_vm9, %v8556_v49, %v17071_v24  ;;  %v11018_v12 = vrot.slane %v10995_v56, 11  ;;  %v7549_v26 = vrot.slane %v10996_v0, 7  ;;  %v10638_v2 = vcombine.low %v17061_v20, %v17065_v38  ;;  %v6949_v56 = vld [vmem:[%s11907_s28 + $0xac] sm:$0x3] }
 0x341   : > { %v8442_v14 = vpop.permute.xlu0 %8441  ;;  %v8364_v1 = vpop.permute.xlu1 %8363  ;;  %v8620_v24 = vsel %vm2878_vm13, %v8588_v40, %v17118_v4  ;;  %v17216_v16 = vsel %vm12149_vm5, %v11081_v19, %v7747_v39  ;;  %v10756_v38 = vcombine.low %v17174_v53, %v17189_v34  ;;  %v11193_v4 = vcombine.low %v17180_v5, %v7543_v15 }
 0x342   : > { %v8682_v21 = vsel %vm2944_vm15, %v8650_v11, %v8442_v14  ;;  %v8652_v17 = vsel %vm2911_vm14, %v8620_v24, %v8364_v1  ;;  %v7751_v39 = vsel %vm12149_vm5, %v7749_v29, %v7750_v47  ;;  %v10827_v57 = vrot.slane %v6745_v33, 11  ;;  %v6947_v47 = vld [vmem:[%s11907_s28 + $0xa4] sm:$0xc]  ;;  %v6747_v14 = vld [vmem:[%s11907_s28 + $0xb0] sm:$0x8] }
 0x343   : > { %8297 = vrot.lane.b32.xlu0 %v19400_v42, %s11844_s9  ;;  %8203 = vrot.lane.b32.xlu1 %v11162_v62, %s11843_s8  ;;  %v7754_v62 = vrot.slane %v17192_v44, 6  ;;  %v6879_v32 = vrot.slane %v6877_v27, 4  ;;  %v6880_v19 = vrot.slane %v6746_v43, 7  ;;  %v19401_v9 = vcombine.low %v17098_v60, %v17078_v31  ;;  %v17255_v60 = vld [vmem:[%s11907_s28 + $0x88] sm:$0x1]  ;;  %v19403_v1 = vld [vmem:[#allocation18_spill] sm:$0xff] }
 0x344   : > { %11586 = vmatprep.mubr.msk.bf16.mxu1 %vm2993_vm0, %v8682_v21  ;;  %v19402_v37 = vrot.slane %v17078_v31, 7  ;;  %v7550_v10 = vsel %vm11909_vm2, %v17128_v54, %v7549_v26  ;;  %v11082_v5 = vrot.slane %v11052_v13, 10  ;;  %v7085_v0 = vrot.slane %v17221_v41, 6  ;;  %v19405_v44 = vld [vmem:[#allocation21_spill] sm:$0xff]  ;;  %v17269_v21 = vld [vmem:[%s11907_s28 + $0x84] sm:$0xf] }
 0x345   : > { %v17227_v23 = vpop.permute.xlu0 %7917  ;;  %v8444_v20 = vpop.permute.xlu1 %8443  ;;  %v10209_v31 = vrot.slane %v17224_v59, 9  ;;  %v7756_v36 = vrot.slane %v7754_v62, 4  ;;  %v7757_v11 = vrot.slane %v11054_v50, 6  ;;  %v6884_v54 = vrot.slane %v17236_v8, 7  ;;  %v6951_v26 = vld [vmem:[%s11907_s28 + $0xb8] sm:$0xf] }
 0x346   : > { %v8684_v48 = vsel %vm2944_vm15, %v8652_v17, %v8444_v20  ;;  %v7547_v53 = vsel %vm11909_vm2, %v11018_v12, %v19402_v37  ;;  %v19404_v34 = vcombine.low %v16846_v35, %v16861_v52  ;;  %v5834_v49 = vsel %vm557_vm6, %v10638_v2, %v19405_v44  ;;  %v6748_v12 = vld [vmem:[%s11907_s28 + $0xb8] sm:$0x7]  ;;  %v10170_v33 = vld [vmem:[%s11907_s28 + $0x70] sm:$0xe]  ;;  %v6950_v24 = vld [vmem:[%s11907_s28 + $0xb4] sm:$0xc] }
 0x347   : > { %8299 = vrot.lane.b32.xlu0 %v19401_v9, %s11844_s9  ;;  %5807 = vrot.lane.b32.xlu1 %v10755_v7, %s11846_s15  ;;  %v3751_v15 = vrot.slane %v17269_v21, 5  ;;  %v11209_v7 = vcombine.low %v17216_v16, %v7751_v39  ;;  %v11194_v35 = vcombine.low %v7547_v53, %v7550_v10  ;;  %v6878_v52 = vsel %vm11909_vm2, %v10827_v57, %v6877_v27  ;;  %v6952_v20 = vld [vmem:[%s11907_s28 + $0xbc] sm:$0x3]  ;;  %v11787_v57 = vld [vmem:[%s11907_s28 + $0x74] sm:$0xf] }
 0x348   : > { %11587 = vmatmul.mubr.msk.bf16.vlgmr.msra.gmra.mxu1 %vm2993_vm0, %v8684_v48  ;;  %v5831_v29 = vsel %vm557_vm6, %v19404_v34, %v19403_v1  ;;  %v6881_v43 = vsel %vm11909_vm2, %v6879_v32, %v6880_v19  ;;  %v10843_v2 = vrot.slane %v6947_v47, 10  ;;  %v7755_v16 = vsel %vm12149_vm5, %v11082_v5, %v7754_v62  ;;  %v17293_v48 = vld [vmem:[%s11907_s28 + $0x108] sm:$0xf]  ;;  %v17304_v53 = vld [vmem:[%s11907_s28 + $0x118] sm:$0xf]  ;;  %v19407_v5 = vld [vmem:[#allocation8_spill] sm:$0xff] }
 0x349   : > { %v17272_v40 = vpop.permute.xlu0 %7997  ;;  %v17274_v42 = vpop.permute.xlu1 %7919  ;;  %v7087_v13 = vrot.slane %v7085_v0, 4  ;;  %v7088_v41 = vrot.slane %v6949_v56, 6  ;;  %v10828_v17 = vrot.slane %v6747_v14, 11  ;;  %v7758_v27 = vsel %vm12149_vm5, %v7756_v36, %v7757_v11  ;;  %v19406_v62 = vld [vmem:[#allocation7_spill] sm:$0xff]  ;;  %v10172_v10 = vld [vmem:[%s11907_s28 + $0x78] sm:$0x1] }
 0x34a   : > { %v6886_v39 = vrot.slane %v6884_v54, 4  ;;  %v6887_v50 = vrot.slane %v6748_v12, 7  ;;  %v7092_v8 = vrot.slane %v6951_v26, 6  ;;  %v3744_v32 = vrot.slane %v11787_v57, 5  ;;  %v10913_v12 = vld [vmem:[%s11907_s28 + $0x10c] sm:$0x3] }
 0x34b   : > { %5809 = vrot.lane.b32.xlu0 %v10756_v38, %s11846_s15  ;;  %8377 = vrot.lane.b32.xlu1 %v11193_v4, %s11845_s10  ;;  %v3754_v38 = vrot.slane %v17255_v60, 5  ;;  %v10208_v4 = vrot.slane %v10170_v33, 9  ;;  %v5878_v19 = vsel %vm2779_vm7, %v5834_v49, %v19406_v62  ;;  %v5876_v47 = vsel %vm2779_vm7, %v5831_v29, %v19407_v5 }
 0x34c   : > { %v11115_v56 = vcombine.low %v6878_v52, %v6881_v43  ;;  %v7086_v36 = vsel %vm12149_vm5, %v10843_v2, %v7085_v0  ;;  %v10844_v11 = vrot.slane %v6950_v24, 10  ;;  %v11210_v14 = vcombine.low %v7755_v16, %v7758_v27  ;;  %v10914_v24 = vld [vmem:[%s11907_s28 + $0x114] sm:$0xc]  ;;  %v10916_v16 = vld [vmem:[%s11907_s28 + $0x11c] sm:$0x3] }
 0x34d   : > { %v17299_v9 = vpop.permute.xlu0 %8109  ;;  %v17301_v37 = vpop.permute.xlu1 %7999  ;;  %v7089_v1 = vsel %vm12149_vm5, %v7087_v13, %v7088_v41  ;;  %v7095_v34 = vrot.slane %v6952_v20, 6  ;;  %v7325_v44 = vrot.slane %v17293_v48, 6  ;;  %v6885_v29 = vsel %vm11909_vm2, %v10828_v17, %v6884_v54  ;;  %v19408_v13 = vld [vmem:[#allocation62_spill] sm:$0xff] }
 0x34e   : > { %v6888_v0 = vsel %vm11909_vm2, %v6886_v39, %v6887_v50  ;;  %v7094_v49 = vrot.slane %v7092_v8, 4  ;;  %v7332_v26 = vrot.slane %v17304_v53, 6  ;;  %v10639_v33 = vcombine.low %v16996_v18, %v17029_v63  ;;  %v19409_v17 = vld [vmem:[#allocation70_spill] sm:$0xff]  ;;  %v17343_v39 = vld [vmem:[%s11907_s28 + $0x30] sm:$0xf] }
 0x34f   : > { %8457 = vrot.lane.b32.xlu0 %v11209_v7, %s11846_s15  ;;  %8379 = vrot.lane.b32.xlu1 %v11194_v35, %s11845_s10  ;;  %v10911_v7 = vld [vmem:[%s11907_s28 + $0x104] sm:$0xc]  ;;  %v17327_v35 = vsel %vm13496_vm12, %v10208_v4, %v3744_v32  ;;  %v3746_v52 = vrot.slane %v3744_v32, 4  ;;  %v3747_v43 = vrot.slane %v10172_v10, 5  ;;  %v5908_v41 = vsel %vm2812_vm8, %v5876_v47, %v19408_v13  ;;  %v17340_v27 = vld [vmem:[%s11907_s28 + $0x20] sm:$0xf] }
 0x350   : > { %v5910_v20 = vsel %vm2812_vm8, %v5878_v19, %v19409_v17  ;;  %v11131_v50 = vcombine.low %v7086_v36, %v7089_v1  ;;  %v7093_v48 = vsel %vm12149_vm5, %v10844_v11, %v7092_v8  ;;  %v11116_v4 = vcombine.low %v6885_v29, %v6888_v0  ;;  %v10602_v19 = vld [vmem:[%s11907_s28 + $0x148] sm:$0xf]  ;;  %v17353_v10 = vld [vmem:[%s11907_s28 + $0x164] sm:$0xf] }
 0x351   : > { %v17329_v54 = vpop.permute.xlu0 %8189  ;;  %v17331_v2 = vpop.permute.xlu1 %8111  ;;  %v10939_v57 = vrot.slane %v10911_v7, 10  ;;  %v7327_v32 = vrot.slane %v7325_v44, 4  ;;  %v7328_v62 = vrot.slane %v10913_v12, 6  ;;  %v7096_v53 = vsel %vm12149_vm5, %v7094_v49, %v7095_v34  ;;  %v17368_v34 = vld [vmem:[%s11907_s28 + $0x160] sm:$0xf] }
 0x352   : > { %v10940_v5 = vrot.slane %v10914_v24, 10  ;;  %v7334_v8 = vrot.slane %v7332_v26, 4  ;;  %v7335_v47 = vrot.slane %v10916_v16, 6  ;;  %v5940_v36 = vsel %vm2845_vm9, %v5908_v41, %v15831_v55  ;;  %v10601_v0 = vld [vmem:[%s11907_s28 + $0x144] sm:$0xe] }
 0x353   : > { %7933 = vrot.lane.b32.xlu0 %v11115_v56, %s11840_s29  ;;  %8459 = vrot.lane.b32.xlu1 %v11210_v14, %s11846_s15  ;;  %v17357_v56 = vsel %vm13496_vm12, %v3746_v52, %v3747_v43  ;;  %v5942_v11 = vsel %vm2845_vm9, %v5910_v20, %v15883_v28  ;;  %v7553_v29 = vrot.slane %v17353_v10, 7  ;;  %v5972_v49 = vsel %vm2878_vm13, %v5940_v36, %v16580_v6  ;;  %v11788_v7 = vld [vmem:[%s11907_s28 + $0x24] sm:$0xf]  ;;  %v11789_v12 = vld [vmem:[%s11907_s28 + $0x34] sm:$0xf] }
 0x354   : > { %v11091_v55 = vcombine.low %v17340_v27, %v11788_v7  ;;  %v11092_v28 = vcombine.low %v17343_v39, %v11789_v12  ;;  %v17379_v52 = vld [vmem:[%s11907_s28 + $0x170] sm:$0xf]  ;;  %v17382_v43 = vld [vmem:[%s11907_s28 + $0x174] sm:$0xf]  ;;  %v5175_v24 = vrot.slane %v10602_v19, 5  ;;  %v11727_v16 = vld [vmem:[%s11907_s28 + $0x100] sm:$0xff]   ;;  %v11132_v13 = vcombine.low %v7093_v48, %v7096_v53 }
 0x355   : > { %v17363_v14 = vpop.permute.xlu0 %8285  ;;  %v17365_v1 = vpop.permute.xlu1 %8191  ;;  %v7326_v6 = vsel %vm12149_vm5, %v10939_v57, %v7325_v44  ;;  %v7329_v41 = vsel %vm12149_vm5, %v7327_v32, %v7328_v62  ;;  %v7560_v17 = vrot.slane %v17382_v43, 7  ;;  %v10603_v20 = vld [vmem:[%s11907_s28 + $0x14c] sm:$0x1]  ;;  %v11179_v27 = vcombine.low %v17368_v34, %v17353_v10  ;;  %v17404_v48 = vld [vmem:[%s11907_s28 + $0x158] sm:$0xf] }
 0x356   : > { %v17397_v39 = vsel %vm12149_vm5, %v10940_v5, %v7332_v26  ;;  %v10629_v44 = vrot.slane %v10601_v0, 9  ;;  %v5974_v57 = vsel %vm2878_vm13, %v5942_v11, %v16600_v45  ;;  %v6004_v32 = vsel %vm2911_vm14, %v5972_v49, %v16732_v61  ;;  %v17418_v5 = vld [vmem:[%s11907_s28 + $0x154] sm:$0xe]  ;;  %v17423_v0 = vld [vmem:[%s11907_s28 + $0x15c] sm:$0x1] }
 0x357   : > { %8013 = vrot.lane.b32.xlu0 %v11131_v50, %s11841_s30  ;;  %7935 = vrot.lane.b32.xlu1 %v11116_v4, %s11840_s29  ;;  %v17401_v50 = vsel %vm12149_vm5, %v7334_v8, %v7335_v47  ;;  %v10997_v4 = vld [vmem:[%s11907_s28 + $0x160] sm:$0x8]  ;;  %v7555_v19 = vrot.slane %v7553_v29, 4  ;;  %v11180_v53 = vcombine.low %v17379_v52, %v17382_v43  ;;  %v10998_v8 = vld [vmem:[%s11907_s28 + $0x168] sm:$0x7]  ;;  %v11163_v36 = vcombine.low %v7326_v6, %v7329_v41 }
 0x358   : > { %v5177_v45 = vrot.slane %v5175_v24, 4  ;;  %v5178_v11 = vrot.slane %v10603_v20, 5  ;;  %v17426_v61 = vld [vmem:[%s11907_s28 + $0x168] sm:$0xf]  ;;  %v11728_v49 = vld [vmem:[%s11907_s28 + $0x110] sm:$0xff]   ;;  %v11164_v7 = vcombine.low %v17397_v39, %v17401_v50  ;;  %v17435_v12 = vrot.slane %v7560_v17, 4 }
 0x359   : > { %v17411_v62 = vpop.permute.xlu0 %8287  ;;  %v5796_v26 = vpop.permute.xlu1 %5795  ;;  %v5182_v6 = vrot.slane %v17404_v48, 5  ;;  %v11019_v41 = vrot.slane %v10997_v4, 11  ;;  %v8481_v20 = vsel %vm557_vm6, %v11091_v55, %v17227_v23  ;;  %v7556_v39 = vrot.slane %v10998_v8, 7  ;;  %v11055_v50 = vld [vmem:[%s11907_s28 + $0x164] sm:$0xc] }
 0x35a   : > { %v6036_v47 = vsel %vm2944_vm15, %v6004_v32, %v5796_v26  ;;  %v6006_v32 = vsel %vm2911_vm14, %v5974_v57, %v16759_v3  ;;  %v8526_v48 = vsel %vm2779_vm7, %v8481_v20, %v17272_v40  ;;  %v5185_v23 = vrot.slane %v17423_v0, 5  ;;  %v11057_v55 = vld [vmem:[%s11907_s28 + $0x16c] sm:$0x3]  ;;  %v11000_v57 = vld [vmem:[%s11907_s28 + $0x178] sm:$0x7] }
 0x35b   : > { %8125 = vrot.lane.b32.xlu0 %v11727_v16, %s11842_s7  ;;  %8015 = vrot.lane.b32.xlu1 %v11132_v13, %s11841_s30  ;;  %v17443_v16 = vsel %vm13496_vm12, %v10629_v44, %v5175_v24  ;;  %v10630_v13 = vrot.slane %v17418_v5, 9  ;;  %v7761_v24 = vrot.slane %v17426_v61, 6  ;;  %v10999_v44 = vld [vmem:[%s11907_s28 + $0x170] sm:$0x8]  ;;  %v8484_v5 = vsel %vm557_vm6, %v11092_v28, %v17274_v42  ;;  %v17474_v28 = vld [vmem:[%s11907_s28 + $0xc4] sm:$0xf] }
 0x35c   : > { %11554 = vmatprep.mubr.msk.bf16.mxu0 %vm2993_vm0, %v6036_v47  ;;  %v8558_v8 = vsel %vm2812_vm8, %v8526_v48, %v17299_v9  ;;  %v5179_v40 = vsel %vm13496_vm12, %v5177_v45, %v5178_v11  ;;  %v5184_v0 = vrot.slane %v5182_v6, 4  ;;  %v17471_v42 = vsel %vm11909_vm2, %v11019_v41, %v7553_v29  ;;  %v17484_v61 = vld [vmem:[%s11907_s28 + $0x178] sm:$0xf]  ;;  %v6955_v43 = vld [vmem:[%s11907_s28 + $0xcc] sm:$0x3] }
 0x35d   : > { %v5798_v4 = vpop.permute.xlu0 %5797  ;;  %v8366_v26 = vpop.permute.xlu1 %8365  ;;  %v8590_v47 = vsel %vm2845_vm9, %v8558_v8, %v17329_v54  ;;  %v11083_v9 = vrot.slane %v11055_v50, 10  ;;  %v17481_v54 = vsel %vm11909_vm2, %v7555_v19, %v7556_v39  ;;  %v11020_v11 = vrot.slane %v10999_v44, 11 }
 0x35e   : > { %v6038_v3 = vsel %vm2944_vm15, %v6006_v32, %v5798_v4  ;;  %v8622_v45 = vsel %vm2878_vm13, %v8590_v47, %v17363_v14  ;;  %v8528_v29 = vsel %vm2779_vm7, %v8484_v5, %v17301_v37  ;;  %v7763_v14 = vrot.slane %v7761_v24, 4  ;;  %v6749_v32 = vld [vmem:[%s11907_s28 + $0xc0] sm:$0x8] }
 0x35f   : > { %8205 = vrot.lane.b32.xlu0 %v11163_v36, %s11843_s8  ;;  %8127 = vrot.lane.b32.xlu1 %v11728_v49, %s11842_s7  ;;  %v7764_v36 = vrot.slane %v11057_v55, 6  ;;  %v8654_v49 = vsel %vm2911_vm14, %v8622_v45, %v8366_v26  ;;  %v7563_v50 = vrot.slane %v11000_v57, 7  ;;  %v8560_v19 = vsel %vm2812_vm8, %v8528_v29, %v17331_v2  ;;  %v11058_v55 = vld [vmem:[%s11907_s28 + $0x174] sm:$0xc]  ;;  %v6751_v29 = vld [vmem:[%s11907_s28 + $0xd0] sm:$0x8] }
 0x360   : > { %11555 = vmatmul.mubr.msk.bf16.gmra.mxu0 %vm2993_vm0, %v6038_v3  ;;  %v10757_v48 = vcombine.low %v17443_v16, %v5179_v40  ;;  %v6891_v37 = vrot.slane %v17474_v28, 7  ;;  %v8592_v4 = vsel %vm2845_vm9, %v8560_v19, %v17365_v1  ;;  %v5183_v2 = vsel %vm13496_vm12, %v10630_v13, %v5182_v6  ;;  %v6750_v16 = vld [vmem:[%s11907_s28 + $0xc8] sm:$0x7]  ;;  %v17535_v3 = vld [vmem:[%s11907_s28 + $0xd4] sm:$0xf] }
 0x361   : > { %v8446_v41 = vpop.permute.xlu0 %8445  ;;  %v8368_v20 = vpop.permute.xlu1 %8367  ;;  %v11195_v26 = vcombine.low %v17471_v42, %v17481_v54  ;;  %v7768_v44 = vrot.slane %v17484_v61, 6  ;;  %v8624_v1 = vsel %vm2878_vm13, %v8592_v4, %v17411_v62  ;;  %v5186_v10 = vsel %vm13496_vm12, %v5184_v0, %v5185_v23  ;;  %v17520_v6 = vld [vmem:[%s11907_s28 + $0xc8] sm:$0xf]  ;;  %v17559_v54 = vld [vmem:[%s11907_s28 + $0xd8] sm:$0xf] }
 0x362   : > { %v8686_v39 = vsel %vm2944_vm15, %v8654_v49, %v8446_v41  ;;  %v17516_v34 = vsel %vm12149_vm5, %v11083_v9, %v7761_v24  ;;  %v8656_v13 = vsel %vm2911_vm14, %v8624_v1, %v8368_v20  ;;  %v7765_v62 = vsel %vm12149_vm5, %v7763_v14, %v7764_v36  ;;  %v6953_v9 = vld [vmem:[%s11907_s28 + $0xc4] sm:$0xc]  ;;  %v6752_v49 = vld [vmem:[%s11907_s28 + $0xd8] sm:$0x7]  ;;  %v10176_v41 = vld [vmem:[%s11907_s28 + $0x90] sm:$0xe] }
 0x363   : > { %8301 = vrot.lane.b32.xlu0 %v11179_v27, %s11844_s9  ;;  %8207 = vrot.lane.b32.xlu1 %v11164_v7, %s11843_s8  ;;  %v10829_v27 = vrot.slane %v6749_v32, 11  ;;  %v11060_v7 = vld [vmem:[%s11907_s28 + $0x17c] sm:$0x3]  ;;  %v7561_v23 = vsel %vm11909_vm2, %v11020_v11, %v7560_v17  ;;  %v7564_v24 = vsel %vm11909_vm2, %v17435_v12, %v7563_v50  ;;  %v6893_v57 = vrot.slane %v6891_v37, 4  ;;  %v19410_v36 = vld [vmem:[#allocation34_spill] sm:$0xff] }
 0x364   : > { %11590 = vmatprep.mubr.msk.bf16.mxu1 %vm2993_vm0, %v8686_v39  ;;  %v6894_v47 = vrot.slane %v6750_v16, 7  ;;  %v11084_v0 = vrot.slane %v11058_v55, 10  ;;  %v10758_v17 = vcombine.low %v5183_v2, %v5186_v10  ;;  %v7770_v42 = vrot.slane %v7768_v44, 4  ;;  %v17589_v19 = vld [vmem:[%s11907_s28 + $0x128] sm:$0xf]  ;;  %v19411_v55 = vld [vmem:[#allocation37_spill] sm:$0xff] }
 0x365   : > { %v17523_v5 = vpop.permute.xlu0 %7921  ;;  %v8448_v8 = vpop.permute.xlu1 %8447  ;;  %v7771_v12 = vrot.slane %v11060_v7, 6  ;;  %v7099_v28 = vrot.slane %v17520_v6, 6  ;;  %v17551_v45 = vsel %vm13496_vm12, %v10209_v31, %v3751_v15  ;;  %v3753_v52 = vrot.slane %v3751_v15, 4  ;;  %v11790_v39 = vld [vmem:[%s11907_s28 + $0x94] sm:$0xf] }
 0x366   : > { %v8688_v40 = vsel %vm2944_vm15, %v8656_v13, %v8448_v8  ;;  %v5837_v59 = vsel %vm557_vm6, %v10639_v33, %v19410_v36  ;;  %v10640_v31 = vcombine.low %v17327_v35, %v17357_v56  ;;  %v11211_v15 = vcombine.low %v17516_v34, %v7765_v62  ;;  %v6956_v56 = vld [vmem:[%s11907_s28 + $0xd4] sm:$0xc]  ;;  %v6958_v16 = vld [vmem:[%s11907_s28 + $0xdc] sm:$0x3]  ;;  %v10178_v1 = vld [vmem:[%s11907_s28 + $0x98] sm:$0x1] }
 0x367   : > { %8303 = vrot.lane.b32.xlu0 %v11180_v53, %s11844_s9  ;;  %5811 = vrot.lane.b32.xlu1 %v10757_v48, %s11846_s15  ;;  %v6898_v53 = vrot.slane %v17535_v3, 7  ;;  %v11196_v61 = vcombine.low %v7561_v23, %v7564_v24  ;;  %v6892_v18 = vsel %vm11909_vm2, %v10829_v27, %v6891_v37  ;;  %v6895_v63 = vsel %vm11909_vm2, %v6893_v57, %v6894_v47  ;;  %v19412_v34 = vld [vmem:[#allocation43_spill] sm:$0xff]  ;;  %v10917_v8 = vld [vmem:[%s11907_s28 + $0x124] sm:$0xc] }
 0x368   : > { %11591 = vmatmul.mubr.msk.bf16.gmra.mxu1 %vm2993_vm0, %v8688_v40  ;;  %v7769_v33 = vsel %vm12149_vm5, %v11084_v0, %v7768_v44  ;;  %v10845_v35 = vrot.slane %v6953_v9, 10  ;;  %v7772_v20 = vsel %vm12149_vm5, %v7770_v42, %v7771_v12  ;;  %v7101_v14 = vrot.slane %v7099_v28, 4  ;;  %v10919_v57 = vld [vmem:[%s11907_s28 + $0x12c] sm:$0x3]  ;;  %v17622_v12 = vld [vmem:[%s11907_s28 + $0x138] sm:$0xf] }
 0x369   : > { %v17568_v11 = vpop.permute.xlu0 %8001  ;;  %v17570_v21 = vpop.permute.xlu1 %7923  ;;  %v7102_v50 = vrot.slane %v6955_v43, 6  ;;  %v7106_v32 = vrot.slane %v17559_v54, 6  ;;  %v3758_v48 = vrot.slane %v11790_v39, 5  ;;  %v10830_v37 = vrot.slane %v6751_v29, 11  ;;  %v19414_v54 = vld [vmem:[#allocation73_spill] sm:$0xff] }
 0x36a   : > { %v6900_v4 = vrot.slane %v6898_v53, 4  ;;  %v6901_v2 = vrot.slane %v6752_v49, 7  ;;  %v5840_v44 = vsel %vm557_vm6, %v10640_v31, %v19411_v55  ;;  %v10210_v10 = vrot.slane %v10176_v41, 9  ;;  %v17642_v41 = vld [vmem:[%s11907_s28 + $0x168] sm:$0xf] }
 0x36b   : > { %5813 = vrot.lane.b32.xlu0 %v10758_v17, %s11846_s15  ;;  %8381 = vrot.lane.b32.xlu1 %v11195_v26, %s11845_s10  ;;  %v17597_v26 = vsel %vm13496_vm12, %v3753_v52, %v3754_v38  ;;  %v5880_v27 = vsel %vm2779_vm7, %v5837_v59, %v19412_v34  ;;  %v11117_v13 = vcombine.low %v6892_v18, %v6895_v63  ;;  %v7339_v62 = vrot.slane %v17589_v19, 6  ;;  %v19413_v52 = vld [vmem:[#allocation49_spill] sm:$0xff]  ;;  %v17645_v18 = vld [vmem:[%s11907_s28 + $0x50] sm:$0xf]  ;;  %v19415_v19 = vld [vmem:[#allocation75_spill] sm:$0xff] }
 0x36c   : > { %v11212_v60 = vcombine.low %v7769_v33, %v7772_v20  ;;  %v7100_v38 = vsel %vm12149_vm5, %v10845_v35, %v7099_v28  ;;  %v7103_v23 = vsel %vm12149_vm5, %v7101_v14, %v7102_v50  ;;  %v10846_v24 = vrot.slane %v6956_v56, 10  ;;  %v17654_v56 = vld [vmem:[%s11907_s28 + $0x184] sm:$0xf]  ;;  %v10920_v20 = vld [vmem:[%s11907_s28 + $0x134] sm:$0xc] }
 0x36d   : > { %v17604_v7 = vpop.permute.xlu0 %8113  ;;  %v17606_v6 = vpop.permute.xlu1 %8003  ;;  %v7108_v3 = vrot.slane %v7106_v32, 4  ;;  %v7109_v40 = vrot.slane %v6958_v16, 6  ;;  %v3760_v47 = vrot.slane %v3758_v48, 4  ;;  %v3761_v0 = vrot.slane %v10178_v1, 5  ;;  %v11791_v55 = vld [vmem:[%s11907_s28 + $0x44] sm:$0xf] }
 0x36e   : > { %v6899_v17 = vsel %vm11909_vm2, %v10830_v37, %v6898_v53  ;;  %v6902_v42 = vsel %vm11909_vm2, %v6900_v4, %v6901_v2  ;;  %v10641_v9 = vcombine.low %v17551_v45, %v17597_v26  ;;  %v17628_v28 = vsel %vm13496_vm12, %v10210_v10, %v3758_v48  ;;  %v17635_v53 = vld [vmem:[%s11907_s28 + $0x40] sm:$0xf]  ;;  %v10922_v37 = vld [vmem:[%s11907_s28 + $0x13c] sm:$0x3]  ;;  %v10607_v4 = vld [vmem:[%s11907_s28 + $0x164] sm:$0xe] }
 0x36f   : > { %8461 = vrot.lane.b32.xlu0 %v11211_v15, %s11846_s15  ;;  %8383 = vrot.lane.b32.xlu1 %v11196_v61, %s11845_s10  ;;  %v5882_v43 = vsel %vm2779_vm7, %v5840_v44, %v19413_v52  ;;  %v5912_v36 = vsel %vm2812_vm8, %v5880_v27, %v19414_v54  ;;  %v11133_v15 = vcombine.low %v7100_v38, %v7103_v23  ;;  %v10941_v61 = vrot.slane %v10917_v8, 10  ;;  %v17684_v27 = vld [vmem:[%s11907_s28 + $0x178] sm:$0xf]  ;;  %v17692_v8 = vld [vmem:[%s11907_s28 + $0x194] sm:$0xf]  ;;  %v19417_v54 = vld [vmem:[#allocation103_spill] sm:$0xff] }
 0x370   : > { %v7341_v29 = vrot.slane %v7339_v62, 4  ;;  %v7342_v49 = vrot.slane %v10919_v57, 6  ;;  %v11118_v63 = vcombine.low %v6899_v17, %v6902_v42  ;;  %v7107_v33 = vsel %vm12149_vm5, %v10846_v24, %v7106_v32  ;;  %v10609_v23 = vld [vmem:[%s11907_s28 + $0x16c] sm:$0x1]  ;;  %v11792_v17 = vld [vmem:[%s11907_s28 + $0x54] sm:$0xf] }
 0x371   : > { %v17637_v59 = vpop.permute.xlu0 %8193  ;;  %v17639_v31 = vpop.permute.xlu1 %8115  ;;  %v7110_v35 = vsel %vm12149_vm5, %v7108_v3, %v7109_v40  ;;  %v7346_v14 = vrot.slane %v17622_v12, 6  ;;  %v17660_v50 = vsel %vm13496_vm12, %v3760_v47, %v3761_v0  ;;  %v5914_v39 = vsel %vm2812_vm8, %v5882_v43, %v19415_v19  ;;  %v17698_v40 = vld [vmem:[%s11907_s28 + $0x190] sm:$0xf]  ;;  %v19416_v47 = vld [vmem:[#allocation93_spill] sm:$0xff]  ;;  %v10610_v52 = vld [vmem:[%s11907_s28 + $0x174] sm:$0xe] }
 0x372   : > { %v5944_v32 = vsel %vm2845_vm9, %v5912_v36, %v16434_v30  ;;  %v7567_v48 = vrot.slane %v17654_v56, 7  ;;  %v5946_v2 = vsel %vm2845_vm9, %v5914_v39, %v16402_v46  ;;  %v11093_v44 = vcombine.low %v17635_v53, %v11791_v55  ;;  %v17680_v30 = vld [vmem:[%s11907_s28 + $0x180] sm:$0xf]  ;;  %v11002_v19 = vld [vmem:[%s11907_s28 + $0x188] sm:$0x7]  ;;  %v11734_v39 = vld [vmem:[%s11907_s28 + $0x130] sm:$0xff]  }
 0x373   : > { %7937 = vrot.lane.b32.xlu0 %v11117_v13, %s11840_s29  ;;  %8463 = vrot.lane.b32.xlu1 %v11212_v60, %s11846_s15  ;;  %v5976_v16 = vsel %vm2878_vm13, %v5944_v32, %v16598_v25  ;;  %v5189_v34 = vrot.slane %v17642_v41, 5  ;;  %v11733_v13 = vld [vmem:[%s11907_s28 + $0x120] sm:$0xff]   ;;  %v11134_v46 = vcombine.low %v7107_v33, %v7110_v35  ;;  %v7340_v25 = vsel %vm12149_vm5, %v10941_v61, %v7339_v62  ;;  %v10612_v41 = vld [vmem:[%s11907_s28 + $0x17c] sm:$0x1] }
 0x374   : > { %v7343_v60 = vsel %vm12149_vm5, %v7341_v29, %v7342_v49  ;;  %v10942_v38 = vrot.slane %v10920_v20, 10  ;;  %v7348_v24 = vrot.slane %v7346_v14, 4  ;;  %v7349_v3 = vrot.slane %v10922_v37, 6 }
 0x375   : > { %v17675_v1 = vpop.permute.xlu0 %8289  ;;  %v17677_v10 = vpop.permute.xlu1 %8195  ;;  %v7574_v62 = vrot.slane %v17692_v8, 7  ;;  %v10631_v57 = vrot.slane %v10607_v4, 9  ;;  %v5978_v0 = vsel %vm2878_vm13, %v5946_v2, %v19416_v47  ;;  %v11094_v42 = vcombine.low %v17645_v18, %v11792_v17  ;;  %v11001_v18 = vld [vmem:[%s11907_s28 + $0x180] sm:$0x8]  ;;  %v17737_v2 = vld [vmem:[%s11907_s28 + $0x188] sm:$0xf] }
 0x376   : > { %v7569_v12 = vrot.slane %v7567_v48, 4  ;;  %v5196_v43 = vrot.slane %v17684_v27, 5  ;;  %v6008_v36 = vsel %vm2911_vm14, %v5976_v16, %v19417_v54  ;;  %v11181_v61 = vcombine.low %v17680_v30, %v17654_v56  ;;  %v11066_v30 = vld [vmem:[%s11907_s28 + $0x19c] sm:$0x3] }
 0x377   : > { %8017 = vrot.lane.b32.xlu0 %v11133_v15, %s11841_s30  ;;  %7939 = vrot.lane.b32.xlu1 %v11118_v63, %s11840_s29  ;;  %v5191_v29 = vrot.slane %v5189_v34, 4  ;;  %v5192_v49 = vrot.slane %v10609_v23, 5  ;;  %v11165_v33 = vcombine.low %v7340_v25, %v7343_v60  ;;  %v7347_v35 = vsel %vm12149_vm5, %v10942_v38, %v7346_v14  ;;  %v19418_v25 = vld [vmem:[#allocation105_spill] sm:$0xff] }
 0x378   : > { %v11182_v20 = vcombine.low %v17698_v40, %v17692_v8  ;;  %v7350_v32 = vsel %vm12149_vm5, %v7348_v24, %v7349_v3  ;;  %v17730_v37 = vrot.slane %v7574_v62, 4  ;;  %v17734_v14 = vsel %vm13496_vm12, %v10631_v57, %v5189_v34  ;;  %v19419_v8 = vld [vmem:[#allocation31_spill] sm:$0xff] }
 0x379   : > { %v17711_v53 = vpop.permute.xlu0 %8291  ;;  %v5800_v15 = vpop.permute.xlu1 %5799  ;;  %v10632_v4 = vrot.slane %v10610_v52, 9  ;;  %v8487_v16 = vsel %vm557_vm6, %v11093_v44, %v17523_v5  ;;  %v5198_v55 = vrot.slane %v5196_v43, 4  ;;  %v5199_v27 = vrot.slane %v10612_v41, 5 }
 0x37a   : > { %v6040_v63 = vsel %vm2944_vm15, %v6008_v36, %v5800_v15  ;;  %v6010_v60 = vsel %vm2911_vm14, %v5978_v0, %v19418_v25  ;;  %v8530_v34 = vsel %vm2779_vm7, %v8487_v16, %v17568_v11  ;;  %v5193_v24 = vsel %vm13496_vm12, %v5191_v29, %v5192_v49  ;;  %v11003_v11 = vld [vmem:[%s11907_s28 + $0x190] sm:$0x8]  ;;  %v11004_v36 = vld [vmem:[%s11907_s28 + $0x198] sm:$0x7]  ;;  %v6722_v15 = vld [vmem:[%s11907_s28 + $0xe4] sm:$0xf] }
 0x37b   : > { %8129 = vrot.lane.b32.xlu0 %v11733_v13, %s11842_s7  ;;  %8019 = vrot.lane.b32.xlu1 %v11134_v46, %s11841_s30  ;;  %v11021_v13 = vrot.slane %v11001_v18, 11  ;;  %v11061_v46 = vld [vmem:[%s11907_s28 + $0x184] sm:$0xc]  ;;  %v7570_v5 = vrot.slane %v11002_v19, 7  ;;  %v8490_v44 = vsel %vm557_vm6, %v11094_v42, %v17570_v21  ;;  %v8562_v3 = vsel %vm2812_vm8, %v8530_v34, %v17604_v7  ;;  %v11063_v7 = vld [vmem:[%s11907_s28 + $0x18c] sm:$0x3] }
 0x37c   : > { %11558 = vmatprep.mubr.msk.bf16.mxu0 %vm2993_vm0, %v6040_v63  ;;  %v7775_v47 = vrot.slane %v17737_v2, 6  ;;  %v8594_v0 = vsel %vm2845_vm9, %v8562_v3, %v17637_v59  ;;  %v11166_v17 = vcombine.low %v7347_v35, %v7350_v32  ;;  %v17762_v21 = vsel %vm13496_vm12, %v10632_v4, %v5196_v43  ;;  %v11065_v29 = vld [vmem:[%s11907_s28 + $0x198] sm:$0xf]  ;;  %v6753_v32 = vld [vmem:[%s11907_s28 + $0xe0] sm:$0x8] }
 0x37d   : > { %v5802_v38 = vpop.permute.xlu0 %5801  ;;  %v8370_v23 = vpop.permute.xlu1 %8369  ;;  %v11085_v42 = vrot.slane %v11061_v46, 10  ;;  %v8626_v52 = vsel %vm2878_vm13, %v8594_v0, %v17675_v1  ;;  %v10759_v54 = vcombine.low %v17734_v14, %v5193_v24  ;;  %v17771_v59 = vsel %vm13496_vm12, %v5198_v55, %v5199_v27  ;;  %v6754_v14 = vld [vmem:[%s11907_s28 + $0xe8] sm:$0x7]  ;;  %v11064_v4 = vld [vmem:[%s11907_s28 + $0x194] sm:$0xc] }
 0x37e   : > { %v6042_v57 = vsel %vm2944_vm15, %v6010_v60, %v5802_v38  ;;  %v17777_v43 = vsel %vm11909_vm2, %v11021_v13, %v7567_v48  ;;  %v8532_v1 = vsel %vm2779_vm7, %v8490_v44, %v17606_v6  ;;  %v8658_v49 = vsel %vm2911_vm14, %v8626_v52, %v8370_v23  ;;  %v6960_v46 = vld [vmem:[%s11907_s28 + $0xe8] sm:$0xf]  ;;  %v17820_v25 = vld [vmem:[%s11907_s28 + $0xf4] sm:$0xf]  ;;  %v6959_v24 = vld [vmem:[%s11907_s28 + $0xe4] sm:$0xc] }
 0x37f   : > { %8209 = vrot.lane.b32.xlu0 %v11165_v33, %s11843_s8  ;;  %8131 = vrot.lane.b32.xlu1 %v11734_v39, %s11842_s7  ;;  %v7571_v63 = vsel %vm11909_vm2, %v7569_v12, %v7570_v5  ;;  %v11022_v33 = vrot.slane %v11003_v11, 11  ;;  %v8564_v35 = vsel %vm2812_vm8, %v8532_v1, %v17639_v31  ;;  %v7777_v19 = vrot.slane %v7775_v47, 4  ;;  %v6755_v11 = vld [vmem:[%s11907_s28 + $0xf0] sm:$0x8]  ;;  %v6963_v52 = vld [vmem:[%s11907_s28 + $0xf8] sm:$0xf] }
 0x380   : > { %11559 = vmatmul.mubr.msk.bf16.gmra.mxu0 %vm2993_vm0, %v6042_v57  ;;  %v7778_v39 = vrot.slane %v11063_v7, 6  ;;  %v8596_v6 = vsel %vm2845_vm9, %v8564_v35, %v17677_v10  ;;  %v7577_v12 = vrot.slane %v11004_v36, 7  ;;  %v6905_v31 = vrot.slane %v6722_v15, 7  ;;  %v6961_v57 = vld [vmem:[%s11907_s28 + $0xec] sm:$0x3] }
 0x381   : > { %v8450_v41 = vpop.permute.xlu0 %8449  ;;  %v8372_v18 = vpop.permute.xlu1 %8371  ;;  %v7782_v2 = vrot.slane %v11065_v29, 6  ;;  %v10642_v16 = vcombine.low %v17628_v28, %v17660_v50  ;;  %v8628_v55 = vsel %vm2878_vm13, %v8596_v6, %v17711_v53  ;;  %v10760_v56 = vcombine.low %v17762_v21, %v17771_v59  ;;  %v6962_v29 = vld [vmem:[%s11907_s28 + $0xf4] sm:$0xc] }
 0x382   : > { %v8690_v48 = vsel %vm2944_vm15, %v8658_v49, %v8450_v41  ;;  %v11197_v10 = vcombine.low %v17777_v43, %v7571_v63  ;;  %v7776_v28 = vsel %vm12149_vm5, %v11085_v42, %v7775_v47  ;;  %v7575_v50 = vsel %vm11909_vm2, %v11022_v33, %v7574_v62  ;;  %v6756_v42 = vld [vmem:[%s11907_s28 + $0xf8] sm:$0x7]  ;;  %v17863_v63 = vld [vmem:[%s11907_s28 + $0x148] sm:$0xf]  ;;  %v19422_v6 = vld [vmem:[#allocation52_spill] sm:$0xff] }
 0x383   : > { %8305 = vrot.lane.b32.xlu0 %v11181_v61, %s11844_s9  ;;  %8211 = vrot.lane.b32.xlu1 %v11166_v17, %s11843_s8  ;;  %v8660_v61 = vsel %vm2911_vm14, %v8628_v55, %v8372_v18  ;;  %v10831_v53 = vrot.slane %v6753_v32, 11  ;;  %v7779_v34 = vsel %vm12149_vm5, %v7777_v19, %v7778_v39  ;;  %v6908_v38 = vrot.slane %v6754_v14, 7  ;;  %v10179_v19 = vld [vmem:[%s11907_s28 + $0xa0] sm:$0xe]  ;;  %v17872_v39 = vld [vmem:[%s11907_s28 + $0xa8] sm:$0x1] }
 0x384   : > { %11594 = vmatprep.mubr.msk.bf16.mxu1 %vm2993_vm0, %v8690_v48  ;;  %v11086_v23 = vrot.slane %v11064_v4, 10  ;;  %v7578_v62 = vsel %vm11909_vm2, %v17730_v37, %v7577_v12  ;;  %v6907_v5 = vrot.slane %v6905_v31, 4  ;;  %v7784_v44 = vrot.slane %v7782_v2, 4  ;;  %v6964_v48 = vld [vmem:[%s11907_s28 + $0xfc] sm:$0x3]  ;;  %v19421_v32 = vld [vmem:[#allocation24_spill] sm:$0xff] }
 0x385   : > { %v17810_v27 = vpop.permute.xlu0 %7925  ;;  %v8452_v13 = vpop.permute.xlu1 %8451  ;;  %v7785_v3 = vrot.slane %v11066_v30, 6  ;;  %v7113_v47 = vrot.slane %v6960_v46, 6  ;;  %v6912_v0 = vrot.slane %v17820_v25, 7  ;;  %v5843_v40 = vsel %vm557_vm6, %v10641_v9, %v19419_v8  ;;  %v17887_v30 = vld [vmem:[%s11907_s28 + $0x158] sm:$0xf] }
 0x386   : > { %v8692_v60 = vsel %vm2944_vm15, %v8660_v61, %v8452_v13  ;;  %v10847_v7 = vrot.slane %v6959_v24, 10  ;;  %v11198_v59 = vcombine.low %v7575_v50, %v7578_v62  ;;  %v6906_v43 = vsel %vm11909_vm2, %v10831_v53, %v6905_v31  ;;  %v10925_v53 = vld [vmem:[%s11907_s28 + $0x14c] sm:$0x3]  ;;  %v19423_v62 = vld [vmem:[#allocation78_spill] sm:$0xff] }
 0x387   : > { %8307 = vrot.lane.b32.xlu0 %v11182_v20, %s11844_s9  ;;  %5815 = vrot.lane.b32.xlu1 %v10759_v54, %s11846_s15  ;;  %v19420_v20 = vld [vmem:[#allocation33_spill] sm:$0xff]  ;;  %v11213_v54 = vcombine.low %v7776_v28, %v7779_v34  ;;  %v7783_v45 = vsel %vm12149_vm5, %v11086_v23, %v7782_v2  ;;  %v6909_v26 = vsel %vm11909_vm2, %v6907_v5, %v6908_v38  ;;  %v7116_v36 = vrot.slane %v6961_v57, 6 }
 0x388   : > { %11595 = vmatmul.mubr.msk.bf16.gmra.mxu1 %vm2993_vm0, %v8692_v60  ;;  %v5846_v17 = vsel %vm557_vm6, %v10642_v16, %v19420_v20  ;;  %v7786_v9 = vsel %vm12149_vm5, %v7784_v44, %v7785_v3  ;;  %v10832_v15 = vrot.slane %v6755_v11, 11  ;;  %v7115_v1 = vrot.slane %v7113_v47, 4  ;;  %v11793_v60 = vld [vmem:[%s11907_s28 + $0xa4] sm:$0xf]  ;;  %v19424_v44 = vld [vmem:[#allocation85_spill] sm:$0xff] }
 0x389   : > { %v17845_v37 = vpop.permute.xlu0 %8005  ;;  %v17847_v21 = vpop.permute.xlu1 %7927  ;;  %v6914_v49 = vrot.slane %v6912_v0, 4  ;;  %v6915_v41 = vrot.slane %v6756_v42, 7  ;;  %v7120_v18 = vrot.slane %v6963_v52, 6  ;;  %v5884_v14 = vsel %vm2779_vm7, %v5843_v40, %v19421_v32  ;;  %v10926_v20 = vld [vmem:[%s11907_s28 + $0x154] sm:$0xc] }
 0x38a   : > { %v5886_v12 = vsel %vm2779_vm7, %v5846_v17, %v19422_v6  ;;  %v11119_v31 = vcombine.low %v6906_v43, %v6909_v26  ;;  %v10848_v4 = vrot.slane %v6962_v29, 10  ;;  %v11214_v2 = vcombine.low %v7783_v45, %v7786_v9  ;;  %v10928_v17 = vld [vmem:[%s11907_s28 + $0x15c] sm:$0x3]  ;;  %v11794_v43 = vld [vmem:[%s11907_s28 + $0x184] sm:$0xf]  ;;  %v19427_v29 = vld [vmem:[#allocation92_spill] sm:$0xff] }
 0x38b   : > { %5817 = vrot.lane.b32.xlu0 %v10760_v56, %s11846_s15  ;;  %8385 = vrot.lane.b32.xlu1 %v11197_v10, %s11845_s10  ;;  %v7114_v16 = vsel %vm12149_vm5, %v10847_v7, %v7113_v47  ;;  %v6913_v55 = vsel %vm11909_vm2, %v10832_v15, %v6912_v0  ;;  %v10923_v56 = vld [vmem:[%s11907_s28 + $0x144] sm:$0xc]  ;;  %v7353_v10 = vrot.slane %v17863_v63, 6  ;;  %v7117_v61 = vsel %vm12149_vm5, %v7115_v1, %v7116_v36  ;;  %v19425_v7 = vld [vmem:[#allocation80_spill] sm:$0xff]  ;;  %v10552_v63 = vld [vmem:[%s11907_s28 + $0x188] sm:$0x7] }
 0x38c   : > { %v6916_v13 = vsel %vm11909_vm2, %v6914_v49, %v6915_v41  ;;  %v7122_v28 = vrot.slane %v7120_v18, 4  ;;  %v7123_v50 = vrot.slane %v6964_v48, 6  ;;  %v10211_v46 = vrot.slane %v10179_v19, 9  ;;  %v19426_v36 = vld [vmem:[#allocation72_spill] sm:$0xff]  ;;  %v6705_v49 = vld [vmem:[%s11907_s28 + $0x60] sm:$0xf] }
 0x38d   : > { %v17865_v33 = vpop.permute.xlu0 %8117  ;;  %v17867_v35 = vpop.permute.xlu1 %8007  ;;  %v3765_v34 = vrot.slane %v11793_v60, 5  ;;  %v3768_v38 = vrot.slane %v17872_v39, 5  ;;  %v5916_v5 = vsel %vm2812_vm8, %v5884_v14, %v19423_v62  ;;  %v5918_v3 = vsel %vm2812_vm8, %v5886_v12, %v19424_v44  ;;  %v19428_v48 = vld [vmem:[#allocation95_spill] sm:$0xff]  ;;  %v6707_v39 = vld [vmem:[%s11907_s28 + $0x70] sm:$0xf]  ;;  %v11739_v12 = vld [vmem:[%s11907_s28 + $0x140] sm:$0xff]  }
 0x38e   : > { %v10943_v57 = vrot.slane %v10923_v56, 10  ;;  %v7360_v47 = vrot.slane %v17887_v30, 6  ;;  %v11135_v11 = vcombine.low %v7114_v16, %v7117_v61  ;;  %v11120_v0 = vcombine.low %v6913_v55, %v6916_v13  ;;  %v10553_v55 = vld [vmem:[%s11907_s28 + $0x190] sm:$0x8]  ;;  %v11795_v56 = vld [vmem:[%s11907_s28 + $0x64] sm:$0xf] }
 0x38f   : > { %8465 = vrot.lane.b32.xlu0 %v11213_v54, %s11846_s15  ;;  %8387 = vrot.lane.b32.xlu1 %v11198_v59, %s11845_s10  ;;  %v7355_v8 = vrot.slane %v7353_v10, 4  ;;  %v7356_v40 = vrot.slane %v10925_v53, 6  ;;  %v5948_v42 = vsel %vm2845_vm9, %v5916_v5, %v19425_v7  ;;  %v7121_v52 = vsel %vm12149_vm5, %v10848_v4, %v7120_v18  ;;  %v10551_v59 = vld [vmem:[%s11907_s28 + $0x180] sm:$0x8]  ;;  %v11797_v5 = vld [vmem:[%s11907_s28 + $0x74] sm:$0xf] }
 0x390   : > { %v7124_v54 = vsel %vm12149_vm5, %v7122_v28, %v7123_v50  ;;  %v4995_v45 = vrot.slane %v11794_v43, 7  ;;  %v17919_v26 = vsel %vm13496_vm12, %v10211_v46, %v3765_v34  ;;  %v3767_v9 = vrot.slane %v3765_v34, 4  ;;  %v10554_v28 = vld [vmem:[%s11907_s28 + $0x198] sm:$0x7]  ;;  %v11796_v50 = vld [vmem:[%s11907_s28 + $0x194] sm:$0xf] }
 0x391   : > { %v17896_v23 = vpop.permute.xlu0 %8197  ;;  %v17898_v24 = vpop.permute.xlu1 %8119  ;;  %v5950_v15 = vsel %vm2845_vm9, %v5918_v3, %v19426_v36  ;;  %v5980_v1 = vsel %vm2878_vm13, %v5948_v42, %v19427_v29  ;;  %v10944_v32 = vrot.slane %v10926_v20, 10  ;;  %v7362_v14 = vrot.slane %v7360_v47, 4  ;;  %v19430_v34 = vld [vmem:[#allocation107_spill] sm:$0xff]  ;;  %v17965_v20 = vld [vmem:[%s11907_s28 + $0x1a0] sm:$0xf]  ;;  %v11740_v42 = vld [vmem:[%s11907_s28 + $0x150] sm:$0xff]  }
 0x392   : > { %v5982_v19 = vsel %vm2878_vm13, %v5950_v15, %v19428_v48  ;;  %v7363_v6 = vrot.slane %v10928_v17, 6  ;;  %v7354_v4 = vsel %vm12149_vm5, %v10943_v57, %v7353_v10  ;;  %v10569_v16 = vrot.slane %v10551_v59, 11  ;;  %v19429_v10 = vld [vmem:[#allocation104_spill] sm:$0xff]  ;;  %v17968_v17 = vld [vmem:[%s11907_s28 + $0x1a4] sm:$0xf] }
 0x393   : > { %7941 = vrot.lane.b32.xlu0 %v11119_v31, %s11840_s29  ;;  %8467 = vrot.lane.b32.xlu1 %v11214_v2, %s11846_s15  ;;  %v11136_v31 = vcombine.low %v7121_v52, %v7124_v54  ;;  %v7357_v2 = vsel %vm12149_vm5, %v7355_v8, %v7356_v40  ;;  %v11095_v30 = vcombine.low %v6705_v49, %v11795_v56  ;;  %v4997_v61 = vrot.slane %v4995_v45, 4  ;;  %v10613_v7 = vld [vmem:[%s11907_s28 + $0x184] sm:$0xe]  ;;  %v17978_v43 = vld [vmem:[%s11907_s28 + $0x198] sm:$0xf] }
 0x394   : > { %v4998_v13 = vrot.slane %v10552_v63, 7  ;;  %v5002_v53 = vrot.slane %v11796_v50, 7  ;;  %v17947_v46 = vsel %vm13496_vm12, %v3767_v9, %v3768_v38  ;;  %v6012_v60 = vsel %vm2911_vm14, %v5980_v1, %v19429_v10  ;;  %v11006_v10 = vld [vmem:[%s11907_s28 + $0x1a8] sm:$0x7] }
 0x395   : > { %v17926_v41 = vpop.permute.xlu0 %8293  ;;  %v17928_v18 = vpop.permute.xlu1 %8199  ;;  %v6014_v62 = vsel %vm2911_vm14, %v5982_v19, %v19430_v34  ;;  %v11096_v44 = vcombine.low %v6707_v39, %v11797_v5  ;;  %v11167_v8 = vcombine.low %v7354_v4, %v7357_v2  ;;  %v7361_v38 = vsel %vm12149_vm5, %v10944_v32, %v7360_v47  ;;  %v10615_v19 = vld [vmem:[%s11907_s28 + $0x18c] sm:$0x1]  ;;  %v10618_v4 = vld [vmem:[%s11907_s28 + $0x19c] sm:$0x1]  ;;  %v10975_v5 = vld [vmem:[%s11907_s28 + $0x1b0] sm:$0xf] }
 0x396   : > { %v7364_v40 = vsel %vm12149_vm5, %v7362_v14, %v7363_v6  ;;  %v4996_v52 = vsel %vm11909_vm2, %v10569_v16, %v4995_v45  ;;  %v10570_v54 = vrot.slane %v10553_v55, 11  ;;  %v5005_v59 = vrot.slane %v10554_v28, 7  ;;  %v18013_v16 = vld [vmem:[%s11907_s28 + $0x1b4] sm:$0xf] }
 0x397   : > { %8021 = vrot.lane.b32.xlu0 %v11135_v11, %s11841_s30  ;;  %7943 = vrot.lane.b32.xlu1 %v11120_v0, %s11840_s29  ;;  %v17957_v11 = vld [vmem:[%s11907_s28 + $0x188] sm:$0xf]  ;;  %v7581_v47 = vrot.slane %v17968_v17, 7  ;;  %v8493_v9 = vsel %vm557_vm6, %v11095_v30, %v17810_v27  ;;  %v4999_v36 = vsel %vm11909_vm2, %v4997_v61, %v4998_v13  ;;  %v5004_v15 = vrot.slane %v5002_v53, 4  ;;  %v11005_v30 = vld [vmem:[%s11907_s28 + $0x1a0] sm:$0x8] }
 0x398   : > { %v5203_v29 = vrot.slane %v17957_v11, 5  ;;  %v8534_v45 = vsel %vm2779_vm7, %v8493_v9, %v17845_v37  ;;  %v11168_v63 = vcombine.low %v7361_v38, %v7364_v40  ;;  %v11183_v48 = vcombine.low %v17965_v20, %v17968_v17  ;;  %v10616_v37 = vld [vmem:[%s11907_s28 + $0x194] sm:$0xe]  ;;  %v11072_v17 = vld [vmem:[%s11907_s28 + $0x1bc] sm:$0x3] }
 0x399   : > { %v17954_v3 = vpop.permute.xlu0 %8295  ;;  %v5804_v57 = vpop.permute.xlu1 %5803  ;;  %v10633_v27 = vrot.slane %v10613_v7, 9  ;;  %v8496_v39 = vsel %vm557_vm6, %v11096_v44, %v17847_v21  ;;  %v8566_v32 = vsel %vm2812_vm8, %v8534_v45, %v17865_v33  ;;  %v5210_v6 = vrot.slane %v17978_v43, 5  ;;  %v11069_v7 = vld [vmem:[%s11907_s28 + $0x1ac] sm:$0x3]  ;;  %v11071_v45 = vld [vmem:[%s11907_s28 + $0x1b8] sm:$0xf] }
 0x39a   : > { %v6044_v0 = vsel %vm2944_vm15, %v6012_v60, %v5804_v57  ;;  %v5003_v21 = vsel %vm11909_vm2, %v10570_v54, %v5002_v53  ;;  %v7583_v33 = vrot.slane %v7581_v47, 4  ;;  %v5205_v55 = vrot.slane %v5203_v29, 4  ;;  %v11068_v60 = vld [vmem:[%s11907_s28 + $0x1a8] sm:$0xf]  ;;  %v11798_v54 = vld [vmem:[%s11907_s28 + $0xb4] sm:$0xf] }
 0x39b   : > { %8133 = vrot.lane.b32.xlu0 %v11739_v12, %s11842_s7  ;;  %8023 = vrot.lane.b32.xlu1 %v11136_v31, %s11841_s30  ;;  %v8598_v12 = vsel %vm2845_vm9, %v8566_v32, %v17896_v23  ;;  %v10745_v31 = vcombine.low %v4996_v52, %v4999_v36  ;;  %v5006_v23 = vsel %vm11909_vm2, %v5004_v15, %v5005_v59  ;;  %v5206_v56 = vrot.slane %v10615_v19, 5  ;;  %v11007_v52 = vld [vmem:[%s11907_s28 + $0x1b0] sm:$0x8] }
 0x39c   : > { %11562 = vmatprep.mubr.msk.bf16.mxu0 %vm2993_vm0, %v6044_v0  ;;  %v8630_v2 = vsel %vm2878_vm13, %v8598_v12, %v17926_v41  ;;  %v8536_v61 = vsel %vm2779_vm7, %v8496_v39, %v17867_v35  ;;  %v7588_v41 = vrot.slane %v18013_v16, 7  ;;  %v10634_v53 = vrot.slane %v10616_v37, 9 }
 0x39d   : > { %v5806_v1 = vpop.permute.xlu0 %5805  ;;  %v8374_v49 = vpop.permute.xlu1 %8373  ;;  %v8568_v34 = vsel %vm2812_vm8, %v8536_v61, %v17898_v24  ;;  %v5212_v44 = vrot.slane %v5210_v6, 4  ;;  %v5213_v35 = vrot.slane %v10618_v4, 5  ;;  %v10746_v11 = vcombine.low %v5003_v21, %v5006_v23  ;;  %v11070_v4 = vld [vmem:[%s11907_s28 + $0x1b4] sm:$0xc] }
 0x39e   : > { %v6046_v14 = vsel %vm2944_vm15, %v6014_v62, %v5806_v1  ;;  %v8662_v13 = vsel %vm2911_vm14, %v8630_v2, %v8374_v49  ;;  %v8600_v57 = vsel %vm2845_vm9, %v8568_v34, %v17928_v18  ;;  %v5204_v0 = vsel %vm13496_vm12, %v10633_v27, %v5203_v29  ;;  %v11008_v29 = vld [vmem:[%s11907_s28 + $0x1b8] sm:$0x7]  ;;  %v10182_v1 = vld [vmem:[%s11907_s28 + $0xb0] sm:$0xe] }
 0x39f   : > { %8213 = vrot.lane.b32.xlu0 %v11167_v8, %s11843_s8  ;;  %8135 = vrot.lane.b32.xlu1 %v11740_v42, %s11842_s7  ;;  %v11023_v24 = vrot.slane %v11005_v30, 11  ;;  %v11067_v8 = vld [vmem:[%s11907_s28 + $0x1a4] sm:$0xc]  ;;  %v8632_v38 = vsel %vm2878_vm13, %v8600_v57, %v17954_v3  ;;  %v5207_v18 = vsel %vm13496_vm12, %v5205_v55, %v5206_v56  ;;  %v7584_v40 = vrot.slane %v11006_v10, 7  ;;  %v10184_v49 = vld [vmem:[%s11907_s28 + $0xb8] sm:$0x1] }
 0x3a0   : > { %11563 = vmatmul.mubr.msk.bf16.gmra.mxu0 %vm2993_vm0, %v6046_v14  ;;  %v7789_v42 = vrot.slane %v11068_v60, 6  ;;  %v3772_v59 = vrot.slane %v11798_v54, 5  ;;  %v7590_v3 = vrot.slane %v7588_v41, 4  ;;  %v11184_v15 = vcombine.low %v10975_v5, %v18013_v16  ;;  %v19431_v5 = vld [vmem:[#allocation9_spill] sm:$0xff] }
 0x3a1   : > { %v8454_v28 = vpop.permute.xlu0 %8453  ;;  %v8376_v50 = vpop.permute.xlu1 %8375  ;;  %v5211_v19 = vsel %vm13496_vm12, %v10634_v53, %v5210_v6  ;;  %v5214_v27 = vsel %vm13496_vm12, %v5212_v44, %v5213_v35  ;;  %v11087_v39 = vrot.slane %v11067_v8, 10  ;;  %v10761_v32 = vcombine.low %v5204_v0, %v5207_v18  ;;  %v19433_v18 = vld [vmem:[#allocation45_spill] sm:$0xff] }
 0x3a2   : > { %v8694_v62 = vsel %vm2944_vm15, %v8662_v13, %v8454_v28  ;;  %v8664_v43 = vsel %vm2911_vm14, %v8632_v38, %v8376_v50  ;;  %v7582_v14 = vsel %vm11909_vm2, %v11023_v24, %v7581_v47  ;;  %v7792_v37 = vrot.slane %v11069_v7, 6  ;;  %v19432_v24 = vld [vmem:[#allocation17_spill] sm:$0xff]  ;;  %v6709_v7 = vld [vmem:[%s11907_s28 + $0x80] sm:$0xf] }
 0x3a3   : > { %8215 = vrot.lane.b32.xlu0 %v11168_v63, %s11843_s8  ;;  %5739 = vrot.lane.b32.xlu1 %v10745_v31, %s11845_s10  ;;  %v11024_v6 = vrot.slane %v11007_v52, 11  ;;  %v7585_v12 = vsel %vm11909_vm2, %v7583_v33, %v7584_v40  ;;  %v7791_v31 = vrot.slane %v7789_v42, 4  ;;  %v7591_v21 = vrot.slane %v11008_v29, 7  ;;  %v19437_v29 = vld [vmem:[#allocation94_spill] sm:$0xff] }
 0x3a4   : > { %11598 = vmatprep.mubr.msk.bf16.mxu1 %vm2993_vm0, %v8694_v62  ;;  %v7796_v2 = vrot.slane %v11071_v45, 6  ;;  %v10212_v20 = vrot.slane %v10182_v1, 9  ;;  %v3775_v23 = vrot.slane %v10184_v49, 5  ;;  %v10643_v47 = vcombine.low %v17919_v26, %v17947_v46  ;;  %v11799_v1 = vld [vmem:[%s11907_s28 + $0x84] sm:$0xf] }
 0x3a5   : > { %v18042_v9 = vpop.permute.xlu0 %7929  ;;  %v8456_v36 = vpop.permute.xlu1 %8455  ;;  %v10762_v30 = vcombine.low %v5211_v19, %v5214_v27  ;;  %v11199_v61 = vcombine.low %v7582_v14, %v7585_v12  ;;  %v7790_v33 = vsel %vm12149_vm5, %v11087_v39, %v7789_v42  ;;  %v7589_v13 = vsel %vm11909_vm2, %v11024_v6, %v7588_v41 }
 0x3a6   : > { %v8696_v63 = vsel %vm2944_vm15, %v8664_v43, %v8456_v36  ;;  %v11088_v28 = vrot.slane %v11070_v4, 10  ;;  %v7793_v50 = vsel %vm12149_vm5, %v7791_v31, %v7792_v37  ;;  %v7592_v26 = vsel %vm11909_vm2, %v7590_v3, %v7591_v21  ;;  %v19436_v36 = vld [vmem:[#allocation81_spill] sm:$0xff]  ;;  %v11800_v37 = vld [vmem:[%s11907_s28 + $0x94] sm:$0xf] }
 0x3a7   : > { %5741 = vrot.lane.b32.xlu0 %v10746_v11, %s11845_s10  ;;  %8309 = vrot.lane.b32.xlu1 %v11183_v48, %s11844_s9  ;;  %v3774_v48 = vrot.slane %v3772_v59, 4  ;;  %v7798_v46 = vrot.slane %v7796_v2, 4  ;;  %v7799_v53 = vrot.slane %v11072_v17, 6  ;;  %v3773_v10 = vsel %vm13496_vm12, %v10212_v20, %v3772_v59  ;;  %v19435_v59 = vld [vmem:[#allocation61_spill] sm:$0xff]  ;;  %v19440_v31 = vld [vmem:[#allocation76_spill] sm:$0xff] }
 0x3a8   : > { %11599 = vmatmul.mubr.msk.bf16.gmra.mxu1 %vm2993_vm0, %v8696_v63  ;;  %v11215_v41 = vcombine.low %v7790_v33, %v7793_v50  ;;  %v11200_v62 = vcombine.low %v7589_v13, %v7592_v26  ;;  %v5849_v51 = vsel %vm557_vm6, %v10643_v47, %v19431_v5  ;;  %v7797_v35 = vsel %vm12149_vm5, %v11088_v28, %v7796_v2  ;;  %v19438_v63 = vld [vmem:[#allocation106_spill] sm:$0xff]  ;;  %v19441_v4 = vld [vmem:[#allocation97_spill] sm:$0xff] }
 0x3a9   : > { %v8010_v55 = vpop.permute.xlu0 %8009  ;;  %v7932_v56 = vpop.permute.xlu1 %7931  ;;  %v3776_v60 = vsel %vm13496_vm12, %v3774_v48, %v3775_v23  ;;  %v7800_v57 = vsel %vm12149_vm5, %v7798_v46, %v7799_v53  ;;  %v5888_v8 = vsel %vm2779_vm7, %v5849_v51, %v19432_v24  ;;  %v11097_v49 = vcombine.low %v6709_v7, %v11799_v1  ;;  %v19442_v48 = vld [vmem:[#allocation109_spill] sm:$0xff]  ;;  %v10185_v50 = vld [vmem:[%s11907_s28 + $0xc0] sm:$0xe]  ;;  %v11801_v26 = vld [vmem:[%s11907_s28 + $0xc4] sm:$0xf] }
 0x3aa   : > { %v10644_v44 = vcombine.low %v3773_v10, %v3776_v60  ;;  %v11216_v38 = vcombine.low %v7797_v35, %v7800_v57  ;;  %v5920_v54 = vsel %vm2812_vm8, %v5888_v8, %v19434_v58  ;;  %v3779_v46 = vrot.slane %v11801_v26, 5  ;;  %v10187_v60 = vld [vmem:[%s11907_s28 + $0xc8] sm:$0x1]  ;;  %v11802_v35 = vld [vmem:[%s11907_s28 + $0xd4] sm:$0xf] }
 0x3ab   : > { %8311 = vrot.lane.b32.xlu0 %v11184_v15, %s11844_s9  ;;  %5819 = vrot.lane.b32.xlu1 %v10761_v32, %s11846_s15  ;;  %v5952_v3 = vsel %vm2845_vm9, %v5920_v54, %v19436_v36  ;;  %v6711_v15 = vld [vmem:[%s11907_s28 + $0x90] sm:$0xf]  ;;  %v19439_v32 = vld [vmem:[#allocation87_spill] sm:$0xff]  ;;  %v8499_v20 = vsel %vm557_vm6, %v11097_v49, %v18042_v9  ;;  %v10213_v5 = vrot.slane %v10185_v50, 9  ;;  %v3786_v57 = vrot.slane %v11802_v35, 5  ;;  %v19451_v50 = vld [vmem:[#allocation89_spill] sm:$0xff] }
 0x3ac   : > { %v5852_v40 = vsel %vm557_vm6, %v10644_v44, %v19433_v18  ;;  %v5984_v45 = vsel %vm2878_vm13, %v5952_v3, %v19437_v29  ;;  %v11098_v6 = vcombine.low %v6711_v15, %v11800_v37  ;;  %v8538_v17 = vsel %vm2779_vm7, %v8499_v20, %v8010_v55  ;;  %v10190_v18 = vld [vmem:[%s11907_s28 + $0xd8] sm:$0x1]  ;;  %v6713_v37 = vld [vmem:[%s11907_s28 + $0xa0] sm:$0xf] }
 0x3ad   : > { %v8122_v34 = vpop.permute.xlu0 %8121  ;;  %v8012_v16 = vpop.permute.xlu1 %8011  ;;  %v5890_v43 = vsel %vm2779_vm7, %v5852_v40, %v19435_v59  ;;  %v6016_v19 = vsel %vm2911_vm14, %v5984_v45, %v19438_v63  ;;  %v3781_v44 = vrot.slane %v3779_v46, 4  ;;  %v3780_v40 = vsel %vm13496_vm12, %v10213_v5, %v3779_v46  ;;  %v19443_v45 = vld [vmem:[#allocation66_spill] sm:$0xff]  ;;  %v11804_v46 = vld [vmem:[%s11907_s28 + $0xb4] sm:$0xf] }
 0x3ae   : > { %v5922_v14 = vsel %vm2812_vm8, %v5890_v43, %v19439_v32  ;;  %v8570_v33 = vsel %vm2812_vm8, %v8538_v17, %v8122_v34  ;;  %v3789_v58 = vrot.slane %v10190_v18, 5  ;;  %v19445_v32 = vld [vmem:[#allocation22_spill] sm:$0xff]  ;;  %v19449_v17 = vld [vmem:[#allocation96_spill] sm:$0xff]  ;;  %vm6657_vm2 = vcmask 191616  }
 0x3af   : > { %5821 = vrot.lane.b32.xlu0 %v10762_v30, %s11846_s15  ;;  %8389 = vrot.lane.b32.xlu1 %v11199_v61, %s11845_s10  ;;  %v5954_v21 = vsel %vm2845_vm9, %v5922_v14, %v19440_v31  ;;  %v8502_v61 = vsel %vm557_vm6, %v11098_v6, %v7932_v56  ;;  %v19446_v31 = vld [vmem:[#allocation88_spill] sm:$0xff]  ;;  %v19448_v20 = vld [vmem:[#allocation74_spill] sm:$0xff]  ;;  %vm9354_vm5 = vcmask 322816  }
 0x3b0   : > { %v5986_v2 = vsel %vm2878_vm13, %v5954_v21, %v19441_v4  ;;  %v8540_v55 = vsel %vm2779_vm7, %v8502_v61, %v8012_v16  ;;  %v3782_v16 = vrot.slane %v10187_v60, 5  ;;  %v19447_v4 = vld [vmem:[#allocation14_spill] sm:$0xff]  ;;  %v19453_v60 = vld [vmem:[#allocation99_spill] sm:$0xff] }
 0x3b1   : > { %v8202_v11 = vpop.permute.xlu0 %8201  ;;  %v8124_v0 = vpop.permute.xlu1 %8123  ;;  %v6018_v23 = vsel %vm2911_vm14, %v5986_v2, %v19442_v48  ;;  %v11805_v18 = vld [vmem:[%s11907_s28 + $0xe4] sm:$0xf] }
 0x3b2   : > { %v8602_v28 = vsel %vm2845_vm9, %v8570_v33, %v8202_v11  ;;  %v8572_v34 = vsel %vm2812_vm8, %v8540_v55, %v8124_v0  ;;  %v3783_v7 = vsel %vm13496_vm12, %v3781_v44, %v3782_v16  ;;  %v19450_v33 = vld [vmem:[#allocation108_spill] sm:$0xff] }
 0x3b3   : > { %8469 = vrot.lane.b32.xlu0 %v11215_v41, %s11846_s15  ;;  %8391 = vrot.lane.b32.xlu1 %v11200_v62, %s11845_s10  ;;  %v10645_v43 = vcombine.low %v3780_v40, %v3783_v7 }
 0x3b5   : > { %v8298_v42 = vpop.permute.xlu0 %8297  ;;  %v8204_v52 = vpop.permute.xlu1 %8203  ;;  %v5855_v1 = vsel %vm557_vm6, %v10645_v43, %v19443_v45  ;;  %v11806_v45 = vld [vmem:[%s11907_s28 + $0xf4] sm:$0xf] }
 0x3b6   : > { %v8634_v9 = vsel %vm2878_vm13, %v8602_v28, %v8298_v42  ;;  %v8604_v62 = vsel %vm2845_vm9, %v8572_v34, %v8204_v52  ;;  %v3788_v52 = vrot.slane %v3786_v57, 4 }
 0x3b7   : > { %8471 = vrot.lane.b32.xlu1 %v11216_v38, %s11846_s15  ;;  %v10188_v38 = vld [vmem:[%s11907_s28 + $0xd0] sm:$0xe]  ;;  %s278_s15 = scalar_lea.vmem %s18821_s3, %s19514_s21 }
 0x3b8   : > { %v10214_v42 = vrot.slane %v10188_v38, 9  ;;  %v3790_v3 = vsel %vm13496_vm12, %v3788_v52, %v3789_v58  ;;  %v10191_v38 = vld [vmem:[%s11907_s28 + $0xe0] sm:$0xe]  ;;  %v10193_v58 = vld [vmem:[%s11907_s28 + $0xe8] sm:$0x1] }
 0x3b9   : > { %v8300_v27 = vpop.permute.xlu0 %8299  ;;  %v5808_v39 = vpop.permute.xlu1 %5807 }
 0x3ba   : > { %v6048_v12 = vsel %vm2944_vm15, %v6016_v19, %v5808_v39  ;;  %v8636_v51 = vsel %vm2878_vm13, %v8604_v62, %v8300_v27  ;;  %v3787_v36 = vsel %vm13496_vm12, %v10214_v42, %v3786_v57  ;;  %v19444_v27 = vld [vmem:[#allocation11_spill] sm:$0xff] }
 0x3bb   : > { %11566 = vmatprep.mubr.msk.bf16.mxu0 %vm2993_vm0, %v6048_v12  ;;  %v10646_v49 = vcombine.low %v3787_v36, %v3790_v3  ;;  %v5892_v39 = vsel %vm2779_vm7, %v5855_v1, %v19444_v27  ;;  %v19454_v62 = vld [vmem:[#allocation111_spill] sm:$0xff]  ;;  %v10215_v36 = vrot.slane %v10191_v38, 9  ;;  %v3800_v1 = vrot.slane %v11806_v45, 5 }
 0x3bc   : > { %v5924_v21 = vsel %vm2812_vm8, %v5892_v39, %v19446_v31  ;;  %v10194_v39 = vld [vmem:[%s11907_s28 + $0xf0] sm:$0xe]  ;;  %v19463_v38 = vld [vmem:[#allocation91_spill] sm:$0xff] }
 0x3bd   : > { %v5810_v47 = vpop.permute.xlu0 %5809  ;;  %v8378_v30 = vpop.permute.xlu1 %8377  ;;  %v5858_v14 = vsel %vm557_vm6, %v10646_v49, %v19445_v32  ;;  %v5956_v48 = vsel %vm2845_vm9, %v5924_v21, %v19448_v20  ;;  %v10196_v32 = vld [vmem:[%s11907_s28 + $0xf8] sm:$0x1] }
 0x3be   : > { %v6050_v13 = vsel %vm2944_vm15, %v6018_v23, %v5810_v47  ;;  %v8666_v53 = vsel %vm2911_vm14, %v8634_v9, %v8378_v30  ;;  %v5894_v2 = vsel %vm2779_vm7, %v5858_v14, %v19447_v4  ;;  %v6715_v23 = vld [vmem:[%s11907_s28 + $0xb0] sm:$0xf]  ;;  %v5988_v47 = vsel %vm2878_vm13, %v5956_v48, %v19449_v17  ;;  %v11803_v30 = vld [vmem:[%s11907_s28 + $0xa4] sm:$0xf] }
 0x3bf   : > { %11567 = vmatmul.mubr.msk.bf16.gmra.mxu0 %vm2993_vm0, %v6050_v13  ;;  %v11099_v61 = vcombine.low %v6713_v37, %v11803_v30  ;;  %v6020_v13 = vsel %vm2911_vm14, %v5988_v47, %v19450_v33  ;;  %v5926_v26 = vsel %vm2812_vm8, %v5894_v2, %v19451_v50  ;;  %v11100_v55 = vcombine.low %v6715_v23, %v11804_v46  ;;  %v19455_v47 = vld [vmem:[#allocation51_spill] sm:$0xff]  ;;  %v19457_v50 = vld [vmem:[#allocation25_spill] sm:$0xff]  ;;  %v6717_v46 = vld [vmem:[%s11907_s28 + $0xc0] sm:$0xf] }
 0x3c0   : > { %v3803_v31 = vrot.slane %v10196_v32, 5 }
 0x3c1   : > { %v8458_v10 = vpop.permute.xlu0 %8457  ;;  %v8380_v56 = vpop.permute.xlu1 %8379 }
 0x3c2   : > { %v8698_v41 = vsel %vm2944_vm15, %v8666_v53, %v8458_v10  ;;  %v8668_v11 = vsel %vm2911_vm14, %v8636_v51, %v8380_v56  ;;  %v19452_v10 = vld [vmem:[#allocation84_spill] sm:$0xff] }
 0x3c3   : > { %11602 = vmatprep.mubr.msk.bf16.mxu1 %vm2993_vm0, %v8698_v41  ;;  %v5958_v56 = vsel %vm2845_vm9, %v5926_v26, %v19452_v10  ;;  %v19458_v10 = vld [vmem:[#allocation90_spill] sm:$0xff] }
 0x3c4   : > { %v5990_v34 = vsel %vm2878_vm13, %v5958_v56, %v19453_v60  ;;  %v19459_v60 = vld [vmem:[#allocation10_spill] sm:$0xff] }
 0x3c5   : > { %v7934_v24 = vpop.permute.xlu0 %7933  ;;  %v8460_v8 = vpop.permute.xlu1 %8459  ;;  %v6022_v5 = vsel %vm2911_vm14, %v5990_v34, %v19454_v62 }
 0x3c6   : > { %v8700_v0 = vsel %vm2944_vm15, %v8668_v11, %v8460_v8  ;;  %v8505_v41 = vsel %vm557_vm6, %v11099_v61, %v7934_v24 }
 0x3c7   : > { %11603 = vmatmul.mubr.msk.bf16.gmra.mxu1 %vm2993_vm0, %v8700_v0  ;;  %v3793_v0 = vrot.slane %v11805_v18, 5 }
 0x3c9   : > { %v8014_v54 = vpop.permute.xlu0 %8013  ;;  %v7936_v59 = vpop.permute.xlu1 %7935  ;;  %v3794_v14 = vsel %vm13496_vm12, %v10215_v36, %v3793_v0 }
 0x3ca   : > { %v8542_v51 = vsel %vm2779_vm7, %v8505_v41, %v8014_v54  ;;  %v8508_v35 = vsel %vm557_vm6, %v11100_v55, %v7936_v59  ;;  %v19460_v41 = vld [vmem:[#allocation83_spill] sm:$0xff] }
 0x3cd   : > { %v8126_v15 = vpop.permute.xlu0 %8125  ;;  %v8016_v29 = vpop.permute.xlu1 %8015 }
 0x3ce   : > { %v8574_v57 = vsel %vm2812_vm8, %v8542_v51, %v8126_v15  ;;  %v8544_v40 = vsel %vm2779_vm7, %v8508_v35, %v8016_v29  ;;  %v3795_v15 = vrot.slane %v3793_v0, 4  ;;  %v3796_v29 = vrot.slane %v10193_v58, 5  ;;  %v19461_v51 = vld [vmem:[#allocation98_spill] sm:$0xff]  ;;  %v11808_v0 = vld [vmem:[%s11907_s28 + $0xd4] sm:$0xf]  ;;  %v19465_v58 = vld [vmem:[#allocation101_spill] sm:$0xff] }
 0x3d0   : > { %v3797_v37 = vsel %vm13496_vm12, %v3795_v15, %v3796_v29 }
 0x3d1   : > { %v8206_v63 = vpop.permute.xlu0 %8205  ;;  %v8128_v19 = vpop.permute.xlu1 %8127  ;;  %v10647_v2 = vcombine.low %v3794_v14, %v3797_v37 }
 0x3d2   : > { %v8606_v8 = vsel %vm2845_vm9, %v8574_v57, %v8206_v63  ;;  %v8576_v54 = vsel %vm2812_vm8, %v8544_v40, %v8128_v19  ;;  %v19462_v57 = vld [vmem:[#allocation110_spill] sm:$0xff] }
 0x3d3   : > { %v5861_v30 = vsel %vm557_vm6, %v10647_v2, %v19455_v47 }
 0x3d5   : > { %v8302_v6 = vpop.permute.xlu0 %8301  ;;  %v8208_v12 = vpop.permute.xlu1 %8207 }
 0x3d6   : > { %v8638_v24 = vsel %vm2878_vm13, %v8606_v8, %v8302_v6  ;;  %v8608_v43 = vsel %vm2845_vm9, %v8576_v54, %v8208_v12  ;;  %v10216_v6 = vrot.slane %v10194_v39, 9  ;;  %v3802_v12 = vrot.slane %v3800_v1, 4 }
 0x3d8   : > { %v3801_v20 = vsel %vm13496_vm12, %v10216_v6, %v3800_v1  ;;  %v3804_v48 = vsel %vm13496_vm12, %v3802_v12, %v3803_v31 }
 0x3d9   : > { %v8304_v28 = vpop.permute.xlu0 %8303  ;;  %v5812_v9 = vpop.permute.xlu1 %5811  ;;  %v10648_v61 = vcombine.low %v3801_v20, %v3804_v48  ;;  %v10197_v20 = vld [vmem:[%s11907_s28 + $0x100] sm:$0xe]  ;;  %v11809_v48 = vld [vmem:[%s11907_s28 + $0x104] sm:$0xf] }
 0x3da   : > { %v6052_v53 = vsel %vm2944_vm15, %v6020_v13, %v5812_v9  ;;  %v8640_v3 = vsel %vm2878_vm13, %v8608_v43, %v8304_v28  ;;  %v19456_v28 = vld [vmem:[#allocation29_spill] sm:$0xff]  ;;  %v19466_v43 = vld [vmem:[#allocation112_spill] sm:$0xff] }
 0x3db   : > { %11570 = vmatprep.mubr.msk.bf16.mxu0 %vm2993_vm0, %v6052_v53  ;;  %v5896_v9 = vsel %vm2779_vm7, %v5861_v30, %v19456_v28  ;;  %v5864_v26 = vsel %vm557_vm6, %v10648_v61, %v19457_v50  ;;  %v10199_v61 = vld [vmem:[%s11907_s28 + $0x108] sm:$0x1]  ;;  %v10217_v28 = vrot.slane %v10197_v20, 9 }
 0x3dc   : > { %v5928_v56 = vsel %vm2812_vm8, %v5896_v9, %v19458_v10  ;;  %v5898_v34 = vsel %vm2779_vm7, %v5864_v26, %v19459_v60  ;;  %v3810_v50 = vrot.slane %v10199_v61, 5  ;;  %v11810_v26 = vld [vmem:[%s11907_s28 + $0x114] sm:$0xf]  ;;  %v10200_v10 = vld [vmem:[%s11907_s28 + $0x110] sm:$0xe] }
 0x3dd   : > { %v5814_v44 = vpop.permute.xlu0 %5813  ;;  %v8382_v16 = vpop.permute.xlu1 %8381  ;;  %v5960_v62 = vsel %vm2845_vm9, %v5928_v56, %v19460_v41  ;;  %v5930_v18 = vsel %vm2812_vm8, %v5898_v34, %v19463_v38  ;;  %v10202_v56 = vld [vmem:[%s11907_s28 + $0x118] sm:$0x1]  ;;  %v10218_v41 = vrot.slane %v10200_v10, 9 }
 0x3de   : > { %v6054_v11 = vsel %vm2944_vm15, %v6022_v5, %v5814_v44  ;;  %v8670_v7 = vsel %vm2911_vm14, %v8638_v24, %v8382_v16  ;;  %v6719_v5 = vld [vmem:[%s11907_s28 + $0xd0] sm:$0xf]  ;;  %v5992_v44 = vsel %vm2878_vm13, %v5960_v62, %v19461_v51  ;;  %v11807_v16 = vld [vmem:[%s11907_s28 + $0xc4] sm:$0xf] }
 0x3df   : > { %11571 = vmatmul.mubr.msk.bf16.gmra.mxu0 %vm2993_vm0, %v6054_v11  ;;  %v11101_v35 = vcombine.low %v6717_v46, %v11807_v16  ;;  %v6024_v11 = vsel %vm2911_vm14, %v5992_v44, %v19462_v57  ;;  %v11102_v40 = vcombine.low %v6719_v5, %v11808_v0  ;;  %v3814_v46 = vrot.slane %v11810_v26, 5 }
 0x3e0   : > { %v3817_v5 = vrot.slane %v10202_v56, 5 }
 0x3e1   : > { %v8462_v42 = vpop.permute.xlu0 %8461  ;;  %v8384_v52 = vpop.permute.xlu1 %8383  ;;  %v3816_v62 = vrot.slane %v3814_v46, 4 }
 0x3e2   : > { %v8702_v59 = vsel %vm2944_vm15, %v8670_v7, %v8462_v42  ;;  %v8672_v49 = vsel %vm2911_vm14, %v8640_v3, %v8384_v52  ;;  %v19464_v42 = vld [vmem:[#allocation82_spill] sm:$0xff] }
 0x3e3   : > { %11606 = vmatprep.mubr.msk.bf16.mxu1 %vm2993_vm0, %v8702_v59  ;;  %v5962_v52 = vsel %vm2845_vm9, %v5930_v18, %v19464_v42  ;;  %v3818_v57 = vsel %vm13496_vm12, %v3816_v62, %v3817_v5 }
 0x3e4   : > { %v5994_v54 = vsel %vm2878_vm13, %v5962_v52, %v19465_v58  ;;  %v19469_v52 = vld [vmem:[#allocation32_spill] sm:$0xff] }
 0x3e5   : > { %v7938_v63 = vpop.permute.xlu0 %7937  ;;  %v8464_v27 = vpop.permute.xlu1 %8463  ;;  %v6026_v36 = vsel %vm2911_vm14, %v5994_v54, %v19466_v43  ;;  %v6721_v54 = vld [vmem:[%s11907_s28 + $0xe0] sm:$0xf]  ;;  %v19470_v43 = vld [vmem:[#allocation77_spill] sm:$0xff] }
 0x3e6   : > { %v8704_v19 = vsel %vm2944_vm15, %v8672_v49, %v8464_v27  ;;  %v8511_v59 = vsel %vm557_vm6, %v11101_v35, %v7938_v63  ;;  %v3815_v35 = vsel %vm13496_vm12, %v10218_v41, %v3814_v46 }
 0x3e7   : > { %11607 = vmatmul.mubr.msk.bf16.gmra.mxu1 %vm2993_vm0, %v8704_v19  ;;  %v10650_v18 = vcombine.low %v3815_v35, %v3818_v57 }
 0x3e9   : > { %v8018_v21 = vpop.permute.xlu0 %8017  ;;  %v7940_v4 = vpop.permute.xlu1 %7939  ;;  %v5870_v58 = vsel %vm557_vm6, %v10650_v18, %v19469_v52 }
 0x3ea   : > { %v8546_v3 = vsel %vm2779_vm7, %v8511_v59, %v8018_v21  ;;  %v8514_v45 = vsel %vm557_vm6, %v11102_v40, %v7940_v4 }
 0x3ed   : > { %v8130_v23 = vpop.permute.xlu0 %8129  ;;  %v8020_v17 = vpop.permute.xlu1 %8019 }
 0x3ee   : > { %v8578_v1 = vsel %vm2812_vm8, %v8546_v3, %v8130_v23  ;;  %v8548_v32 = vsel %vm2779_vm7, %v8514_v45, %v8020_v17  ;;  %v3807_v23 = vrot.slane %v11809_v48, 5  ;;  %v19471_v3 = vld [vmem:[#allocation68_spill] sm:$0xff] }
 0x3f0   : > { %v3809_v9 = vrot.slane %v3807_v23, 4  ;;  %v3808_v60 = vsel %vm13496_vm12, %v10217_v28, %v3807_v23 }
 0x3f1   : > { %v8210_v33 = vpop.permute.xlu0 %8209  ;;  %v8132_v13 = vpop.permute.xlu1 %8131 }
 0x3f2   : > { %v8610_v27 = vsel %vm2845_vm9, %v8578_v1, %v8210_v33  ;;  %v8580_v6 = vsel %vm2812_vm8, %v8548_v32, %v8132_v13  ;;  %v3811_v34 = vsel %vm13496_vm12, %v3809_v9, %v3810_v50  ;;  %v6723_v1 = vld [vmem:[%s11907_s28 + $0xf0] sm:$0xf] }
 0x3f3   : > { %v10649_v16 = vcombine.low %v3808_v60, %v3811_v34 }
 0x3f5   : > { %v8306_v55 = vpop.permute.xlu0 %8305  ;;  %v8212_v53 = vpop.permute.xlu1 %8211 }
 0x3f6   : > { %v8642_v63 = vsel %vm2878_vm13, %v8610_v27, %v8306_v55  ;;  %v8612_v21 = vsel %vm2845_vm9, %v8580_v6, %v8212_v53 }
 0x3f9   : > { %v8308_v8 = vpop.permute.xlu0 %8307  ;;  %v5816_v24 = vpop.permute.xlu1 %5815 }
 0x3fa   : > { %v6056_v7 = vsel %vm2944_vm15, %v6024_v11, %v5816_v24  ;;  %v8644_v4 = vsel %vm2878_vm13, %v8612_v21, %v8308_v8  ;;  %v19467_v24 = vld [vmem:[#allocation4_spill] sm:$0xff]  ;;  %v19475_v21 = vld [vmem:[#allocation3_spill] sm:$0xff] }
 0x3fb   : > { %11574 = vmatprep.mubr.msk.bf16.mxu0 %vm2993_vm0, %v6056_v7  ;;  %v5867_v38 = vsel %vm557_vm6, %v10649_v16, %v19467_v24  ;;  %v19468_v7 = vld [vmem:[#allocation60_spill] sm:$0xff] }
 0x3fc   : > { %v5900_v42 = vsel %vm2779_vm7, %v5867_v38, %v19468_v7 }
 0x3fd   : > { %v5818_v15 = vpop.permute.xlu0 %5817  ;;  %v8386_v29 = vpop.permute.xlu1 %8385 }
 0x3fe   : > { %v6058_v49 = vsel %vm2944_vm15, %v6026_v36, %v5818_v15  ;;  %v11552_v39 = vpop.f32.mrf.mxu0  ;;  %v8674_v19 = vsel %vm2911_vm14, %v8642_v63, %v8386_v29  ;;  %v5932_v36 = vsel %vm2812_vm8, %v5900_v42, %v19470_v43  ;;  %v5902_v15 = vsel %vm2779_vm7, %v5870_v58, %v19471_v3  ;;  %v19472_v29 = vld [vmem:[#allocation79_spill] sm:$0xff]  ;;  %v11811_v63 = vld [vmem:[%s11907_s28 + $0xe4] sm:$0xf]  ;;  %v18350_v42 = vld [vmem:[%s18822_s4] ss:$0 sm:$0xff] }
 0x3ff   : > { %11575 = vmatmul.mubr.msk.bf16.gmra.mxu0 %vm2993_vm0, %v6058_v49  ;;  %v5964_v45 = vsel %vm2845_vm9, %v5932_v36, %v19472_v29  ;;  %v19473_v49 = vld [vmem:[#allocation100_spill] sm:$0xff]  ;;  %v19479_v3 = vld [vmem:[#allocation55_spill] sm:$0xff] }
 0x400   : > { %v6146_v31 = vpop.f32.mrf.mxu0  ;;  %v5996_v27 = vsel %vm2878_vm13, %v5964_v45, %v19473_v49  ;;  %v19478_v43 = vld [vmem:[#allocation44_spill] sm:$0xff] }
 0x401   : > { %v8466_v14 = vpop.permute.xlu0 %8465  ;;  %v8388_v37 = vpop.permute.xlu1 %8387  ;;  %6305 = vrot.lane.b32.xlu0 %v6146_v31, %s11843_s8 }
 0x402   : > { %v8706_v12 = vsel %vm2944_vm15, %v8674_v19, %v8466_v14  ;;  %v11553_v2 = vpop.f32.mrf.mxu0  ;;  %v8676_v17 = vsel %vm2911_vm14, %v8644_v4, %v8388_v37  ;;  %v19474_v37 = vld [vmem:[#allocation71_spill] sm:$0xff] }
 0x403   : > { %11610 = vmatprep.mubr.msk.bf16.mxu1 %vm2993_vm0, %v8706_v12  ;;  %v5934_v6 = vsel %vm2812_vm8, %v5902_v15, %v19474_v37  ;;  %v11104_v12 = vcombine.low %v6723_v1, %v17820_v25 }
 0x404   : > { %v6149_v13 = vpop.f32.mrf.mxu0  ;;  %v5966_v4 = vsel %vm2845_vm9, %v5934_v6, %v19475_v21 }
 0x405   : > { %v7942_v47 = vpop.permute.xlu0 %7941  ;;  %v8468_v30 = vpop.permute.xlu1 %8467  ;;  %6309 = vrot.lane.b32.xlu0 %v11552_v39, %s11843_s8  ;;  %6307 = vrot.lane.b32.xlu1 %v6149_v13, %s11843_s8  ;;  %v11103_v39 = vcombine.low %v6721_v54, %v11811_v63 }
 0x406   : > { %v8708_v33 = vsel %vm2944_vm15, %v8676_v17, %v8468_v30 }
 0x407   : > { %11611 = vmatmul.mubr.msk.bf16.gmra.mxu1 %vm2993_vm0, %v8708_v33  ;;  %v8517_v48 = vsel %vm557_vm6, %v11103_v39, %v7942_v47 }
 0x409   : > { %v8022_v55 = vpop.permute.xlu0 %8021  ;;  %v7944_v53 = vpop.permute.xlu1 %7943  ;;  %6311 = vrot.lane.b32.xlu1 %v11553_v2, %s11843_s8  ;;  %v19476_v2 = vld [vmem:[#allocation102_spill] sm:$0xff] }
 0x40a   : > { %v5998_v20 = vsel %vm2878_vm13, %v5966_v4, %v19476_v2  ;;  %v8550_v17 = vsel %vm2779_vm7, %v8517_v48, %v8022_v55  ;;  %v8520_v25 = vsel %vm557_vm6, %v11104_v12, %v7944_v53 }
 0x40d   : > { %v8134_v51 = vpop.permute.xlu0 %8133  ;;  %v8024_v44 = vpop.permute.xlu1 %8023 }
 0x40e   : > { %v8582_v13 = vsel %vm2812_vm8, %v8550_v17, %v8134_v51  ;;  %v8552_v46 = vsel %vm2779_vm7, %v8520_v25, %v8024_v44 }
 0x411   : > { %v8214_v11 = vpop.permute.xlu0 %8213  ;;  %v8136_v8 = vpop.permute.xlu1 %8135 }
 0x412   : > { %v8614_v50 = vsel %vm2845_vm9, %v8582_v13, %v8214_v11  ;;  %v8584_v56 = vsel %vm2812_vm8, %v8552_v46, %v8136_v8 }
 0x415   : > { %v8216_v0 = vpop.permute.xlu0 %8215  ;;  %v5740_v40 = vpop.permute.xlu1 %5739 }
 0x416   : > { %v6028_v32 = vsel %vm2911_vm14, %v5996_v27, %v5740_v40  ;;  %v8616_v41 = vsel %vm2845_vm9, %v8584_v56, %v8216_v0  ;;  %v19477_v40 = vld [vmem:[#allocation64_spill] sm:$0xff] }
 0x419   : > { %v5742_v59 = vpop.permute.xlu0 %5741  ;;  %v8310_v22 = vpop.permute.xlu1 %8309 }
 0x41a   : > { %v6030_v30 = vsel %vm2911_vm14, %v5998_v20, %v5742_v59  ;;  %v8646_v47 = vsel %vm2878_vm13, %v8614_v50, %v8310_v22  ;;  %v18356_v59 = vld [vmem:[%s18823_s5] ss:$0 sm:$0xff]  ;;  %v19482_v50 = vld [vmem:[#allocation23_spill] sm:$0xff] }
 0x41d   : > { %v8312_v19 = vpop.permute.xlu0 %8311  ;;  %v5820_v14 = vpop.permute.xlu1 %5819 }
 0x41e   : > { %v6060_v31 = vsel %vm2944_vm15, %v6028_v32, %v5820_v14  ;;  %v8648_v62 = vsel %vm2878_vm13, %v8616_v41, %v8312_v19  ;;  %v19480_v32 = vld [vmem:[#allocation20_spill] sm:$0xff] }
 0x41f   : > { %11578 = vmatprep.mubr.msk.bf16.mxu0 %vm2993_vm0, %v6060_v31 }
 0x420   : > { %v11556_v23 = vpop.f32.mrf.mxu0 }
 0x421   : > { %v5822_v61 = vpop.permute.xlu0 %5821  ;;  %v8390_v33 = vpop.permute.xlu1 %8389 }
 0x422   : > { %v6062_v28 = vsel %vm2944_vm15, %v6030_v30, %v5822_v61  ;;  %v6162_v9 = vpop.f32.mrf.mxu0  ;;  %v8678_v55 = vsel %vm2911_vm14, %v8646_v47, %v8390_v33  ;;  %v19481_v61 = vld [vmem:[#allocation36_spill] sm:$0xff] }
 0x423   : > { %6313 = vrot.lane.b32.xlu0 %v6162_v9, %s11843_s8  ;;  %11579 = vmatmul.mubr.msk.bf16.gmra.mxu0 %vm2993_vm0, %v6062_v28 }
 0x424   : > { %v11557_v26 = vpop.f32.mrf.mxu0 }
 0x425   : > { %v8470_v10 = vpop.permute.xlu0 %8469  ;;  %v8392_v53 = vpop.permute.xlu1 %8391 }
 0x426   : > { %v8710_v60 = vsel %vm2944_vm15, %v8678_v55, %v8470_v10  ;;  %v6165_v34 = vpop.f32.mrf.mxu0  ;;  %v8680_v5 = vsel %vm2911_vm14, %v8648_v62, %v8392_v53  ;;  %v19484_v62 = vld [vmem:[#allocation39_spill] sm:$0xff] }
 0x427   : > { %6317 = vrot.lane.b32.xlu0 %v11556_v23, %s11843_s8  ;;  %6315 = vrot.lane.b32.xlu1 %v6165_v34, %s11843_s8 }
 0x428   : > { %11614 = vmatprep.mubr.msk.bf16.mxu1 %vm2993_vm0, %v8710_v60 }
 0x429   : > { %v8472_v51 = vpop.permute.xlu1 %8471 }
 0x42a   : > { %v8712_v44 = vsel %vm2944_vm15, %v8680_v5, %v8472_v51 }
 0x42b   : > { %6319 = vrot.lane.b32.xlu1 %v11557_v26, %s11843_s8  ;;  %11615 = vmatmul.mubr.msk.bf16.gmra.mxu1 %vm2993_vm0, %v8712_v44  ;;  %v19483_v26 = vld [vmem:[#allocation16_spill] sm:$0xff] }
 0x440   : > { %v11560_v16 = vpop.f32.mrf.mxu0 }
 0x442   : > { %v6178_v35 = vpop.f32.mrf.mxu0 }
 0x443   : > { %6321 = vrot.lane.b32.xlu0 %v6178_v35, %s11843_s8 }
 0x444   : > { %v11561_v57 = vpop.f32.mrf.mxu0 }
 0x446   : > { %v6181_v11 = vpop.f32.mrf.mxu0 }
 0x447   : > { %6325 = vrot.lane.b32.xlu0 %v11560_v16, %s11843_s8  ;;  %6323 = vrot.lane.b32.xlu1 %v6181_v11, %s11843_s8 }
 0x44b   : > { %6327 = vrot.lane.b32.xlu1 %v11561_v57, %s11843_s8 }
 0x460   : > { %v11564_v8 = vpop.f32.mrf.mxu0 }
 0x462   : > { %v6194_v24 = vpop.f32.mrf.mxu0 }
 0x463   : > { %6329 = vrot.lane.b32.xlu0 %v6194_v24, %s11843_s8 }
 0x464   : > { %v11565_v38 = vpop.f32.mrf.mxu0 }
 0x466   : > { %v6197_v18 = vpop.f32.mrf.mxu0 }
 0x467   : > { %6333 = vrot.lane.b32.xlu0 %v11564_v8, %s11843_s8  ;;  %6331 = vrot.lane.b32.xlu1 %v6197_v18, %s11843_s8 }
 0x46b   : > { %6335 = vrot.lane.b32.xlu1 %v11565_v38, %s11843_s8 }
 0x473   : > { %v6306_v0 = vpop.permute.xlu0 %6305 }
 0x474   : > { %v6401_v7 = vadd.f32 %v6306_v0, %v19477_v40 }
 0x476   : > { %v6433_v52 = vmul.f32 %v18350_v42, %v6401_v7 }
 0x477   : > { %v6310_v58 = vpop.permute.xlu0 %6309  ;;  %v6308_v54 = vpop.permute.xlu1 %6307 }
 0x478   : > { %v6465_v22 = vadd.f32 %v18356_v59, %v6433_v52  ;;  %v6403_v36 = vadd.f32 %v19478_v43, %v6310_v58  ;;  %v6402_v15 = vadd.f32 %v6308_v54, %v19479_v3  ;;  %v19485_v58 = vld [vmem:[#allocation65_spill] sm:$0xff] }
 0x47a   : > { %v6497_v29 = vmax.f32 %v6465_v22, 0.0  ;;  %v6435_v45 = vmul.f32 %v18350_v42, %v6403_v36  ;;  %v6434_v1 = vmul.f32 %v18350_v42, %v6402_v15 }
 0x47b   : > { %v6312_v49 = vpop.permute.xlu1 %6311 }
 0x47c   : > { %v11340_v27 = vpack.c.bf16 %v6497_v29, %v6497_v29  ;;  %v6467_v63 = vadd.f32 %v18356_v59, %v6435_v45  ;;  %v6466_v39 = vadd.f32 %v18356_v59, %v6434_v1  ;;  %v6404_v19 = vadd.f32 %v19480_v32, %v6312_v49  ;;  %v19486_v45 = vld [vmem:[#allocation38_spill] sm:$0xff]  ;;  %v19487_v49 = vld [vmem:[#allocation35_spill] sm:$0xff] }
 0x47e   : > { %6658 = vst.msk [vmem:[%s14736_s12] sm:$0xf] %vm6657_vm2, %v11340_v27  ;;  %v6499_v37 = vmax.f32 %v6467_v63, 0.0  ;;  %v6498_v6 = vmax.f32 %v6466_v39, 0.0  ;;  %v6436_v12 = vmul.f32 %v18350_v42, %v6404_v19  ;;  %v18409_v63 = vpop.f32.mrf.mxu1 }
 0x47f   : > { %v11568_v14 = vpop.f32.mrf.mxu0 }
 0x480   : > { %v11342_v21 = vpack.c.bf16 %v6499_v37, %v6499_v37  ;;  %v11341_v4 = vpack.c.bf16 %v6498_v6, %v6498_v6  ;;  %v6468_v2 = vadd.f32 %v18356_v59, %v6436_v12 }
 0x481   : > { %v6210_v31 = vpop.f32.mrf.mxu0 }
 0x482   : > { %6337 = vrot.lane.b32.xlu0 %v6210_v31, %s11843_s8  ;;  %6660 = vst.msk [vmem:[%s14736_s12 + $0x8] sm:$0xf] %vm6657_vm2, %v11342_v21  ;;  %6659 = vst.msk [vmem:[%s14736_s12 + $0x4] sm:$0xf] %vm6657_vm2, %v11341_v4  ;;  %v6500_v48 = vmax.f32 %v6468_v2, 0.0  ;;  %v19488_v21 = vld [vmem:[#allocation41_spill] sm:$0xff]  ;;  %v18416_v2 = vpop.f32.mrf.mxu1 }
 0x483   : > { %v11569_v20 = vpop.f32.mrf.mxu0 }
 0x484   : > { %v11343_v17 = vpack.c.bf16 %v6500_v48, %v6500_v48 }
 0x485   : > { %v6213_v23 = vpop.f32.mrf.mxu0 }
 0x486   : > { %6341 = vrot.lane.b32.xlu0 %v11568_v14, %s11843_s8  ;;  %6339 = vrot.lane.b32.xlu1 %v6213_v23, %s11843_s8  ;;  %6661 = vst.msk [vmem:[%s14736_s12 + $0xc] sm:$0xf] %vm6657_vm2, %v11343_v17 }
 0x48a   : > { %6343 = vrot.lane.b32.xlu1 %v11569_v20, %s11843_s8 }
 0x495   : > { %v6314_v30 = vpop.permute.xlu0 %6313 }
 0x496   : > { %v6405_v33 = vadd.f32 %v6314_v30, %v19481_v61 }
 0x498   : > { %v6437_v25 = vmul.f32 %v18350_v42, %v6405_v33 }
 0x499   : > { %v6318_v13 = vpop.permute.xlu0 %6317  ;;  %v6316_v28 = vpop.permute.xlu1 %6315 }
 0x49a   : > { %v6469_v9 = vadd.f32 %v18356_v59, %v6437_v25  ;;  %v6407_v47 = vadd.f32 %v19482_v50, %v6318_v13  ;;  %v6406_v46 = vadd.f32 %v6316_v28, %v19483_v26  ;;  %v18423_v28 = vpop.f32.mrf.mxu1 }
 0x49c   : > { %v6501_v55 = vmax.f32 %v6469_v9, 0.0  ;;  %v6439_v10 = vmul.f32 %v18350_v42, %v6407_v47  ;;  %v6438_v53 = vmul.f32 %v18350_v42, %v6406_v46 }
 0x49d   : > { %v6320_v56 = vpop.permute.xlu1 %6319 }
 0x49e   : > { %v11344_v60 = vpack.c.bf16 %v6501_v55, %v6501_v55  ;;  %v6471_v34 = vadd.f32 %v18356_v59, %v6439_v10  ;;  %v6470_v41 = vadd.f32 %v18356_v59, %v6438_v53  ;;  %v6408_v5 = vadd.f32 %v19484_v62, %v6320_v56  ;;  %v8799_v10 = vpop.f32.mrf.mxu1 }
 0x49f   : > { %v11572_v51 = vpop.f32.mrf.mxu0 }
 0x4a0   : > { %6662 = vst.msk [vmem:[%s14736_s12 + $0x10] sm:$0xf] %vm6657_vm2, %v11344_v60  ;;  %v6503_v44 = vmax.f32 %v6471_v34, 0.0  ;;  %v6502_v16 = vmax.f32 %v6470_v41, 0.0  ;;  %v6440_v35 = vmul.f32 %v18350_v42, %v6408_v5  ;;  %v18433_v53 = vpop.f32.mrf.mxu1  ;;  %v19489_v5 = vld [vmem:[#allocation59_spill] sm:$0xff] }
 0x4a1   : > { %v6226_v57 = vpop.f32.mrf.mxu0 }
 0x4a2   : > { %v11346_v11 = vpack.c.bf16 %v6503_v44, %v6503_v44  ;;  %v11345_v8 = vpack.c.bf16 %v6502_v16, %v6502_v16  ;;  %v6472_v24 = vadd.f32 %v18356_v59, %v6440_v35  ;;  %6345 = vrot.lane.b32.xlu0 %v6226_v57, %s11843_s8  ;;  %v8812_v56 = vpop.f32.mrf.mxu1 }
 0x4a3   : > { %v11573_v38 = vpop.f32.mrf.mxu0 }
 0x4a4   : > { %6664 = vst.msk [vmem:[%s14736_s12 + $0x18] sm:$0xf] %vm6657_vm2, %v11346_v11  ;;  %6663 = vst.msk [vmem:[%s14736_s12 + $0x14] sm:$0xf] %vm6657_vm2, %v11345_v8  ;;  %v6504_v18 = vmax.f32 %v6472_v24, 0.0  ;;  %v18436_v60 = vpop.f32.mrf.mxu1  ;;  %v19490_v8 = vld [vmem:[#allocation42_spill] sm:$0xff] }
 0x4a5   : > { %v6229_v0 = vpop.f32.mrf.mxu0 }
 0x4a6   : > { %v11347_v7 = vpack.c.bf16 %v6504_v18, %v6504_v18  ;;  %6349 = vrot.lane.b32.xlu0 %v11572_v51, %s11843_s8  ;;  %6347 = vrot.lane.b32.xlu1 %v6229_v0, %s11843_s8  ;;  %v8815_v34 = vpop.f32.mrf.mxu1 }
 0x4a8   : > { %6665 = vst.msk [vmem:[%s14736_s12 + $0x1c] sm:$0xf] %vm6657_vm2, %v11347_v7  ;;  %v18439_v44 = vpop.f32.mrf.mxu1 }
 0x4aa   : > { %6351 = vrot.lane.b32.xlu1 %v11573_v38, %s11843_s8  ;;  %v19491_v38 = vld [vmem:[#allocation50_spill] sm:$0xff]  ;;  %v8828_v0 = vpop.f32.mrf.mxu1 }
 0x4b5   : > { %v6322_v52 = vpop.permute.xlu0 %6321 }
 0x4b6   : > { %v6409_v54 = vadd.f32 %v6322_v52, %v19485_v58 }
 0x4b8   : > { %v6441_v22 = vmul.f32 %v18350_v42, %v6409_v54 }
 0x4b9   : > { %v6326_v36 = vpop.permute.xlu0 %6325  ;;  %v6324_v15 = vpop.permute.xlu1 %6323 }
 0x4ba   : > { %v6473_v29 = vadd.f32 %v18356_v59, %v6441_v22  ;;  %v6411_v1 = vadd.f32 %v19486_v45, %v6326_v36  ;;  %v6410_v27 = vadd.f32 %v6324_v15, %v19487_v49 }
 0x4bc   : > { %v6505_v39 = vmax.f32 %v6473_v29, 0.0  ;;  %v6443_v19 = vmul.f32 %v18350_v42, %v6411_v1  ;;  %v6442_v14 = vmul.f32 %v18350_v42, %v6410_v27  ;;  %v19492_v1 = vld [vmem:[#allocation12_spill] sm:$0xff] }
 0x4bd   : > { %v6328_v37 = vpop.permute.xlu1 %6327 }
 0x4be   : > { %v11348_v6 = vpack.c.bf16 %v6505_v39, %v6505_v39  ;;  %v6475_v12 = vadd.f32 %v18356_v59, %v6443_v19  ;;  %v6474_v31 = vadd.f32 %v18356_v59, %v6442_v14  ;;  %v6412_v4 = vadd.f32 %v19488_v21, %v6328_v37  ;;  %v18450_v39 = vpop.f32.mrf.mxu1 }
 0x4bf   : > { %v11576_v20 = vpop.f32.mrf.mxu0 }
 0x4c0   : > { %6666 = vst.msk [vmem:[%s14736_s12 + $0x20] sm:$0xf] %vm6657_vm2, %v11348_v6  ;;  %v6507_v48 = vmax.f32 %v6475_v12, 0.0  ;;  %v6506_v23 = vmax.f32 %v6474_v31, 0.0  ;;  %v6444_v17 = vmul.f32 %v18350_v42, %v6412_v4  ;;  %v8831_v4 = vpop.f32.mrf.mxu1 }
 0x4c1   : > { %v6242_v30 = vpop.f32.mrf.mxu0 }
 0x4c2   : > { %v11350_v33 = vpack.c.bf16 %v6507_v48, %v6507_v48  ;;  %v11349_v25 = vpack.c.bf16 %v6506_v23, %v6506_v23  ;;  %v6476_v13 = vadd.f32 %v18356_v59, %v6444_v17  ;;  %6353 = vrot.lane.b32.xlu0 %v6242_v30, %s11843_s8  ;;  %v11600_v23 = vpop.f32.mrf.mxu1 }
 0x4c3   : > { %v11577_v9 = vpop.f32.mrf.mxu0 }
 0x4c4   : > { %6668 = vst.msk [vmem:[%s14736_s12 + $0x28] sm:$0xf] %vm6657_vm2, %v11350_v33  ;;  %6667 = vst.msk [vmem:[%s14736_s12 + $0x24] sm:$0xf] %vm6657_vm2, %v11349_v25  ;;  %v6508_v47 = vmax.f32 %v6476_v13, 0.0  ;;  %v8844_v25 = vpop.f32.mrf.mxu1 }
 0x4c5   : > { %v6245_v46 = vpop.f32.mrf.mxu0 }
 0x4c6   : > { %v11351_v55 = vpack.c.bf16 %v6508_v47, %v6508_v47  ;;  %6357 = vrot.lane.b32.xlu0 %v11576_v20, %s11843_s8  ;;  %6355 = vrot.lane.b32.xlu1 %v6245_v46, %s11843_s8 }
 0x4c8   : > { %6669 = vst.msk [vmem:[%s14736_s12 + $0x2c] sm:$0xf] %vm6657_vm2, %v11351_v55 }
 0x4ca   : > { %6359 = vrot.lane.b32.xlu1 %v11577_v9, %s11843_s8  ;;  %v11601_v9 = vpop.f32.mrf.mxu1 }
 0x4cc   : > { %v8847_v47 = vpop.f32.mrf.mxu1 }
 0x4ce   : > { %v11604_v46 = vpop.f32.mrf.mxu1 }
 0x4d5   : > { %v6330_v41 = vpop.permute.xlu0 %6329 }
 0x4d6   : > { %v6413_v51 = vadd.f32 %v6330_v41, %v19489_v5  ;;  %v19493_v41 = vld [vmem:[#allocation40_spill] sm:$0xff] }
 0x4d8   : > { %v6445_v16 = vmul.f32 %v18350_v42, %v6413_v51 }
 0x4d9   : > { %v6334_v35 = vpop.permute.xlu0 %6333  ;;  %v6332_v57 = vpop.permute.xlu1 %6331 }
 0x4da   : > { %v6477_v11 = vadd.f32 %v18356_v59, %v6445_v16  ;;  %v6415_v24 = vadd.f32 %v19490_v8, %v6334_v35  ;;  %v6414_v18 = vadd.f32 %v6332_v57, %v19491_v38  ;;  %v8860_v16 = vpop.f32.mrf.mxu1 }
 0x4dc   : > { %v6509_v7 = vmax.f32 %v6477_v11, 0.0  ;;  %v6447_v52 = vmul.f32 %v18350_v42, %v6415_v24  ;;  %v6446_v54 = vmul.f32 %v18350_v42, %v6414_v18  ;;  %v19494_v24 = vld [vmem:[#allocation27_spill] sm:$0xff]  ;;  %v19495_v18 = vld [vmem:[#allocation2_spill] sm:$0xff] }
 0x4dd   : > { %v6336_v22 = vpop.permute.xlu1 %6335 }
 0x4de   : > { %v11352_v36 = vpack.c.bf16 %v6509_v7, %v6509_v7  ;;  %v6479_v15 = vadd.f32 %v18356_v59, %v6447_v52  ;;  %v6478_v29 = vadd.f32 %v18356_v59, %v6446_v54  ;;  %v6416_v27 = vadd.f32 %v19492_v1, %v6336_v22 }
 0x4e0   : > { %6670 = vst.msk [vmem:[%s14736_s12 + $0x30] sm:$0xf] %vm6657_vm2, %v11352_v36  ;;  %v6511_v19 = vmax.f32 %v6479_v15, 0.0  ;;  %v6510_v14 = vmax.f32 %v6478_v29, 0.0  ;;  %v6448_v37 = vmul.f32 %v18350_v42, %v6416_v27  ;;  %v19496_v29 = vld [vmem:[#allocation53_spill] sm:$0xff] }
 0x4e2   : > { %v11354_v6 = vpack.c.bf16 %v6511_v19, %v6511_v19  ;;  %v11353_v12 = vpack.c.bf16 %v6510_v14, %v6510_v14  ;;  %v6480_v31 = vadd.f32 %v18356_v59, %v6448_v37 }
 0x4e3   : > { %v11580_v20 = vpop.f32.mrf.mxu0 }
 0x4e4   : > { %6672 = vst.msk [vmem:[%s14736_s12 + $0x38] sm:$0xf] %vm6657_vm2, %v11354_v6  ;;  %6671 = vst.msk [vmem:[%s14736_s12 + $0x34] sm:$0xf] %vm6657_vm2, %v11353_v12  ;;  %v6512_v48 = vmax.f32 %v6480_v31, 0.0 }
 0x4e5   : > { %v6258_v17 = vpop.f32.mrf.mxu0 }
 0x4e6   : > { %v11355_v30 = vpack.c.bf16 %v6512_v48, %v6512_v48  ;;  %6361 = vrot.lane.b32.xlu0 %v6258_v17, %s11843_s8 }
 0x4e7   : > { %v11581_v33 = vpop.f32.mrf.mxu0 }
 0x4e8   : > { %6673 = vst.msk [vmem:[%s14736_s12 + $0x3c] sm:$0xf] %vm6657_vm2, %v11355_v30 }
 0x4e9   : > { %v6261_v13 = vpop.f32.mrf.mxu0 }
 0x4ea   : > { %6365 = vrot.lane.b32.xlu0 %v11580_v20, %s11843_s8  ;;  %6363 = vrot.lane.b32.xlu1 %v6261_v13, %s11843_s8 }
 0x4ee   : > { %8955 = vrot.lane.b32.xlu0 %v18416_v2, %s11845_s10  ;;  %6367 = vrot.lane.b32.xlu1 %v11581_v33, %s11843_s8 }
 0x4f2   : > { %8959 = vrot.lane.b32.xlu0 %v18409_v63, %s11845_s10  ;;  %8957 = vrot.lane.b32.xlu1 %v8799_v10, %s11845_s10 }
 0x4f4   : > { %v6338_v55 = vpop.permute.xlu0 %6337 }
 0x4f5   : > { %v6417_v51 = vadd.f32 %v6338_v55, %v19493_v41  ;;  %v19498_v55 = vld [vmem:[#allocation58_spill] sm:$0xff] }
 0x4f6   : > { %8963 = vrot.lane.b32.xlu0 %v8812_v56, %s11845_s10  ;;  %8961 = vrot.lane.b32.xlu1 %v18423_v28, %s11845_s10  ;;  %v11605_v56 = vpop.f32.mrf.mxu1 }
 0x4f7   : > { %v6449_v2 = vmul.f32 %v18350_v42, %v6417_v51 }
 0x4f8   : > { %v6342_v35 = vpop.permute.xlu0 %6341  ;;  %v6340_v57 = vpop.permute.xlu1 %6339 }
 0x4f9   : > { %v6481_v11 = vadd.f32 %v18356_v59, %v6449_v2  ;;  %v6419_v63 = vadd.f32 %v19494_v24, %v6342_v35  ;;  %v6418_v10 = vadd.f32 %v6340_v57, %v19495_v18 }
 0x4fa   : > { %8967 = vrot.lane.b32.xlu0 %v18433_v53, %s11845_s10  ;;  %8965 = vrot.lane.b32.xlu1 %v8815_v34, %s11845_s10  ;;  %v8863_v53 = vpop.f32.mrf.mxu1 }
 0x4fb   : > { %v6513_v7 = vmax.f32 %v6481_v11, 0.0  ;;  %v6451_v28 = vmul.f32 %v18350_v42, %v6419_v63  ;;  %v6450_v52 = vmul.f32 %v18350_v42, %v6418_v10 }
 0x4fc   : > { %v6344_v54 = vpop.permute.xlu1 %6343  ;;  %v11608_v37 = vpop.f32.mrf.mxu1 }
 0x4fd   : > { %v11356_v22 = vpack.c.bf16 %v6513_v7, %v6513_v7  ;;  %v6483_v36 = vadd.f32 %v18356_v59, %v6451_v28  ;;  %v6482_v15 = vadd.f32 %v18356_v59, %v6450_v52  ;;  %v6420_v27 = vadd.f32 %v19496_v29, %v6344_v54  ;;  %v19500_v52 = vld [vmem:[#allocation46_spill] sm:$0xff] }
 0x4fe   : > { %8971 = vrot.lane.b32.xlu0 %v8828_v0, %s11845_s10  ;;  %8969 = vrot.lane.b32.xlu1 %v18436_v60, %s11845_s10  ;;  %v8876_v0 = vpop.f32.mrf.mxu1 }
 0x4ff   : > { %6674 = vst.msk [vmem:[%s14736_s12 + $0x40] sm:$0xf] %vm6657_vm2, %v11356_v22  ;;  %v6515_v34 = vmax.f32 %v6483_v36, 0.0  ;;  %v6514_v19 = vmax.f32 %v6482_v15, 0.0  ;;  %v6452_v14 = vmul.f32 %v18350_v42, %v6420_v27 }
 0x500   : > { %v11609_v48 = vpop.f32.mrf.mxu1 }
 0x501   : > { %v11358_v6 = vpack.c.bf16 %v6515_v34, %v6515_v34  ;;  %v11357_v12 = vpack.c.bf16 %v6514_v19, %v6514_v19  ;;  %v6484_v31 = vadd.f32 %v18356_v59, %v6452_v14 }
 0x502   : > { %8975 = vrot.lane.b32.xlu0 %v18439_v44, %s11845_s10  ;;  %8973 = vrot.lane.b32.xlu1 %v8831_v4, %s11845_s10  ;;  %v8879_v44 = vpop.f32.mrf.mxu1 }
 0x503   : > { %6676 = vst.msk [vmem:[%s14736_s12 + $0x48] sm:$0xf] %vm6657_vm2, %v11358_v6  ;;  %6675 = vst.msk [vmem:[%s14736_s12 + $0x44] sm:$0xf] %vm6657_vm2, %v11357_v12  ;;  %v6516_v60 = vmax.f32 %v6484_v31, 0.0 }
 0x504   : > { %v11612_v4 = vpop.f32.mrf.mxu1  ;;  %v11271_v12 = vld [vmem:[%s278_s15] ss:$0 sm:$0xff] }
 0x505   : > { %v11359_v20 = vpack.c.bf16 %v6516_v60, %v6516_v60  ;;  %v11404_v60 = vpack.c.bf16 %v11271_v12, %v11271_v12  ;;  %v19506_v12 = vld [vmem:[#allocation63_spill] sm:$0xff] }
 0x506   : > { %8979 = vrot.lane.b32.xlu0 %v8844_v25, %s11845_s10  ;;  %8977 = vrot.lane.b32.xlu1 %v18450_v39, %s11845_s10  ;;  %v8892_v17 = vpop.f32.mrf.mxu1  ;;  %v19497_v39 = vld [vmem:[#allocation67_spill] sm:$0xff] }
 0x507   : > { %6677 = vst.msk [vmem:[%s14736_s12 + $0x4c] sm:$0xf] %vm6657_vm2, %v11359_v20  ;;  %v19501_v20 = vld [vmem:[#allocation48_spill] sm:$0xff] }
 0x50a   : > { %8983 = vrot.lane.b32.xlu0 %v11600_v23, %s11845_s10  ;;  %8981 = vrot.lane.b32.xlu1 %v8847_v47, %s11845_s10  ;;  %v11613_v23 = vpop.f32.mrf.mxu1 }
 0x50c   : > { %v8895_v2 = vpop.f32.mrf.mxu1 }
 0x50e   : > { %8987 = vrot.lane.b32.xlu0 %v8860_v16, %s11845_s10  ;;  %8985 = vrot.lane.b32.xlu1 %v11601_v9, %s11845_s10  ;;  %v11616_v10 = vpop.f32.mrf.mxu1 }
 0x510   : > { %v8908_v27 = vpop.f32.mrf.mxu1 }
 0x512   : > { %8991 = vrot.lane.b32.xlu0 %v11604_v46, %s11845_s10  ;;  %8989 = vrot.lane.b32.xlu1 %v8863_v53, %s11845_s10  ;;  %v19499_v46 = vld [vmem:[#allocation47_spill] sm:$0xff] }
 0x514   : > { %v6346_v30 = vpop.permute.xlu0 %6345 }
 0x515   : > { %v6421_v33 = vadd.f32 %v6346_v30, %v19497_v39 }
 0x516   : > { %8995 = vrot.lane.b32.xlu0 %v8876_v0, %s11845_s10  ;;  %8993 = vrot.lane.b32.xlu1 %v11605_v56, %s11845_s10 }
 0x517   : > { %v6453_v25 = vmul.f32 %v18350_v42, %v6421_v33  ;;  %v19502_v33 = vld [vmem:[#allocation26_spill] sm:$0xff] }
 0x518   : > { %v6350_v13 = vpop.permute.xlu0 %6349  ;;  %v6348_v47 = vpop.permute.xlu1 %6347 }
 0x519   : > { %v6485_v9 = vadd.f32 %v18356_v59, %v6453_v25  ;;  %v6423_v51 = vadd.f32 %v19498_v55, %v6350_v13  ;;  %v6422_v16 = vadd.f32 %v6348_v47, %v19499_v46  ;;  %v19503_v25 = vld [vmem:[#allocation30_spill] sm:$0xff] }
 0x51a   : > { %8999 = vrot.lane.b32.xlu0 %v11608_v37, %s11845_s10  ;;  %8997 = vrot.lane.b32.xlu1 %v8879_v44, %s11845_s10  ;;  %v11617_v37 = vpop.f32.mrf.mxu1 }
 0x51b   : > { %v6517_v35 = vmax.f32 %v6485_v9, 0.0  ;;  %v6455_v57 = vmul.f32 %v18350_v42, %v6423_v51  ;;  %v6454_v11 = vmul.f32 %v18350_v42, %v6422_v16 }
 0x51c   : > { %v6352_v63 = vpop.permute.xlu1 %6351  ;;  %v8911_v31 = vpop.f32.mrf.mxu1 }
 0x51d   : > { %v11360_v56 = vpack.c.bf16 %v6517_v35, %v6517_v35  ;;  %v6487_v7 = vadd.f32 %v18356_v59, %v6455_v57  ;;  %v6486_v28 = vadd.f32 %v18356_v59, %v6454_v11  ;;  %v6424_v54 = vadd.f32 %v19500_v52, %v6352_v63  ;;  %v19504_v11 = vld [vmem:[#allocation56_spill] sm:$0xff] }
 0x51e   : > { %9003 = vrot.lane.b32.xlu0 %v8892_v17, %s11845_s10  ;;  %9001 = vrot.lane.b32.xlu1 %v11609_v48, %s11845_s10 }
 0x51f   : > { %6678 = vst.msk [vmem:[%s14736_s12 + $0x50] sm:$0xf] %vm6657_vm2, %v11360_v56  ;;  %v6519_v22 = vmax.f32 %v6487_v7, 0.0  ;;  %v6518_v36 = vmax.f32 %v6486_v28, 0.0  ;;  %v6456_v15 = vmul.f32 %v18350_v42, %v6424_v54 }
 0x521   : > { %v11362_v53 = vpack.c.bf16 %v6519_v22, %v6519_v22  ;;  %v11361_v34 = vpack.c.bf16 %v6518_v36, %v6518_v36  ;;  %v6488_v19 = vadd.f32 %v18356_v59, %v6456_v15 }
 0x522   : > { %9007 = vrot.lane.b32.xlu0 %v11612_v4, %s11845_s10  ;;  %9005 = vrot.lane.b32.xlu1 %v8895_v2, %s11845_s10 }
 0x523   : > { %6680 = vst.msk [vmem:[%s14736_s12 + $0x58] sm:$0xf] %vm6657_vm2, %v11362_v53  ;;  %6679 = vst.msk [vmem:[%s14736_s12 + $0x54] sm:$0xf] %vm6657_vm2, %v11361_v34  ;;  %v6520_v14 = vmax.f32 %v6488_v19, 0.0  ;;  %v19505_v53 = vld [vmem:[#allocation13_spill] sm:$0xff] }
 0x525   : > { %v11363_v6 = vpack.c.bf16 %v6520_v14, %v6520_v14 }
 0x526   : > { %9011 = vrot.lane.b32.xlu0 %v8908_v27, %s11845_s10  ;;  %9009 = vrot.lane.b32.xlu1 %v11613_v23, %s11845_s10 }
 0x527   : > { %6681 = vst.msk [vmem:[%s14736_s12 + $0x5c] sm:$0xf] %vm6657_vm2, %v11363_v6 }
 0x52a   : > { %9015 = vrot.lane.b32.xlu0 %v11616_v10, %s11845_s10  ;;  %9013 = vrot.lane.b32.xlu1 %v8911_v31, %s11845_s10 }
 0x52e   : > { %9017 = vrot.lane.b32.xlu1 %v11617_v37, %s11845_s10  ;;  %9351 = vrot.lane.b32.xlu0 %v11404_v60, %s11847_s14  ;;  %v19507_v60 = vld [vmem:[#allocation69_spill] sm:$0xff] }
 0x534   : > { %v6354_v0 = vpop.permute.xlu0 %6353 }
 0x535   : > { %v6425_v48 = vadd.f32 %v6354_v0, %v19501_v20 }
 0x537   : > { %v6457_v44 = vmul.f32 %v18350_v42, %v6425_v48 }
 0x538   : > { %v6358_v4 = vpop.permute.xlu0 %6357  ;;  %v6356_v17 = vpop.permute.xlu1 %6355 }
 0x539   : > { %v6489_v30 = vadd.f32 %v18356_v59, %v6457_v44  ;;  %v6427_v23 = vadd.f32 %v19502_v33, %v6358_v4  ;;  %v6426_v13 = vadd.f32 %v6356_v17, %v19503_v25 }
 0x53b   : > { %v6521_v47 = vmax.f32 %v6489_v30, 0.0  ;;  %v6459_v9 = vmul.f32 %v18350_v42, %v6427_v23  ;;  %v6458_v51 = vmul.f32 %v18350_v42, %v6426_v13 }
 0x53c   : > { %v6360_v16 = vpop.permute.xlu1 %6359 }
 0x53d   : > { %v11364_v2 = vpack.c.bf16 %v6521_v47, %v6521_v47  ;;  %v6491_v35 = vadd.f32 %v18356_v59, %v6459_v9  ;;  %v6490_v57 = vadd.f32 %v18356_v59, %v6458_v51  ;;  %v6428_v63 = vadd.f32 %v19504_v11, %v6360_v16  ;;  %v19508_v51 = vld [vmem:[#allocation54_spill] sm:$0xff] }
 0x53f   : > { %6682 = vst.msk [vmem:[%s14736_s12 + $0x60] sm:$0xf] %vm6657_vm2, %v11364_v2  ;;  %v6523_v10 = vmax.f32 %v6491_v35, 0.0  ;;  %v6522_v56 = vmax.f32 %v6490_v57, 0.0  ;;  %v6460_v7 = vmul.f32 %v18350_v42, %v6428_v63 }
 0x541   : > { %v11366_v28 = vpack.c.bf16 %v6523_v10, %v6523_v10  ;;  %v11365_v54 = vpack.c.bf16 %v6522_v56, %v6522_v56  ;;  %v6492_v22 = vadd.f32 %v18356_v59, %v6460_v7 }
 0x543   : > { %6684 = vst.msk [vmem:[%s14736_s12 + $0x68] sm:$0xf] %vm6657_vm2, %v11366_v28  ;;  %6683 = vst.msk [vmem:[%s14736_s12 + $0x64] sm:$0xf] %vm6657_vm2, %v11365_v54  ;;  %v6524_v36 = vmax.f32 %v6492_v22, 0.0 }
 0x545   : > { %v11367_v15 = vpack.c.bf16 %v6524_v36, %v6524_v36 }
 0x547   : > { %6685 = vst.msk [vmem:[%s14736_s12 + $0x6c] sm:$0xf] %vm6657_vm2, %v11367_v15 }
 0x558   : > { %v6362_v27 = vpop.permute.xlu0 %6361 }
 0x559   : > { %v6429_v34 = vadd.f32 %v6362_v27, %v19505_v53 }
 0x55b   : > { %v6461_v19 = vmul.f32 %v18350_v42, %v6429_v34 }
 0x55c   : > { %v6366_v14 = vpop.permute.xlu0 %6365  ;;  %v6364_v37 = vpop.permute.xlu1 %6363 }
 0x55d   : > { %v6493_v6 = vadd.f32 %v18356_v59, %v6461_v19  ;;  %v6431_v31 = vadd.f32 %v19506_v12, %v6366_v14  ;;  %v6430_v0 = vadd.f32 %v6364_v37, %v19507_v60 }
 0x55f   : > { %v6525_v48 = vmax.f32 %v6493_v6, 0.0  ;;  %v6463_v44 = vmul.f32 %v18350_v42, %v6431_v31  ;;  %v6462_v4 = vmul.f32 %v18350_v42, %v6430_v0 }
 0x560   : > { %v8956_v17 = vpop.permute.xlu0 %8955  ;;  %v6368_v30 = vpop.permute.xlu1 %6367 }
 0x561   : > { %v11368_v23 = vpack.c.bf16 %v6525_v48, %v6525_v48  ;;  %v6495_v13 = vadd.f32 %v18356_v59, %v6463_v44  ;;  %v6494_v47 = vadd.f32 %v18356_v59, %v6462_v4  ;;  %v9051_v9 = vadd.f32 %v8956_v17, %v19477_v40 }
 0x562   : > { %v6432_v16 = vadd.f32 %v19508_v51, %v6368_v30 }
 0x563   : > { %6686 = vst.msk [vmem:[%s14736_s12 + $0x70] sm:$0xf] %vm6657_vm2, %v11368_v23  ;;  %v6527_v2 = vmax.f32 %v6495_v13, 0.0  ;;  %v6526_v35 = vmax.f32 %v6494_v47, 0.0  ;;  %v9083_v57 = vmul.f32 %v18350_v42, %v9051_v9 }
 0x564   : > { %v6464_v63 = vmul.f32 %v18350_v42, %v6432_v16  ;;  %v8960_v10 = vpop.permute.xlu0 %8959  ;;  %v8958_v56 = vpop.permute.xlu1 %8957 }
 0x565   : > { %v11370_v7 = vpack.c.bf16 %v6527_v2, %v6527_v2  ;;  %v11369_v28 = vpack.c.bf16 %v6526_v35, %v6526_v35  ;;  %v9115_v54 = vadd.f32 %v18356_v59, %v9083_v57  ;;  %v9053_v22 = vadd.f32 %v19478_v43, %v8960_v10 }
 0x566   : > { %v6496_v40 = vadd.f32 %v18356_v59, %v6464_v63  ;;  %v9052_v36 = vadd.f32 %v8958_v56, %v19479_v3 }
 0x567   : > { %6688 = vst.msk [vmem:[%s14736_s12 + $0x78] sm:$0xf] %vm6657_vm2, %v11370_v7  ;;  %6687 = vst.msk [vmem:[%s14736_s12 + $0x74] sm:$0xf] %vm6657_vm2, %v11369_v28  ;;  %v9147_v15 = vmax.f32 %v9115_v54, 0.0  ;;  %v9085_v27 = vmul.f32 %v18350_v42, %v9053_v22 }
 0x568   : > { %v6528_v34 = vmax.f32 %v6496_v40, 0.0  ;;  %v9084_v19 = vmul.f32 %v18350_v42, %v9052_v36  ;;  %v8964_v14 = vpop.permute.xlu0 %8963  ;;  %v8962_v37 = vpop.permute.xlu1 %8961 }
 0x569   : > { %v11372_v43 = vpack.c.bf16 %v9147_v15, %v9147_v15  ;;  %v9117_v6 = vadd.f32 %v18356_v59, %v9085_v27  ;;  %v9055_v3 = vadd.f32 %v8964_v14, %v19481_v61  ;;  %v9054_v31 = vadd.f32 %v19480_v32, %v8962_v37 }
 0x56a   : > { %v11371_v0 = vpack.c.bf16 %v6528_v34, %v6528_v34  ;;  %v9116_v48 = vadd.f32 %v18356_v59, %v9084_v19 }
 0x56b   : > { %9308 = vst.msk [vmem:[%s14736_s12] sm:$0xf] %vm9307_vm4, %v11372_v43  ;;  %v9149_v44 = vmax.f32 %v9117_v6, 0.0  ;;  %v9087_v4 = vmul.f32 %v18350_v42, %v9055_v3  ;;  %v9086_v17 = vmul.f32 %v18350_v42, %v9054_v31 }
 0x56c   : > { %6689 = vst.msk [vmem:[%s14736_s12 + $0x7c] sm:$0xf] %vm6657_vm2, %v11371_v0  ;;  %v9148_v30 = vmax.f32 %v9116_v48, 0.0  ;;  %v8968_v23 = vpop.permute.xlu0 %8967  ;;  %v8966_v13 = vpop.permute.xlu1 %8965 }
 0x56d   : > { %v11374_v61 = vpack.c.bf16 %v9149_v44, %v9149_v44  ;;  %v9119_v32 = vadd.f32 %v18356_v59, %v9087_v4  ;;  %v9118_v47 = vadd.f32 %v18356_v59, %v9086_v17  ;;  %v9057_v9 = vadd.f32 %v19482_v50, %v8968_v23 }
 0x56e   : > { %v11373_v16 = vpack.c.bf16 %v9148_v30, %v9148_v30  ;;  %v9056_v2 = vadd.f32 %v8966_v13, %v19483_v26 }
 0x56f   : > { %9310 = vst.msk [vmem:[%s14736_s12 + $0x8] sm:$0xf] %vm9307_vm4, %v11374_v61  ;;  %v9151_v35 = vmax.f32 %v9119_v32, 0.0  ;;  %v9150_v57 = vmax.f32 %v9118_v47, 0.0  ;;  %v9089_v63 = vmul.f32 %v18350_v42, %v9057_v9 }
 0x570   : > { %9309 = vst.msk [vmem:[%s14736_s12 + $0x4] sm:$0xf] %vm9307_vm4, %v11373_v16  ;;  %v9088_v10 = vmul.f32 %v18350_v42, %v9056_v2  ;;  %v8972_v56 = vpop.permute.xlu0 %8971  ;;  %v8970_v7 = vpop.permute.xlu1 %8969 }
 0x571   : > { %v11376_v28 = vpack.c.bf16 %v9151_v35, %v9151_v35  ;;  %v11375_v54 = vpack.c.bf16 %v9150_v57, %v9150_v57  ;;  %v9121_v50 = vadd.f32 %v18356_v59, %v9089_v63  ;;  %v9059_v22 = vadd.f32 %v8972_v56, %v19485_v58 }
 0x572   : > { %v9120_v26 = vadd.f32 %v18356_v59, %v9088_v10  ;;  %v9058_v40 = vadd.f32 %v19484_v62, %v8970_v7 }
 0x573   : > { %9312 = vst.msk [vmem:[%s14736_s12 + $0x10] sm:$0xf] %vm9307_vm4, %v11376_v28  ;;  %9311 = vst.msk [vmem:[%s14736_s12 + $0xc] sm:$0xf] %vm9307_vm4, %v11375_v54  ;;  %v9153_v36 = vmax.f32 %v9121_v50, 0.0  ;;  %v9091_v15 = vmul.f32 %v18350_v42, %v9059_v22 }
 0x574   : > { %v9152_v27 = vmax.f32 %v9120_v26, 0.0  ;;  %v9090_v34 = vmul.f32 %v18350_v42, %v9058_v40  ;;  %v8976_v19 = vpop.permute.xlu0 %8975  ;;  %v8974_v14 = vpop.permute.xlu1 %8973 }
 0x575   : > { %v11378_v37 = vpack.c.bf16 %v9153_v36, %v9153_v36  ;;  %v9123_v58 = vadd.f32 %v18356_v59, %v9091_v15  ;;  %v9061_v43 = vadd.f32 %v19486_v45, %v8976_v19  ;;  %v9060_v62 = vadd.f32 %v8974_v14, %v19487_v49 }
 0x576   : > { %v11377_v6 = vpack.c.bf16 %v9152_v27, %v9152_v27  ;;  %v9122_v3 = vadd.f32 %v18356_v59, %v9090_v34 }
 0x577   : > { %9314 = vst.msk [vmem:[%s14736_s12 + $0x18] sm:$0xf] %vm9307_vm4, %v11378_v37  ;;  %v9155_v31 = vmax.f32 %v9123_v58, 0.0  ;;  %v9093_v0 = vmul.f32 %v18350_v42, %v9061_v43  ;;  %v9092_v48 = vmul.f32 %v18350_v42, %v9060_v62 }
 0x578   : > { %9313 = vst.msk [vmem:[%s14736_s12 + $0x14] sm:$0xf] %vm9307_vm4, %v11377_v6  ;;  %v9154_v44 = vmax.f32 %v9122_v3, 0.0  ;;  %v8980_v4 = vpop.permute.xlu0 %8979  ;;  %v8978_v17 = vpop.permute.xlu1 %8977 }
 0x579   : > { %v11380_v45 = vpack.c.bf16 %v9155_v31, %v9155_v31  ;;  %v9125_v49 = vadd.f32 %v18356_v59, %v9093_v0  ;;  %v9124_v30 = vadd.f32 %v18356_v59, %v9092_v48  ;;  %v9063_v23 = vadd.f32 %v8980_v4, %v19489_v5 }
 0x57a   : > { %v11379_v13 = vpack.c.bf16 %v9154_v44, %v9154_v44  ;;  %v9062_v61 = vadd.f32 %v19488_v21, %v8978_v17 }
 0x57b   : > { %9316 = vst.msk [vmem:[%s14736_s12 + $0x20] sm:$0xf] %vm9307_vm4, %v11380_v45  ;;  %v9157_v32 = vmax.f32 %v9125_v49, 0.0  ;;  %v9156_v47 = vmax.f32 %v9124_v30, 0.0  ;;  %v9095_v9 = vmul.f32 %v18350_v42, %v9063_v23 }
 0x57c   : > { %9315 = vst.msk [vmem:[%s14736_s12 + $0x1c] sm:$0xf] %vm9307_vm4, %v11379_v13  ;;  %v9094_v16 = vmul.f32 %v18350_v42, %v9062_v61  ;;  %v8984_v2 = vpop.permute.xlu0 %8983  ;;  %v8982_v35 = vpop.permute.xlu1 %8981 }
 0x57d   : > { %v11382_v57 = vpack.c.bf16 %v9157_v32, %v9157_v32  ;;  %v11381_v63 = vpack.c.bf16 %v9156_v47, %v9156_v47  ;;  %v9127_v5 = vadd.f32 %v18356_v59, %v9095_v9  ;;  %v9065_v10 = vadd.f32 %v19490_v8, %v8984_v2 }
 0x57e   : > { %v9126_v21 = vadd.f32 %v18356_v59, %v9094_v16  ;;  %v9064_v56 = vadd.f32 %v8982_v35, %v19491_v38 }
 0x57f   : > { %9318 = vst.msk [vmem:[%s14736_s12 + $0x28] sm:$0xf] %vm9307_vm4, %v11382_v57  ;;  %9317 = vst.msk [vmem:[%s14736_s12 + $0x24] sm:$0xf] %vm9307_vm4, %v11381_v63  ;;  %v9159_v7 = vmax.f32 %v9127_v5, 0.0  ;;  %v9097_v28 = vmul.f32 %v18350_v42, %v9065_v10 }
 0x580   : > { %v9158_v54 = vmax.f32 %v9126_v21, 0.0  ;;  %v9096_v50 = vmul.f32 %v18350_v42, %v9064_v56  ;;  %v8988_v22 = vpop.permute.xlu0 %8987  ;;  %v8986_v26 = vpop.permute.xlu1 %8985 }
 0x581   : > { %v11384_v40 = vpack.c.bf16 %v9159_v7, %v9159_v7  ;;  %v9129_v8 = vadd.f32 %v18356_v59, %v9097_v28  ;;  %v9067_v36 = vadd.f32 %v8988_v22, %v19493_v41  ;;  %v9066_v38 = vadd.f32 %v19492_v1, %v8986_v26 }
 0x582   : > { %v11383_v15 = vpack.c.bf16 %v9158_v54, %v9158_v54  ;;  %v9128_v27 = vadd.f32 %v18356_v59, %v9096_v50 }
 0x583   : > { %9320 = vst.msk [vmem:[%s14736_s12 + $0x30] sm:$0xf] %vm9307_vm4, %v11384_v40  ;;  %v9161_v34 = vmax.f32 %v9129_v8, 0.0  ;;  %v9099_v19 = vmul.f32 %v18350_v42, %v9067_v36  ;;  %v9098_v14 = vmul.f32 %v18350_v42, %v9066_v38 }
 0x584   : > { %9319 = vst.msk [vmem:[%s14736_s12 + $0x2c] sm:$0xf] %vm9307_vm4, %v11383_v15  ;;  %v9160_v37 = vmax.f32 %v9128_v27, 0.0  ;;  %v8992_v58 = vpop.permute.xlu0 %8991  ;;  %v8990_v43 = vpop.permute.xlu1 %8989 }
 0x585   : > { %v11386_v41 = vpack.c.bf16 %v9161_v34, %v9161_v34  ;;  %v9131_v1 = vadd.f32 %v18356_v59, %v9099_v19  ;;  %v9130_v62 = vadd.f32 %v18356_v59, %v9098_v14  ;;  %v9069_v6 = vadd.f32 %v19494_v24, %v8992_v58 }
 0x586   : > { %v11385_v3 = vpack.c.bf16 %v9160_v37, %v9160_v37  ;;  %v9068_v31 = vadd.f32 %v8990_v43, %v19495_v18 }
 0x587   : > { %9322 = vst.msk [vmem:[%s14736_s12 + $0x38] sm:$0xf] %vm9307_vm4, %v11386_v41  ;;  %v9163_v0 = vmax.f32 %v9131_v1, 0.0  ;;  %v9162_v48 = vmax.f32 %v9130_v62, 0.0  ;;  %v9101_v44 = vmul.f32 %v18350_v42, %v9069_v6 }
 0x588   : > { %9321 = vst.msk [vmem:[%s14736_s12 + $0x34] sm:$0xf] %vm9307_vm4, %v11385_v3  ;;  %v9100_v4 = vmul.f32 %v18350_v42, %v9068_v31  ;;  %v8996_v17 = vpop.permute.xlu0 %8995  ;;  %v8994_v45 = vpop.permute.xlu1 %8993 }
 0x589   : > { %v11388_v49 = vpack.c.bf16 %v9163_v0, %v9163_v0  ;;  %v11387_v30 = vpack.c.bf16 %v9162_v48, %v9162_v48  ;;  %v9133_v24 = vadd.f32 %v18356_v59, %v9101_v44  ;;  %v9071_v23 = vadd.f32 %v8996_v17, %v19497_v39 }
 0x58a   : > { %v9132_v18 = vadd.f32 %v18356_v59, %v9100_v4  ;;  %v9070_v13 = vadd.f32 %v19496_v29, %v8994_v45 }
 0x58b   : > { %9324 = vst.msk [vmem:[%s14736_s12 + $0x40] sm:$0xf] %vm9307_vm4, %v11388_v49  ;;  %9323 = vst.msk [vmem:[%s14736_s12 + $0x3c] sm:$0xf] %vm9307_vm4, %v11387_v30  ;;  %v9165_v61 = vmax.f32 %v9133_v24, 0.0  ;;  %v9103_v32 = vmul.f32 %v18350_v42, %v9071_v23 }
 0x58c   : > { %v9164_v47 = vmax.f32 %v9132_v18, 0.0  ;;  %v9102_v9 = vmul.f32 %v18350_v42, %v9070_v13  ;;  %v9000_v16 = vpop.permute.xlu0 %8999  ;;  %v8998_v2 = vpop.permute.xlu1 %8997 }
 0x58d   : > { %v11390_v35 = vpack.c.bf16 %v9165_v61, %v9165_v61  ;;  %v9135_v39 = vadd.f32 %v18356_v59, %v9103_v32  ;;  %v9073_v57 = vadd.f32 %v19498_v55, %v9000_v16  ;;  %v9072_v29 = vadd.f32 %v8998_v2, %v19499_v46 }
 0x58e   : > { %v11389_v63 = vpack.c.bf16 %v9164_v47, %v9164_v47  ;;  %v9134_v5 = vadd.f32 %v18356_v59, %v9102_v9 }
 0x58f   : > { %9326 = vst.msk [vmem:[%s14736_s12 + $0x48] sm:$0xf] %vm9307_vm4, %v11390_v35  ;;  %v9167_v10 = vmax.f32 %v9135_v39, 0.0  ;;  %v9105_v21 = vmul.f32 %v18350_v42, %v9073_v57  ;;  %v9104_v56 = vmul.f32 %v18350_v42, %v9072_v29 }
 0x590   : > { %9325 = vst.msk [vmem:[%s14736_s12 + $0x44] sm:$0xf] %vm9307_vm4, %v11389_v63  ;;  %v9166_v7 = vmax.f32 %v9134_v5, 0.0  ;;  %v9004_v28 = vpop.permute.xlu0 %9003  ;;  %v9002_v54 = vpop.permute.xlu1 %9001 }
 0x591   : > { %v11392_v55 = vpack.c.bf16 %v9167_v10, %v9167_v10  ;;  %v9137_v46 = vadd.f32 %v18356_v59, %v9105_v21  ;;  %v9136_v50 = vadd.f32 %v18356_v59, %v9104_v56  ;;  %v9075_v22 = vadd.f32 %v9004_v28, %v19501_v20 }
 0x592   : > { %v11391_v26 = vpack.c.bf16 %v9166_v7, %v9166_v7  ;;  %v9074_v40 = vadd.f32 %v19500_v52, %v9002_v54 }
 0x593   : > { %9328 = vst.msk [vmem:[%s14736_s12 + $0x50] sm:$0xf] %vm9307_vm4, %v11392_v55  ;;  %v9169_v8 = vmax.f32 %v9137_v46, 0.0  ;;  %v9168_v36 = vmax.f32 %v9136_v50, 0.0  ;;  %v9107_v38 = vmul.f32 %v18350_v42, %v9075_v22 }
 0x594   : > { %9327 = vst.msk [vmem:[%s14736_s12 + $0x4c] sm:$0xf] %vm9307_vm4, %v11391_v26  ;;  %v9106_v15 = vmul.f32 %v18350_v42, %v9074_v40  ;;  %v9008_v27 = vpop.permute.xlu0 %9007  ;;  %v9006_v34 = vpop.permute.xlu1 %9005 }
 0x595   : > { %v11394_v19 = vpack.c.bf16 %v9169_v8, %v9169_v8  ;;  %v11393_v14 = vpack.c.bf16 %v9168_v36, %v9168_v36  ;;  %v9139_v20 = vadd.f32 %v18356_v59, %v9107_v38  ;;  %v9077_v37 = vadd.f32 %v19502_v33, %v9008_v27 }
 0x596   : > { %v9138_v52 = vadd.f32 %v18356_v59, %v9106_v15  ;;  %v9076_v58 = vadd.f32 %v9006_v34, %v19503_v25 }
 0x597   : > { %9330 = vst.msk [vmem:[%s14736_s12 + $0x58] sm:$0xf] %vm9307_vm4, %v11394_v19  ;;  %9329 = vst.msk [vmem:[%s14736_s12 + $0x54] sm:$0xf] %vm9307_vm4, %v11393_v14  ;;  %v9171_v43 = vmax.f32 %v9139_v20, 0.0  ;;  %v9109_v41 = vmul.f32 %v18350_v42, %v9077_v37 }
 0x598   : > { %v9170_v1 = vmax.f32 %v9138_v52, 0.0  ;;  %v9108_v62 = vmul.f32 %v18350_v42, %v9076_v58  ;;  %v9012_v6 = vpop.permute.xlu0 %9011  ;;  %v9010_v3 = vpop.permute.xlu1 %9009  ;;  %v11814_v42 = vld [vmem:[%s18822_s4] ss:$0 sm:$0xff] }
 0x599   : > { %v11396_v31 = vpack.c.bf16 %v9171_v43, %v9171_v43  ;;  %v9141_v33 = vadd.f32 %v18356_v59, %v9109_v41  ;;  %v9079_v0 = vadd.f32 %v9012_v6, %v19505_v53  ;;  %v9078_v25 = vadd.f32 %v19504_v11, %v9010_v3 }
 0x59a   : > { %v11395_v48 = vpack.c.bf16 %v9170_v1, %v9170_v1  ;;  %v9140_v44 = vadd.f32 %v18356_v59, %v9108_v62  ;;  %v11815_v59 = vld [vmem:[%s18823_s5] ss:$0 sm:$0xff] }
 0x59b   : > { %9332 = vst.msk [vmem:[%s14736_s12 + $0x60] sm:$0xf] %vm9307_vm4, %v11396_v31  ;;  %v9173_v4 = vmax.f32 %v9141_v33, 0.0  ;;  %v9111_v17 = vmul.f32 %v11814_v42, %v9079_v0  ;;  %v9110_v45 = vmul.f32 %v11814_v42, %v9078_v25 }
 0x59c   : > { %9331 = vst.msk [vmem:[%s14736_s12 + $0x5c] sm:$0xf] %vm9307_vm4, %v11395_v48  ;;  %v9172_v49 = vmax.f32 %v9140_v44, 0.0  ;;  %v9016_v53 = vpop.permute.xlu0 %9015  ;;  %v9014_v30 = vpop.permute.xlu1 %9013 }
 0x59d   : > { %v11398_v11 = vpack.c.bf16 %v9173_v4, %v9173_v4  ;;  %v9143_v24 = vadd.f32 %v11815_v59, %v9111_v17  ;;  %v9142_v23 = vadd.f32 %v11815_v59, %v9110_v45  ;;  %v9081_v18 = vadd.f32 %v19506_v12, %v9016_v53 }
 0x59e   : > { %v11397_v13 = vpack.c.bf16 %v9172_v49, %v9172_v49  ;;  %v9080_v61 = vadd.f32 %v9014_v30, %v19507_v60 }
 0x59f   : > { %9334 = vst.msk [vmem:[%s14736_s12 + $0x68] sm:$0xf] %vm9307_vm4, %v11398_v11  ;;  %v9175_v32 = vmax.f32 %v9143_v24, 0.0  ;;  %v9174_v47 = vmax.f32 %v9142_v23, 0.0  ;;  %v9113_v9 = vmul.f32 %v11814_v42, %v9081_v18 }
 0x5a0   : > { %9333 = vst.msk [vmem:[%s14736_s12 + $0x64] sm:$0xf] %vm9307_vm4, %v11397_v13  ;;  %v9112_v12 = vmul.f32 %v11814_v42, %v9080_v61  ;;  %v9018_v16 = vpop.permute.xlu1 %9017  ;;  %v9352_v60 = vpop.permute.xlu0 %9351 }
 0x5a1   : > { %v11400_v2 = vpack.c.bf16 %v9175_v32, %v9175_v32  ;;  %v11399_v35 = vpack.c.bf16 %v9174_v47, %v9174_v47  ;;  %v9145_v39 = vadd.f32 %v11815_v59, %v9113_v9  ;;  %v9082_v57 = vadd.f32 %v19508_v51, %v9018_v16  ;;  %9355 = vst.msk [vmem:[%s14736_s12] sm:$0xf] %vm9354_vm5, %v9352_v60 }
 0x5a2   : > { %9356 = vst.msk [vmem:[%s14736_s12 + $0x4] sm:$0xf] %vm9354_vm5, %v9352_v60  ;;  %9357 = vst.msk [vmem:[%s14736_s12 + $0x8] sm:$0xf] %vm9354_vm5, %v9352_v60  ;;  %v9144_v51 = vadd.f32 %v11815_v59, %v9112_v12 }
 0x5a3   : > { %9358 = vst.msk [vmem:[%s14736_s12 + $0xc] sm:$0xf] %vm9354_vm5, %v9352_v60  ;;  %9359 = vst.msk [vmem:[%s14736_s12 + $0x10] sm:$0xf] %vm9354_vm5, %v9352_v60  ;;  %v9177_v29 = vmax.f32 %v9145_v39, 0.0  ;;  %v9114_v63 = vmul.f32 %v11814_v42, %v9082_v57 }
 0x5a4   : > { %9360 = vst.msk [vmem:[%s14736_s12 + $0x14] sm:$0xf] %vm9354_vm5, %v9352_v60  ;;  %9361 = vst.msk [vmem:[%s14736_s12 + $0x18] sm:$0xf] %vm9354_vm5, %v9352_v60  ;;  %v9176_v5 = vmax.f32 %v9144_v51, 0.0 }
 0x5a5   : > { %9362 = vst.msk [vmem:[%s14736_s12 + $0x1c] sm:$0xf] %vm9354_vm5, %v9352_v60  ;;  %9363 = vst.msk [vmem:[%s14736_s12 + $0x20] sm:$0xf] %vm9354_vm5, %v9352_v60  ;;  %v11402_v10 = vpack.c.bf16 %v9177_v29, %v9177_v29  ;;  %v9146_v21 = vadd.f32 %v11815_v59, %v9114_v63 }
 0x5a6   : > { %9364 = vst.msk [vmem:[%s14736_s12 + $0x24] sm:$0xf] %vm9354_vm5, %v9352_v60  ;;  %9365 = vst.msk [vmem:[%s14736_s12 + $0x28] sm:$0xf] %vm9354_vm5, %v9352_v60  ;;  %v11401_v56 = vpack.c.bf16 %v9176_v5, %v9176_v5 }
 0x5a7   : > { %9366 = vst.msk [vmem:[%s14736_s12 + $0x2c] sm:$0xf] %vm9354_vm5, %v9352_v60  ;;  %9367 = vst.msk [vmem:[%s14736_s12 + $0x30] sm:$0xf] %vm9354_vm5, %v9352_v60  ;;  %v9178_v7 = vmax.f32 %v9146_v21, 0.0 }
 0x5a8   : > { %9368 = vst.msk [vmem:[%s14736_s12 + $0x34] sm:$0xf] %vm9354_vm5, %v9352_v60  ;;  %9369 = vst.msk [vmem:[%s14736_s12 + $0x38] sm:$0xf] %vm9354_vm5, %v9352_v60 }
 0x5a9   : > { %9370 = vst.msk [vmem:[%s14736_s12 + $0x3c] sm:$0xf] %vm9354_vm5, %v9352_v60  ;;  %9371 = vst.msk [vmem:[%s14736_s12 + $0x40] sm:$0xf] %vm9354_vm5, %v9352_v60  ;;  %v11403_v28 = vpack.c.bf16 %v9178_v7, %v9178_v7 }
 0x5aa   : > { %9372 = vst.msk [vmem:[%s14736_s12 + $0x44] sm:$0xf] %vm9354_vm5, %v9352_v60  ;;  %9373 = vst.msk [vmem:[%s14736_s12 + $0x48] sm:$0xf] %vm9354_vm5, %v9352_v60 }
 0x5ab   : > { %9374 = vst.msk [vmem:[%s14736_s12 + $0x4c] sm:$0xf] %vm9354_vm5, %v9352_v60  ;;  %9375 = vst.msk [vmem:[%s14736_s12 + $0x50] sm:$0xf] %vm9354_vm5, %v9352_v60 }
 0x5ac   : > { %9376 = vst.msk [vmem:[%s14736_s12 + $0x54] sm:$0xf] %vm9354_vm5, %v9352_v60  ;;  %9377 = vst.msk [vmem:[%s14736_s12 + $0x58] sm:$0xf] %vm9354_vm5, %v9352_v60 }
 0x5ad   : > { %9378 = vst.msk [vmem:[%s14736_s12 + $0x5c] sm:$0xf] %vm9354_vm5, %v9352_v60  ;;  %9379 = vst.msk [vmem:[%s14736_s12 + $0x60] sm:$0xf] %vm9354_vm5, %v9352_v60 }
 0x5ae   : > { %9380 = vst.msk [vmem:[%s14736_s12 + $0x64] sm:$0xf] %vm9354_vm5, %v9352_v60  ;;  %9381 = vst.msk [vmem:[%s14736_s12 + $0x68] sm:$0xf] %vm9354_vm5, %v9352_v60 }
 0x5af   : > { %9336 = vst.msk [vmem:[%s14736_s12 + $0x70] sm:$0xf] %vm9307_vm4, %v11400_v2  ;;  %9335 = vst.msk [vmem:[%s14736_s12 + $0x6c] sm:$0xf] %vm9307_vm4, %v11399_v35 }
 0x5b0   : > { %9382 = vst.msk [vmem:[%s14736_s12 + $0x6c] sm:$0xf] %vm9354_vm5, %v9352_v60  ;;  %9383 = vst.msk [vmem:[%s14736_s12 + $0x70] sm:$0xf] %vm9354_vm5, %v9352_v60 }
 0x5b1   : > { %9338 = vst.msk [vmem:[%s14736_s12 + $0x78] sm:$0xf] %vm9307_vm4, %v11402_v10  ;;  %9337 = vst.msk [vmem:[%s14736_s12 + $0x74] sm:$0xf] %vm9307_vm4, %v11401_v56 }
 0x5b2   : > { %9385 = vst.msk [vmem:[%s14736_s12 + $0x78] sm:$0xf] %vm9354_vm5, %v9352_v60  ;;  %9384 = vst.msk [vmem:[%s14736_s12 + $0x74] sm:$0xf] %vm9354_vm5, %v9352_v60 }
 0x5b3   : > { %9339 = vst.msk [vmem:[%s14736_s12 + $0x7c] sm:$0xf] %vm9307_vm4, %v11403_v28 }
 0x5b4   : > { %9386 = vst.msk [vmem:[%s14736_s12 + $0x7c] sm:$0xf] %vm9354_vm5, %v9352_v60 }
 0x5b5 PF: > { %s16_s23 = sadd.s32 1, %s11838_s23   ;;  %s19509_s21 = smov %s11834_s22 }
 0x5b6   : > { %p13_p5 = scmp.ge.s32.totalorder %s16_s23, 4   ;;  %s19510_s22 = smov %s19512_s24 }
 0x5b8   :  { %15 = sbr.rel (!%p13_p5) target bundleno = 2 (0x2), region = 86 }

</bundles_post_ra>
